<compile_context>
chip_gen: v7x
topology: tpu7x:2x2x1
jax: 0.10.0
libtpu: 0.0.40
codegen_flags: <defaults>
</compile_context>

<pallas_src>
import functools
import math

import jax
import jax.numpy as jnp
from jax.experimental import pallas as pl
from jax.experimental.pallas import tpu as pltpu


# ----------------------------------------------------------------------------
# Fused mask-head kernel.  One grid step = r input image-rows (W padded).
#   for each (kh, kw) tap of the 2x2 deconv:
#     y = relu(x @ W1[:, tap] + b1[tap])          (r*wpad, cdec)   f32 epilogue
#     z = y.bf16 @ W2 + b2                        (r*wpad, chid)   f32
#     o[:, kh, :, kw*chid:(kw+1)*chid] = z.bf16   (drop the W pad columns)
# ----------------------------------------------------------------------------
def _fused_mask_head_kernel(x_ref, w1_ref, b1_ref, w2_ref, b2_ref, o_ref, *,
                            r, w, wpad, cdec, chid):
    """x_ref : (r*wpad, cin)     bf16
       w1_ref: (cin, 4*cdec)     bf16   columns ordered (kh, kw, cdec)
       b1_ref: (1, 4*cdec)       f32
       w2_ref: (cdec, chid)      bf16   VMEM-resident
       b2_ref: (1, chid)         f32
       o_ref : (r, 2, w, 2*chid) bf16   dims (q, kh, w, kw*chid + c)
    """
    x = x_ref[...]
    w2 = w2_ref[...]
    # Hoist the (1, chid) -> (r*wpad, chid) broadcast out of the tap loop
    # (JAX does not CSE broadcast_in_dim; 4 copies would be materialized).
    b2 = jnp.broadcast_to(b2_ref[...], (r * wpad, chid))

    # 4 deconv taps; each tap's y/z are consumed immediately (short live
    # ranges), and r*wpad <= 512 keeps per-tap temporaries modest so spills
    # stay off the critical ld/st slots.
    for kh in range(2):
        for kw in range(2):
            p = kh * 2 + kw
            w1p = w1_ref[:, p * cdec:(p + 1) * cdec]          # (cin, cdec)
            b1p = b1_ref[:, p * cdec:(p + 1) * cdec]          # (1, cdec)
            y = jnp.dot(x, w1p, preferred_element_type=jnp.float32) + b1p
            y = jnp.maximum(y, 0.0).astype(jnp.bfloat16)      # fused ReLU
            z = jnp.dot(y, w2, preferred_element_type=jnp.float32) + b2
            # (r*wpad, chid) -> (r, wpad, chid): wpad is a multiple of the
            # bf16 sublane tile (16), so this is a tile-aligned, movement-free
            # regroup of rows.
            zb = z.astype(jnp.bfloat16).reshape(r, wpad, chid)
            # Drop the W pad columns and store into the tap's NHWC slot:
            # out[q, kh, w, kw*chid + c]  ==  NHWC[n, 2h+kh, 2w+kw, c].
            o_ref[:, kh, :, kw * chid:(kw + 1) * chid] = zb[:, :w, :]


def _pick_block_rows(q, wpad, m_max=512):
    """Input image-rows per grid step.

    Matmul M = r*wpad; keep it a multiple of 128 (full MXU tiles on
    v5e/v6e/v7x) and capped at m_max=512 so double-buffered blocks stay well
    inside the 32 MiB default scoped VMEM on every generation (v7x included).
    Prefer >=2 grid steps so v7x's two TensorCores both get work.
    """
    r_align = max(1, 128 // math.gcd(128, wpad))              # r*wpad % 128 == 0
    r_cap = max(r_align, (m_max // wpad) // r_align * r_align)
    r = min(r_cap, max(r_align, pl.cdiv(q, r_align) * r_align))
    if q > r_align and pl.cdiv(q, r) < 2:
        r = max(r_align, pl.cdiv(pl.cdiv(q, 2), r_align) * r_align)
    return r


# ----------------------------------------------------------------------------
# Mask-predictor head forward (the MaskRCNN_Cell custom Sequential).
# ----------------------------------------------------------------------------
def mask_predictor_forward(x_nchw, params, *, block_rows=None, nchw=False):
    """x_nchw: (N, 256, H, W) f32 -> NHWC (N, 2H, 2W, 512) bf16 by default,
    or NCHW (N, 512, 2H, 2W) bf16 if nchw=True (torch layout; bf16 transpose)."""
    n, cin, h, w = x_nchw.shape
    wt = params["deconv_w"]                      # torch: (Cin, Cdec, 2, 2)
    cdec = wt.shape[1]
    wc = params["conv_w"]                        # torch: (Chid, Cdec, 1, 1)
    chid = wc.shape[0]

    q = n * h
    wpad = pl.cdiv(w, 16) * 16                   # pad W to the bf16 sublane tile

    # --- input prep: NCHW->NHWC, bf16 cast, pad W (one small fused XLA copy) --
    x_nhwc = jnp.transpose(x_nchw, (0, 2, 3, 1)).astype(jnp.bfloat16)
    x_pad = jnp.pad(x_nhwc, ((0, 0), (0, 0), (0, wpad - w), (0, 0)))
    x2 = x_pad.reshape(q * wpad, cin)

    # --- weight / bias prep (bf16 MXU inputs, f32 biases) --------------------
    # (Cin, kh, kw, Cdec) -> (Cin, 4*Cdec): columns ordered (kh, kw, cdec)
    w1 = jnp.transpose(wt, (0, 2, 3, 1)).reshape(cin, 4 * cdec).astype(jnp.bfloat16)
    b1 = jnp.tile(params["deconv_b"], 4).reshape(1, 4 * cdec).astype(jnp.float32)
    w2 = jnp.transpose(wc.reshape(chid, cdec), (1, 0)).astype(jnp.bfloat16)
    b2 = params["conv_b"].reshape(1, chid).astype(jnp.float32)

    r = block_rows or _pick_block_rows(q, wpad)
    grid_q = pl.cdiv(q, r)

    flops = 2 * 4 * q * wpad * (cin * cdec + cdec * chid)
    bytes_accessed = (q * wpad * cin * 2 + q * 2 * w * 2 * chid * 2 +
                      cin * 4 * cdec * 2 + cdec * chid * 2 +
                      4 * cdec * 4 + chid * 4)

    kern = functools.partial(_fused_mask_head_kernel,
                             r=r, w=w, wpad=wpad, cdec=cdec, chid=chid)
    out = pl.pallas_call(
        kern,
        # (q, kh, w, kw*chid + c): reshapes for free to NHWC (N, 2H, 2W, chid).
        out_shape=jax.ShapeDtypeStruct((q, 2, w, 2 * chid), jnp.bfloat16),
        grid_spec=pltpu.PrefetchScalarGridSpec(
            num_scalar_prefetch=0,
            grid=(grid_q,),
            in_specs=[
                pl.BlockSpec((r * wpad, cin), lambda i: (i, 0)),
                pl.BlockSpec((cin, 4 * cdec), lambda i: (0, 0)),   # resident
                pl.BlockSpec((1, 4 * cdec), lambda i: (0, 0)),     # resident
                pl.BlockSpec((cdec, chid), lambda i: (0, 0)),      # resident
                pl.BlockSpec((1, chid), lambda i: (0, 0)),         # resident
            ],
            out_specs=pl.BlockSpec((r, 2, w, 2 * chid),
                                   lambda i: (i, 0, 0, 0)),
        ),
        compiler_params=pltpu.CompilerParams(
            dimension_semantics=("parallel",)),
        cost_estimate=pl.CostEstimate(flops=flops, transcendentals=0,
                                      bytes_accessed=bytes_accessed),
    )(x2, w1, b1, w2, b2)

    out_nhwc = out.reshape(n, 2 * h, 2 * w, chid)        # free (metadata only)
    if nchw:
        # Torch layout; done in bf16 (half the traffic of an f32 transpose).
        return jnp.transpose(out_nhwc, (0, 3, 1, 2))
    return out_nhwc


# ----------------------------------------------------------------------------
# Pure-JAX reference (same math & same bf16/f32 mixed precision, no Pallas).
# Returns NHWC f32.
# ----------------------------------------------------------------------------
def mask_predictor_reference(x_nchw, params):
    n, cin, h, w = x_nchw.shape
    wt = params["deconv_w"]
    cdec = wt.shape[1]
    wc = params["conv_w"]
    chid = wc.shape[0]

    x = jnp.transpose(x_nchw, (0, 2, 3, 1)).astype(jnp.bfloat16)
    # deconv k=2, s=2 (no overlap): out[n, 2h+kh, 2w+kw, o] = sum_i x*W + b
    y = jnp.einsum("nhwi,iokl->nhkwlo", x, wt.astype(jnp.bfloat16),
                   preferred_element_type=jnp.float32)
    y = y + params["deconv_b"]
    y = jnp.maximum(y, 0.0).reshape(n, 2 * h, 2 * w, cdec).astype(jnp.bfloat16)
    z = jnp.einsum("nhwc,oc->nhwo", y,
                   wc.reshape(chid, cdec).astype(jnp.bfloat16),
                   preferred_element_type=jnp.float32)
    z = z + params["conv_b"]
    return z                                      # NHWC (n, 2h, 2w, chid) f32


def init_params(key, cin=256, hidden=512):
    k0, k1, k2, k3 = jax.random.split(key, 4)
    return {
        # ConvTranspose2d(256, 256, 2, 2): torch weight (Cin, Cout, kH, kW)
        "deconv_w": jax.random.normal(k0, (cin, cin, 2, 2), jnp.float32) * 0.05,
        "deconv_b": jax.random.normal(k1, (cin,), jnp.float32) * 0.05,
        # Conv2d(256, 512, 1): torch weight (Cout, Cin, 1, 1)
        "conv_w": jax.random.normal(k2, (hidden, cin, 1, 1), jnp.float32) * 0.05,
        "conv_b": jax.random.normal(k3, (hidden,), jnp.float32) * 0.05,
    }


if __name__ == "__main__":
    key = jax.random.PRNGKey(0)
    kx, kp = jax.random.split(key)

    # Mask-head features in Mask R-CNN: (num_rois, 256, 14, 14). Keep it small.
    x = jax.random.normal(kx, (2, 256, 14, 14), jnp.float32)
    params = init_params(kp)

    out_nhwc = jax.jit(mask_predictor_forward)(x, params)
    out_nhwc = jax.block_until_ready(out_nhwc)
    assert out_nhwc.shape == (2, 28, 28, 512), out_nhwc.shape
    assert out_nhwc.dtype == jnp.bfloat16, out_nhwc.dtype

    ref = jax.jit(mask_predictor_reference)(x, params)
    ref = jax.block_until_ready(ref)
    # Kernel emits bf16; compare against the bf16-rounded f32 reference.
    ref_b = ref.astype(jnp.bfloat16).astype(jnp.float32)
    out_f = out_nhwc.astype(jnp.float32)
    max_err = float(jnp.max(jnp.abs(out_f - ref_b)))
    assert jnp.allclose(out_f, ref_b, atol=2e-2, rtol=2e-2), max_err

    # NCHW path (torch module semantics): bf16 transpose in the wrapper.
    out_nchw = jax.jit(functools.partial(mask_predictor_forward, nchw=True))(x, params)
    out_nchw = jax.block_until_ready(out_nchw)
    assert out_nchw.shape == (2, 512, 28, 28), out_nchw.shape
    ref_nchw = jnp.transpose(ref_b, (0, 3, 1, 2))
    assert jnp.allclose(out_nchw.astype(jnp.float32), ref_nchw,
                        atol=2e-2, rtol=2e-2)

    print("KERNEL_OK")
</pallas_src>

<mosaic_0001>
module attributes {stable_mosaic.version = 11 : i64} {
  func.func @_fused_mask_head_kernel(%arg0: i32, %arg1: memref<256x256xbf16, #tpu.memory_space<vmem>>, %arg2: memref<256x1024xbf16, #tpu.memory_space<vmem>>, %arg3: memref<1x1024xf32, #tpu.memory_space<vmem>>, %arg4: memref<256x512xbf16, #tpu.memory_space<vmem>>, %arg5: memref<1x512xf32, #tpu.memory_space<vmem>>, %arg6: memref<16x2x14x1024xbf16, #tpu.memory_space<vmem>>) attributes {dimension_semantics = [#tpu.dimension_semantics<parallel>], iteration_bounds = array<i64: 2>, scalar_prefetch = 0 : i64, scratch_operands = 0 : i64, tpu.core_type = #tpu.core_type<tc>, window_params = [{transform_indices = @transform_0, window_bounds = array<i64: 256, 256>}, {pipeline_mode = #tpu.pipeline_mode<synchronous>, transform_indices = @transform_1, window_bounds = array<i64: 256, 1024>}, {pipeline_mode = #tpu.pipeline_mode<synchronous>, transform_indices = @transform_2, window_bounds = array<i64: 1, 1024>}, {pipeline_mode = #tpu.pipeline_mode<synchronous>, transform_indices = @transform_3, window_bounds = array<i64: 256, 512>}, {pipeline_mode = #tpu.pipeline_mode<synchronous>, transform_indices = @transform_4, window_bounds = array<i64: 1, 512>}, {transform_indices = @transform_5, window_bounds = array<i64: 16, 2, 14, 1024>}]} {
    %c0 = arith.constant 0 : index
    %c0_0 = arith.constant 0 : index
    %0 = vector.load %arg1[%c0, %c0_0] : memref<256x256xbf16, #tpu.memory_space<vmem>>, vector<256x256xbf16>
    %c0_1 = arith.constant 0 : index
    %c0_2 = arith.constant 0 : index
    %1 = vector.load %arg4[%c0_1, %c0_2] : memref<256x512xbf16, #tpu.memory_space<vmem>>, vector<256x512xbf16>
    %c0_3 = arith.constant 0 : index
    %c0_4 = arith.constant 0 : index
    %2 = vector.load %arg5[%c0_3, %c0_4] : memref<1x512xf32, #tpu.memory_space<vmem>>, vector<1x512xf32>
    %3 = vector.shape_cast %2 : vector<1x512xf32> to vector<1x512xf32>
    %4 = vector.broadcast %3 : vector<1x512xf32> to vector<256x512xf32>
    %c0_5 = arith.constant 0 : index
    %c0_6 = arith.constant 0 : index
    %5 = vector.load %arg2[%c0_5, %c0_6] : memref<256x1024xbf16, #tpu.memory_space<vmem>>, vector<256x256xbf16>
    %c0_7 = arith.constant 0 : index
    %c0_8 = arith.constant 0 : index
    %6 = vector.load %arg3[%c0_7, %c0_8] : memref<1x1024xf32, #tpu.memory_space<vmem>>, vector<1x256xf32>
    %cst = arith.constant dense<0.000000e+00> : vector<256x256xf32>
    %7 = tpu.matmul %0, %5, %cst {dimension_numbers = #tpu.dot_dimension_numbers<[1], [0], [0], [1], [0, 0, 1, 1], [], []>} : vector<256x256xbf16>, vector<256x256xbf16>, vector<256x256xf32> -> vector<256x256xf32>
    %8 = vector.broadcast %6 : vector<1x256xf32> to vector<256x256xf32>
    %9 = arith.addf %7, %8 : vector<256x256xf32>
    %cst_9 = arith.constant 0.000000e+00 : f32
    %10 = vector.broadcast %cst_9 : f32 to vector<256x256xf32>
    %11 = arith.maximumf %9, %10 : vector<256x256xf32>
    %12 = arith.truncf %11 : vector<256x256xf32> to vector<256x256xbf16>
    %cst_10 = arith.constant dense<0.000000e+00> : vector<256x512xf32>
    %13 = tpu.matmul %12, %1, %cst_10 {dimension_numbers = #tpu.dot_dimension_numbers<[1], [0], [0], [1], [0, 0, 1, 1], [], []>} : vector<256x256xbf16>, vector<256x512xbf16>, vector<256x512xf32> -> vector<256x512xf32>
    %14 = arith.addf %13, %4 : vector<256x512xf32>
    %15 = arith.truncf %14 : vector<256x512xf32> to vector<256x512xbf16>
    %16 = vector.shape_cast %15 : vector<256x512xbf16> to vector<16x16x512xbf16>
    %17 = vector.extract_strided_slice %16 {offsets = [0, 0, 0], sizes = [16, 14, 512], strides = [1, 1, 1]} : vector<16x16x512xbf16> to vector<16x14x512xbf16>
    %c0_11 = arith.constant 0 : index
    %c0_12 = arith.constant 0 : index
    %c0_13 = arith.constant 0 : index
    %c0_14 = arith.constant 0 : index
    %18 = vector.load %arg6[%c0_11, %c0_12, %c0_13, %c0_14] : memref<16x2x14x1024xbf16, #tpu.memory_space<vmem>>, vector<16x1x14x512xbf16>
    %19 = vector.shape_cast %18 : vector<16x1x14x512xbf16> to vector<16x14x512xbf16>
    %20 = vector.shape_cast %17 : vector<16x14x512xbf16> to vector<16x1x14x512xbf16>
    tpu.vector_store %arg6[%c0_11, %c0_12, %c0_13, %c0_14], %20 {strides = array<i32>} : memref<16x2x14x1024xbf16, #tpu.memory_space<vmem>>, vector<16x1x14x512xbf16>,
    %c0_15 = arith.constant 0 : index
    %c256 = arith.constant 256 : index
    %21 = vector.load %arg2[%c0_15, %c256] : memref<256x1024xbf16, #tpu.memory_space<vmem>>, vector<256x256xbf16>
    %c0_16 = arith.constant 0 : index
    %c256_17 = arith.constant 256 : index
    %22 = vector.load %arg3[%c0_16, %c256_17] : memref<1x1024xf32, #tpu.memory_space<vmem>>, vector<1x256xf32>
    %cst_18 = arith.constant dense<0.000000e+00> : vector<256x256xf32>
    %23 = tpu.matmul %0, %21, %cst_18 {dimension_numbers = #tpu.dot_dimension_numbers<[1], [0], [0], [1], [0, 0, 1, 1], [], []>} : vector<256x256xbf16>, vector<256x256xbf16>, vector<256x256xf32> -> vector<256x256xf32>
    %24 = vector.broadcast %22 : vector<1x256xf32> to vector<256x256xf32>
    %25 = arith.addf %23, %24 : vector<256x256xf32>
    %cst_19 = arith.constant 0.000000e+00 : f32
    %26 = vector.broadcast %cst_19 : f32 to vector<256x256xf32>
    %27 = arith.maximumf %25, %26 : vector<256x256xf32>
    %28 = arith.truncf %27 : vector<256x256xf32> to vector<256x256xbf16>
    %cst_20 = arith.constant dense<0.000000e+00> : vector<256x512xf32>
    %29 = tpu.matmul %28, %1, %cst_20 {dimension_numbers = #tpu.dot_dimension_numbers<[1], [0], [0], [1], [0, 0, 1, 1], [], []>} : vector<256x256xbf16>, vector<256x512xbf16>, vector<256x512xf32> -> vector<256x512xf32>
    %30 = arith.addf %29, %4 : vector<256x512xf32>
    %31 = arith.truncf %30 : vector<256x512xf32> to vector<256x512xbf16>
    %32 = vector.shape_cast %31 : vector<256x512xbf16> to vector<16x16x512xbf16>
    %33 = vector.extract_strided_slice %32 {offsets = [0, 0, 0], sizes = [16, 14, 512], strides = [1, 1, 1]} : vector<16x16x512xbf16> to vector<16x14x512xbf16>
    %c0_21 = arith.constant 0 : index
    %c0_22 = arith.constant 0 : index
    %c0_23 = arith.constant 0 : index
    %c512 = arith.constant 512 : index
    %34 = vector.load %arg6[%c0_21, %c0_22, %c0_23, %c512] : memref<16x2x14x1024xbf16, #tpu.memory_space<vmem>>, vector<16x1x14x512xbf16>
    %35 = vector.shape_cast %34 : vector<16x1x14x512xbf16> to vector<16x14x512xbf16>
    %36 = vector.shape_cast %33 : vector<16x14x512xbf16> to vector<16x1x14x512xbf16>
    tpu.vector_store %arg6[%c0_21, %c0_22, %c0_23, %c512], %36 {strides = array<i32>} : memref<16x2x14x1024xbf16, #tpu.memory_space<vmem>>, vector<16x1x14x512xbf16>,
    %c0_24 = arith.constant 0 : index
    %c512_25 = arith.constant 512 : index
    %37 = vector.load %arg2[%c0_24, %c512_25] : memref<256x1024xbf16, #tpu.memory_space<vmem>>, vector<256x256xbf16>
    %c0_26 = arith.constant 0 : index
    %c512_27 = arith.constant 512 : index
    %38 = vector.load %arg3[%c0_26, %c512_27] : memref<1x1024xf32, #tpu.memory_space<vmem>>, vector<1x256xf32>
    %cst_28 = arith.constant dense<0.000000e+00> : vector<256x256xf32>
    %39 = tpu.matmul %0, %37, %cst_28 {dimension_numbers = #tpu.dot_dimension_numbers<[1], [0], [0], [1], [0, 0, 1, 1], [], []>} : vector<256x256xbf16>, vector<256x256xbf16>, vector<256x256xf32> -> vector<256x256xf32>
    %40 = vector.broadcast %38 : vector<1x256xf32> to vector<256x256xf32>
    %41 = arith.addf %39, %40 : vector<256x256xf32>
    %cst_29 = arith.constant 0.000000e+00 : f32
    %42 = vector.broadcast %cst_29 : f32 to vector<256x256xf32>
    %43 = arith.maximumf %41, %42 : vector<256x256xf32>
    %44 = arith.truncf %43 : vector<256x256xf32> to vector<256x256xbf16>
    %cst_30 = arith.constant dense<0.000000e+00> : vector<256x512xf32>
    %45 = tpu.matmul %44, %1, %cst_30 {dimension_numbers = #tpu.dot_dimension_numbers<[1], [0], [0], [1], [0, 0, 1, 1], [], []>} : vector<256x256xbf16>, vector<256x512xbf16>, vector<256x512xf32> -> vector<256x512xf32>
    %46 = arith.addf %45, %4 : vector<256x512xf32>
    %47 = arith.truncf %46 : vector<256x512xf32> to vector<256x512xbf16>
    %48 = vector.shape_cast %47 : vector<256x512xbf16> to vector<16x16x512xbf16>
    %49 = vector.extract_strided_slice %48 {offsets = [0, 0, 0], sizes = [16, 14, 512], strides = [1, 1, 1]} : vector<16x16x512xbf16> to vector<16x14x512xbf16>
    %c0_31 = arith.constant 0 : index
    %c1 = arith.constant 1 : index
    %c0_32 = arith.constant 0 : index
    %c0_33 = arith.constant 0 : index
    %50 = vector.load %arg6[%c0_31, %c1, %c0_32, %c0_33] : memref<16x2x14x1024xbf16, #tpu.memory_space<vmem>>, vector<16x1x14x512xbf16>
    %51 = vector.shape_cast %50 : vector<16x1x14x512xbf16> to vector<16x14x512xbf16>
    %52 = vector.shape_cast %49 : vector<16x14x512xbf16> to vector<16x1x14x512xbf16>
    tpu.vector_store %arg6[%c0_31, %c1, %c0_32, %c0_33], %52 {strides = array<i32>} : memref<16x2x14x1024xbf16, #tpu.memory_space<vmem>>, vector<16x1x14x512xbf16>,
    %c0_34 = arith.constant 0 : index
    %c768 = arith.constant 768 : index
    %53 = vector.load %arg2[%c0_34, %c768] : memref<256x1024xbf16, #tpu.memory_space<vmem>>, vector<256x256xbf16>
    %c0_35 = arith.constant 0 : index
    %c768_36 = arith.constant 768 : index
    %54 = vector.load %arg3[%c0_35, %c768_36] : memref<1x1024xf32, #tpu.memory_space<vmem>>, vector<1x256xf32>
    %cst_37 = arith.constant dense<0.000000e+00> : vector<256x256xf32>
    %55 = tpu.matmul %0, %53, %cst_37 {dimension_numbers = #tpu.dot_dimension_numbers<[1], [0], [0], [1], [0, 0, 1, 1], [], []>} : vector<256x256xbf16>, vector<256x256xbf16>, vector<256x256xf32> -> vector<256x256xf32>
    %56 = vector.broadcast %54 : vector<1x256xf32> to vector<256x256xf32>
    %57 = arith.addf %55, %56 : vector<256x256xf32>
    %cst_38 = arith.constant 0.000000e+00 : f32
    %58 = vector.broadcast %cst_38 : f32 to vector<256x256xf32>
    %59 = arith.maximumf %57, %58 : vector<256x256xf32>
    %60 = arith.truncf %59 : vector<256x256xf32> to vector<256x256xbf16>
    %cst_39 = arith.constant dense<0.000000e+00> : vector<256x512xf32>
    %61 = tpu.matmul %60, %1, %cst_39 {dimension_numbers = #tpu.dot_dimension_numbers<[1], [0], [0], [1], [0, 0, 1, 1], [], []>} : vector<256x256xbf16>, vector<256x512xbf16>, vector<256x512xf32> -> vector<256x512xf32>
    %62 = arith.addf %61, %4 : vector<256x512xf32>
    %63 = arith.truncf %62 : vector<256x512xf32> to vector<256x512xbf16>
    %64 = vector.shape_cast %63 : vector<256x512xbf16> to vector<16x16x512xbf16>
    %65 = vector.extract_strided_slice %64 {offsets = [0, 0, 0], sizes = [16, 14, 512], strides = [1, 1, 1]} : vector<16x16x512xbf16> to vector<16x14x512xbf16>
    %c0_40 = arith.constant 0 : index
    %c1_41 = arith.constant 1 : index
    %c0_42 = arith.constant 0 : index
    %c512_43 = arith.constant 512 : index
    %66 = vector.load %arg6[%c0_40, %c1_41, %c0_42, %c512_43] : memref<16x2x14x1024xbf16, #tpu.memory_space<vmem>>, vector<16x1x14x512xbf16>
    %67 = vector.shape_cast %66 : vector<16x1x14x512xbf16> to vector<16x14x512xbf16>
    %68 = vector.shape_cast %65 : vector<16x14x512xbf16> to vector<16x1x14x512xbf16>
    tpu.vector_store %arg6[%c0_40, %c1_41, %c0_42, %c512_43], %68 {strides = array<i32>} : memref<16x2x14x1024xbf16, #tpu.memory_space<vmem>>, vector<16x1x14x512xbf16>,
    return
  }
  func.func @transform_0(%arg0: i32) -> (i32, i32) {
    %c0_i32 = arith.constant 0 : i32
    %c0_i32_0 = arith.constant 0 : i32
    return %arg0, %c0_i32 : i32, i32
  }
  func.func @transform_1(%arg0: i32) -> (i32, i32) {
    %c0_i32 = arith.constant 0 : i32
    %c0_i32_0 = arith.constant 0 : i32
    %c0_i32_1 = arith.constant 0 : i32
    return %c0_i32, %c0_i32_0 : i32, i32
  }
  func.func @transform_2(%arg0: i32) -> (i32, i32) {
    %c0_i32 = arith.constant 0 : i32
    %c0_i32_0 = arith.constant 0 : i32
    %c0_i32_1 = arith.constant 0 : i32
    return %c0_i32, %c0_i32_0 : i32, i32
  }
  func.func @transform_3(%arg0: i32) -> (i32, i32) {
    %c0_i32 = arith.constant 0 : i32
    %c0_i32_0 = arith.constant 0 : i32
    %c0_i32_1 = arith.constant 0 : i32
    return %c0_i32, %c0_i32_0 : i32, i32
  }
  func.func @transform_4(%arg0: i32) -> (i32, i32) {
    %c0_i32 = arith.constant 0 : i32
    %c0_i32_0 = arith.constant 0 : i32
    %c0_i32_1 = arith.constant 0 : i32
    return %c0_i32, %c0_i32_0 : i32, i32
  }
  func.func @transform_5(%arg0: i32) -> (i32, i32, i32, i32) {
    %c0_i32 = arith.constant 0 : i32
    %c0_i32_0 = arith.constant 0 : i32
    %c0_i32_1 = arith.constant 0 : i32
    %c0_i32_2 = arith.constant 0 : i32
    return %arg0, %c0_i32, %c0_i32_0, %c0_i32_1 : i32, i32, i32, i32
  }
}

</mosaic_0001>

<bundles_post_ra>
// kernel: mask_predictor_forward.1
= control target key start
LH: loop header
LB: loop body
LE: loop exit
PB: predicated region body
PF: predicated region fallthrough
CT: control target
= control target key end

     0   :  { %s7957_s18 = smov 0   ;;  %s7959_s19 = smov 0   ;;  %s10645_s0 = inlined_call_operand.vmem [shape: bf16[448,256], index: 0, kind: input, shape index: {}]   ;;  %s10646_s1 = inlined_call_operand.vmem [shape: bf16[256,1024], index: 1, kind: input, shape index: {}]   ;;  %s10647_s2 = inlined_call_operand.vmem [shape: f32[1,1024], index: 2, kind: input, shape index: {}]   ;;  %s10648_s3 = inlined_call_operand.vmem [shape: bf16[256,512], index: 3, kind: input, shape index: {}]   ;;  %s10649_s4 = inlined_call_operand.vmem [shape: f32[1,512], index: 4, kind: input, shape index: {}]   ;;  %s10650_s5 = inlined_call_operand.vmem [shape: bf16[28,2,14,1024], index: 5, kind: output, shape index: {}]  }
   0x1   :  { %s7961_s20 = smov 0  }
   0x2 LB: > { %s7970_s21 = sadd.s32 4294967295, %s7893_s20   ;;  %s7972_s22 = sadd.s32 1, %s7893_s20   ;;  %s7893_s20 = sphi %s7961_s20, %s10661_s20   ;;  %s7889_s19 = sphi %s7959_s19, %s10660_s19   ;;  %s7885_s18 = sphi %s7957_s18, %s10659_s18  }
   0x3   : > { %s129_s23 = ssub.s32 %s7893_s20, %s7972_s22  ;;  %s132_s24 = sadd.s32 1, %s7889_s19 }
   0x4   : > { %p130_p0 = scmp.eq.s32.totalorder %s129_s23, 0  ;;  %p142_p1 = scmp.ne.s32.totalorder %s7889_s19, %s7885_s18 }
   0x5   : > { %p143_p2 = scmp.eq.s32.totalorder %s7970_s21, 1  ;;  %p6458_p3 = scmp.ge.s32.totalorder %s7893_s20, 1 }
   0x6   : > { %s7980_s25 = scalar_select %p130_p0, %s7889_s19, %s132_s24  }
   0x7   : > { %p7982_p4 = por %p143_p2, %p142_p1  ;;  %p199_p5 = scmp.lt.s32.totalorder %s7893_s20, 3 }
   0x9   : > { %p200_p6 = pnand %p6458_p3, %p199_p5 }
   0xa   : > { %v375_v0 = vld [vmem:[%s10646_s1] sm:$0xff] (!%p200_p6)  ;;  %s6460_s8 = sshll.u32 (!%p200_p6), %s7970_s21, 5  ;;  %s229_s14 = sand.u32 (!%p200_p6), 1, %s7885_s18  }
   0xb   : > { %203 = sbr.rel (%p200_p6) target bundleno = 1762 (0x6e2), region = 40  ;;  %v376_v1 = vld [vmem:[%s10646_s1 + $0x20] sm:$0xff] (!%p200_p6)  ;;  %p238_p7 = scmp.lt.s32.totalorder (!%p200_p6), %s6460_s8, 55 }
   0xc   : > { %v377_v2 = vld [vmem:[%s10646_s1 + $0x40] sm:$0xff] (!%p200_p6)  ;;  %v6496_v3 = vcombine.high (!%p200_p6), %v375_v0, %v376_v1  ;;  %v6495_v4 = vcombine.low (!%p200_p6), %v375_v0, %v376_v1 }
   0xd   : > { %v378_v5 = vld [vmem:[%s10646_s1 + $0x60] sm:$0xff] (!%p200_p6) }
   0xe   : > { %v6498_v6 = vcombine.high (!%p200_p6), %v377_v2, %v378_v5  ;;  %v379_v7 = vld [vmem:[%s10646_s1 + $0x80] sm:$0xff] (!%p200_p6)  ;;  %739 = vmatprep.subr.bf16.mxu0 (!%p200_p6), %v6496_v3  ;;  %v6497_v9 = vcombine.low (!%p200_p6), %v377_v2, %v378_v5 }
   0xf   : > { %v380_v8 = vld [vmem:[%s10646_s1 + $0xa0] sm:$0xff] (!%p200_p6)  ;;  %740 = vmatpush1.bf16.msra.mxu0 (!%p200_p6), %v6495_v4  ;;  %v8108_v4 = vld [vmem:[%s10648_s3 + $0xc] ss:$16 sps:$4 sm:$0xff] (!%p200_p6)  }
  0x10   : > { %741 = vmatprep.subr.bf16.mxu0 (!%p200_p6), %v6498_v6  ;;  %v6500_v10 = vcombine.high (!%p200_p6), %v379_v7, %v380_v8  ;;  %v381_v11 = vld [vmem:[%s10646_s1 + $0xc0] sm:$0xff] (!%p200_p6)  ;;  %v6499_v13 = vcombine.low (!%p200_p6), %v379_v7, %v380_v8 }
  0x11   : > { %v382_v12 = vld [vmem:[%s10646_s1 + $0xe0] sm:$0xff] (!%p200_p6) }
  0x12   : > { %s10663_s8 = smov (!%p238_p7, %s6460_s8), 55  ;;  %v6502_v14 = vcombine.high %v381_v11, %v382_v12  ;;  %v383_v15 = vld [vmem:[%s10646_s1 + $0x100] sm:$0xff]  ;;  %v6501_v18 = vcombine.low %v381_v11, %v382_v12  ;;  %s7072_s7 = sshll.u32 (%p7982_p4), %s7970_s21, 4 }
  0x13   : > { %s7093_s15 = sshll.u32 %s10663_s8, 3  ;;  %742 = vmatpush1.bf16.msra.mxu0 %v6497_v9  ;;  %v384_v16 = vld [vmem:[%s10646_s1 + $0x120] sm:$0xff]  ;;  %v7498_v9 = vld [vmem:[%s10648_s3 + $0x8] ss:$16 sps:$4 sm:$0xff]   ;;  %s7354_s8 = sshll.u32 (%p7982_p4), %s7970_s21, 11 }
  0x14   : > { %s8014_s28 = scalar_lea.vmem %s10645_s0, %s7093_s15  ;;  %743 = vmatprep.subr.bf16.mxu0 %v6500_v10  ;;  %v6504_v19 = vcombine.high %v383_v15, %v384_v16  ;;  %v385_v20 = vld [vmem:[%s10646_s1 + $0x140] sm:$0xff]  ;;  %v6503_v22 = vcombine.low %v383_v15, %v384_v16  ;;  %v7502_v10 = vld [vmem:[%s10648_s3 + $0x2c] ss:$16 sps:$4 sm:$0xff]   ;;  %s6459_s15 = sshll.u32 %s229_s14, 11 }
  0x15   : > { %v7445_v17 = vld [vmem:[%s8014_s28 + $0x4] ss:$8 sps:$4 sm:$0xff]   ;;  %v8097_v1 = vld [vmem:[%s10648_s3] ss:$16 sps:$4 sm:$0xff]   ;;  %v7448_v8 = vld [vmem:[%s8014_s28 + $0x14] ss:$8 sps:$4 sm:$0xff]   ;;  %s10425_s12 = scalar_lea.vmem (%p7982_p4), %s10650_s5, %s7354_s8  }
  0x16   : > { %771 = vmatprep.mubr.bf16.mxu0 %v7445_v17  ;;  %v386_v21 = vld [vmem:[%s10646_s1 + $0x160] sm:$0xff]  ;;  %v7450_v16 = vld [vmem:[%s8014_s28 + $0x10] ss:$8 sps:$4 sm:$0xff]   ;;  %s8770_s18 = scalar_lea.vmem [#allocation2], %s6459_s15   ;;  %s6172_s9 = ssub.s32 (%p7982_p4), 28, %s7072_s7 }
  0x17   : > { %744 = vmatpush1.bf16.msra.mxu0 %v6499_v13  ;;  %v6506_v23 = vcombine.high %v385_v20, %v386_v21  ;;  %v387_v24 = vld [vmem:[%s10646_s1 + $0x180] sm:$0xff]  ;;  %v6505_v26 = vcombine.low %v385_v20, %v386_v21  ;;  %v7504_v13 = vld [vmem:[%s10648_s3 + $0x28] ss:$16 sps:$4 sm:$0xff]   ;;  %v7514_v20 = vld [vmem:[%s10648_s3 + $0x6c] ss:$16 sps:$4 sm:$0xff]   ;;  %p6173_p8 = scmp.lt.s32.totalorder (%p7982_p4), %s6172_s9, 16 }
  0x18   : > { %745 = vmatprep.subr.bf16.mxu0 %v6502_v14  ;;  %v388_v25 = vld [vmem:[%s10646_s1 + $0x1a0] sm:$0xff]  ;;  %v7508_v14 = vld [vmem:[%s10648_s3 + $0x4c] ss:$16 sps:$4 sm:$0xff]  }
  0x19   : > { %v6508_v27 = vcombine.high %v387_v24, %v388_v25  ;;  %v389_v28 = vld [vmem:[%s10646_s1 + $0x1c0] sm:$0xff]  ;;  %v6507_v30 = vcombine.low %v387_v24, %v388_v25  ;;  %v7520_v24 = vld [vmem:[%s10648_s3 + $0x8c] ss:$16 sps:$4 sm:$0xff]  }
  0x1a   : > { %v390_v29 = vld [vmem:[%s10646_s1 + $0x1e0] sm:$0xff] }
  0x1b   : > { %746 = vmatpush1.bf16.msra.mxu0 %v6501_v18  ;;  %v6510_v31 = vcombine.high %v389_v28, %v390_v29  ;;  %v391_v32 = vld [vmem:[%s10646_s1 + $0x200] sm:$0xff]  ;;  %v6509_v34 = vcombine.low %v389_v28, %v390_v29  ;;  %v7454_v28 = vld [vmem:[%s8014_s28 + $0x34] ss:$8 sps:$4 sm:$0xff]   ;;  %v7522_v29 = vld [vmem:[%s10648_s3 + $0x88] ss:$16 sps:$4 sm:$0xff]  }
  0x1c   : > { %747 = vmatprep.subr.bf16.mxu0 %v6504_v19  ;;  %v392_v33 = vld [vmem:[%s10646_s1 + $0x220] sm:$0xff]  ;;  %v7510_v19 = vld [vmem:[%s10648_s3 + $0x48] ss:$16 sps:$4 sm:$0xff]  }
  0x1d   : > { %v393_v35 = vld [vmem:[%s10646_s1 + $0x240] sm:$0xff]  ;;  %v6512_v37 = vcombine.high %v391_v32, %v392_v33  ;;  %v6511_v38 = vcombine.low %v391_v32, %v392_v33  ;;  %v7528_v33 = vld [vmem:[%s10648_s3 + $0xa8] ss:$16 sps:$4 sm:$0xff]  }
  0x1e   : > { %v394_v36 = vld [vmem:[%s10646_s1 + $0x260] sm:$0xff] }
  0x1f   : > { %748 = vmatpush1.bf16.msra.mxu0 %v6503_v22  ;;  %v395_v39 = vld [vmem:[%s10646_s1 + $0x280] sm:$0xff]  ;;  %v6514_v41 = vcombine.high %v393_v35, %v394_v36  ;;  %v6513_v42 = vcombine.low %v393_v35, %v394_v36  ;;  %v7456_v36 = vld [vmem:[%s8014_s28 + $0x30] ss:$8 sps:$4 sm:$0xff]  }
  0x20   : > { %749 = vmatprep.subr.bf16.mxu0 %v6506_v23  ;;  %v396_v40 = vld [vmem:[%s10646_s1 + $0x2a0] sm:$0xff]  ;;  %v7516_v23 = vld [vmem:[%s10648_s3 + $0x68] ss:$16 sps:$4 sm:$0xff]  }
  0x21   : > { %v397_v43 = vld [vmem:[%s10646_s1 + $0x2c0] sm:$0xff]  ;;  %v6516_v45 = vcombine.high %v395_v39, %v396_v40  ;;  %v6515_v46 = vcombine.low %v395_v39, %v396_v40  ;;  %v7534_v39 = vld [vmem:[%s10648_s3 + $0xc8] ss:$16 sps:$4 sm:$0xff]   ;;  %v7538_v40 = vld [vmem:[%s10648_s3 + $0xec] ss:$16 sps:$4 sm:$0xff]  }
  0x22   : > { %v398_v44 = vld [vmem:[%s10646_s1 + $0x2e0] sm:$0xff] }
  0x23   : > { %750 = vmatpush1.bf16.msra.mxu0 %v6505_v26  ;;  %v399_v47 = vld [vmem:[%s10646_s1 + $0x300] sm:$0xff]  ;;  %v6518_v49 = vcombine.high %v397_v43, %v398_v44  ;;  %v6517_v50 = vcombine.low %v397_v43, %v398_v44  ;;  %v7540_v43 = vld [vmem:[%s10648_s3 + $0xe8] ss:$16 sps:$4 sm:$0xff]   ;;  %v7544_v44 = vld [vmem:[%s10648_s3 + $0x10c] ss:$16 sps:$4 sm:$0xff]  }
  0x24   : > { %751 = vmatprep.subr.bf16.mxu0 %v6508_v27  ;;  %v400_v48 = vld [vmem:[%s10646_s1 + $0x320] sm:$0xff] }
  0x25   : > { %v401_v51 = vld [vmem:[%s10646_s1 + $0x340] sm:$0xff]  ;;  %v6520_v53 = vcombine.high %v399_v47, %v400_v48  ;;  %v6519_v54 = vcombine.low %v399_v47, %v400_v48  ;;  %v7460_v48 = vld [vmem:[%s8014_s28 + $0x54] ss:$8 sps:$4 sm:$0xff]  }
  0x26   : > { %v402_v52 = vld [vmem:[%s10646_s1 + $0x360] sm:$0xff] }
  0x27   : > { %752 = vmatpush1.bf16.msra.mxu0 %v6507_v30  ;;  %v403_v55 = vld [vmem:[%s10646_s1 + $0x380] sm:$0xff]  ;;  %v6522_v57 = vcombine.high %v401_v51, %v402_v52  ;;  %v6521_v58 = vcombine.low %v401_v51, %v402_v52  ;;  %v7526_v30 = vld [vmem:[%s10648_s3 + $0xac] ss:$16 sps:$4 sm:$0xff]  }
  0x28   : > { %753 = vmatprep.subr.bf16.mxu0 %v6510_v31  ;;  %v404_v56 = vld [vmem:[%s10646_s1 + $0x3a0] sm:$0xff] }
  0x29   : > { %v6524_v59 = vcombine.high %v403_v55, %v404_v56  ;;  %v405_v60 = vld [vmem:[%s10646_s1 + $0x3c0] sm:$0xff]  ;;  %v6523_v62 = vcombine.low %v403_v55, %v404_v56  ;;  %v7462_v56 = vld [vmem:[%s8014_s28 + $0x50] ss:$8 sps:$4 sm:$0xff]  }
  0x2a   : > { %v406_v61 = vld [vmem:[%s10646_s1 + $0x3e0] sm:$0xff] }
  0x2b   : > { %754 = vmatpush1.bf16.msra.mxu0 %v6509_v34  ;;  %v6526_v63 = vcombine.high %v405_v60, %v406_v61  ;;  %v8092_v0 = vld [vmem:[%s10648_s3 + $0x4] ss:$16 sps:$4 sm:$0xff]   ;;  %v6525_v2 = vcombine.low %v405_v60, %v406_v61  ;;  %v8114_v5 = vld [vmem:[%s10648_s3 + $0x20] ss:$16 sps:$4 sm:$0xff]   ;;  %v7532_v34 = vld [vmem:[%s10648_s3 + $0xcc] ss:$16 sps:$4 sm:$0xff]  }
  0x2c   : > { %755 = vmatprep.subr.bf16.mxu0 %v6512_v37  ;;  %v8102_v3 = vld [vmem:[%s10648_s3 + $0x24] ss:$16 sps:$4 sm:$0xff]   ;;  %1348 = vmatprep.subr.bf16.mxu1 %v8092_v0  ;;  %v7447_v6 = vld [vmem:[%s8014_s28] ss:$8 sps:$4 sm:$0xff]   ;;  %v7562_v60 = vld [vmem:[%s10648_s3 + $0x16c] ss:$16 sps:$4 sm:$0xff]  }
  0x2d   : > { %1349 = vmatpush1.bf16.msra.mxu1 %v8097_v1  ;;  %v8121_v7 = vld [vmem:[%s10648_s3 + $0x44] ss:$16 sps:$4 sm:$0xff]   ;;  %v8135_v11 = vld [vmem:[%s10648_s3 + $0x40] ss:$16 sps:$4 sm:$0xff]  }
  0x2e   : > { %1350 = vmatprep.subr.bf16.mxu1 %v8102_v3  ;;  %v8141_v12 = vld [vmem:[%s10648_s3 + $0x64] ss:$16 sps:$4 sm:$0xff]   ;;  %v8153_v15 = vld [vmem:[%s10648_s3 + $0x60] ss:$16 sps:$4 sm:$0xff]  }
  0x2f   : > { %756 = vmatpush1.bf16.msra.mxu0 %v6511_v38  ;;  %v8160_v17 = vld [vmem:[%s10648_s3 + $0x84] ss:$16 sps:$4 sm:$0xff]   ;;  %v8173_v21 = vld [vmem:[%s10648_s3 + $0x80] ss:$16 sps:$4 sm:$0xff]  }
  0x30   : > { %757 = vmatprep.subr.bf16.mxu0 %v6514_v41  ;;  %v7451_v18 = vld [vmem:[%s8014_s28 + $0x24] ss:$8 sps:$4 sm:$0xff]   ;;  %v8191_v25 = vld [vmem:[%s10648_s3 + $0xa0] ss:$16 sps:$4 sm:$0xff]  }
  0x31   : > { %1351 = vmatpush1.bf16.msra.mxu1 %v8114_v5  ;;  %v8179_v22 = vld [vmem:[%s10648_s3 + $0xa4] ss:$16 sps:$4 sm:$0xff]   ;;  %v7453_v26 = vld [vmem:[%s8014_s28 + $0x20] ss:$8 sps:$4 sm:$0xff]  }
  0x32   : > { %1352 = vmatprep.subr.bf16.mxu1 %v8121_v7  ;;  %v8198_v27 = vld [vmem:[%s10648_s3 + $0xc4] ss:$16 sps:$4 sm:$0xff]   ;;  %v8211_v31 = vld [vmem:[%s10648_s3 + $0xc0] ss:$16 sps:$4 sm:$0xff]  }
  0x33   : > { %758 = vmatpush1.bf16.msra.mxu0 %v6513_v42  ;;  %v8217_v32 = vld [vmem:[%s10648_s3 + $0xe4] ss:$16 sps:$4 sm:$0xff]   ;;  %v8229_v35 = vld [vmem:[%s10648_s3 + $0xe0] ss:$16 sps:$4 sm:$0xff]  }
  0x34   : > { %759 = vmatprep.subr.bf16.mxu0 %v6516_v45  ;;  %v8236_v37 = vld [vmem:[%s10648_s3 + $0x104] ss:$16 sps:$4 sm:$0xff]   ;;  %v8249_v41 = vld [vmem:[%s10648_s3 + $0x100] ss:$16 sps:$4 sm:$0xff]  }
  0x35   : > { %1353 = vmatpush1.bf16.msra.mxu1 %v8135_v11  ;;  %v7457_v38 = vld [vmem:[%s8014_s28 + $0x44] ss:$8 sps:$4 sm:$0xff]   ;;  %v8267_v45 = vld [vmem:[%s10648_s3 + $0x120] ss:$16 sps:$4 sm:$0xff]  }
  0x36   : > { %1354 = vmatprep.subr.bf16.mxu1 %v8141_v12  ;;  %v8255_v42 = vld [vmem:[%s10648_s3 + $0x124] ss:$16 sps:$4 sm:$0xff]   ;;  %v8287_v51 = vld [vmem:[%s10648_s3 + $0x140] ss:$16 sps:$4 sm:$0xff]  }
  0x37   : > { %760 = vmatpush1.bf16.msra.mxu0 %v6515_v46  ;;  %v7459_v46 = vld [vmem:[%s8014_s28 + $0x40] ss:$8 sps:$4 sm:$0xff]   ;;  %v8274_v47 = vld [vmem:[%s10648_s3 + $0x144] ss:$16 sps:$4 sm:$0xff]  }
  0x38   : > { %761 = vmatprep.subr.bf16.mxu0 %v6518_v49  ;;  %v7546_v49 = vld [vmem:[%s10648_s3 + $0x108] ss:$16 sps:$4 sm:$0xff]   ;;  %v8293_v52 = vld [vmem:[%s10648_s3 + $0x164] ss:$16 sps:$4 sm:$0xff]   ;;  %v8305_v55 = vld [vmem:[%s10648_s3 + $0x160] ss:$16 sps:$4 sm:$0xff]  }
  0x39   : > { %1355 = vmatpush1.bf16.msra.mxu1 %v8153_v15  ;;  %v8325_v61 = vld [vmem:[%s10648_s3 + $0x180] ss:$16 sps:$4 sm:$0xff]  }
  0x3a   : > { %1356 = vmatprep.subr.bf16.mxu1 %v8160_v17 }
  0x3b   : > { %762 = vmatpush1.bf16.msra.mxu0 %v6517_v50  ;;  %v7550_v50 = vld [vmem:[%s10648_s3 + $0x12c] ss:$16 sps:$4 sm:$0xff]  }
  0x3c   : > { %763 = vmatprep.subr.bf16.mxu0 %v6520_v53  ;;  %v7552_v53 = vld [vmem:[%s10648_s3 + $0x128] ss:$16 sps:$4 sm:$0xff]  }
  0x3d   : > { %1357 = vmatpush1.bf16.msra.mxu1 %v8173_v21 }
  0x3e   : > { %1358 = vmatprep.subr.bf16.mxu1 %v8179_v22 }
  0x3f   : > { %764 = vmatpush1.bf16.msra.mxu0 %v6519_v54  ;;  %v7556_v54 = vld [vmem:[%s10648_s3 + $0x14c] ss:$16 sps:$4 sm:$0xff]  }
  0x40   : > { %765 = vmatprep.subr.bf16.mxu0 %v6522_v57  ;;  %v8312_v57 = vld [vmem:[%s10648_s3 + $0x184] ss:$16 sps:$4 sm:$0xff]  }
  0x41   : > { %1359 = vmatpush1.bf16.msra.mxu1 %v8191_v25 }
  0x42   : > { %1360 = vmatprep.subr.bf16.mxu1 %v8198_v27 }
  0x43   : > { %766 = vmatpush1.bf16.msra.mxu0 %v6521_v58  ;;  %v7463_v58 = vld [vmem:[%s8014_s28 + $0x64] ss:$8 sps:$4 sm:$0xff]  }
  0x44   : > { %767 = vmatprep.subr.bf16.mxu0 %v6524_v59  ;;  %v7558_v59 = vld [vmem:[%s10648_s3 + $0x148] ss:$16 sps:$4 sm:$0xff]  }
  0x45   : > { %1361 = vmatpush1.bf16.msra.mxu1 %v8211_v31 }
  0x46   : > { %1362 = vmatprep.subr.bf16.mxu1 %v8217_v32 }
  0x47   : > { %768 = vmatpush1.bf16.msra.mxu0 %v6523_v62  ;;  %v8331_v62 = vld [vmem:[%s10648_s3 + $0x1a4] ss:$16 sps:$4 sm:$0xff]  }
  0x48   : > { %769 = vmatprep.subr.bf16.mxu0 %v6526_v63  ;;  %v7564_v63 = vld [vmem:[%s10648_s3 + $0x168] ss:$16 sps:$4 sm:$0xff]  }
  0x49   : > { %1363 = vmatpush1.bf16.msra.mxu1 %v8229_v35 }
  0x4a   : > { %1364 = vmatprep.subr.bf16.mxu1 %v8236_v37 }
  0x4b   : > { %770 = vmatpush1.bf16.msra.mxu0 %v6525_v2  ;;  %v7568_v2 = vld [vmem:[%s10648_s3 + $0x18c] ss:$16 sps:$4 sm:$0xff]  }
  0x4c   : > { %1541 = vmatprep.subr.bf16.mxu0 %v8108_v4 }
  0x4d   : > { %1365 = vmatpush1.bf16.msra.mxu1 %v8249_v41 }
  0x4e   : > { %772 = vmatmul.mubr.bf16.vlgmr.msra.gmra.mrb[0].mxu0 %v7447_v6  ;;  %1366 = vmatprep.subr.bf16.mxu1 %v8255_v42  ;;  %v8343_v6 = vld [vmem:[%s10648_s3 + $0x1a0] ss:$16 sps:$4 sm:$0xff]  }
  0x4f   : > { %781 = vmatprep.mubr.bf16.mxu0 %v7448_v8  ;;  %1542 = vmatpush1.bf16.msra.mxu0 %v7498_v9  ;;  %v7465_v8 = vld [vmem:[%s8014_s28 + $0x60] ss:$8 sps:$4 sm:$0xff]   ;;  %v7466_v9 = vld [vmem:[%s8014_s28 + $0x74] ss:$8 sps:$4 sm:$0xff]  }
  0x50   : > { %1543 = vmatprep.subr.bf16.mxu0 %v7502_v10  ;;  %v7570_v10 = vld [vmem:[%s10648_s3 + $0x188] ss:$16 sps:$4 sm:$0xff]  }
  0x51   : > { %1367 = vmatpush1.bf16.msra.mxu1 %v8267_v45 }
  0x52   : > { %1368 = vmatprep.subr.bf16.mxu1 %v8274_v47 }
  0x53   : > { %1544 = vmatpush1.bf16.msra.mxu0 %v7504_v13  ;;  %v7574_v13 = vld [vmem:[%s10648_s3 + $0x1ac] ss:$16 sps:$4 sm:$0xff]  }
  0x54   : > { %1545 = vmatprep.subr.bf16.mxu0 %v7508_v14  ;;  %v7468_v14 = vld [vmem:[%s8014_s28 + $0x70] ss:$8 sps:$4 sm:$0xff]  }
  0x55   : > { %1369 = vmatpush1.bf16.msra.mxu1 %v8287_v51 }
  0x56   : > { %782 = vmatmul.mubr.bf16.gmra.mrb[4].mxu0 %v7450_v16  ;;  %1370 = vmatprep.subr.bf16.mxu1 %v8293_v52  ;;  %v7469_v16 = vld [vmem:[%s8014_s28 + $0x84] ss:$8 sps:$4 sm:$0xff]  }
  0x57   : > { %791 = vmatprep.mubr.bf16.mxu0 %v7451_v18  ;;  %1546 = vmatpush1.bf16.msra.mxu0 %v7510_v19  ;;  %v7471_v18 = vld [vmem:[%s8014_s28 + $0x80] ss:$8 sps:$4 sm:$0xff]   ;;  %v7472_v19 = vld [vmem:[%s8014_s28 + $0x94] ss:$8 sps:$4 sm:$0xff]  }
  0x58   : > { %1547 = vmatprep.subr.bf16.mxu0 %v7514_v20  ;;  %v7474_v20 = vld [vmem:[%s8014_s28 + $0x90] ss:$8 sps:$4 sm:$0xff]  }
  0x59   : > { %1371 = vmatpush1.bf16.msra.mxu1 %v8305_v55 }
  0x5a   : > { %1372 = vmatprep.subr.bf16.mxu1 %v8312_v57 }
  0x5b   : > { %1548 = vmatpush1.bf16.msra.mxu0 %v7516_v23  ;;  %v7475_v23 = vld [vmem:[%s8014_s28 + $0xa4] ss:$8 sps:$4 sm:$0xff]  }
  0x5c   : > { %1549 = vmatprep.subr.bf16.mxu0 %v7520_v24  ;;  %v7477_v24 = vld [vmem:[%s8014_s28 + $0xa0] ss:$8 sps:$4 sm:$0xff]  }
  0x5d   : > { %1373 = vmatpush1.bf16.msra.mxu1 %v8325_v61 }
  0x5e   : > { %792 = vmatmul.mubr.bf16.gmra.mrb[8].mxu0 %v7453_v26  ;;  %1374 = vmatprep.subr.bf16.mxu1 %v8331_v62  ;;  %v7478_v26 = vld [vmem:[%s8014_s28 + $0xb4] ss:$8 sps:$4 sm:$0xff]  }
  0x5f   : > { %801 = vmatprep.mubr.bf16.mxu0 %v7454_v28  ;;  %1550 = vmatpush1.bf16.msra.mxu0 %v7522_v29  ;;  %v8366_v28 = vld [vmem:[%s10648_s3 + $0x1a8] ss:$16 sps:$4 sm:$0xff]  }
  0x60   : > { %1551 = vmatprep.subr.bf16.mxu0 %v7526_v30  ;;  %v7480_v29 = vld [vmem:[%s8014_s28 + $0xb0] ss:$8 sps:$4 sm:$0xff]   ;;  %v8373_v30 = vld [vmem:[%s10648_s3 + $0x1c4] ss:$16 sps:$4 sm:$0xff]  }
  0x61   : > { %1375 = vmatpush1.bf16.msra.mxu1 %v8343_v6 }
  0x62   : > { %1376 = vmatprep.subr.bf16.mxu1 %v8373_v30 }
  0x63   : > { %1552 = vmatpush1.bf16.msra.mxu0 %v7528_v33  ;;  %v8378_v33 = vld [vmem:[%s10648_s3 + $0x1cc] ss:$16 sps:$4 sm:$0xff]  }
  0x64   : > { %1553 = vmatprep.subr.bf16.mxu0 %v7532_v34  ;;  %v7481_v34 = vld [vmem:[%s8014_s28 + $0xc4] ss:$8 sps:$4 sm:$0xff]  }
  0x66   : > { %802 = vmatmul.mubr.bf16.gmra.mrb[12].mxu0 %v7456_v36  ;;  %v8384_v36 = vld [vmem:[%s10648_s3 + $0x1c0] ss:$16 sps:$4 sm:$0xff]  }
  0x67   : > { %811 = vmatprep.mubr.bf16.mxu0 %v7457_v38  ;;  %1554 = vmatpush1.bf16.msra.mxu0 %v7534_v39  ;;  %v8389_v38 = vld [vmem:[%s10648_s3 + $0x1c8] ss:$16 sps:$4 sm:$0xff]   ;;  %v8398_v39 = vld [vmem:[%s10648_s3 + $0x1e4] ss:$16 sps:$4 sm:$0xff]  }
  0x68   : > { %1555 = vmatprep.subr.bf16.mxu0 %v7538_v40  ;;  %1377 = vmatpush1.bf16.msra.mxu1 %v8384_v36  ;;  %v8403_v40 = vld [vmem:[%s10648_s3 + $0x1e0] ss:$16 sps:$4 sm:$0xff]  }
  0x69   : > { %1378 = vmatprep.subr.bf16.mxu1 %v8398_v39 }
  0x6b   : > { %1556 = vmatpush1.bf16.msra.mxu0 %v7540_v43  ;;  %v8408_v43 = vld [vmem:[%s10648_s3 + $0x1ec] ss:$16 sps:$4 sm:$0xff]  }
  0x6c   : > { %1557 = vmatprep.subr.bf16.mxu0 %v7544_v44  ;;  %v8413_v44 = vld [vmem:[%s10648_s3 + $0x1e8] ss:$16 sps:$4 sm:$0xff]   ;;  %1379 = vmatpush1.bf16.msra.mxu1 %v8403_v40 }
  0x6e   : > { %812 = vmatmul.mubr.bf16.gmra.mrb[16].mxu0 %v7459_v46  ;;  %v7483_v46 = vld [vmem:[%s8014_s28 + $0xc0] ss:$8 sps:$4 sm:$0xff]  }
  0x6f   : > { %821 = vmatprep.mubr.bf16.mxu0 %v7460_v48  ;;  %1558 = vmatpush1.bf16.msra.mxu0 %v7546_v49  ;;  %v7484_v48 = vld [vmem:[%s8014_s28 + $0xd4] ss:$8 sps:$4 sm:$0xff]   ;;  %v2182_v49 = vld [vmem:[%s10646_s1 + $0x8] sm:$0xff] }
  0x70   : > { %1559 = vmatprep.subr.bf16.mxu0 %v7550_v50  ;;  %v2183_v50 = vld [vmem:[%s10646_s1 + $0x28] sm:$0xff] }
  0x73   : > { %1560 = vmatpush1.bf16.msra.mxu0 %v7552_v53  ;;  %v6655_v53 = vcombine.low %v2182_v49, %v2183_v50 }
  0x74   : > { %1561 = vmatprep.subr.bf16.mxu0 %v7556_v54  ;;  %v6656_v54 = vcombine.high %v2182_v49, %v2183_v50  ;;  %v2184_v50 = vld [vmem:[%s10646_s1 + $0x48] sm:$0xff] }
  0x76   : > { %822 = vmatmul.mubr.bf16.gmra.mrb[20].mxu0 %v7462_v56  ;;  %2386 = vmatprep.subr.bf16.mxu1 %v6656_v54  ;;  %v7486_v56 = vld [vmem:[%s8014_s28 + $0xd0] ss:$8 sps:$4 sm:$0xff]   ;;  %v2185_v54 = vld [vmem:[%s10646_s1 + $0x68] sm:$0xff] }
  0x77   : > { %831 = vmatprep.mubr.bf16.mxu0 %v7463_v58  ;;  %1562 = vmatpush1.bf16.msra.mxu0 %v7558_v59  ;;  %v7487_v58 = vld [vmem:[%s8014_s28 + $0xe4] ss:$8 sps:$4 sm:$0xff]   ;;  %v7490_v59 = vld [vmem:[%s8014_s28 + $0xf4] ss:$8 sps:$4 sm:$0xff]  }
  0x78   : > { %1563 = vmatprep.subr.bf16.mxu0 %v7562_v60  ;;  %v7492_v60 = vld [vmem:[%s8014_s28 + $0xf0] ss:$8 sps:$4 sm:$0xff]  }
  0x7b   : > { %1564 = vmatpush1.bf16.msra.mxu0 %v7564_v63  ;;  %v355_v63 = vlaneseq }
  0x7c   : > { %1565 = vmatprep.subr.bf16.mxu0 %v7568_v2 }
  0x7d   : > { %v8433_v2 = vshrl.u32 %v355_v63, 7  ;;  %v6658_v63 = vcombine.high %v2184_v50, %v2185_v54 }
  0x7e   : > { %832 = vmatmul.mubr.bf16.gmra.mrb[24].mxu0 %v7465_v8 }
  0x7f   : > { %841 = vmatprep.mubr.bf16.mxu0 %v7466_v9  ;;  %1566 = vmatpush1.bf16.msra.mxu0 %v7570_v10  ;;  %v8436_v8 = vsub.s32 0, %v8433_v2  ;;  %v407_v9 = vld [vmem:[%s10647_s2] sm:$0x3]  ;;  %v8442_v10 = vsub.s32 1, %v8433_v2 }
  0x80   : > { %1567 = vmatprep.subr.bf16.mxu0 %v7574_v13 }
  0x81   : > { %v8445_v13 = vrot.slane %v407_v9, %v8436_v8 }
  0x83   : > { %1568 = vmatpush1.bf16.msra.mxu0 %v8366_v28 }
  0x84   : > { %1569 = vmatprep.subr.bf16.mxu0 %v8378_v33 }
  0x86   : > { %842 = vmatmul.mubr.bf16.gmra.mrb[28].mxu0 %v7468_v14  ;;  %v8448_v14 = vrot.slane %v407_v9, %v8442_v10 }
  0x87   : > { %851 = vmatprep.mubr.bf16.mxu0 %v7469_v16  ;;  %1570 = vmatpush1.bf16.msra.mxu0 %v8389_v38 }
  0x88   : > { %1571 = vmatprep.subr.bf16.mxu0 %v8408_v43 }
  0x8b   : > { %1572 = vmatpush1.bf16.msra.mxu0 %v8413_v44 }
  0x8c   : > { %2675 = vmatprep.subr.bf16.mxu0 %v8092_v0  ;;  %v7489_v0 = vld [vmem:[%s8014_s28 + $0xe0] ss:$8 sps:$4 sm:$0xff]  }
  0x8e   : > { %852 = vmatmul.mubr.bf16.gmra.mrb[32].mxu0 %v7471_v18 }
  0x8f   : > { %861 = vmatprep.mubr.bf16.mxu0 %v7472_v19 }
  0x96   : > { %862 = vmatmul.mubr.bf16.gmra.mrb[36].mxu0 %v7474_v20 }
  0x97   : > { %871 = vmatprep.mubr.bf16.mxu0 %v7475_v23 }
  0x9e   : > { %872 = vmatmul.mubr.bf16.gmra.mrb[40].mxu0 %v7477_v24 }
  0x9f   : > { %881 = vmatprep.mubr.bf16.mxu0 %v7478_v26 }
  0xa6   : > { %882 = vmatmul.mubr.bf16.gmra.mrb[44].mxu0 %v7480_v29 }
  0xa7   : > { %891 = vmatprep.mubr.bf16.mxu0 %v7481_v34 }
  0xae   : > { %892 = vmatmul.mubr.bf16.gmra.mrb[48].mxu0 %v7483_v46 }
  0xaf   : > { %901 = vmatprep.mubr.bf16.mxu0 %v7484_v48 }
  0xb6   : > { %902 = vmatmul.mubr.bf16.gmra.mrb[52].mxu0 %v7486_v56 }
  0xb7   : > { %911 = vmatprep.mubr.bf16.mxu0 %v7487_v58 }
  0xbe   : > { %912 = vmatmul.mubr.bf16.gmra.mrb[56].mxu0 %v7489_v0 }
  0xbf   : > { %921 = vmatprep.mubr.bf16.mxu0 %v7490_v59 }
  0xc6   : > { %922 = vmatmul.mubr.bf16.gmra.mrb[60].mxu0 %v7492_v60 }
 0x121   : > { %v773_v16 = vpop.f32.mrb[0].mxu0 }
 0x122   : > { %v774_v18 = vadd.f32 %v773_v16, %v8445_v13  ;;  %v775_v19 = vpop.f32.mrb[1].mxu0 }
 0x123   : > { %v776_v20 = vadd.f32 %v775_v19, %v8448_v14  ;;  %v777_v23 = vpop.f32.mrb[2].mxu0  ;;  %v2187_v19 = vld [vmem:[%s10646_s1 + $0xa8] sm:$0xff] }
 0x124   : > { %v778_v24 = vadd.f32 %v777_v23, %v8445_v13  ;;  %v779_v26 = vpop.f32.mrb[3].mxu0  ;;  %v932_v34 = vmax.f32 %v774_v18, 0.0  ;;  %v2186_v18 = vld [vmem:[%s10646_s1 + $0x88] sm:$0xff] }
 0x125   : > { %v780_v29 = vadd.f32 %v779_v26, %v8448_v14  ;;  %v933_v48 = vmax.f32 %v776_v20, 0.0  ;;  %v6657_v26 = vcombine.low %v2184_v50, %v2185_v54 }
 0x126   : > { %v934_v46 = vmax.f32 %v778_v24, 0.0 }
 0x127   : > { %v935_v49 = vmax.f32 %v780_v29, 0.0 }
 0x128   : > { %v996_v56 = vpack.c.bf16 %v934_v46, %v932_v34  ;;  %v6660_v46 = vcombine.high %v2186_v18, %v2187_v19 }
 0x129   : > { %v783_v58 = vpop.f32.mrb[4].mxu0  ;;  %v997_v0 = vpack.c.bf16 %v935_v49, %v933_v48 }
 0x12a   : > { %v784_v59 = vadd.f32 %v783_v58, %v8445_v13  ;;  %v785_v60 = vpop.f32.mrb[5].mxu0  ;;  %v2188_v58 = vld [vmem:[%s10646_s1 + $0xc8] sm:$0xff] }
 0x12b   : > { %v786_v9 = vadd.f32 %v785_v60, %v8448_v14  ;;  %v787_v16 = vpop.f32.mrb[6].mxu0  ;;  %1380 = vmatprep.mubr.bf16.mxu1 %v997_v0  ;;  %1573 = vmatprep.mubr.bf16.mxu0 %v997_v0 }
 0x12c   : > { %v788_v20 = vadd.f32 %v787_v16, %v8445_v13  ;;  %v789_v23 = vpop.f32.mrb[7].mxu0  ;;  %1381 = vmatmul.mubr.bf16.vlgmr.msra.gmra.mrb[0].mxu1 %v996_v56  ;;  %1574 = vmatmul.mubr.bf16.vlgmr.msra.gmra.mrb[64].mxu0 %v996_v56  ;;  %v936_v29 = vmax.f32 %v784_v59, 0.0  ;;  %v2189_v56 = vld [vmem:[%s10646_s1 + $0xe8] sm:$0xff] }
 0x12d   : > { %v790_v24 = vadd.f32 %v789_v23, %v8448_v14  ;;  %2387 = vmatpush1.bf16.msra.mxu1 %v6655_v53  ;;  %2676 = vmatpush1.bf16.msra.mxu0 %v8097_v1  ;;  %v937_v48 = vmax.f32 %v786_v9, 0.0  ;;  %v6659_v1 = vcombine.low %v2186_v18, %v2187_v19  ;;  %v6662_v59 = vcombine.high %v2188_v58, %v2189_v56  ;;  %v2190_v9 = vld [vmem:[%s10646_s1 + $0x108] sm:$0xff] }
 0x12e   : > { %v938_v34 = vmax.f32 %v788_v20, 0.0  ;;  %2388 = vmatprep.subr.bf16.mxu1 %v6658_v63  ;;  %2677 = vmatprep.subr.bf16.mxu0 %v8102_v3  ;;  %v6661_v19 = vcombine.low %v2188_v58, %v2189_v56 }
 0x12f   : > { %v939_v49 = vmax.f32 %v790_v24, 0.0 }
 0x130   : > { %v998_v53 = vpack.c.bf16 %v938_v34, %v936_v29  ;;  %v2192_v34 = vld [vmem:[%s10646_s1 + $0x148] sm:$0xff] }
 0x131   : > { %v793_v50 = vpop.f32.mrb[8].mxu0  ;;  %v999_v54 = vpack.c.bf16 %v939_v49, %v937_v48  ;;  %2389 = vmatpush1.bf16.msra.mxu1 %v6657_v26  ;;  %2678 = vmatpush1.bf16.msra.mxu0 %v8114_v5  ;;  %v2191_v5 = vld [vmem:[%s10646_s1 + $0x128] sm:$0xff] }
 0x132   : > { %v794_v0 = vadd.f32 %v793_v50, %v8445_v13  ;;  %v795_v3 = vpop.f32.mrb[9].mxu0  ;;  %2390 = vmatprep.subr.bf16.mxu1 %v6660_v46  ;;  %2679 = vmatprep.subr.bf16.mxu0 %v8121_v7  ;;  %v6664_v24 = vcombine.high %v2190_v9, %v2191_v5  ;;  %v2193_v46 = vld [vmem:[%s10646_s1 + $0x168] sm:$0xff] }
 0x133   : > { %v796_v60 = vadd.f32 %v795_v3, %v8448_v14  ;;  %v797_v63 = vpop.f32.mrb[10].mxu0  ;;  %1390 = vmatprep.mubr.bf16.mxu1 %v999_v54  ;;  %1583 = vmatprep.mubr.bf16.mxu0 %v999_v54 }
 0x134   : > { %v798_v16 = vadd.f32 %v797_v63, %v8445_v13  ;;  %v799_v18 = vpop.f32.mrb[11].mxu0  ;;  %1391 = vmatmul.mubr.bf16.gmra.mrb[4].mxu1 %v998_v53  ;;  %1584 = vmatmul.mubr.bf16.gmra.mrb[68].mxu0 %v998_v53  ;;  %v940_v20 = vmax.f32 %v794_v0, 0.0  ;;  %v6666_v53 = vcombine.high %v2192_v34, %v2193_v46 }
 0x135   : > { %v800_v7 = vadd.f32 %v799_v18, %v8448_v14  ;;  %2391 = vmatpush1.bf16.msra.mxu1 %v6659_v1  ;;  %2680 = vmatpush1.bf16.msra.mxu0 %v8135_v11  ;;  %v941_v26 = vmax.f32 %v796_v60, 0.0  ;;  %v6663_v11 = vcombine.low %v2190_v9, %v2191_v5  ;;  %v2194_v1 = vld [vmem:[%s10646_s1 + $0x188] sm:$0xff] }
 0x136   : > { %v942_v23 = vmax.f32 %v798_v16, 0.0  ;;  %2392 = vmatprep.subr.bf16.mxu1 %v6662_v59  ;;  %2681 = vmatprep.subr.bf16.mxu0 %v8141_v12  ;;  %v6665_v59 = vcombine.low %v2192_v34, %v2193_v46  ;;  %v2196_v18 = vld [vmem:[%s10646_s1 + $0x1c8] sm:$0xff] }
 0x137   : > { %v943_v29 = vmax.f32 %v800_v7, 0.0  ;;  %v2197_v7 = vld [vmem:[%s10646_s1 + $0x1e8] sm:$0xff] }
 0x138   : > { %v1000_v48 = vpack.c.bf16 %v942_v23, %v940_v20  ;;  %v2198_v46 = vld [vmem:[%s10646_s1 + $0x208] sm:$0xff] }
 0x139   : > { %v803_v49 = vpop.f32.mrb[12].mxu0  ;;  %v1001_v58 = vpack.c.bf16 %v943_v29, %v941_v26  ;;  %2393 = vmatpush1.bf16.msra.mxu1 %v6661_v19  ;;  %2682 = vmatpush1.bf16.msra.mxu0 %v8153_v15  ;;  %v2195_v15 = vld [vmem:[%s10646_s1 + $0x1a8] sm:$0xff]  ;;  %v6670_v26 = vcombine.high %v2196_v18, %v2197_v7 }
 0x13a   : > { %v804_v56 = vadd.f32 %v803_v49, %v8445_v13  ;;  %v805_v12 = vpop.f32.mrb[13].mxu0  ;;  %2394 = vmatprep.subr.bf16.mxu1 %v6664_v24  ;;  %2683 = vmatprep.subr.bf16.mxu0 %v8160_v17  ;;  %v6668_v9 = vcombine.high %v2194_v1, %v2195_v15 }
 0x13b   : > { %v806_v50 = vadd.f32 %v805_v12, %v8448_v14  ;;  %v807_v54 = vpop.f32.mrb[14].mxu0  ;;  %1400 = vmatprep.mubr.bf16.mxu1 %v1001_v58  ;;  %1593 = vmatprep.mubr.bf16.mxu0 %v1001_v58  ;;  %v6669_v58 = vcombine.low %v2196_v18, %v2197_v7 }
 0x13c   : > { %v808_v0 = vadd.f32 %v807_v54, %v8445_v13  ;;  %v809_v3 = vpop.f32.mrb[15].mxu0  ;;  %1401 = vmatmul.mubr.bf16.gmra.mrb[8].mxu1 %v1000_v48  ;;  %1594 = vmatmul.mubr.bf16.gmra.mrb[72].mxu0 %v1000_v48  ;;  %v944_v60 = vmax.f32 %v804_v56, 0.0  ;;  %v2200_v54 = vld [vmem:[%s10646_s1 + $0x248] sm:$0xff] }
 0x13d   : > { %v810_v17 = vadd.f32 %v809_v3, %v8448_v14  ;;  %2395 = vmatpush1.bf16.msra.mxu1 %v6663_v11  ;;  %2684 = vmatpush1.bf16.msra.mxu0 %v8173_v21  ;;  %v945_v5 = vmax.f32 %v806_v50, 0.0  ;;  %v6667_v21 = vcombine.low %v2194_v1, %v2195_v15  ;;  %v2201_v1 = vld [vmem:[%s10646_s1 + $0x268] sm:$0xff] }
 0x13e   : > { %v946_v63 = vmax.f32 %v808_v0, 0.0  ;;  %2396 = vmatprep.subr.bf16.mxu1 %v6666_v53  ;;  %2685 = vmatprep.subr.bf16.mxu0 %v8179_v22  ;;  %v6673_v18 = vcombine.low %v2200_v54, %v2201_v1 }
 0x13f   : > { %v947_v16 = vmax.f32 %v810_v17, 0.0 }
 0x140   : > { %v1002_v19 = vpack.c.bf16 %v946_v63, %v944_v60 }
 0x141   : > { %v813_v20 = vpop.f32.mrb[16].mxu0  ;;  %v1003_v23 = vpack.c.bf16 %v947_v16, %v945_v5  ;;  %2397 = vmatpush1.bf16.msra.mxu1 %v6665_v59  ;;  %2686 = vmatpush1.bf16.msra.mxu0 %v8191_v25  ;;  %v2199_v25 = vld [vmem:[%s10646_s1 + $0x228] sm:$0xff]  ;;  %v6674_v59 = vcombine.high %v2200_v54, %v2201_v1 }
 0x142   : > { %v814_v24 = vadd.f32 %v813_v20, %v8445_v13  ;;  %v815_v22 = vpop.f32.mrb[17].mxu0  ;;  %2398 = vmatprep.subr.bf16.mxu1 %v6668_v9  ;;  %2687 = vmatprep.subr.bf16.mxu0 %v8198_v27  ;;  %v6672_v12 = vcombine.high %v2198_v46, %v2199_v25  ;;  %v2202_v9 = vld [vmem:[%s10646_s1 + $0x288] sm:$0xff] }
 0x143   : > { %v816_v29 = vadd.f32 %v815_v22, %v8448_v14  ;;  %v817_v34 = vpop.f32.mrb[18].mxu0  ;;  %1410 = vmatprep.mubr.bf16.mxu1 %v1003_v23  ;;  %1603 = vmatprep.mubr.bf16.mxu0 %v1003_v23  ;;  %v2205_v22 = vld [vmem:[%s10646_s1 + $0x2e8] sm:$0xff] }
 0x144   : > { %v818_v48 = vadd.f32 %v817_v34, %v8445_v13  ;;  %v819_v49 = vpop.f32.mrb[19].mxu0  ;;  %1411 = vmatmul.mubr.bf16.gmra.mrb[12].mxu1 %v1002_v19  ;;  %1604 = vmatmul.mubr.bf16.gmra.mrb[76].mxu0 %v1002_v19  ;;  %v948_v11 = vmax.f32 %v814_v24, 0.0  ;;  %v2204_v24 = vld [vmem:[%s10646_s1 + $0x2c8] sm:$0xff] }
 0x145   : > { %v820_v27 = vadd.f32 %v819_v49, %v8448_v14  ;;  %2399 = vmatpush1.bf16.msra.mxu1 %v6667_v21  ;;  %2688 = vmatpush1.bf16.msra.mxu0 %v8211_v31  ;;  %v949_v53 = vmax.f32 %v816_v29, 0.0  ;;  %v6671_v31 = vcombine.low %v2198_v46, %v2199_v25  ;;  %v6678_v25 = vcombine.high %v2204_v24, %v2205_v22 }
 0x146   : > { %v950_v56 = vmax.f32 %v818_v48, 0.0  ;;  %2400 = vmatprep.subr.bf16.mxu1 %v6670_v26  ;;  %2689 = vmatprep.subr.bf16.mxu0 %v8217_v32 }
 0x147   : > { %v951_v50 = vmax.f32 %v820_v27, 0.0  ;;  %v2206_v27 = vld [vmem:[%s10646_s1 + $0x308] sm:$0xff] }
 0x148   : > { %v1004_v15 = vpack.c.bf16 %v950_v56, %v948_v11  ;;  %v6677_v56 = vcombine.low %v2204_v24, %v2205_v22 }
 0x149   : > { %v823_v0 = vpop.f32.mrb[20].mxu0  ;;  %v1005_v3 = vpack.c.bf16 %v951_v50, %v949_v53  ;;  %2401 = vmatpush1.bf16.msra.mxu1 %v6669_v58  ;;  %2690 = vmatpush1.bf16.msra.mxu0 %v8229_v35  ;;  %v2203_v35 = vld [vmem:[%s10646_s1 + $0x2a8] sm:$0xff] }
 0x14a   : > { %v824_v17 = vadd.f32 %v823_v0, %v8445_v13  ;;  %v825_v32 = vpop.f32.mrb[21].mxu0  ;;  %2402 = vmatprep.subr.bf16.mxu1 %v6672_v12  ;;  %2691 = vmatprep.subr.bf16.mxu0 %v8236_v37  ;;  %v6676_v20 = vcombine.high %v2202_v9, %v2203_v35  ;;  %v2209_v0 = vld [vmem:[%s10646_s1 + $0x368] sm:$0xff] }
 0x14b   : > { %v826_v60 = vadd.f32 %v825_v32, %v8448_v14  ;;  %v827_v63 = vpop.f32.mrb[22].mxu0  ;;  %1420 = vmatprep.mubr.bf16.mxu1 %v1005_v3  ;;  %1613 = vmatprep.mubr.bf16.mxu0 %v1005_v3 }
 0x14c   : > { %v828_v5 = vadd.f32 %v827_v63, %v8445_v13  ;;  %v829_v16 = vpop.f32.mrb[23].mxu0  ;;  %1421 = vmatmul.mubr.bf16.gmra.mrb[16].mxu1 %v1004_v15  ;;  %1614 = vmatmul.mubr.bf16.gmra.mrb[80].mxu0 %v1004_v15  ;;  %v952_v7 = vmax.f32 %v824_v17, 0.0  ;;  %v2208_v15 = vld [vmem:[%s10646_s1 + $0x348] sm:$0xff] }
 0x14d   : > { %v830_v37 = vadd.f32 %v829_v16, %v8448_v14  ;;  %2403 = vmatpush1.bf16.msra.mxu1 %v6671_v31  ;;  %2692 = vmatpush1.bf16.msra.mxu0 %v8249_v41  ;;  %v953_v23 = vmax.f32 %v826_v60, 0.0  ;;  %v6675_v41 = vcombine.low %v2202_v9, %v2203_v35  ;;  %v2210_v9 = vld [vmem:[%s10646_s1 + $0x388] sm:$0xff]  ;;  %v6681_v16 = vcombine.low %v2208_v15, %v2209_v0 }
 0x14e   : > { %v954_v19 = vmax.f32 %v828_v5, 0.0  ;;  %2404 = vmatprep.subr.bf16.mxu1 %v6674_v59  ;;  %2693 = vmatprep.subr.bf16.mxu0 %v8255_v42  ;;  %v6682_v59 = vcombine.high %v2208_v15, %v2209_v0 }
 0x14f   : > { %v955_v21 = vmax.f32 %v830_v37, 0.0 }
 0x150   : > { %v1006_v26 = vpack.c.bf16 %v954_v19, %v952_v7 }
 0x151   : > { %v833_v29 = vpop.f32.mrb[24].mxu0  ;;  %v1007_v34 = vpack.c.bf16 %v955_v21, %v953_v23  ;;  %2405 = vmatpush1.bf16.msra.mxu1 %v6673_v18  ;;  %2694 = vmatpush1.bf16.msra.mxu0 %v8267_v45  ;;  %v2207_v45 = vld [vmem:[%s10646_s1 + $0x328] sm:$0xff] }
 0x152   : > { %v834_v46 = vadd.f32 %v833_v29, %v8445_v13  ;;  %v835_v42 = vpop.f32.mrb[25].mxu0  ;;  %2406 = vmatprep.subr.bf16.mxu1 %v6676_v20  ;;  %2695 = vmatprep.subr.bf16.mxu0 %v8274_v47  ;;  %v6680_v50 = vcombine.high %v2206_v27, %v2207_v45  ;;  %v2212_v23 = vld [vmem:[%s10646_s1 + $0x3c8] sm:$0xff] }
 0x153   : > { %v836_v48 = vadd.f32 %v835_v42, %v8448_v14  ;;  %v837_v49 = vpop.f32.mrb[26].mxu0  ;;  %1430 = vmatprep.mubr.bf16.mxu1 %v1007_v34  ;;  %1623 = vmatprep.mubr.bf16.mxu0 %v1007_v34  ;;  %v2213_v21 = vld [vmem:[%s10646_s1 + $0x3e8] sm:$0xff] }
 0x154   : > { %v838_v58 = vadd.f32 %v837_v49, %v8445_v13  ;;  %v839_v11 = vpop.f32.mrb[27].mxu0  ;;  %1431 = vmatmul.mubr.bf16.gmra.mrb[20].mxu1 %v1006_v26  ;;  %1624 = vmatmul.mubr.bf16.gmra.mrb[84].mxu0 %v1006_v26  ;;  %v956_v12 = vmax.f32 %v834_v46, 0.0  ;;  %v6686_v34 = vcombine.high %v2212_v23, %v2213_v21 }
 0x155   : > { %v840_v47 = vadd.f32 %v839_v11, %v8448_v14  ;;  %2407 = vmatpush1.bf16.msra.mxu1 %v6675_v41  ;;  %2696 = vmatpush1.bf16.msra.mxu0 %v8287_v51  ;;  %v957_v54 = vmax.f32 %v836_v48, 0.0  ;;  %v6679_v51 = vcombine.low %v2206_v27, %v2207_v45 }
 0x156   : > { %v958_v53 = vmax.f32 %v838_v58, 0.0  ;;  %2408 = vmatprep.subr.bf16.mxu1 %v6678_v25  ;;  %2697 = vmatprep.subr.bf16.mxu0 %v8293_v52 }
 0x157   : > { %v959_v1 = vmax.f32 %v840_v47, 0.0 }
 0x158   : > { %v1008_v3 = vpack.c.bf16 %v958_v53, %v956_v12 }
 0x159   : > { %v843_v31 = vpop.f32.mrb[28].mxu0  ;;  %v1009_v17 = vpack.c.bf16 %v959_v1, %v957_v54  ;;  %2409 = vmatpush1.bf16.msra.mxu1 %v6677_v56  ;;  %2698 = vmatpush1.bf16.msra.mxu0 %v8305_v55  ;;  %v2211_v55 = vld [vmem:[%s10646_s1 + $0x3a8] sm:$0xff] }
 0x15a   : > { %v844_v32 = vadd.f32 %v843_v31, %v8445_v13  ;;  %v845_v52 = vpop.f32.mrb[29].mxu0  ;;  %2410 = vmatprep.subr.bf16.mxu1 %v6680_v50  ;;  %2699 = vmatprep.subr.bf16.mxu0 %v8312_v57  ;;  %v6684_v7 = vcombine.high %v2210_v9, %v2211_v55 }
 0x15b   : > { %v846_v60 = vadd.f32 %v845_v52, %v8448_v14  ;;  %v847_v63 = vpop.f32.mrb[30].mxu0  ;;  %1440 = vmatprep.mubr.bf16.mxu1 %v1009_v17  ;;  %1633 = vmatprep.mubr.bf16.mxu0 %v1009_v17 }
 0x15c   : > { %v848_v35 = vadd.f32 %v847_v63, %v8445_v13  ;;  %v849_v5 = vpop.f32.mrb[31].mxu0  ;;  %1441 = vmatmul.mubr.bf16.gmra.mrb[24].mxu1 %v1008_v3  ;;  %1634 = vmatmul.mubr.bf16.gmra.mrb[88].mxu0 %v1008_v3  ;;  %v960_v37 = vmax.f32 %v844_v32, 0.0 }
 0x15d   : > { %v850_v57 = vadd.f32 %v849_v5, %v8448_v14  ;;  %2411 = vmatpush1.bf16.msra.mxu1 %v6679_v51  ;;  %2700 = vmatpush1.bf16.msra.mxu0 %v8325_v61  ;;  %v961_v19 = vmax.f32 %v846_v60, 0.0  ;;  %v6683_v61 = vcombine.low %v2210_v9, %v2211_v55 }
 0x15e   : > { %v962_v18 = vmax.f32 %v848_v35, 0.0  ;;  %2412 = vmatprep.subr.bf16.mxu1 %v6682_v59  ;;  %2701 = vmatprep.subr.bf16.mxu0 %v8331_v62 }
 0x15f   : > { %v963_v20 = vmax.f32 %v850_v57, 0.0 }
 0x160   : > { %v1010_v24 = vpack.c.bf16 %v962_v18, %v960_v37 }
 0x161   : > { %v853_v22 = vpop.f32.mrb[32].mxu0  ;;  %v1011_v26 = vpack.c.bf16 %v963_v20, %v961_v19  ;;  %2413 = vmatpush1.bf16.msra.mxu1 %v6681_v16  ;;  %2702 = vmatpush1.bf16.msra.mxu0 %v8343_v6  ;;  %v6685_v6 = vcombine.low %v2212_v23, %v2213_v21 }
 0x162   : > { %v854_v29 = vadd.f32 %v853_v22, %v8445_v13  ;;  %v855_v62 = vpop.f32.mrb[33].mxu0  ;;  %2414 = vmatprep.subr.bf16.mxu1 %v6684_v7  ;;  %2703 = vmatprep.subr.bf16.mxu0 %v8373_v30 }
 0x163   : > { %v856_v41 = vadd.f32 %v855_v62, %v8448_v14  ;;  %v857_v46 = vpop.f32.mrb[34].mxu0  ;;  %1450 = vmatprep.mubr.bf16.mxu1 %v1011_v26  ;;  %1643 = vmatprep.mubr.bf16.mxu0 %v1011_v26 }
 0x164   : > { %v858_v42 = vadd.f32 %v857_v46, %v8445_v13  ;;  %v859_v25 = vpop.f32.mrb[35].mxu0  ;;  %1451 = vmatmul.mubr.bf16.gmra.mrb[28].mxu1 %v1010_v24  ;;  %1644 = vmatmul.mubr.bf16.gmra.mrb[92].mxu0 %v1010_v24  ;;  %v964_v49 = vmax.f32 %v854_v29, 0.0 }
 0x165   : > { %v860_v48 = vadd.f32 %v859_v25, %v8448_v14  ;;  %2415 = vmatpush1.bf16.msra.mxu1 %v6683_v61  ;;  %2704 = vmatpush1.bf16.msra.mxu0 %v8384_v36  ;;  %v965_v30 = vmax.f32 %v856_v41, 0.0 }
 0x166   : > { %v966_v27 = vmax.f32 %v858_v42, 0.0  ;;  %2416 = vmatprep.subr.bf16.mxu1 %v6686_v34  ;;  %2705 = vmatprep.subr.bf16.mxu0 %v8398_v39 }
 0x167   : > { %v967_v45 = vmax.f32 %v860_v48, 0.0 }
 0x168   : > { %v1012_v58 = vpack.c.bf16 %v966_v27, %v964_v49 }
 0x169   : > { %v863_v11 = vpop.f32.mrb[36].mxu0  ;;  %v1013_v47 = vpack.c.bf16 %v967_v45, %v965_v30  ;;  %2417 = vmatpush1.bf16.msra.mxu1 %v6685_v6  ;;  %2706 = vmatpush1.bf16.msra.mxu0 %v8403_v40 }
 0x16a   : > { %v864_v56 = vadd.f32 %v863_v11, %v8445_v13  ;;  %v865_v12 = vpop.f32.mrb[37].mxu0  ;;  %2868 = vmatprep.subr.bf16.mxu1 %v8108_v4 }
 0x16b   : > { %v866_v36 = vadd.f32 %v865_v12, %v8448_v14  ;;  %v867_v53 = vpop.f32.mrb[38].mxu0  ;;  %1460 = vmatprep.mubr.bf16.mxu1 %v1013_v47  ;;  %1653 = vmatprep.mubr.bf16.mxu0 %v1013_v47 }
 0x16c   : > { %v868_v39 = vadd.f32 %v867_v53, %v8445_v13  ;;  %v869_v50 = vpop.f32.mrb[39].mxu0  ;;  %1461 = vmatmul.mubr.bf16.gmra.mrb[32].mxu1 %v1012_v58  ;;  %1654 = vmatmul.mubr.bf16.gmra.mrb[96].mxu0 %v1012_v58  ;;  %v968_v1 = vmax.f32 %v864_v56, 0.0 }
 0x16d   : > { %v870_v54 = vadd.f32 %v869_v50, %v8448_v14  ;;  %v969_v40 = vmax.f32 %v866_v36, 0.0 }
 0x16e   : > { %v970_v15 = vmax.f32 %v868_v39, 0.0 }
 0x16f   : > { %v971_v0 = vmax.f32 %v870_v54, 0.0 }
 0x170   : > { %v1014_v3 = vpack.c.bf16 %v970_v15, %v968_v1 }
 0x171   : > { %v873_v31 = vpop.f32.mrb[40].mxu0  ;;  %v1015_v17 = vpack.c.bf16 %v971_v0, %v969_v40 }
 0x172   : > { %v874_v4 = vadd.f32 %v873_v31, %v8445_v13  ;;  %v875_v51 = vpop.f32.mrb[41].mxu0 }
 0x173   : > { %v876_v32 = vadd.f32 %v875_v51, %v8448_v14  ;;  %v877_v52 = vpop.f32.mrb[42].mxu0  ;;  %1470 = vmatprep.mubr.bf16.mxu1 %v1015_v17  ;;  %1663 = vmatprep.mubr.bf16.mxu0 %v1015_v17 }
 0x174   : > { %v878_v59 = vadd.f32 %v877_v52, %v8445_v13  ;;  %v879_v60 = vpop.f32.mrb[43].mxu0  ;;  %1471 = vmatmul.mubr.bf16.gmra.mrb[36].mxu1 %v1014_v3  ;;  %1664 = vmatmul.mubr.bf16.gmra.mrb[100].mxu0 %v1014_v3  ;;  %v972_v9 = vmax.f32 %v874_v4, 0.0 }
 0x175   : > { %v880_v63 = vadd.f32 %v879_v60, %v8448_v14  ;;  %v973_v35 = vmax.f32 %v876_v32, 0.0 }
 0x176   : > { %v974_v55 = vmax.f32 %v878_v59, 0.0 }
 0x177   : > { %v975_v5 = vmax.f32 %v880_v63, 0.0 }
 0x178   : > { %v1016_v57 = vpack.c.bf16 %v974_v55, %v972_v9 }
 0x179   : > { %v883_v16 = vpop.f32.mrb[44].mxu0  ;;  %v1017_v37 = vpack.c.bf16 %v975_v5, %v973_v35 }
 0x17a   : > { %v884_v18 = vadd.f32 %v883_v16, %v8445_v13  ;;  %v885_v7 = vpop.f32.mrb[45].mxu0 }
 0x17b   : > { %v886_v19 = vadd.f32 %v885_v7, %v8448_v14  ;;  %v887_v20 = vpop.f32.mrb[46].mxu0  ;;  %1480 = vmatprep.mubr.bf16.mxu1 %v1017_v37  ;;  %1673 = vmatprep.mubr.bf16.mxu0 %v1017_v37 }
 0x17c   : > { %v888_v23 = vadd.f32 %v887_v20, %v8445_v13  ;;  %v889_v21 = vpop.f32.mrb[47].mxu0  ;;  %1481 = vmatmul.mubr.bf16.gmra.mrb[40].mxu1 %v1016_v57  ;;  %1674 = vmatmul.mubr.bf16.gmra.mrb[104].mxu0 %v1016_v57  ;;  %v976_v22 = vmax.f32 %v884_v18, 0.0 }
 0x17d   : > { %v890_v24 = vadd.f32 %v889_v21, %v8448_v14  ;;  %v977_v61 = vmax.f32 %v886_v19, 0.0 }
 0x17e   : > { %v978_v26 = vmax.f32 %v888_v23, 0.0 }
 0x17f   : > { %v979_v29 = vmax.f32 %v890_v24, 0.0 }
 0x180   : > { %v1018_v62 = vpack.c.bf16 %v978_v26, %v976_v22 }
 0x181   : > { %v893_v34 = vpop.f32.mrb[48].mxu0  ;;  %v1019_v41 = vpack.c.bf16 %v979_v29, %v977_v61 }
 0x182   : > { %v894_v46 = vadd.f32 %v893_v34, %v8445_v13  ;;  %v895_v42 = vpop.f32.mrb[49].mxu0 }
 0x183   : > { %v896_v25 = vadd.f32 %v895_v42, %v8448_v14  ;;  %v897_v48 = vpop.f32.mrb[50].mxu0  ;;  %1490 = vmatprep.mubr.bf16.mxu1 %v1019_v41  ;;  %1683 = vmatprep.mubr.bf16.mxu0 %v1019_v41  ;;  %v7589_v42 = vld [vmem:[%s8014_s28 + $0x4] ss:$8 sps:$4 sm:$0xff]  }
 0x184   : > { %v898_v6 = vadd.f32 %v897_v48, %v8445_v13  ;;  %v899_v49 = vpop.f32.mrb[51].mxu0  ;;  %1491 = vmatmul.mubr.bf16.gmra.mrb[44].mxu1 %v1018_v62  ;;  %1684 = vmatmul.mubr.bf16.gmra.mrb[108].mxu0 %v1018_v62  ;;  %v980_v30 = vmax.f32 %v894_v46, 0.0  ;;  %v7593_v48 = vld [vmem:[%s10648_s3 + $0x2c] ss:$16 sps:$4 sm:$0xff]  }
 0x185   : > { %v900_v27 = vadd.f32 %v899_v49, %v8448_v14  ;;  %v981_v58 = vmax.f32 %v896_v25, 0.0  ;;  %v7591_v25 = vld [vmem:[%s8014_s28 + $0x14] ss:$8 sps:$4 sm:$0xff]  }
 0x186   : > { %v982_v45 = vmax.f32 %v898_v6, 0.0  ;;  %v7594_v6 = vld [vmem:[%s10648_s3 + $0x28] ss:$16 sps:$4 sm:$0xff]   ;;  %v7595_v49 = vld [vmem:[%s10648_s3 + $0x4c] ss:$16 sps:$4 sm:$0xff]  }
 0x187   : > { %v983_v11 = vmax.f32 %v900_v27, 0.0  ;;  %v7596_v27 = vld [vmem:[%s8014_s28 + $0x10] ss:$8 sps:$4 sm:$0xff]  }
 0x188   : > { %v1020_v47 = vpack.c.bf16 %v982_v45, %v980_v30  ;;  %v7597_v30 = vld [vmem:[%s8014_s28 + $0x24] ss:$8 sps:$4 sm:$0xff]   ;;  %v7598_v45 = vld [vmem:[%s10648_s3 + $0x48] ss:$16 sps:$4 sm:$0xff]  }
 0x189   : > { %v903_v56 = vpop.f32.mrb[52].mxu0  ;;  %v1021_v12 = vpack.c.bf16 %v983_v11, %v981_v58  ;;  %v7599_v58 = vld [vmem:[%s10648_s3 + $0x6c] ss:$16 sps:$4 sm:$0xff]   ;;  %v7600_v11 = vld [vmem:[%s10648_s3 + $0x68] ss:$16 sps:$4 sm:$0xff]  }
 0x18a   : > { %v904_v36 = vadd.f32 %v903_v56, %v8445_v13  ;;  %v905_v53 = vpop.f32.mrb[53].mxu0  ;;  %v7602_v56 = vld [vmem:[%s8014_s28 + $0x20] ss:$8 sps:$4 sm:$0xff]  }
 0x18b   : > { %v906_v39 = vadd.f32 %v905_v53, %v8448_v14  ;;  %v907_v50 = vpop.f32.mrb[54].mxu0  ;;  %1500 = vmatprep.mubr.bf16.mxu1 %v1021_v12  ;;  %1693 = vmatprep.mubr.bf16.mxu0 %v1021_v12  ;;  %v7603_v12 = vld [vmem:[%s8014_s28 + $0x34] ss:$8 sps:$4 sm:$0xff]  }
 0x18c   : > { %v908_v54 = vadd.f32 %v907_v50, %v8445_v13  ;;  %v909_v1 = vpop.f32.mrb[55].mxu0  ;;  %1501 = vmatmul.mubr.bf16.gmra.mrb[48].mxu1 %v1020_v47  ;;  %1694 = vmatmul.mubr.bf16.gmra.mrb[112].mxu0 %v1020_v47  ;;  %v984_v40 = vmax.f32 %v904_v36, 0.0  ;;  %v7601_v47 = vld [vmem:[%s10648_s3 + $0x8c] ss:$16 sps:$4 sm:$0xff]   ;;  %v7604_v36 = vld [vmem:[%s10648_s3 + $0x88] ss:$16 sps:$4 sm:$0xff]  }
 0x18d   : > { %v910_v15 = vadd.f32 %v909_v1, %v8448_v14  ;;  %v985_v3 = vmax.f32 %v906_v39, 0.0  ;;  %v7605_v53 = vld [vmem:[%s10648_s3 + $0xac] ss:$16 sps:$4 sm:$0xff]   ;;  %v7606_v39 = vld [vmem:[%s10648_s3 + $0xa8] ss:$16 sps:$4 sm:$0xff]  }
 0x18e   : > { %v986_v0 = vmax.f32 %v908_v54, 0.0  ;;  %v7607_v50 = vld [vmem:[%s10648_s3 + $0xcc] ss:$16 sps:$4 sm:$0xff]   ;;  %v7608_v54 = vld [vmem:[%s8014_s28 + $0x30] ss:$8 sps:$4 sm:$0xff]  }
 0x18f   : > { %v987_v31 = vmax.f32 %v910_v15, 0.0  ;;  %v7609_v1 = vld [vmem:[%s8014_s28 + $0x44] ss:$8 sps:$4 sm:$0xff]   ;;  %v7610_v15 = vld [vmem:[%s10648_s3 + $0xc8] ss:$16 sps:$4 sm:$0xff]  }
 0x190   : > { %v1022_v17 = vpack.c.bf16 %v986_v0, %v984_v40  ;;  %v7611_v40 = vld [vmem:[%s10648_s3 + $0xec] ss:$16 sps:$4 sm:$0xff]   ;;  %v7612_v0 = vld [vmem:[%s10648_s3 + $0xe8] ss:$16 sps:$4 sm:$0xff]  }
 0x191   : > { %v913_v4 = vpop.f32.mrb[56].mxu0  ;;  %v1023_v51 = vpack.c.bf16 %v987_v31, %v985_v3  ;;  %v7613_v3 = vld [vmem:[%s10648_s3 + $0x10c] ss:$16 sps:$4 sm:$0xff]   ;;  %v7614_v31 = vld [vmem:[%s8014_s28 + $0x40] ss:$8 sps:$4 sm:$0xff]  }
 0x192   : > { %v914_v32 = vadd.f32 %v913_v4, %v8445_v13  ;;  %v915_v52 = vpop.f32.mrb[57].mxu0  ;;  %v7616_v4 = vld [vmem:[%s10648_s3 + $0x108] ss:$16 sps:$4 sm:$0xff]  }
 0x193   : > { %v916_v59 = vadd.f32 %v915_v52, %v8448_v14  ;;  %v917_v60 = vpop.f32.mrb[58].mxu0  ;;  %1510 = vmatprep.mubr.bf16.mxu1 %v1023_v51  ;;  %1703 = vmatprep.mubr.bf16.mxu0 %v1023_v51  ;;  %v7617_v51 = vld [vmem:[%s10648_s3 + $0x12c] ss:$16 sps:$4 sm:$0xff]  }
 0x194   : > { %v918_v63 = vadd.f32 %v917_v60, %v8445_v13  ;;  %v919_v9 = vpop.f32.mrb[59].mxu0  ;;  %1511 = vmatmul.mubr.bf16.gmra.mrb[52].mxu1 %v1022_v17  ;;  %1704 = vmatmul.mubr.bf16.gmra.mrb[116].mxu0 %v1022_v17  ;;  %v988_v35 = vmax.f32 %v914_v32, 0.0  ;;  %v7615_v17 = vld [vmem:[%s8014_s28 + $0x54] ss:$8 sps:$4 sm:$0xff]   ;;  %v7618_v32 = vld [vmem:[%s10648_s3 + $0x128] ss:$16 sps:$4 sm:$0xff]  }
 0x195   : > { %v920_v55 = vadd.f32 %v919_v9, %v8448_v14  ;;  %v989_v57 = vmax.f32 %v916_v59, 0.0  ;;  %v7619_v52 = vld [vmem:[%s10648_s3 + $0x14c] ss:$16 sps:$4 sm:$0xff]   ;;  %v7620_v59 = vld [vmem:[%s8014_s28 + $0x50] ss:$8 sps:$4 sm:$0xff]  }
 0x196   : > { %v990_v5 = vmax.f32 %v918_v63, 0.0  ;;  %v7621_v60 = vld [vmem:[%s8014_s28 + $0x64] ss:$8 sps:$4 sm:$0xff]   ;;  %v7622_v63 = vld [vmem:[%s10648_s3 + $0x148] ss:$16 sps:$4 sm:$0xff]  }
 0x197   : > { %v991_v16 = vmax.f32 %v920_v55, 0.0  ;;  %v7623_v9 = vld [vmem:[%s10648_s3 + $0x16c] ss:$16 sps:$4 sm:$0xff]   ;;  %v7624_v55 = vld [vmem:[%s10648_s3 + $0x168] ss:$16 sps:$4 sm:$0xff]  }
 0x198   : > { %v1024_v37 = vpack.c.bf16 %v990_v5, %v988_v35  ;;  %v7625_v35 = vld [vmem:[%s10648_s3 + $0x18c] ss:$16 sps:$4 sm:$0xff]   ;;  %v7626_v5 = vld [vmem:[%s8014_s28 + $0x60] ss:$8 sps:$4 sm:$0xff]  }
 0x199   : > { %v923_v18 = vpop.f32.mrb[60].mxu0  ;;  %v1025_v7 = vpack.c.bf16 %v991_v16, %v989_v57  ;;  %v7627_v57 = vld [vmem:[%s8014_s28 + $0x74] ss:$8 sps:$4 sm:$0xff]   ;;  %v7628_v16 = vld [vmem:[%s10648_s3 + $0x188] ss:$16 sps:$4 sm:$0xff]  }
 0x19a   : > { %v924_v19 = vadd.f32 %v923_v18, %v8445_v13  ;;  %v925_v20 = vpop.f32.mrb[61].mxu0  ;;  %v7630_v18 = vld [vmem:[%s8014_s28 + $0x70] ss:$8 sps:$4 sm:$0xff]  }
 0x19b   : > { %v926_v23 = vadd.f32 %v925_v20, %v8448_v14  ;;  %v927_v21 = vpop.f32.mrb[62].mxu0  ;;  %1520 = vmatprep.mubr.bf16.mxu1 %v1025_v7  ;;  %1713 = vmatprep.mubr.bf16.mxu0 %v1025_v7  ;;  %v7631_v7 = vld [vmem:[%s8014_s28 + $0x84] ss:$8 sps:$4 sm:$0xff]   ;;  %v7635_v20 = vld [vmem:[%s8014_s28 + $0x90] ss:$8 sps:$4 sm:$0xff]  }
 0x19c   : > { %v928_v24 = vadd.f32 %v927_v21, %v8445_v13  ;;  %v929_v22 = vpop.f32.mrb[63].mxu0  ;;  %1521 = vmatmul.mubr.bf16.gmra.mrb[56].mxu1 %v1024_v37  ;;  %1714 = vmatmul.mubr.bf16.gmra.mrb[120].mxu0 %v1024_v37  ;;  %v992_v61 = vmax.f32 %v924_v19, 0.0  ;;  %v7590_v13 = vld [vmem:[%s8014_s28] ss:$8 sps:$4 sm:$0xff]   ;;  %v7629_v37 = vld [vmem:[%s10648_s3 + $0x1ac] ss:$16 sps:$4 sm:$0xff]  }
 0x19d   : > { %v930_v26 = vadd.f32 %v929_v22, %v8448_v14  ;;  %v993_v62 = vmax.f32 %v926_v23, 0.0  ;;  %v7592_v14 = vld [vmem:[%s10648_s3 + $0x8] ss:$16 sps:$4 sm:$0xff]   ;;  %v7632_v19 = vld [vmem:[%s10648_s3 + $0x4] ss:$16 sps:$4 sm:$0xff]  }
 0x19e   : > { %v994_v29 = vmax.f32 %v928_v24, 0.0  ;;  %v7636_v23 = vld [vmem:[%s8014_s28 + $0xa4] ss:$8 sps:$4 sm:$0xff]   ;;  %v7637_v21 = vld [vmem:[%s8014_s28 + $0xa0] ss:$8 sps:$4 sm:$0xff]  }
 0x19f   : > { %v995_v34 = vmax.f32 %v930_v26, 0.0 }
 0x1a0   : > { %v1026_v41 = vpack.c.bf16 %v994_v29, %v992_v61  ;;  %v7638_v29 = vld [vmem:[%s8014_s28 + $0xb4] ss:$8 sps:$4 sm:$0xff]  }
 0x1a1   : > { %v1027_v46 = vpack.c.bf16 %v995_v34, %v993_v62 }
 0x1a3   : > { %1530 = vmatprep.mubr.bf16.mxu1 %v1027_v46  ;;  %1723 = vmatprep.mubr.bf16.mxu0 %v1027_v46 }
 0x1a4   : > { %1531 = vmatmul.mubr.bf16.gmra.mrb[60].mxu1 %v1026_v41  ;;  %1724 = vmatmul.mubr.bf16.gmra.mrb[124].mxu0 %v1026_v41 }
 0x1a5   : > { %2418 = vmatprep.mubr.bf16.mxu1 %v7589_v42 }
 0x1ac   : > { %2419 = vmatmul.mubr.bf16.vlgmr.msra.gmra.mrb[64].mxu1 %v7590_v13 }
 0x1ad   : > { %2428 = vmatprep.mubr.bf16.mxu1 %v7591_v25  ;;  %2869 = vmatpush1.bf16.msra.mxu1 %v7592_v14 }
 0x1ae   : > { %2870 = vmatprep.subr.bf16.mxu1 %v7593_v48 }
 0x1b1   : > { %2871 = vmatpush1.bf16.msra.mxu1 %v7594_v6 }
 0x1b2   : > { %2872 = vmatprep.subr.bf16.mxu1 %v7595_v49 }
 0x1b4   : > { %2429 = vmatmul.mubr.bf16.gmra.mrb[68].mxu1 %v7596_v27 }
 0x1b5   : > { %2438 = vmatprep.mubr.bf16.mxu1 %v7597_v30  ;;  %2873 = vmatpush1.bf16.msra.mxu1 %v7598_v45 }
 0x1b6   : > { %2874 = vmatprep.subr.bf16.mxu1 %v7599_v58 }
 0x1b9   : > { %2875 = vmatpush1.bf16.msra.mxu1 %v7600_v11 }
 0x1ba   : > { %2876 = vmatprep.subr.bf16.mxu1 %v7601_v47 }
 0x1bc   : > { %2439 = vmatmul.mubr.bf16.gmra.mrb[72].mxu1 %v7602_v56  ;;  %v7639_v56 = vld [vmem:[%s8014_s28 + $0xb0] ss:$8 sps:$4 sm:$0xff]  }
 0x1bd   : > { %2448 = vmatprep.mubr.bf16.mxu1 %v7603_v12  ;;  %2877 = vmatpush1.bf16.msra.mxu1 %v7604_v36 }
 0x1be   : > { %2878 = vmatprep.subr.bf16.mxu1 %v7605_v53  ;;  %v7640_v53 = vld [vmem:[%s8014_s28 + $0xc4] ss:$8 sps:$4 sm:$0xff]  }
 0x1c1   : > { %2879 = vmatpush1.bf16.msra.mxu1 %v7606_v39 }
 0x1c2   : > { %2880 = vmatprep.subr.bf16.mxu1 %v7607_v50 }
 0x1c4   : > { %2449 = vmatmul.mubr.bf16.gmra.mrb[76].mxu1 %v7608_v54 }
 0x1c5   : > { %2458 = vmatprep.mubr.bf16.mxu1 %v7609_v1  ;;  %2881 = vmatpush1.bf16.msra.mxu1 %v7610_v15 }
 0x1c6   : > { %2882 = vmatprep.subr.bf16.mxu1 %v7611_v40 }
 0x1c9   : > { %2883 = vmatpush1.bf16.msra.mxu1 %v7612_v0 }
 0x1ca   : > { %2884 = vmatprep.subr.bf16.mxu1 %v7613_v3 }
 0x1cc   : > { %2459 = vmatmul.mubr.bf16.gmra.mrb[80].mxu1 %v7614_v31 }
 0x1cd   : > { %2468 = vmatprep.mubr.bf16.mxu1 %v7615_v17  ;;  %2885 = vmatpush1.bf16.msra.mxu1 %v7616_v4 }
 0x1ce   : > { %2886 = vmatprep.subr.bf16.mxu1 %v7617_v51 }
 0x1d1   : > { %2887 = vmatpush1.bf16.msra.mxu1 %v7618_v32 }
 0x1d2   : > { %2888 = vmatprep.subr.bf16.mxu1 %v7619_v52 }
 0x1d4   : > { %2469 = vmatmul.mubr.bf16.gmra.mrb[84].mxu1 %v7620_v59 }
 0x1d5   : > { %2478 = vmatprep.mubr.bf16.mxu1 %v7621_v60  ;;  %2889 = vmatpush1.bf16.msra.mxu1 %v7622_v63 }
 0x1d6   : > { %2890 = vmatprep.subr.bf16.mxu1 %v7623_v9 }
 0x1d9   : > { %2891 = vmatpush1.bf16.msra.mxu1 %v7624_v55  ;;  %v7641_v55 = vld [vmem:[%s8014_s28 + $0xc0] ss:$8 sps:$4 sm:$0xff]  }
 0x1da   : > { %2892 = vmatprep.subr.bf16.mxu1 %v7625_v35  ;;  %v8789_v35 = vld [vmem:[%s10646_s1 + $0x10] sm:$0xff] }
 0x1dc   : > { %2479 = vmatmul.mubr.bf16.gmra.mrb[88].mxu1 %v7626_v5  ;;  %v8794_v5 = vld [vmem:[%s10646_s1 + $0x30] sm:$0xff] }
 0x1dd   : > { %2488 = vmatprep.mubr.bf16.mxu1 %v7627_v57  ;;  %2893 = vmatpush1.bf16.msra.mxu1 %v7628_v16 }
 0x1de   : > { %2894 = vmatprep.subr.bf16.mxu1 %v7629_v37  ;;  %v7642_v37 = vld [vmem:[%s8014_s28 + $0xd4] ss:$8 sps:$4 sm:$0xff]  }
 0x1e1   : > { %2895 = vmatpush1.bf16.msra.mxu1 %v8366_v28  ;;  %v7633_v28 = vld [vmem:[%s8014_s28 + $0x80] ss:$8 sps:$4 sm:$0xff]  }
 0x1e2   : > { %2896 = vmatprep.subr.bf16.mxu1 %v8378_v33  ;;  %v7634_v33 = vld [vmem:[%s8014_s28 + $0x94] ss:$8 sps:$4 sm:$0xff]  }
 0x1e4   : > { %2489 = vmatmul.mubr.bf16.gmra.mrb[92].mxu1 %v7630_v18  ;;  %v6751_v18 = vcombine.low %v8789_v35, %v8794_v5 }
 0x1e5   : > { %2498 = vmatprep.mubr.bf16.mxu1 %v7631_v7  ;;  %2897 = vmatpush1.bf16.msra.mxu1 %v8389_v38  ;;  %v365_v38 = vsub.s32 2, %v8433_v2  ;;  %v6752_v7 = vcombine.high %v8789_v35, %v8794_v5  ;;  %v3515_v35 = vld [vmem:[%s10646_s1 + $0xd0] sm:$0xff] }
 0x1e6   : > { %2898 = vmatprep.subr.bf16.mxu1 %v8408_v43  ;;  %v353_v43 = vld [vmem:[%s10649_s4] sm:$0xf]  ;;  %v3516_v5 = vld [vmem:[%s10646_s1 + $0xf0] sm:$0xff] }
 0x1e7   : > { %v8750_v24 = vrot.slane %v353_v43, %v8436_v8  ;;  %v8752_v22 = vrot.slane %v353_v43, %v365_v38  ;;  %v8756_v26 = vrot.slane %v353_v43, %v8442_v10  ;;  %3713 = vmatprep.subr.bf16.mxu0 %v6752_v7 }
 0x1e9   : > { %2899 = vmatpush1.bf16.msra.mxu1 %v8413_v44  ;;  %v369_v44 = vsub.s32 3, %v8433_v2 }
 0x1ea   : > { %4002 = vmatprep.subr.bf16.mxu1 %v7632_v19 }
 0x1eb   : > { %v8758_v61 = vrot.slane %v353_v43, %v369_v44 }
 0x1ec   : > { %2499 = vmatmul.mubr.bf16.gmra.mrb[96].mxu1 %v7633_v28 }
 0x1ed   : > { %2508 = vmatprep.mubr.bf16.mxu1 %v7634_v33 }
 0x1f4   : > { %2509 = vmatmul.mubr.bf16.gmra.mrb[100].mxu1 %v7635_v20 }
 0x1f5   : > { %2518 = vmatprep.mubr.bf16.mxu1 %v7636_v23 }
 0x1fc   : > { %2519 = vmatmul.mubr.bf16.gmra.mrb[104].mxu1 %v7637_v21 }
 0x1fd   : > { %2528 = vmatprep.mubr.bf16.mxu1 %v7638_v29 }
 0x1ff   : > { %v1382_v62 = vpop.f32.mrb[0].mxu1  ;;  %v1575_v34 = vpop.f32.mrb[64].mxu0 }
 0x200   : > { %v1383_v2 = vadd.f32 %v1382_v62, %v8750_v24  ;;  %v1576_v41 = vadd.f32 %v1575_v34, %v8752_v22  ;;  %v1384_v46 = vpop.f32.mrb[1].mxu1  ;;  %v1577_v42 = vpop.f32.mrb[65].mxu0 }
 0x201   : > { %v1385_v13 = vadd.f32 %v1384_v46, %v8756_v26  ;;  %v1578_v25 = vadd.f32 %v1577_v42, %v8758_v61  ;;  %v1386_v14 = vpop.f32.mrb[2].mxu1  ;;  %v1579_v48 = vpop.f32.mrb[66].mxu0 }
 0x202   : > { %v1387_v6 = vadd.f32 %v1386_v14, %v8750_v24  ;;  %v1580_v49 = vadd.f32 %v1579_v48, %v8752_v22  ;;  %v1388_v27 = vpop.f32.mrb[3].mxu1  ;;  %v1581_v30 = vpop.f32.mrb[67].mxu0  ;;  %v7643_v14 = vld [vmem:[%s8014_s28 + $0xd0] ss:$8 sps:$4 sm:$0xff]  }
 0x203   : > { %v7094_v45 = vpack.c.bf16 %v1385_v13, %v1383_v2  ;;  %v7095_v58 = vpack.c.bf16 %v1578_v25, %v1576_v41  ;;  %v1389_v11 = vadd.f32 %v1388_v27, %v8756_v26  ;;  %v1582_v47 = vadd.f32 %v1581_v30, %v8758_v61 }
 0x204   : > { %2529 = vmatmul.mubr.bf16.gmra.mrb[108].mxu1 %v7639_v56 }
 0x205   : > { %2118 = vst [vmem:[%s8770_s18] sm:$0xff] %v7094_v45  ;;  %2119 = vst [vmem:[%s8770_s18 + $0x8] sm:$0xff] %v7095_v58  ;;  %v7096_v12 = vpack.c.bf16 %v1389_v11, %v1387_v6  ;;  %v7097_v36 = vpack.c.bf16 %v1582_v47, %v1580_v49  ;;  %2538 = vmatprep.mubr.bf16.mxu1 %v7640_v53  ;;  %v7644_v49 = vld [vmem:[%s8014_s28 + $0xe4] ss:$8 sps:$4 sm:$0xff]  }
 0x207   : > { %2120 = vst [vmem:[%s8770_s18 + $0x20] sm:$0x77] %v7096_v12  ;;  %2121 = vst [vmem:[%s8770_s18 + $0x28] sm:$0x77] %v7097_v36  ;;  %v1392_v39 = vpop.f32.mrb[4].mxu1  ;;  %v1585_v50 = vpop.f32.mrb[68].mxu0 }
 0x208   : > { %v1393_v54 = vadd.f32 %v1392_v39, %v8750_v24  ;;  %v1586_v1 = vadd.f32 %v1585_v50, %v8752_v22  ;;  %v1394_v15 = vpop.f32.mrb[5].mxu1  ;;  %v1587_v40 = vpop.f32.mrb[69].mxu0 }
 0x209   : > { %v1395_v0 = vadd.f32 %v1394_v15, %v8756_v26  ;;  %v1588_v3 = vadd.f32 %v1587_v40, %v8758_v61  ;;  %v1396_v31 = vpop.f32.mrb[6].mxu1  ;;  %v1589_v17 = vpop.f32.mrb[70].mxu0 }
 0x20a   : > { %v1397_v4 = vadd.f32 %v1396_v31, %v8750_v24  ;;  %v1590_v51 = vadd.f32 %v1589_v17, %v8752_v22  ;;  %v1398_v32 = vpop.f32.mrb[7].mxu1  ;;  %v1591_v52 = vpop.f32.mrb[71].mxu0  ;;  %v7645_v31 = vld [vmem:[%s8014_s28 + $0xe0] ss:$8 sps:$4 sm:$0xff]  }
 0x20b   : > { %v7098_v59 = vpack.c.bf16 %v1395_v0, %v1393_v54  ;;  %v7099_v60 = vpack.c.bf16 %v1588_v3, %v1586_v1  ;;  %v1399_v63 = vadd.f32 %v1398_v32, %v8756_v26  ;;  %v1592_v9 = vadd.f32 %v1591_v52, %v8758_v61 }
 0x20c   : > { %2539 = vmatmul.mubr.bf16.gmra.mrb[112].mxu1 %v7641_v55 }
 0x20d   : > { %2122 = vst [vmem:[%s8770_s18 + $0x80] sm:$0xff] %v7098_v59  ;;  %2123 = vst [vmem:[%s8770_s18 + $0x88] sm:$0xff] %v7099_v60  ;;  %v7100_v57 = vpack.c.bf16 %v1399_v63, %v1397_v4  ;;  %v7101_v16 = vpack.c.bf16 %v1592_v9, %v1590_v51  ;;  %2548 = vmatprep.mubr.bf16.mxu1 %v7642_v37  ;;  %v7646_v51 = vld [vmem:[%s8014_s28 + $0xf4] ss:$8 sps:$4 sm:$0xff]  }
 0x20f   : > { %2124 = vst [vmem:[%s8770_s18 + $0xa0] sm:$0x77] %v7100_v57  ;;  %2125 = vst [vmem:[%s8770_s18 + $0xa8] sm:$0x77] %v7101_v16  ;;  %v1402_v19 = vpop.f32.mrb[8].mxu1  ;;  %v1595_v28 = vpop.f32.mrb[72].mxu0 }
 0x210   : > { %v1403_v33 = vadd.f32 %v1402_v19, %v8750_v24  ;;  %v1596_v20 = vadd.f32 %v1595_v28, %v8752_v22  ;;  %v1404_v23 = vpop.f32.mrb[9].mxu1  ;;  %v1597_v38 = vpop.f32.mrb[73].mxu0 }
 0x211   : > { %v1405_v43 = vadd.f32 %v1404_v23, %v8756_v26  ;;  %v1598_v44 = vadd.f32 %v1597_v38, %v8758_v61  ;;  %v1406_v21 = vpop.f32.mrb[10].mxu1  ;;  %v1599_v29 = vpop.f32.mrb[74].mxu0 }
 0x212   : > { %v1407_v62 = vadd.f32 %v1406_v21, %v8750_v24  ;;  %v1600_v34 = vadd.f32 %v1599_v29, %v8752_v22  ;;  %v1408_v2 = vpop.f32.mrb[11].mxu1  ;;  %v1601_v41 = vpop.f32.mrb[75].mxu0 }
 0x213   : > { %v7102_v46 = vpack.c.bf16 %v1405_v43, %v1403_v33  ;;  %v7103_v42 = vpack.c.bf16 %v1598_v44, %v1596_v20  ;;  %v1409_v13 = vadd.f32 %v1408_v2, %v8756_v26  ;;  %v1602_v25 = vadd.f32 %v1601_v41, %v8758_v61  ;;  %v7647_v44 = vld [vmem:[%s8014_s28 + $0xf0] ss:$8 sps:$4 sm:$0xff]  }
 0x214   : > { %2549 = vmatmul.mubr.bf16.gmra.mrb[116].mxu1 %v7643_v14 }
 0x215   : > { %2126 = vst [vmem:[%s8770_s18 + $0x100] sm:$0xff] %v7102_v46  ;;  %2127 = vst [vmem:[%s8770_s18 + $0x108] sm:$0xff] %v7103_v42  ;;  %v7104_v48 = vpack.c.bf16 %v1409_v13, %v1407_v62  ;;  %v7105_v6 = vpack.c.bf16 %v1602_v25, %v1600_v34  ;;  %2558 = vmatprep.mubr.bf16.mxu1 %v7644_v49 }
 0x217   : > { %2128 = vst [vmem:[%s8770_s18 + $0x120] sm:$0x77] %v7104_v48  ;;  %2129 = vst [vmem:[%s8770_s18 + $0x128] sm:$0x77] %v7105_v6  ;;  %v1412_v27 = vpop.f32.mrb[12].mxu1  ;;  %v1605_v30 = vpop.f32.mrb[76].mxu0 }
 0x218   : > { %v1413_v45 = vadd.f32 %v1412_v27, %v8750_v24  ;;  %v1606_v58 = vadd.f32 %v1605_v30, %v8752_v22  ;;  %v1414_v11 = vpop.f32.mrb[13].mxu1  ;;  %v1607_v47 = vpop.f32.mrb[77].mxu0 }
 0x219   : > { %v1415_v56 = vadd.f32 %v1414_v11, %v8756_v26  ;;  %v1608_v12 = vadd.f32 %v1607_v47, %v8758_v61  ;;  %v1416_v36 = vpop.f32.mrb[14].mxu1  ;;  %v1609_v53 = vpop.f32.mrb[78].mxu0 }
 0x21a   : > { %v1417_v39 = vadd.f32 %v1416_v36, %v8750_v24  ;;  %v1610_v50 = vadd.f32 %v1609_v53, %v8752_v22  ;;  %v1418_v54 = vpop.f32.mrb[15].mxu1  ;;  %v1611_v1 = vpop.f32.mrb[79].mxu0 }
 0x21b   : > { %v7106_v15 = vpack.c.bf16 %v1415_v56, %v1413_v45  ;;  %v7107_v40 = vpack.c.bf16 %v1608_v12, %v1606_v58  ;;  %v1419_v0 = vadd.f32 %v1418_v54, %v8756_v26  ;;  %v1612_v3 = vadd.f32 %v1611_v1, %v8758_v61 }
 0x21c   : > { %2559 = vmatmul.mubr.bf16.gmra.mrb[120].mxu1 %v7645_v31 }
 0x21d   : > { %2130 = vst [vmem:[%s8770_s18 + $0x180] sm:$0xff] %v7106_v15  ;;  %2131 = vst [vmem:[%s8770_s18 + $0x188] sm:$0xff] %v7107_v40  ;;  %v7108_v17 = vpack.c.bf16 %v1419_v0, %v1417_v39  ;;  %v7109_v4 = vpack.c.bf16 %v1612_v3, %v1610_v50  ;;  %2568 = vmatprep.mubr.bf16.mxu1 %v7646_v51 }
 0x21f   : > { %2132 = vst [vmem:[%s8770_s18 + $0x1a0] sm:$0x77] %v7108_v17  ;;  %2133 = vst [vmem:[%s8770_s18 + $0x1a8] sm:$0x77] %v7109_v4  ;;  %v1422_v32 = vpop.f32.mrb[16].mxu1  ;;  %v1615_v52 = vpop.f32.mrb[80].mxu0 }
 0x220   : > { %v1423_v59 = vadd.f32 %v1422_v32, %v8750_v24  ;;  %v1616_v60 = vadd.f32 %v1615_v52, %v8752_v22  ;;  %v1424_v63 = vpop.f32.mrb[17].mxu1  ;;  %v1617_v9 = vpop.f32.mrb[81].mxu0 }
 0x221   : > { %v1425_v55 = vadd.f32 %v1424_v63, %v8756_v26  ;;  %v1618_v57 = vadd.f32 %v1617_v9, %v8758_v61  ;;  %v1426_v16 = vpop.f32.mrb[18].mxu1  ;;  %v1619_v37 = vpop.f32.mrb[82].mxu0 }
 0x222   : > { %v1427_v7 = vadd.f32 %v1426_v16, %v8750_v24  ;;  %v1620_v19 = vadd.f32 %v1619_v37, %v8752_v22  ;;  %v1428_v28 = vpop.f32.mrb[19].mxu1  ;;  %v1621_v33 = vpop.f32.mrb[83].mxu0 }
 0x223   : > { %v7110_v20 = vpack.c.bf16 %v1425_v55, %v1423_v59  ;;  %v7111_v23 = vpack.c.bf16 %v1618_v57, %v1616_v60  ;;  %v1429_v38 = vadd.f32 %v1428_v28, %v8756_v26  ;;  %v1622_v43 = vadd.f32 %v1621_v33, %v8758_v61 }
 0x224   : > { %2569 = vmatmul.mubr.bf16.gmra.mrb[124].mxu1 %v7647_v44 }
 0x225   : > { %2134 = vst [vmem:[%s8770_s18 + $0x200] sm:$0xff] %v7110_v20  ;;  %2135 = vst [vmem:[%s8770_s18 + $0x208] sm:$0xff] %v7111_v23  ;;  %v7112_v21 = vpack.c.bf16 %v1429_v38, %v1427_v7  ;;  %v7113_v29 = vpack.c.bf16 %v1622_v43, %v1620_v19 }
 0x227   : > { %2136 = vst [vmem:[%s8770_s18 + $0x220] sm:$0x77] %v7112_v21  ;;  %2137 = vst [vmem:[%s8770_s18 + $0x228] sm:$0x77] %v7113_v29  ;;  %v1432_v62 = vpop.f32.mrb[20].mxu1  ;;  %v1625_v34 = vpop.f32.mrb[84].mxu0 }
 0x228   : > { %v1433_v2 = vadd.f32 %v1432_v62, %v8750_v24  ;;  %v1626_v41 = vadd.f32 %v1625_v34, %v8752_v22  ;;  %v1434_v46 = vpop.f32.mrb[21].mxu1  ;;  %v1627_v42 = vpop.f32.mrb[85].mxu0 }
 0x229   : > { %v1435_v13 = vadd.f32 %v1434_v46, %v8756_v26  ;;  %v1628_v25 = vadd.f32 %v1627_v42, %v8758_v61  ;;  %v1436_v14 = vpop.f32.mrb[22].mxu1  ;;  %v1629_v48 = vpop.f32.mrb[86].mxu0 }
 0x22a   : > { %v1437_v6 = vadd.f32 %v1436_v14, %v8750_v24  ;;  %v1630_v49 = vadd.f32 %v1629_v48, %v8752_v22  ;;  %v1438_v27 = vpop.f32.mrb[23].mxu1  ;;  %v1631_v30 = vpop.f32.mrb[87].mxu0 }
 0x22b   : > { %v7114_v45 = vpack.c.bf16 %v1435_v13, %v1433_v2  ;;  %v7115_v58 = vpack.c.bf16 %v1628_v25, %v1626_v41  ;;  %v1439_v11 = vadd.f32 %v1438_v27, %v8756_v26  ;;  %v1632_v47 = vadd.f32 %v1631_v30, %v8758_v61 }
 0x22d   : > { %2138 = vst [vmem:[%s8770_s18 + $0x280] sm:$0xff] %v7114_v45  ;;  %2139 = vst [vmem:[%s8770_s18 + $0x288] sm:$0xff] %v7115_v58  ;;  %v7116_v56 = vpack.c.bf16 %v1439_v11, %v1437_v6  ;;  %v7117_v12 = vpack.c.bf16 %v1632_v47, %v1630_v49 }
 0x22f   : > { %2140 = vst [vmem:[%s8770_s18 + $0x2a0] sm:$0x77] %v7116_v56  ;;  %2141 = vst [vmem:[%s8770_s18 + $0x2a8] sm:$0x77] %v7117_v12  ;;  %v1442_v36 = vpop.f32.mrb[24].mxu1  ;;  %v1635_v53 = vpop.f32.mrb[88].mxu0 }
 0x230   : > { %v1443_v39 = vadd.f32 %v1442_v36, %v8750_v24  ;;  %v1636_v50 = vadd.f32 %v1635_v53, %v8752_v22  ;;  %v1444_v54 = vpop.f32.mrb[25].mxu1  ;;  %v1637_v1 = vpop.f32.mrb[89].mxu0 }
 0x231   : > { %v1445_v15 = vadd.f32 %v1444_v54, %v8756_v26  ;;  %v1638_v40 = vadd.f32 %v1637_v1, %v8758_v61  ;;  %v1446_v0 = vpop.f32.mrb[26].mxu1  ;;  %v1639_v3 = vpop.f32.mrb[90].mxu0 }
 0x232   : > { %v1447_v31 = vadd.f32 %v1446_v0, %v8750_v24  ;;  %v1640_v17 = vadd.f32 %v1639_v3, %v8752_v22  ;;  %v1448_v4 = vpop.f32.mrb[27].mxu1  ;;  %v1641_v51 = vpop.f32.mrb[91].mxu0 }
 0x233   : > { %v7118_v32 = vpack.c.bf16 %v1445_v15, %v1443_v39  ;;  %v7119_v52 = vpack.c.bf16 %v1638_v40, %v1636_v50  ;;  %v1449_v59 = vadd.f32 %v1448_v4, %v8756_v26  ;;  %v1642_v60 = vadd.f32 %v1641_v51, %v8758_v61 }
 0x235   : > { %2142 = vst [vmem:[%s8770_s18 + $0x300] sm:$0xff] %v7118_v32  ;;  %2143 = vst [vmem:[%s8770_s18 + $0x308] sm:$0xff] %v7119_v52  ;;  %v7120_v63 = vpack.c.bf16 %v1449_v59, %v1447_v31  ;;  %v7121_v9 = vpack.c.bf16 %v1642_v60, %v1640_v17 }
 0x237   : > { %2144 = vst [vmem:[%s8770_s18 + $0x320] sm:$0x77] %v7120_v63  ;;  %2145 = vst [vmem:[%s8770_s18 + $0x328] sm:$0x77] %v7121_v9  ;;  %v1452_v55 = vpop.f32.mrb[28].mxu1  ;;  %v1645_v57 = vpop.f32.mrb[92].mxu0 }
 0x238   : > { %v1453_v16 = vadd.f32 %v1452_v55, %v8750_v24  ;;  %v1646_v37 = vadd.f32 %v1645_v57, %v8752_v22  ;;  %v1454_v7 = vpop.f32.mrb[29].mxu1  ;;  %v1647_v19 = vpop.f32.mrb[93].mxu0 }
 0x239   : > { %v1455_v28 = vadd.f32 %v1454_v7, %v8756_v26  ;;  %v1648_v33 = vadd.f32 %v1647_v19, %v8758_v61  ;;  %v1456_v20 = vpop.f32.mrb[30].mxu1  ;;  %v1649_v23 = vpop.f32.mrb[94].mxu0 }
 0x23a   : > { %v1457_v38 = vadd.f32 %v1456_v20, %v8750_v24  ;;  %v1650_v43 = vadd.f32 %v1649_v23, %v8752_v22  ;;  %v1458_v44 = vpop.f32.mrb[31].mxu1  ;;  %v1651_v21 = vpop.f32.mrb[95].mxu0 }
 0x23b   : > { %v7122_v29 = vpack.c.bf16 %v1455_v28, %v1453_v16  ;;  %v7123_v62 = vpack.c.bf16 %v1648_v33, %v1646_v37  ;;  %v1459_v34 = vadd.f32 %v1458_v44, %v8756_v26  ;;  %v1652_v2 = vadd.f32 %v1651_v21, %v8758_v61 }
 0x23d   : > { %2146 = vst [vmem:[%s8770_s18 + $0x380] sm:$0xff] %v7122_v29  ;;  %2147 = vst [vmem:[%s8770_s18 + $0x388] sm:$0xff] %v7123_v62  ;;  %v7124_v41 = vpack.c.bf16 %v1459_v34, %v1457_v38  ;;  %v7125_v46 = vpack.c.bf16 %v1652_v2, %v1650_v43 }
 0x23f   : > { %2148 = vst [vmem:[%s8770_s18 + $0x3a0] sm:$0x77] %v7124_v41  ;;  %2149 = vst [vmem:[%s8770_s18 + $0x3a8] sm:$0x77] %v7125_v46  ;;  %v1462_v42 = vpop.f32.mrb[32].mxu1  ;;  %v1655_v13 = vpop.f32.mrb[96].mxu0 }
 0x240   : > { %v1463_v25 = vadd.f32 %v1462_v42, %v8750_v24  ;;  %v1656_v14 = vadd.f32 %v1655_v13, %v8752_v22  ;;  %v1464_v48 = vpop.f32.mrb[33].mxu1  ;;  %v1657_v6 = vpop.f32.mrb[97].mxu0 }
 0x241   : > { %v1465_v49 = vadd.f32 %v1464_v48, %v8756_v26  ;;  %v1658_v27 = vadd.f32 %v1657_v6, %v8758_v61  ;;  %v1466_v30 = vpop.f32.mrb[34].mxu1  ;;  %v1659_v45 = vpop.f32.mrb[98].mxu0 }
 0x242   : > { %v1467_v58 = vadd.f32 %v1466_v30, %v8750_v24  ;;  %v1660_v11 = vadd.f32 %v1659_v45, %v8752_v22  ;;  %v1468_v47 = vpop.f32.mrb[35].mxu1  ;;  %v1661_v56 = vpop.f32.mrb[99].mxu0 }
 0x243   : > { %v7126_v12 = vpack.c.bf16 %v1465_v49, %v1463_v25  ;;  %v7127_v36 = vpack.c.bf16 %v1658_v27, %v1656_v14  ;;  %v1469_v53 = vadd.f32 %v1468_v47, %v8756_v26  ;;  %v1662_v39 = vadd.f32 %v1661_v56, %v8758_v61 }
 0x245   : > { %2150 = vst [vmem:[%s8770_s18 + $0x400] sm:$0xff] %v7126_v12  ;;  %2151 = vst [vmem:[%s8770_s18 + $0x408] sm:$0xff] %v7127_v36  ;;  %v7128_v50 = vpack.c.bf16 %v1469_v53, %v1467_v58  ;;  %v7129_v54 = vpack.c.bf16 %v1662_v39, %v1660_v11 }
 0x247   : > { %2152 = vst [vmem:[%s8770_s18 + $0x420] sm:$0x77] %v7128_v50  ;;  %2153 = vst [vmem:[%s8770_s18 + $0x428] sm:$0x77] %v7129_v54  ;;  %v1472_v1 = vpop.f32.mrb[36].mxu1  ;;  %v1665_v15 = vpop.f32.mrb[100].mxu0 }
 0x248   : > { %v1473_v40 = vadd.f32 %v1472_v1, %v8750_v24  ;;  %v1666_v0 = vadd.f32 %v1665_v15, %v8752_v22  ;;  %v1474_v3 = vpop.f32.mrb[37].mxu1  ;;  %v1667_v31 = vpop.f32.mrb[101].mxu0 }
 0x249   : > { %v1475_v17 = vadd.f32 %v1474_v3, %v8756_v26  ;;  %v1668_v4 = vadd.f32 %v1667_v31, %v8758_v61  ;;  %v1476_v51 = vpop.f32.mrb[38].mxu1  ;;  %v1669_v32 = vpop.f32.mrb[102].mxu0 }
 0x24a   : > { %v1477_v52 = vadd.f32 %v1476_v51, %v8750_v24  ;;  %v1670_v59 = vadd.f32 %v1669_v32, %v8752_v22  ;;  %v1478_v60 = vpop.f32.mrb[39].mxu1  ;;  %v1671_v63 = vpop.f32.mrb[103].mxu0 }
 0x24b   : > { %v7130_v9 = vpack.c.bf16 %v1475_v17, %v1473_v40  ;;  %v7131_v55 = vpack.c.bf16 %v1668_v4, %v1666_v0  ;;  %v1479_v57 = vadd.f32 %v1478_v60, %v8756_v26  ;;  %v1672_v16 = vadd.f32 %v1671_v63, %v8758_v61 }
 0x24d   : > { %2154 = vst [vmem:[%s8770_s18 + $0x480] sm:$0xff] %v7130_v9  ;;  %2155 = vst [vmem:[%s8770_s18 + $0x488] sm:$0xff] %v7131_v55  ;;  %v7132_v37 = vpack.c.bf16 %v1479_v57, %v1477_v52  ;;  %v7133_v7 = vpack.c.bf16 %v1672_v16, %v1670_v59 }
 0x24f   : > { %2156 = vst [vmem:[%s8770_s18 + $0x4a0] sm:$0x77] %v7132_v37  ;;  %2157 = vst [vmem:[%s8770_s18 + $0x4a8] sm:$0x77] %v7133_v7  ;;  %v1482_v19 = vpop.f32.mrb[40].mxu1  ;;  %v1675_v28 = vpop.f32.mrb[104].mxu0 }
 0x250   : > { %v1483_v33 = vadd.f32 %v1482_v19, %v8750_v24  ;;  %v1676_v20 = vadd.f32 %v1675_v28, %v8752_v22  ;;  %v1484_v23 = vpop.f32.mrb[41].mxu1  ;;  %v1677_v38 = vpop.f32.mrb[105].mxu0 }
 0x251   : > { %v1485_v43 = vadd.f32 %v1484_v23, %v8756_v26  ;;  %v1678_v44 = vadd.f32 %v1677_v38, %v8758_v61  ;;  %v1486_v21 = vpop.f32.mrb[42].mxu1  ;;  %v1679_v29 = vpop.f32.mrb[106].mxu0 }
 0x252   : > { %v1487_v62 = vadd.f32 %v1486_v21, %v8750_v24  ;;  %v1680_v34 = vadd.f32 %v1679_v29, %v8752_v22  ;;  %v1488_v2 = vpop.f32.mrb[43].mxu1  ;;  %v1681_v41 = vpop.f32.mrb[107].mxu0 }
 0x253   : > { %v7134_v46 = vpack.c.bf16 %v1485_v43, %v1483_v33  ;;  %v7135_v42 = vpack.c.bf16 %v1678_v44, %v1676_v20  ;;  %v1489_v13 = vadd.f32 %v1488_v2, %v8756_v26  ;;  %v1682_v25 = vadd.f32 %v1681_v41, %v8758_v61 }
 0x255   : > { %2158 = vst [vmem:[%s8770_s18 + $0x500] sm:$0xff] %v7134_v46  ;;  %2159 = vst [vmem:[%s8770_s18 + $0x508] sm:$0xff] %v7135_v42  ;;  %v7136_v14 = vpack.c.bf16 %v1489_v13, %v1487_v62  ;;  %v7137_v48 = vpack.c.bf16 %v1682_v25, %v1680_v34 }
 0x257   : > { %2160 = vst [vmem:[%s8770_s18 + $0x520] sm:$0x77] %v7136_v14  ;;  %2161 = vst [vmem:[%s8770_s18 + $0x528] sm:$0x77] %v7137_v48  ;;  %v1492_v6 = vpop.f32.mrb[44].mxu1  ;;  %v1685_v49 = vpop.f32.mrb[108].mxu0 }
 0x258   : > { %v1493_v27 = vadd.f32 %v1492_v6, %v8750_v24  ;;  %v1686_v30 = vadd.f32 %v1685_v49, %v8752_v22  ;;  %v1494_v45 = vpop.f32.mrb[45].mxu1  ;;  %v1687_v58 = vpop.f32.mrb[109].mxu0 }
 0x259   : > { %v1495_v11 = vadd.f32 %v1494_v45, %v8756_v26  ;;  %v1688_v47 = vadd.f32 %v1687_v58, %v8758_v61  ;;  %v1496_v56 = vpop.f32.mrb[46].mxu1  ;;  %v1689_v12 = vpop.f32.mrb[110].mxu0 }
 0x25a   : > { %v1497_v36 = vadd.f32 %v1496_v56, %v8750_v24  ;;  %v1690_v53 = vadd.f32 %v1689_v12, %v8752_v22  ;;  %v1498_v39 = vpop.f32.mrb[47].mxu1  ;;  %v1691_v50 = vpop.f32.mrb[111].mxu0 }
 0x25b   : > { %v7138_v54 = vpack.c.bf16 %v1495_v11, %v1493_v27  ;;  %v7139_v1 = vpack.c.bf16 %v1688_v47, %v1686_v30  ;;  %v1499_v15 = vadd.f32 %v1498_v39, %v8756_v26  ;;  %v1692_v40 = vadd.f32 %v1691_v50, %v8758_v61 }
 0x25d   : > { %2162 = vst [vmem:[%s8770_s18 + $0x580] sm:$0xff] %v7138_v54  ;;  %2163 = vst [vmem:[%s8770_s18 + $0x588] sm:$0xff] %v7139_v1  ;;  %v7140_v0 = vpack.c.bf16 %v1499_v15, %v1497_v36  ;;  %v7141_v3 = vpack.c.bf16 %v1692_v40, %v1690_v53 }
 0x25f   : > { %2164 = vst [vmem:[%s8770_s18 + $0x5a0] sm:$0x77] %v7140_v0  ;;  %2165 = vst [vmem:[%s8770_s18 + $0x5a8] sm:$0x77] %v7141_v3  ;;  %v1502_v31 = vpop.f32.mrb[48].mxu1  ;;  %v1695_v17 = vpop.f32.mrb[112].mxu0 }
 0x260   : > { %v1503_v4 = vadd.f32 %v1502_v31, %v8750_v24  ;;  %v1696_v51 = vadd.f32 %v1695_v17, %v8752_v22  ;;  %v1504_v32 = vpop.f32.mrb[49].mxu1  ;;  %v1697_v52 = vpop.f32.mrb[113].mxu0 }
 0x261   : > { %v1505_v59 = vadd.f32 %v1504_v32, %v8756_v26  ;;  %v1698_v60 = vadd.f32 %v1697_v52, %v8758_v61  ;;  %v1506_v63 = vpop.f32.mrb[50].mxu1  ;;  %v1699_v9 = vpop.f32.mrb[114].mxu0 }
 0x262   : > { %v1507_v55 = vadd.f32 %v1506_v63, %v8750_v24  ;;  %v1700_v57 = vadd.f32 %v1699_v9, %v8752_v22  ;;  %v1508_v16 = vpop.f32.mrb[51].mxu1  ;;  %v1701_v37 = vpop.f32.mrb[115].mxu0 }
 0x263   : > { %v7142_v7 = vpack.c.bf16 %v1505_v59, %v1503_v4  ;;  %v7143_v19 = vpack.c.bf16 %v1698_v60, %v1696_v51  ;;  %v1509_v28 = vadd.f32 %v1508_v16, %v8756_v26  ;;  %v1702_v33 = vadd.f32 %v1701_v37, %v8758_v61 }
 0x265   : > { %2166 = vst [vmem:[%s8770_s18 + $0x600] sm:$0xff] %v7142_v7  ;;  %2167 = vst [vmem:[%s8770_s18 + $0x608] sm:$0xff] %v7143_v19  ;;  %v7144_v20 = vpack.c.bf16 %v1509_v28, %v1507_v55  ;;  %v7145_v23 = vpack.c.bf16 %v1702_v33, %v1700_v57  ;;  %v2214_v19 = vld [vmem:[%s10647_s2 + $0x2] sm:$0x3] }
 0x267   : > { %2168 = vst [vmem:[%s8770_s18 + $0x620] sm:$0x77] %v7144_v20  ;;  %2169 = vst [vmem:[%s8770_s18 + $0x628] sm:$0x77] %v7145_v23  ;;  %v1512_v38 = vpop.f32.mrb[52].mxu1  ;;  %v1705_v43 = vpop.f32.mrb[116].mxu0 }
 0x268   : > { %v1513_v44 = vadd.f32 %v1512_v38, %v8750_v24  ;;  %v1706_v21 = vadd.f32 %v1705_v43, %v8752_v22  ;;  %v1514_v29 = vpop.f32.mrb[53].mxu1  ;;  %v1707_v62 = vpop.f32.mrb[117].mxu0 }
 0x269   : > { %v1515_v34 = vadd.f32 %v1514_v29, %v8756_v26  ;;  %v1708_v2 = vadd.f32 %v1707_v62, %v8758_v61  ;;  %v1516_v41 = vpop.f32.mrb[54].mxu1  ;;  %v1709_v46 = vpop.f32.mrb[118].mxu0  ;;  %v8978_v29 = vrot.slane %v2214_v19, %v8436_v8 }
 0x26a   : > { %v1517_v42 = vadd.f32 %v1516_v41, %v8750_v24  ;;  %v1710_v13 = vadd.f32 %v1709_v46, %v8752_v22  ;;  %v1518_v25 = vpop.f32.mrb[55].mxu1  ;;  %v1711_v14 = vpop.f32.mrb[119].mxu0 }
 0x26b   : > { %v7146_v48 = vpack.c.bf16 %v1515_v34, %v1513_v44  ;;  %v7147_v6 = vpack.c.bf16 %v1708_v2, %v1706_v21  ;;  %v1519_v49 = vadd.f32 %v1518_v25, %v8756_v26  ;;  %v1712_v27 = vadd.f32 %v1711_v14, %v8758_v61 }
 0x26c   : > { %v8983_v2 = vrot.slane %v2214_v19, %v8442_v10  ;;  %v7651_v19 = vld [vmem:[%s10648_s3 + $0x44] ss:$16 sps:$4 sm:$0xff]  }
 0x26d   : > { %2170 = vst [vmem:[%s8770_s18 + $0x680] sm:$0xff] %v7146_v48  ;;  %2171 = vst [vmem:[%s8770_s18 + $0x688] sm:$0xff] %v7147_v6  ;;  %v7148_v30 = vpack.c.bf16 %v1519_v49, %v1517_v42  ;;  %v7149_v45 = vpack.c.bf16 %v1712_v27, %v1710_v13 }
 0x26f   : > { %2172 = vst [vmem:[%s8770_s18 + $0x6a0] sm:$0x77] %v7148_v30  ;;  %2173 = vst [vmem:[%s8770_s18 + $0x6a8] sm:$0x77] %v7149_v45  ;;  %v1522_v58 = vpop.f32.mrb[56].mxu1  ;;  %v1715_v11 = vpop.f32.mrb[120].mxu0 }
 0x270   : > { %v1523_v47 = vadd.f32 %v1522_v58, %v8750_v24  ;;  %v1716_v56 = vadd.f32 %v1715_v11, %v8752_v22  ;;  %v1524_v12 = vpop.f32.mrb[57].mxu1  ;;  %v1717_v36 = vpop.f32.mrb[121].mxu0  ;;  %v3511_v58 = vld [vmem:[%s10646_s1 + $0x50] sm:$0xff] }
 0x271   : > { %v1525_v53 = vadd.f32 %v1524_v12, %v8756_v26  ;;  %v1718_v39 = vadd.f32 %v1717_v36, %v8758_v61  ;;  %v1526_v50 = vpop.f32.mrb[58].mxu1  ;;  %v1719_v54 = vpop.f32.mrb[122].mxu0  ;;  %v3512_v11 = vld [vmem:[%s10646_s1 + $0x70] sm:$0xff] }
 0x272   : > { %v1527_v1 = vadd.f32 %v1526_v50, %v8750_v24  ;;  %v1720_v15 = vadd.f32 %v1719_v54, %v8752_v22  ;;  %v1528_v40 = vpop.f32.mrb[59].mxu1  ;;  %v1721_v0 = vpop.f32.mrb[123].mxu0 }
 0x273   : > { %v7150_v3 = vpack.c.bf16 %v1525_v53, %v1523_v47  ;;  %v7151_v31 = vpack.c.bf16 %v1718_v39, %v1716_v56  ;;  %v1529_v17 = vadd.f32 %v1528_v40, %v8756_v26  ;;  %v1722_v4 = vadd.f32 %v1721_v0, %v8758_v61 }
 0x274   : > { %v6754_v39 = vcombine.high %v3511_v58, %v3512_v11 }
 0x275   : > { %2174 = vst [vmem:[%s8770_s18 + $0x700] sm:$0xff] %v7150_v3  ;;  %2175 = vst [vmem:[%s8770_s18 + $0x708] sm:$0xff] %v7151_v31  ;;  %v7152_v51 = vpack.c.bf16 %v1529_v17, %v1527_v1  ;;  %v7153_v32 = vpack.c.bf16 %v1722_v4, %v1720_v15  ;;  %v3513_v1 = vld [vmem:[%s10646_s1 + $0x90] sm:$0xff]  ;;  %v6753_v31 = vcombine.low %v3511_v58, %v3512_v11 }
 0x276   : > { %v3514_v15 = vld [vmem:[%s10646_s1 + $0xb0] sm:$0xff] }
 0x277   : > { %2176 = vst [vmem:[%s8770_s18 + $0x720] sm:$0x77] %v7152_v51  ;;  %2177 = vst [vmem:[%s8770_s18 + $0x728] sm:$0x77] %v7153_v32  ;;  %v1532_v52 = vpop.f32.mrb[60].mxu1  ;;  %v1725_v59 = vpop.f32.mrb[124].mxu0  ;;  %v6756_v32 = vcombine.high %v3513_v1, %v3514_v15 }
 0x278   : > { %v1533_v60 = vadd.f32 %v1532_v52, %v8750_v24  ;;  %v1726_v63 = vadd.f32 %v1725_v59, %v8752_v22  ;;  %v1534_v9 = vpop.f32.mrb[61].mxu1  ;;  %v1727_v55 = vpop.f32.mrb[125].mxu0  ;;  %v7648_v17 = vld [vmem:[%s10648_s3] ss:$16 sps:$4 sm:$0xff]   ;;  %v7649_v52 = vld [vmem:[%s10648_s3 + $0x24] ss:$16 sps:$4 sm:$0xff]  }
 0x279   : > { %v1535_v57 = vadd.f32 %v1534_v9, %v8756_v26  ;;  %v1728_v16 = vadd.f32 %v1727_v55, %v8758_v61  ;;  %v1536_v37 = vpop.f32.mrb[62].mxu1  ;;  %v1729_v7 = vpop.f32.mrb[126].mxu0  ;;  %v6755_v55 = vcombine.low %v3513_v1, %v3514_v15 }
 0x27a   : > { %v1537_v28 = vadd.f32 %v1536_v37, %v8750_v24  ;;  %v1730_v33 = vadd.f32 %v1729_v7, %v8752_v22  ;;  %v1538_v20 = vpop.f32.mrb[63].mxu1  ;;  %v1731_v23 = vpop.f32.mrb[127].mxu0  ;;  %v6758_v7 = vcombine.high %v3515_v35, %v3516_v5 }
 0x27b   : > { %v7154_v38 = vpack.c.bf16 %v1535_v57, %v1533_v60  ;;  %v7155_v43 = vpack.c.bf16 %v1728_v16, %v1726_v63  ;;  %v1539_v44 = vadd.f32 %v1538_v20, %v8756_v26  ;;  %v1732_v21 = vadd.f32 %v1731_v23, %v8758_v61  ;;  %v7650_v57 = vld [vmem:[%s10648_s3 + $0x20] ss:$16 sps:$4 sm:$0xff]  }
 0x27c   : > { %v3517_v20 = vld [vmem:[%s10646_s1 + $0x110] sm:$0xff] }
 0x27d   : > { %2178 = vst [vmem:[%s8770_s18 + $0x780] sm:$0xff] %v7154_v38  ;;  %2179 = vst [vmem:[%s8770_s18 + $0x788] sm:$0xff] %v7155_v43  ;;  %v7156_v62 = vpack.c.bf16 %v1539_v44, %v1537_v28  ;;  %v7157_v34 = vpack.c.bf16 %v1732_v21, %v1730_v33  ;;  %v3518_v23 = vld [vmem:[%s10646_s1 + $0x130] sm:$0xff]  ;;  %v6757_v21 = vcombine.low %v3515_v35, %v3516_v5 }
 0x27f   : > { %2180 = vst [vmem:[%s8770_s18 + $0x7a0] sm:$0x77] %v7156_v62  ;;  %2181 = vst [vmem:[%s8770_s18 + $0x7a8] sm:$0x77] %v7157_v34  ;;  %v2420_v41 = vpop.f32.mrb[64].mxu1 }
 0x280   : > { %v2421_v46 = vadd.f32 %v2420_v41, %v8978_v29  ;;  %v2422_v42 = vpop.f32.mrb[65].mxu1  ;;  %v7652_v62 = vld [vmem:[%s10648_s3 + $0x40] ss:$16 sps:$4 sm:$0xff]  }
 0x281   : > { %v2423_v13 = vadd.f32 %v2422_v42, %v8983_v2  ;;  %v2424_v25 = vpop.f32.mrb[66].mxu1  ;;  %v7653_v42 = vld [vmem:[%s10648_s3 + $0x64] ss:$16 sps:$4 sm:$0xff]  }
 0x282   : > { %v2425_v14 = vadd.f32 %v2424_v25, %v8978_v29  ;;  %v2426_v48 = vpop.f32.mrb[67].mxu1  ;;  %v2579_v49 = vmax.f32 %v2421_v46, 0.0  ;;  %v6760_v46 = vcombine.high %v3517_v20, %v3518_v23 }
 0x283   : > { %v2427_v6 = vadd.f32 %v2426_v48, %v8983_v2  ;;  %v2580_v30 = vmax.f32 %v2423_v13, 0.0  ;;  %v3520_v48 = vld [vmem:[%s10646_s1 + $0x170] sm:$0xff] }
 0x284   : > { %v2581_v27 = vmax.f32 %v2425_v14, 0.0  ;;  %v3519_v14 = vld [vmem:[%s10646_s1 + $0x150] sm:$0xff] }
 0x285   : > { %v2582_v45 = vmax.f32 %v2427_v6, 0.0  ;;  %v6761_v15 = vcombine.low %v3519_v14, %v3520_v48 }
 0x286   : > { %v2643_v47 = vpack.c.bf16 %v2581_v27, %v2579_v49 }
 0x287   : > { %v2430_v56 = vpop.f32.mrb[68].mxu1  ;;  %v2644_v12 = vpack.c.bf16 %v2582_v45, %v2580_v30  ;;  %v6759_v30 = vcombine.low %v3517_v20, %v3518_v23  ;;  %v7654_v45 = vld [vmem:[%s10648_s3 + $0x60] ss:$16 sps:$4 sm:$0xff]  }
 0x288   : > { %v2431_v36 = vadd.f32 %v2430_v56, %v8978_v29  ;;  %v2432_v53 = vpop.f32.mrb[69].mxu1  ;;  %v7655_v56 = vld [vmem:[%s10648_s3 + $0x84] ss:$16 sps:$4 sm:$0xff]  }
 0x289   : > { %v2433_v50 = vadd.f32 %v2432_v53, %v8983_v2  ;;  %v2434_v54 = vpop.f32.mrb[70].mxu1  ;;  %2707 = vmatprep.mubr.bf16.mxu0 %v2644_v12  ;;  %2900 = vmatprep.mubr.bf16.mxu1 %v2644_v12  ;;  %v3521_v53 = vld [vmem:[%s10646_s1 + $0x190] sm:$0xff] }
 0x28a   : > { %v2435_v40 = vadd.f32 %v2434_v54, %v8978_v29  ;;  %v2436_v0 = vpop.f32.mrb[71].mxu1  ;;  %2708 = vmatmul.mubr.bf16.vlgmr.msra.gmra.mrb[128].mxu0 %v2643_v47  ;;  %2901 = vmatmul.mubr.bf16.vlgmr.msra.gmra.mrb[128].mxu1 %v2643_v47  ;;  %v2583_v4 = vmax.f32 %v2431_v36, 0.0  ;;  %v6762_v47 = vcombine.high %v3519_v14, %v3520_v48 }
 0x28b   : > { %v2437_v3 = vadd.f32 %v2436_v0, %v8983_v2  ;;  %3714 = vmatpush1.bf16.msra.mxu0 %v6751_v18  ;;  %4003 = vmatpush1.bf16.msra.mxu1 %v7648_v17  ;;  %v2584_v59 = vmax.f32 %v2433_v50, 0.0  ;;  %v7657_v17 = vld [vmem:[%s10648_s3 + $0xa4] ss:$16 sps:$4 sm:$0xff]  }
 0x28c   : > { %v2585_v51 = vmax.f32 %v2435_v40, 0.0  ;;  %3715 = vmatprep.subr.bf16.mxu0 %v6754_v39  ;;  %4004 = vmatprep.subr.bf16.mxu1 %v7649_v52  ;;  %v3522_v39 = vld [vmem:[%s10646_s1 + $0x1b0] sm:$0xff] }
 0x28d   : > { %v2586_v60 = vmax.f32 %v2437_v3, 0.0  ;;  %v7656_v40 = vld [vmem:[%s10648_s3 + $0x80] ss:$16 sps:$4 sm:$0xff]   ;;  %v6763_v5 = vcombine.low %v3521_v53, %v3522_v39 }
 0x28e   : > { %v2645_v18 = vpack.c.bf16 %v2585_v51, %v2583_v4  ;;  %v3524_v52 = vld [vmem:[%s10646_s1 + $0x1f0] sm:$0xff] }
 0x28f   : > { %v2440_v63 = vpop.f32.mrb[72].mxu1  ;;  %v2646_v9 = vpack.c.bf16 %v2586_v60, %v2584_v59  ;;  %3716 = vmatpush1.bf16.msra.mxu0 %v6753_v31  ;;  %4005 = vmatpush1.bf16.msra.mxu1 %v7650_v57  ;;  %v6764_v31 = vcombine.high %v3521_v53, %v3522_v39  ;;  %v7659_v57 = vld [vmem:[%s10648_s3 + $0xc4] ss:$16 sps:$4 sm:$0xff]  }
 0x290   : > { %v2441_v16 = vadd.f32 %v2440_v63, %v8978_v29  ;;  %v2442_v37 = vpop.f32.mrb[73].mxu1  ;;  %3717 = vmatprep.subr.bf16.mxu0 %v6756_v32  ;;  %4006 = vmatprep.subr.bf16.mxu1 %v7651_v19  ;;  %v3523_v32 = vld [vmem:[%s10646_s1 + $0x1d0] sm:$0xff] }
 0x291   : > { %v2443_v28 = vadd.f32 %v2442_v37, %v8983_v2  ;;  %v2444_v33 = vpop.f32.mrb[74].mxu1  ;;  %2717 = vmatprep.mubr.bf16.mxu0 %v2646_v9  ;;  %2910 = vmatprep.mubr.bf16.mxu1 %v2646_v9  ;;  %v3526_v19 = vld [vmem:[%s10646_s1 + $0x230] sm:$0xff]  ;;  %v6765_v23 = vcombine.low %v3523_v32, %v3524_v52 }
 0x292   : > { %v2445_v38 = vadd.f32 %v2444_v33, %v8978_v29  ;;  %v2446_v43 = vpop.f32.mrb[75].mxu1  ;;  %2718 = vmatmul.mubr.bf16.gmra.mrb[132].mxu0 %v2645_v18  ;;  %2911 = vmatmul.mubr.bf16.gmra.mrb[132].mxu1 %v2645_v18  ;;  %v2587_v34 = vmax.f32 %v2441_v16, 0.0  ;;  %v7658_v18 = vld [vmem:[%s10648_s3 + $0xa0] ss:$16 sps:$4 sm:$0xff]  }
 0x293   : > { %v2447_v44 = vadd.f32 %v2446_v43, %v8983_v2  ;;  %3718 = vmatpush1.bf16.msra.mxu0 %v6755_v55  ;;  %4007 = vmatpush1.bf16.msra.mxu1 %v7652_v62  ;;  %v2588_v13 = vmax.f32 %v2443_v28, 0.0  ;;  %v6766_v55 = vcombine.high %v3523_v32, %v3524_v52  ;;  %v7661_v62 = vld [vmem:[%s10648_s3 + $0xe4] ss:$16 sps:$4 sm:$0xff]  }
 0x294   : > { %v2589_v41 = vmax.f32 %v2445_v38, 0.0  ;;  %3719 = vmatprep.subr.bf16.mxu0 %v6758_v7  ;;  %4008 = vmatprep.subr.bf16.mxu1 %v7653_v42  ;;  %v3525_v7 = vld [vmem:[%s10646_s1 + $0x210] sm:$0xff] }
 0x295   : > { %v2590_v25 = vmax.f32 %v2447_v44, 0.0  ;;  %v7660_v38 = vld [vmem:[%s10648_s3 + $0xc0] ss:$16 sps:$4 sm:$0xff]   ;;  %v6767_v48 = vcombine.low %v3525_v7, %v3526_v19 }
 0x296   : > { %v2647_v6 = vpack.c.bf16 %v2589_v41, %v2587_v34  ;;  %v3528_v42 = vld [vmem:[%s10646_s1 + $0x270] sm:$0xff] }
 0x297   : > { %v2450_v49 = vpop.f32.mrb[76].mxu1  ;;  %v2648_v27 = vpack.c.bf16 %v2590_v25, %v2588_v13  ;;  %3720 = vmatpush1.bf16.msra.mxu0 %v6757_v21  ;;  %4009 = vmatpush1.bf16.msra.mxu1 %v7654_v45  ;;  %v6768_v21 = vcombine.high %v3525_v7, %v3526_v19  ;;  %v7663_v45 = vld [vmem:[%s10648_s3 + $0x104] ss:$16 sps:$4 sm:$0xff]  }
 0x298   : > { %v2451_v58 = vadd.f32 %v2450_v49, %v8978_v29  ;;  %v2452_v11 = vpop.f32.mrb[77].mxu1  ;;  %3721 = vmatprep.subr.bf16.mxu0 %v6760_v46  ;;  %4010 = vmatprep.subr.bf16.mxu1 %v7655_v56  ;;  %v3527_v46 = vld [vmem:[%s10646_s1 + $0x250] sm:$0xff] }
 0x299   : > { %v2453_v12 = vadd.f32 %v2452_v11, %v8983_v2  ;;  %v2454_v36 = vpop.f32.mrb[78].mxu1  ;;  %2727 = vmatprep.mubr.bf16.mxu0 %v2648_v27  ;;  %2920 = vmatprep.mubr.bf16.mxu1 %v2648_v27  ;;  %v3530_v56 = vld [vmem:[%s10646_s1 + $0x2b0] sm:$0xff]  ;;  %v6769_v39 = vcombine.low %v3527_v46, %v3528_v42 }
 0x29a   : > { %v2455_v50 = vadd.f32 %v2454_v36, %v8978_v29  ;;  %v2456_v54 = vpop.f32.mrb[79].mxu1  ;;  %2728 = vmatmul.mubr.bf16.gmra.mrb[136].mxu0 %v2647_v6  ;;  %2921 = vmatmul.mubr.bf16.gmra.mrb[136].mxu1 %v2647_v6  ;;  %v2591_v0 = vmax.f32 %v2451_v58, 0.0  ;;  %v7662_v6 = vld [vmem:[%s10648_s3 + $0xe0] ss:$16 sps:$4 sm:$0xff]  }
 0x29b   : > { %v2457_v1 = vadd.f32 %v2456_v54, %v8983_v2  ;;  %3722 = vmatpush1.bf16.msra.mxu0 %v6759_v30  ;;  %4011 = vmatpush1.bf16.msra.mxu1 %v7656_v40  ;;  %v2592_v4 = vmax.f32 %v2453_v12, 0.0  ;;  %v6770_v30 = vcombine.high %v3527_v46, %v3528_v42  ;;  %v7665_v40 = vld [vmem:[%s10648_s3 + $0x124] ss:$16 sps:$4 sm:$0xff]  }
 0x29c   : > { %v2593_v3 = vmax.f32 %v2455_v50, 0.0  ;;  %3723 = vmatprep.subr.bf16.mxu0 %v6762_v47  ;;  %4012 = vmatprep.subr.bf16.mxu1 %v7657_v17  ;;  %v3529_v47 = vld [vmem:[%s10646_s1 + $0x290] sm:$0xff] }
 0x29d   : > { %v2594_v51 = vmax.f32 %v2457_v1, 0.0  ;;  %v7664_v50 = vld [vmem:[%s10648_s3 + $0x100] ss:$16 sps:$4 sm:$0xff]   ;;  %v6771_v52 = vcombine.low %v3529_v47, %v3530_v56 }
 0x29e   : > { %v2649_v59 = vpack.c.bf16 %v2593_v3, %v2591_v0  ;;  %v3532_v17 = vld [vmem:[%s10646_s1 + $0x2f0] sm:$0xff] }
 0x29f   : > { %v2460_v60 = vpop.f32.mrb[80].mxu1  ;;  %v2650_v35 = vpack.c.bf16 %v2594_v51, %v2592_v4  ;;  %3724 = vmatpush1.bf16.msra.mxu0 %v6761_v15  ;;  %4013 = vmatpush1.bf16.msra.mxu1 %v7658_v18  ;;  %v6772_v15 = vcombine.high %v3529_v47, %v3530_v56  ;;  %v7667_v18 = vld [vmem:[%s10648_s3 + $0x144] ss:$16 sps:$4 sm:$0xff]  }
 0x2a0   : > { %v2461_v63 = vadd.f32 %v2460_v60, %v8978_v29  ;;  %v2462_v9 = vpop.f32.mrb[81].mxu1  ;;  %3725 = vmatprep.subr.bf16.mxu0 %v6764_v31  ;;  %4014 = vmatprep.subr.bf16.mxu1 %v7659_v57  ;;  %v3531_v31 = vld [vmem:[%s10646_s1 + $0x2d0] sm:$0xff] }
 0x2a1   : > { %v2463_v16 = vadd.f32 %v2462_v9, %v8983_v2  ;;  %v2464_v37 = vpop.f32.mrb[82].mxu1  ;;  %2737 = vmatprep.mubr.bf16.mxu0 %v2650_v35  ;;  %2930 = vmatprep.mubr.bf16.mxu1 %v2650_v35  ;;  %v3534_v57 = vld [vmem:[%s10646_s1 + $0x330] sm:$0xff]  ;;  %v6773_v19 = vcombine.low %v3531_v31, %v3532_v17 }
 0x2a2   : > { %v2465_v28 = vadd.f32 %v2464_v37, %v8978_v29  ;;  %v2466_v33 = vpop.f32.mrb[83].mxu1  ;;  %2738 = vmatmul.mubr.bf16.gmra.mrb[140].mxu0 %v2649_v59  ;;  %2931 = vmatmul.mubr.bf16.gmra.mrb[140].mxu1 %v2649_v59  ;;  %v2595_v43 = vmax.f32 %v2461_v63, 0.0  ;;  %v7666_v59 = vld [vmem:[%s10648_s3 + $0x120] ss:$16 sps:$4 sm:$0xff]  }
 0x2a3   : > { %v2467_v20 = vadd.f32 %v2466_v33, %v8983_v2  ;;  %3726 = vmatpush1.bf16.msra.mxu0 %v6763_v5  ;;  %4015 = vmatpush1.bf16.msra.mxu1 %v7660_v38  ;;  %v2596_v34 = vmax.f32 %v2463_v16, 0.0  ;;  %v6774_v5 = vcombine.high %v3531_v31, %v3532_v17  ;;  %v7669_v38 = vld [vmem:[%s10648_s3 + $0x164] ss:$16 sps:$4 sm:$0xff]  }
 0x2a4   : > { %v2597_v44 = vmax.f32 %v2465_v28, 0.0  ;;  %3727 = vmatprep.subr.bf16.mxu0 %v6766_v55  ;;  %4016 = vmatprep.subr.bf16.mxu1 %v7661_v62  ;;  %v3533_v55 = vld [vmem:[%s10646_s1 + $0x310] sm:$0xff] }
 0x2a5   : > { %v2598_v41 = vmax.f32 %v2467_v20, 0.0  ;;  %v7668_v28 = vld [vmem:[%s10648_s3 + $0x140] ss:$16 sps:$4 sm:$0xff]   ;;  %v6775_v42 = vcombine.low %v3533_v55, %v3534_v57 }
 0x2a6   : > { %v2651_v13 = vpack.c.bf16 %v2597_v44, %v2595_v43  ;;  %v3536_v62 = vld [vmem:[%s10646_s1 + $0x370] sm:$0xff] }
 0x2a7   : > { %v2470_v25 = vpop.f32.mrb[84].mxu1  ;;  %v2652_v14 = vpack.c.bf16 %v2598_v41, %v2596_v34  ;;  %3728 = vmatpush1.bf16.msra.mxu0 %v6765_v23  ;;  %4017 = vmatpush1.bf16.msra.mxu1 %v7662_v6  ;;  %v6776_v23 = vcombine.high %v3533_v55, %v3534_v57  ;;  %v7671_v6 = vld [vmem:[%s10648_s3 + $0x184] ss:$16 sps:$4 sm:$0xff]   ;;  %v7676_v55 = vld [vmem:[%s10648_s3 + $0x1c0] ss:$16 sps:$4 sm:$0xff]  }
 0x2a8   : > { %v2471_v49 = vadd.f32 %v2470_v25, %v8978_v29  ;;  %v2472_v27 = vpop.f32.mrb[85].mxu1  ;;  %3729 = vmatprep.subr.bf16.mxu0 %v6768_v21  ;;  %4018 = vmatprep.subr.bf16.mxu1 %v7663_v45  ;;  %v3535_v21 = vld [vmem:[%s10646_s1 + $0x350] sm:$0xff] }
 0x2a9   : > { %v2473_v58 = vadd.f32 %v2472_v27, %v8983_v2  ;;  %v2474_v11 = vpop.f32.mrb[86].mxu1  ;;  %2747 = vmatprep.mubr.bf16.mxu0 %v2652_v14  ;;  %2940 = vmatprep.mubr.bf16.mxu1 %v2652_v14  ;;  %v3538_v45 = vld [vmem:[%s10646_s1 + $0x3b0] sm:$0xff]  ;;  %v6777_v56 = vcombine.low %v3535_v21, %v3536_v62 }
 0x2aa   : > { %v2475_v12 = vadd.f32 %v2474_v11, %v8978_v29  ;;  %v2476_v36 = vpop.f32.mrb[87].mxu1  ;;  %2748 = vmatmul.mubr.bf16.gmra.mrb[144].mxu0 %v2651_v13  ;;  %2941 = vmatmul.mubr.bf16.gmra.mrb[144].mxu1 %v2651_v13  ;;  %v2599_v54 = vmax.f32 %v2471_v49, 0.0  ;;  %v7670_v13 = vld [vmem:[%s10648_s3 + $0x160] ss:$16 sps:$4 sm:$0xff]  }
 0x2ab   : > { %v2477_v53 = vadd.f32 %v2476_v36, %v8983_v2  ;;  %3730 = vmatpush1.bf16.msra.mxu0 %v6767_v48  ;;  %4019 = vmatpush1.bf16.msra.mxu1 %v7664_v50  ;;  %v2600_v0 = vmax.f32 %v2473_v58, 0.0  ;;  %v6778_v48 = vcombine.high %v3535_v21, %v3536_v62  ;;  %v7673_v50 = vld [vmem:[%s10648_s3 + $0x1a4] ss:$16 sps:$4 sm:$0xff]  }
 0x2ac   : > { %v2601_v1 = vmax.f32 %v2475_v12, 0.0  ;;  %3731 = vmatprep.subr.bf16.mxu0 %v6770_v30  ;;  %4020 = vmatprep.subr.bf16.mxu1 %v7665_v40  ;;  %v3537_v30 = vld [vmem:[%s10646_s1 + $0x390] sm:$0xff] }
 0x2ad   : > { %v2602_v3 = vmax.f32 %v2477_v53, 0.0  ;;  %v7672_v12 = vld [vmem:[%s10648_s3 + $0x180] ss:$16 sps:$4 sm:$0xff]   ;;  %v6779_v17 = vcombine.low %v3537_v30, %v3538_v45 }
 0x2ae   : > { %v2653_v4 = vpack.c.bf16 %v2601_v1, %v2599_v54  ;;  %v3540_v40 = vld [vmem:[%s10646_s1 + $0x3f0] sm:$0xff] }
 0x2af   : > { %v2480_v51 = vpop.f32.mrb[88].mxu1  ;;  %v2654_v32 = vpack.c.bf16 %v2602_v3, %v2600_v0  ;;  %3732 = vmatpush1.bf16.msra.mxu0 %v6769_v39  ;;  %4021 = vmatpush1.bf16.msra.mxu1 %v7666_v59  ;;  %v6780_v39 = vcombine.high %v3537_v30, %v3538_v45  ;;  %v7675_v59 = vld [vmem:[%s10648_s3 + $0x1c4] ss:$16 sps:$4 sm:$0xff]  }
 0x2b0   : > { %v2481_v60 = vadd.f32 %v2480_v51, %v8978_v29  ;;  %v2482_v35 = vpop.f32.mrb[89].mxu1  ;;  %3733 = vmatprep.subr.bf16.mxu0 %v6772_v15  ;;  %4022 = vmatprep.subr.bf16.mxu1 %v7667_v18  ;;  %v3539_v15 = vld [vmem:[%s10646_s1 + $0x3d0] sm:$0xff] }
 0x2b1   : > { %v2483_v63 = vadd.f32 %v2482_v35, %v8983_v2  ;;  %v2484_v9 = vpop.f32.mrb[90].mxu1  ;;  %2757 = vmatprep.mubr.bf16.mxu0 %v2654_v32  ;;  %2950 = vmatprep.mubr.bf16.mxu1 %v2654_v32 }
 0x2b2   : > { %v2485_v16 = vadd.f32 %v2484_v9, %v8978_v29  ;;  %v2486_v37 = vpop.f32.mrb[91].mxu1  ;;  %2758 = vmatmul.mubr.bf16.gmra.mrb[148].mxu0 %v2653_v4  ;;  %2951 = vmatmul.mubr.bf16.gmra.mrb[148].mxu1 %v2653_v4  ;;  %v2603_v33 = vmax.f32 %v2481_v60, 0.0  ;;  %v7674_v4 = vld [vmem:[%s10648_s3 + $0x1a0] ss:$16 sps:$4 sm:$0xff]   ;;  %v6781_v9 = vcombine.low %v3539_v15, %v3540_v40 }
 0x2b3   : > { %v2487_v7 = vadd.f32 %v2486_v37, %v8983_v2  ;;  %3734 = vmatpush1.bf16.msra.mxu0 %v6771_v52  ;;  %4023 = vmatpush1.bf16.msra.mxu1 %v7668_v28  ;;  %v2604_v43 = vmax.f32 %v2483_v63, 0.0  ;;  %v6782_v52 = vcombine.high %v3539_v15, %v3540_v40  ;;  %v7677_v37 = vld [vmem:[%s10648_s3 + $0x1e4] ss:$16 sps:$4 sm:$0xff]  }
 0x2b4   : > { %v2605_v20 = vmax.f32 %v2485_v16, 0.0  ;;  %3735 = vmatprep.subr.bf16.mxu0 %v6774_v5  ;;  %4024 = vmatprep.subr.bf16.mxu1 %v7669_v38 }
 0x2b5   : > { %v2606_v44 = vmax.f32 %v2487_v7, 0.0 }
 0x2b6   : > { %v2655_v34 = vpack.c.bf16 %v2605_v20, %v2603_v33 }
 0x2b7   : > { %v2490_v41 = vpop.f32.mrb[92].mxu1  ;;  %v2656_v46 = vpack.c.bf16 %v2606_v44, %v2604_v43  ;;  %3736 = vmatpush1.bf16.msra.mxu0 %v6773_v19  ;;  %4025 = vmatpush1.bf16.msra.mxu1 %v7670_v13  ;;  %v7679_v44 = vld [vmem:[%s10648_s3 + $0xc] ss:$16 sps:$4 sm:$0xff]  }
 0x2b8   : > { %v2491_v25 = vadd.f32 %v2490_v41, %v8978_v29  ;;  %v2492_v14 = vpop.f32.mrb[93].mxu1  ;;  %3737 = vmatprep.subr.bf16.mxu0 %v6776_v23  ;;  %4026 = vmatprep.subr.bf16.mxu1 %v7671_v6  ;;  %v7678_v23 = vld [vmem:[%s10648_s3 + $0x1e0] ss:$16 sps:$4 sm:$0xff]  }
 0x2b9   : > { %v2493_v49 = vadd.f32 %v2492_v14, %v8983_v2  ;;  %v2494_v27 = vpop.f32.mrb[94].mxu1  ;;  %2767 = vmatprep.mubr.bf16.mxu0 %v2656_v46  ;;  %2960 = vmatprep.mubr.bf16.mxu1 %v2656_v46 }
 0x2ba   : > { %v2495_v58 = vadd.f32 %v2494_v27, %v8978_v29  ;;  %v2496_v11 = vpop.f32.mrb[95].mxu1  ;;  %2768 = vmatmul.mubr.bf16.gmra.mrb[152].mxu0 %v2655_v34  ;;  %2961 = vmatmul.mubr.bf16.gmra.mrb[152].mxu1 %v2655_v34  ;;  %v2607_v36 = vmax.f32 %v2491_v25, 0.0 }
 0x2bb   : > { %v2497_v47 = vadd.f32 %v2496_v11, %v8983_v2  ;;  %3738 = vmatpush1.bf16.msra.mxu0 %v6775_v42  ;;  %4027 = vmatpush1.bf16.msra.mxu1 %v7672_v12  ;;  %v2608_v54 = vmax.f32 %v2493_v49, 0.0 }
 0x2bc   : > { %v2609_v53 = vmax.f32 %v2495_v58, 0.0  ;;  %3739 = vmatprep.subr.bf16.mxu0 %v6778_v48  ;;  %4028 = vmatprep.subr.bf16.mxu1 %v7673_v50 }
 0x2bd   : > { %v2610_v1 = vmax.f32 %v2497_v47, 0.0 }
 0x2be   : > { %v2657_v0 = vpack.c.bf16 %v2609_v53, %v2607_v36 }
 0x2bf   : > { %v2500_v3 = vpop.f32.mrb[96].mxu1  ;;  %v2658_v31 = vpack.c.bf16 %v2610_v1, %v2608_v54  ;;  %3740 = vmatpush1.bf16.msra.mxu0 %v6777_v56  ;;  %4029 = vmatpush1.bf16.msra.mxu1 %v7674_v4 }
 0x2c0   : > { %v2501_v51 = vadd.f32 %v2500_v3, %v8978_v29  ;;  %v2502_v32 = vpop.f32.mrb[97].mxu1  ;;  %3741 = vmatprep.subr.bf16.mxu0 %v6780_v39  ;;  %4030 = vmatprep.subr.bf16.mxu1 %v7675_v59 }
 0x2c1   : > { %v2503_v60 = vadd.f32 %v2502_v32, %v8983_v2  ;;  %v2504_v35 = vpop.f32.mrb[98].mxu1  ;;  %2777 = vmatprep.mubr.bf16.mxu0 %v2658_v31  ;;  %2970 = vmatprep.mubr.bf16.mxu1 %v2658_v31 }
 0x2c2   : > { %v2505_v5 = vadd.f32 %v2504_v35, %v8978_v29  ;;  %v2506_v18 = vpop.f32.mrb[99].mxu1  ;;  %2778 = vmatmul.mubr.bf16.gmra.mrb[156].mxu0 %v2657_v0  ;;  %2971 = vmatmul.mubr.bf16.gmra.mrb[156].mxu1 %v2657_v0  ;;  %v2611_v57 = vmax.f32 %v2501_v51, 0.0 }
 0x2c3   : > { %v2507_v63 = vadd.f32 %v2506_v18, %v8983_v2  ;;  %3742 = vmatpush1.bf16.msra.mxu0 %v6779_v17  ;;  %4031 = vmatpush1.bf16.msra.mxu1 %v7676_v55  ;;  %v2612_v7 = vmax.f32 %v2503_v60, 0.0 }
 0x2c4   : > { %v2613_v16 = vmax.f32 %v2505_v5, 0.0  ;;  %3743 = vmatprep.subr.bf16.mxu0 %v6782_v52  ;;  %4032 = vmatprep.subr.bf16.mxu1 %v7677_v37 }
 0x2c5   : > { %v2614_v19 = vmax.f32 %v2507_v63, 0.0 }
 0x2c6   : > { %v2659_v28 = vpack.c.bf16 %v2613_v16, %v2611_v57 }
 0x2c7   : > { %v2510_v33 = vpop.f32.mrb[100].mxu1  ;;  %v2660_v20 = vpack.c.bf16 %v2614_v19, %v2612_v7  ;;  %3744 = vmatpush1.bf16.msra.mxu0 %v6781_v9  ;;  %4033 = vmatpush1.bf16.msra.mxu1 %v7678_v23 }
 0x2c8   : > { %v2511_v38 = vadd.f32 %v2510_v33, %v8978_v29  ;;  %v2512_v43 = vpop.f32.mrb[101].mxu1  ;;  %4195 = vmatprep.subr.bf16.mxu0 %v7679_v44 }
 0x2c9   : > { %v2513_v21 = vadd.f32 %v2512_v43, %v8983_v2  ;;  %v2514_v62 = vpop.f32.mrb[102].mxu1  ;;  %2787 = vmatprep.mubr.bf16.mxu0 %v2660_v20  ;;  %2980 = vmatprep.mubr.bf16.mxu1 %v2660_v20 }
 0x2ca   : > { %v2515_v34 = vadd.f32 %v2514_v62, %v8978_v29  ;;  %v2516_v41 = vpop.f32.mrb[103].mxu1  ;;  %2788 = vmatmul.mubr.bf16.gmra.mrb[160].mxu0 %v2659_v28  ;;  %2981 = vmatmul.mubr.bf16.gmra.mrb[160].mxu1 %v2659_v28  ;;  %v2615_v42 = vmax.f32 %v2511_v38, 0.0 }
 0x2cb   : > { %v2517_v46 = vadd.f32 %v2516_v41, %v8983_v2  ;;  %v2616_v25 = vmax.f32 %v2513_v21, 0.0 }
 0x2cc   : > { %v2617_v13 = vmax.f32 %v2515_v34, 0.0 }
 0x2cd   : > { %v2618_v14 = vmax.f32 %v2517_v46, 0.0 }
 0x2ce   : > { %v2661_v48 = vpack.c.bf16 %v2617_v13, %v2615_v42 }
 0x2cf   : > { %v2520_v6 = vpop.f32.mrb[104].mxu1  ;;  %v2662_v49 = vpack.c.bf16 %v2618_v14, %v2616_v25 }
 0x2d0   : > { %v2521_v27 = vadd.f32 %v2520_v6, %v8978_v29  ;;  %v2522_v30 = vpop.f32.mrb[105].mxu1 }
 0x2d1   : > { %v2523_v45 = vadd.f32 %v2522_v30, %v8983_v2  ;;  %v2524_v58 = vpop.f32.mrb[106].mxu1  ;;  %2797 = vmatprep.mubr.bf16.mxu0 %v2662_v49  ;;  %2990 = vmatprep.mubr.bf16.mxu1 %v2662_v49 }
 0x2d2   : > { %v2525_v11 = vadd.f32 %v2524_v58, %v8978_v29  ;;  %v2526_v47 = vpop.f32.mrb[107].mxu1  ;;  %2798 = vmatmul.mubr.bf16.gmra.mrb[164].mxu0 %v2661_v48  ;;  %2991 = vmatmul.mubr.bf16.gmra.mrb[164].mxu1 %v2661_v48  ;;  %v2619_v12 = vmax.f32 %v2521_v27, 0.0 }
 0x2d3   : > { %v2527_v56 = vadd.f32 %v2526_v47, %v8983_v2  ;;  %v2620_v53 = vmax.f32 %v2523_v45, 0.0 }
 0x2d4   : > { %v2621_v36 = vmax.f32 %v2525_v11, 0.0 }
 0x2d5   : > { %v2622_v39 = vmax.f32 %v2527_v56, 0.0 }
 0x2d6   : > { %v2663_v50 = vpack.c.bf16 %v2621_v36, %v2619_v12 }
 0x2d7   : > { %v2530_v54 = vpop.f32.mrb[108].mxu1  ;;  %v2664_v1 = vpack.c.bf16 %v2622_v39, %v2620_v53 }
 0x2d8   : > { %v2531_v15 = vadd.f32 %v2530_v54, %v8978_v29  ;;  %v2532_v40 = vpop.f32.mrb[109].mxu1 }
 0x2d9   : > { %v2533_v0 = vadd.f32 %v2532_v40, %v8983_v2  ;;  %v2534_v3 = vpop.f32.mrb[110].mxu1  ;;  %2807 = vmatprep.mubr.bf16.mxu0 %v2664_v1  ;;  %3000 = vmatprep.mubr.bf16.mxu1 %v2664_v1 }
 0x2da   : > { %v2535_v31 = vadd.f32 %v2534_v3, %v8978_v29  ;;  %v2536_v17 = vpop.f32.mrb[111].mxu1  ;;  %2808 = vmatmul.mubr.bf16.gmra.mrb[168].mxu0 %v2663_v50  ;;  %3001 = vmatmul.mubr.bf16.gmra.mrb[168].mxu1 %v2663_v50  ;;  %v2623_v51 = vmax.f32 %v2531_v15, 0.0 }
 0x2db   : > { %v2537_v4 = vadd.f32 %v2536_v17, %v8983_v2  ;;  %v2624_v52 = vmax.f32 %v2533_v0, 0.0 }
 0x2dc   : > { %v2625_v32 = vmax.f32 %v2535_v31, 0.0 }
 0x2dd   : > { %v2626_v59 = vmax.f32 %v2537_v4, 0.0 }
 0x2de   : > { %v2665_v60 = vpack.c.bf16 %v2625_v32, %v2623_v51 }
 0x2df   : > { %v2540_v35 = vpop.f32.mrb[112].mxu1  ;;  %v2666_v5 = vpack.c.bf16 %v2626_v59, %v2624_v52 }
 0x2e0   : > { %v2541_v18 = vadd.f32 %v2540_v35, %v8978_v29  ;;  %v2542_v63 = vpop.f32.mrb[113].mxu1 }
 0x2e1   : > { %v2543_v9 = vadd.f32 %v2542_v63, %v8983_v2  ;;  %v2544_v55 = vpop.f32.mrb[114].mxu1  ;;  %2817 = vmatprep.mubr.bf16.mxu0 %v2666_v5  ;;  %3010 = vmatprep.mubr.bf16.mxu1 %v2666_v5  ;;  %v7680_v5 = vld [vmem:[%s8014_s28 + $0x4] ss:$8 sps:$4 sm:$0xff]  }
 0x2e2   : > { %v2545_v57 = vadd.f32 %v2544_v55, %v8978_v29  ;;  %v2546_v16 = vpop.f32.mrb[115].mxu1  ;;  %2818 = vmatmul.mubr.bf16.gmra.mrb[172].mxu0 %v2665_v60  ;;  %3011 = vmatmul.mubr.bf16.gmra.mrb[172].mxu1 %v2665_v60  ;;  %v2627_v7 = vmax.f32 %v2541_v18, 0.0  ;;  %v7682_v18 = vld [vmem:[%s8014_s28 + $0x14] ss:$8 sps:$4 sm:$0xff]  }
 0x2e3   : > { %v2547_v37 = vadd.f32 %v2546_v16, %v8983_v2  ;;  %v2628_v28 = vmax.f32 %v2543_v9, 0.0  ;;  %v7684_v63 = vld [vmem:[%s10648_s3 + $0x2c] ss:$16 sps:$4 sm:$0xff]   ;;  %v7685_v9 = vld [vmem:[%s10648_s3 + $0x28] ss:$16 sps:$4 sm:$0xff]  }
 0x2e4   : > { %v2629_v19 = vmax.f32 %v2545_v57, 0.0  ;;  %v7686_v55 = vld [vmem:[%s10648_s3 + $0x4c] ss:$16 sps:$4 sm:$0xff]   ;;  %v7687_v57 = vld [vmem:[%s8014_s28 + $0x10] ss:$8 sps:$4 sm:$0xff]  }
 0x2e5   : > { %v2630_v33 = vmax.f32 %v2547_v37, 0.0  ;;  %v7688_v16 = vld [vmem:[%s8014_s28 + $0x24] ss:$8 sps:$4 sm:$0xff]   ;;  %v7689_v37 = vld [vmem:[%s10648_s3 + $0x48] ss:$16 sps:$4 sm:$0xff]  }
 0x2e6   : > { %v2667_v20 = vpack.c.bf16 %v2629_v19, %v2627_v7  ;;  %v7690_v7 = vld [vmem:[%s10648_s3 + $0x6c] ss:$16 sps:$4 sm:$0xff]   ;;  %v7691_v19 = vld [vmem:[%s10648_s3 + $0x68] ss:$16 sps:$4 sm:$0xff]  }
 0x2e7   : > { %v2550_v23 = vpop.f32.mrb[116].mxu1  ;;  %v2668_v38 = vpack.c.bf16 %v2630_v33, %v2628_v28  ;;  %v7692_v28 = vld [vmem:[%s10648_s3 + $0x8c] ss:$16 sps:$4 sm:$0xff]   ;;  %v7693_v33 = vld [vmem:[%s8014_s28 + $0x20] ss:$8 sps:$4 sm:$0xff]  }
 0x2e8   : > { %v2551_v43 = vadd.f32 %v2550_v23, %v8978_v29  ;;  %v2552_v44 = vpop.f32.mrb[117].mxu1  ;;  %v7695_v23 = vld [vmem:[%s10648_s3 + $0x88] ss:$16 sps:$4 sm:$0xff]  }
 0x2e9   : > { %v2553_v21 = vadd.f32 %v2552_v44, %v8983_v2  ;;  %v2554_v62 = vpop.f32.mrb[118].mxu1  ;;  %2827 = vmatprep.mubr.bf16.mxu0 %v2668_v38  ;;  %3020 = vmatprep.mubr.bf16.mxu1 %v2668_v38  ;;  %v7696_v38 = vld [vmem:[%s10648_s3 + $0xac] ss:$16 sps:$4 sm:$0xff]  }
 0x2ea   : > { %v2555_v34 = vadd.f32 %v2554_v62, %v8978_v29  ;;  %v2556_v41 = vpop.f32.mrb[119].mxu1  ;;  %2828 = vmatmul.mubr.bf16.gmra.mrb[176].mxu0 %v2667_v20  ;;  %3021 = vmatmul.mubr.bf16.gmra.mrb[176].mxu1 %v2667_v20  ;;  %v2631_v42 = vmax.f32 %v2551_v43, 0.0  ;;  %v7694_v20 = vld [vmem:[%s8014_s28 + $0x34] ss:$8 sps:$4 sm:$0xff]   ;;  %v7697_v43 = vld [vmem:[%s10648_s3 + $0xa8] ss:$16 sps:$4 sm:$0xff]  }
 0x2eb   : > { %v2557_v46 = vadd.f32 %v2556_v41, %v8983_v2  ;;  %v2632_v25 = vmax.f32 %v2553_v21, 0.0  ;;  %v7698_v44 = vld [vmem:[%s10648_s3 + $0xcc] ss:$16 sps:$4 sm:$0xff]   ;;  %v7699_v21 = vld [vmem:[%s8014_s28 + $0x30] ss:$8 sps:$4 sm:$0xff]  }
 0x2ec   : > { %v2633_v13 = vmax.f32 %v2555_v34, 0.0  ;;  %v7700_v62 = vld [vmem:[%s8014_s28 + $0x44] ss:$8 sps:$4 sm:$0xff]   ;;  %v7701_v34 = vld [vmem:[%s10648_s3 + $0xc8] ss:$16 sps:$4 sm:$0xff]  }
 0x2ed   : > { %v2634_v14 = vmax.f32 %v2557_v46, 0.0  ;;  %v7702_v41 = vld [vmem:[%s10648_s3 + $0xec] ss:$16 sps:$4 sm:$0xff]   ;;  %v7703_v46 = vld [vmem:[%s10648_s3 + $0xe8] ss:$16 sps:$4 sm:$0xff]  }
 0x2ee   : > { %v2669_v48 = vpack.c.bf16 %v2633_v13, %v2631_v42  ;;  %v7704_v42 = vld [vmem:[%s10648_s3 + $0x10c] ss:$16 sps:$4 sm:$0xff]   ;;  %v7705_v13 = vld [vmem:[%s8014_s28 + $0x40] ss:$8 sps:$4 sm:$0xff]  }
 0x2ef   : > { %v2560_v6 = vpop.f32.mrb[120].mxu1  ;;  %v2670_v49 = vpack.c.bf16 %v2634_v14, %v2632_v25  ;;  %v7706_v25 = vld [vmem:[%s8014_s28 + $0x54] ss:$8 sps:$4 sm:$0xff]   ;;  %v7707_v14 = vld [vmem:[%s10648_s3 + $0x108] ss:$16 sps:$4 sm:$0xff]  }
 0x2f0   : > { %v2561_v27 = vadd.f32 %v2560_v6, %v8978_v29  ;;  %v2562_v30 = vpop.f32.mrb[121].mxu1  ;;  %v7709_v6 = vld [vmem:[%s10648_s3 + $0x128] ss:$16 sps:$4 sm:$0xff]  }
 0x2f1   : > { %v2563_v45 = vadd.f32 %v2562_v30, %v8983_v2  ;;  %v2564_v58 = vpop.f32.mrb[122].mxu1  ;;  %2837 = vmatprep.mubr.bf16.mxu0 %v2670_v49  ;;  %3030 = vmatprep.mubr.bf16.mxu1 %v2670_v49  ;;  %v7710_v49 = vld [vmem:[%s10648_s3 + $0x14c] ss:$16 sps:$4 sm:$0xff]  }
 0x2f2   : > { %v2565_v11 = vadd.f32 %v2564_v58, %v8978_v29  ;;  %v2566_v47 = vpop.f32.mrb[123].mxu1  ;;  %2838 = vmatmul.mubr.bf16.gmra.mrb[180].mxu0 %v2669_v48  ;;  %3031 = vmatmul.mubr.bf16.gmra.mrb[180].mxu1 %v2669_v48  ;;  %v2635_v12 = vmax.f32 %v2561_v27, 0.0  ;;  %v7708_v48 = vld [vmem:[%s10648_s3 + $0x12c] ss:$16 sps:$4 sm:$0xff]   ;;  %v7711_v27 = vld [vmem:[%s8014_s28 + $0x50] ss:$8 sps:$4 sm:$0xff]  }
 0x2f3   : > { %v2567_v56 = vadd.f32 %v2566_v47, %v8983_v2  ;;  %v2636_v53 = vmax.f32 %v2563_v45, 0.0  ;;  %v7712_v30 = vld [vmem:[%s8014_s28 + $0x64] ss:$8 sps:$4 sm:$0xff]   ;;  %v7713_v45 = vld [vmem:[%s10648_s3 + $0x148] ss:$16 sps:$4 sm:$0xff]  }
 0x2f4   : > { %v2637_v36 = vmax.f32 %v2565_v11, 0.0  ;;  %v7714_v58 = vld [vmem:[%s10648_s3 + $0x16c] ss:$16 sps:$4 sm:$0xff]   ;;  %v7715_v11 = vld [vmem:[%s10648_s3 + $0x168] ss:$16 sps:$4 sm:$0xff]  }
 0x2f5   : > { %v2638_v39 = vmax.f32 %v2567_v56, 0.0  ;;  %v7716_v47 = vld [vmem:[%s10648_s3 + $0x18c] ss:$16 sps:$4 sm:$0xff]   ;;  %v7717_v56 = vld [vmem:[%s8014_s28 + $0x60] ss:$8 sps:$4 sm:$0xff]  }
 0x2f6   : > { %v2671_v50 = vpack.c.bf16 %v2637_v36, %v2635_v12  ;;  %v7718_v12 = vld [vmem:[%s8014_s28 + $0x74] ss:$8 sps:$4 sm:$0xff]   ;;  %v7719_v36 = vld [vmem:[%s10648_s3 + $0x188] ss:$16 sps:$4 sm:$0xff]  }
 0x2f7   : > { %v2570_v54 = vpop.f32.mrb[124].mxu1  ;;  %v2672_v1 = vpack.c.bf16 %v2638_v39, %v2636_v53  ;;  %v7720_v53 = vld [vmem:[%s10648_s3 + $0x1ac] ss:$16 sps:$4 sm:$0xff]   ;;  %v7721_v39 = vld [vmem:[%s10648_s3 + $0x1a8] ss:$16 sps:$4 sm:$0xff]  }
 0x2f8   : > { %v2571_v15 = vadd.f32 %v2570_v54, %v8978_v29  ;;  %v2572_v40 = vpop.f32.mrb[125].mxu1  ;;  %v7723_v54 = vld [vmem:[%s8014_s28 + $0x70] ss:$8 sps:$4 sm:$0xff]  }
 0x2f9   : > { %v2573_v0 = vadd.f32 %v2572_v40, %v8983_v2  ;;  %v2574_v3 = vpop.f32.mrb[126].mxu1  ;;  %2847 = vmatprep.mubr.bf16.mxu0 %v2672_v1  ;;  %3040 = vmatprep.mubr.bf16.mxu1 %v2672_v1  ;;  %v7724_v1 = vld [vmem:[%s8014_s28 + $0x84] ss:$8 sps:$4 sm:$0xff]  }
 0x2fa   : > { %v2575_v31 = vadd.f32 %v2574_v3, %v8978_v29  ;;  %v2576_v17 = vpop.f32.mrb[127].mxu1  ;;  %2848 = vmatmul.mubr.bf16.gmra.mrb[184].mxu0 %v2671_v50  ;;  %3041 = vmatmul.mubr.bf16.gmra.mrb[184].mxu1 %v2671_v50  ;;  %v2639_v51 = vmax.f32 %v2571_v15, 0.0  ;;  %v7681_v29 = vld [vmem:[%s8014_s28] ss:$8 sps:$4 sm:$0xff]   ;;  %v7722_v50 = vld [vmem:[%s10648_s3 + $0x1cc] ss:$16 sps:$4 sm:$0xff]  }
 0x2fb   : > { %v2577_v4 = vadd.f32 %v2576_v17, %v8983_v2  ;;  %v2640_v52 = vmax.f32 %v2573_v0, 0.0  ;;  %v7683_v2 = vld [vmem:[%s10648_s3 + $0x8] ss:$16 sps:$4 sm:$0xff]   ;;  %v7726_v40 = vld [vmem:[%s10648_s3 + $0x1ec] ss:$16 sps:$4 sm:$0xff]  }
 0x2fc   : > { %v2641_v32 = vmax.f32 %v2575_v31, 0.0  ;;  %v7725_v15 = vld [vmem:[%s10648_s3 + $0x1c8] ss:$16 sps:$4 sm:$0xff]   ;;  %v7728_v3 = vld [vmem:[%s10648_s3 + $0x4] ss:$16 sps:$4 sm:$0xff]  }
 0x2fd   : > { %v2642_v59 = vmax.f32 %v2577_v4, 0.0  ;;  %v7727_v0 = vld [vmem:[%s10648_s3 + $0x1e8] ss:$16 sps:$4 sm:$0xff]   ;;  %v7730_v17 = vld [vmem:[%s8014_s28 + $0x94] ss:$8 sps:$4 sm:$0xff]  }
 0x2fe   : > { %v2673_v60 = vpack.c.bf16 %v2641_v32, %v2639_v51  ;;  %v7729_v31 = vld [vmem:[%s8014_s28 + $0x80] ss:$8 sps:$4 sm:$0xff]   ;;  %v7731_v4 = vld [vmem:[%s8014_s28 + $0x90] ss:$8 sps:$4 sm:$0xff]   ;;  %v7732_v51 = vld [vmem:[%s8014_s28 + $0xa4] ss:$8 sps:$4 sm:$0xff]  }
 0x2ff   : > { %v2674_v35 = vpack.c.bf16 %v2642_v59, %v2640_v52  ;;  %v7733_v32 = vld [vmem:[%s8014_s28 + $0xa0] ss:$8 sps:$4 sm:$0xff]   ;;  %v7734_v52 = vld [vmem:[%s8014_s28 + $0xb4] ss:$8 sps:$4 sm:$0xff]  }
 0x301   : > { %2857 = vmatprep.mubr.bf16.mxu0 %v2674_v35  ;;  %3050 = vmatprep.mubr.bf16.mxu1 %v2674_v35 }
 0x302   : > { %2858 = vmatmul.mubr.bf16.gmra.mrb[188].mxu0 %v2673_v60  ;;  %3051 = vmatmul.mubr.bf16.gmra.mrb[188].mxu1 %v2673_v60 }
 0x303   : > { %3745 = vmatprep.mubr.bf16.mxu0 %v7680_v5 }
 0x30a   : > { %3746 = vmatmul.mubr.bf16.vlgmr.msra.gmra.mrb[192].mxu0 %v7681_v29 }
 0x30b   : > { %3755 = vmatprep.mubr.bf16.mxu0 %v7682_v18  ;;  %4196 = vmatpush1.bf16.msra.mxu0 %v7683_v2 }
 0x30c   : > { %4197 = vmatprep.subr.bf16.mxu0 %v7684_v63 }
 0x30f   : > { %4198 = vmatpush1.bf16.msra.mxu0 %v7685_v9 }
 0x310   : > { %4199 = vmatprep.subr.bf16.mxu0 %v7686_v55 }
 0x312   : > { %3756 = vmatmul.mubr.bf16.gmra.mrb[196].mxu0 %v7687_v57 }
 0x313   : > { %3765 = vmatprep.mubr.bf16.mxu0 %v7688_v16  ;;  %4200 = vmatpush1.bf16.msra.mxu0 %v7689_v37 }
 0x314   : > { %4201 = vmatprep.subr.bf16.mxu0 %v7690_v7 }
 0x317   : > { %4202 = vmatpush1.bf16.msra.mxu0 %v7691_v19 }
 0x318   : > { %4203 = vmatprep.subr.bf16.mxu0 %v7692_v28 }
 0x31a   : > { %3766 = vmatmul.mubr.bf16.gmra.mrb[200].mxu0 %v7693_v33 }
 0x31b   : > { %3775 = vmatprep.mubr.bf16.mxu0 %v7694_v20  ;;  %4204 = vmatpush1.bf16.msra.mxu0 %v7695_v23  ;;  %v7735_v23 = vld [vmem:[%s8014_s28 + $0xb0] ss:$8 sps:$4 sm:$0xff]  }
 0x31c   : > { %4205 = vmatprep.subr.bf16.mxu0 %v7696_v38 }
 0x31f   : > { %4206 = vmatpush1.bf16.msra.mxu0 %v7697_v43 }
 0x320   : > { %4207 = vmatprep.subr.bf16.mxu0 %v7698_v44  ;;  %v7736_v44 = vld [vmem:[%s8014_s28 + $0xc4] ss:$8 sps:$4 sm:$0xff]  }
 0x322   : > { %3776 = vmatmul.mubr.bf16.gmra.mrb[204].mxu0 %v7699_v21 }
 0x323   : > { %3785 = vmatprep.mubr.bf16.mxu0 %v7700_v62  ;;  %4208 = vmatpush1.bf16.msra.mxu0 %v7701_v34 }
 0x324   : > { %4209 = vmatprep.subr.bf16.mxu0 %v7702_v41 }
 0x327   : > { %4210 = vmatpush1.bf16.msra.mxu0 %v7703_v46 }
 0x328   : > { %4211 = vmatprep.subr.bf16.mxu0 %v7704_v42 }
 0x32a   : > { %3786 = vmatmul.mubr.bf16.gmra.mrb[208].mxu0 %v7705_v13 }
 0x32b   : > { %3795 = vmatprep.mubr.bf16.mxu0 %v7706_v25  ;;  %4212 = vmatpush1.bf16.msra.mxu0 %v7707_v14 }
 0x32c   : > { %4213 = vmatprep.subr.bf16.mxu0 %v7708_v48 }
 0x32f   : > { %4214 = vmatpush1.bf16.msra.mxu0 %v7709_v6 }
 0x330   : > { %4215 = vmatprep.subr.bf16.mxu0 %v7710_v49 }
 0x332   : > { %3796 = vmatmul.mubr.bf16.gmra.mrb[212].mxu0 %v7711_v27 }
 0x333   : > { %3805 = vmatprep.mubr.bf16.mxu0 %v7712_v30  ;;  %4216 = vmatpush1.bf16.msra.mxu0 %v7713_v45 }
 0x334   : > { %4217 = vmatprep.subr.bf16.mxu0 %v7714_v58 }
 0x337   : > { %4218 = vmatpush1.bf16.msra.mxu0 %v7715_v11 }
 0x338   : > { %4219 = vmatprep.subr.bf16.mxu0 %v7716_v47 }
 0x33a   : > { %3806 = vmatmul.mubr.bf16.gmra.mrb[216].mxu0 %v7717_v56  ;;  %v7737_v56 = vld [vmem:[%s8014_s28 + $0xc0] ss:$8 sps:$4 sm:$0xff]  }
 0x33b   : > { %3815 = vmatprep.mubr.bf16.mxu0 %v7718_v12  ;;  %4220 = vmatpush1.bf16.msra.mxu0 %v7719_v36 }
 0x33c   : > { %4221 = vmatprep.subr.bf16.mxu0 %v7720_v53  ;;  %v7738_v53 = vld [vmem:[%s8014_s28 + $0xd4] ss:$8 sps:$4 sm:$0xff]  }
 0x33f   : > { %4222 = vmatpush1.bf16.msra.mxu0 %v7721_v39  ;;  %v9388_v39 = vld [vmem:[%s10646_s1 + $0x18] sm:$0xff] }
 0x340   : > { %4223 = vmatprep.subr.bf16.mxu0 %v7722_v50  ;;  %v9393_v50 = vld [vmem:[%s10646_s1 + $0x38] sm:$0xff] }
 0x342   : > { %3816 = vmatmul.mubr.bf16.gmra.mrb[220].mxu0 %v7723_v54 }
 0x343   : > { %3825 = vmatprep.mubr.bf16.mxu0 %v7724_v1  ;;  %4224 = vmatpush1.bf16.msra.mxu0 %v7725_v15  ;;  %v6911_v15 = vcombine.low %v9388_v39, %v9393_v50 }
 0x344   : > { %4225 = vmatprep.subr.bf16.mxu0 %v7726_v40  ;;  %v6912_v40 = vcombine.high %v9388_v39, %v9393_v50  ;;  %v4843_v39 = vld [vmem:[%s10646_s1 + $0xd8] sm:$0xff] }
 0x345   : > { %v4844_v50 = vld [vmem:[%s10646_s1 + $0xf8] sm:$0xff] }
 0x346   : > { %5041 = vmatprep.subr.bf16.mxu1 %v6912_v40 }
 0x347   : > { %4226 = vmatpush1.bf16.msra.mxu0 %v7727_v0 }
 0x348   : > { %5330 = vmatprep.subr.bf16.mxu0 %v7728_v3 }
 0x34a   : > { %3826 = vmatmul.mubr.bf16.gmra.mrb[224].mxu0 %v7729_v31 }
 0x34b   : > { %3835 = vmatprep.mubr.bf16.mxu0 %v7730_v17 }
 0x352   : > { %3836 = vmatmul.mubr.bf16.gmra.mrb[228].mxu0 %v7731_v4 }
 0x353   : > { %3845 = vmatprep.mubr.bf16.mxu0 %v7732_v51 }
 0x35a   : > { %3846 = vmatmul.mubr.bf16.gmra.mrb[232].mxu0 %v7733_v32 }
 0x35b   : > { %3855 = vmatprep.mubr.bf16.mxu0 %v7734_v52 }
 0x35d   : > { %v2709_v59 = vpop.f32.mrb[128].mxu0  ;;  %v2902_v60 = vpop.f32.mrb[128].mxu1 }
 0x35e   : > { %v2710_v35 = vadd.f32 %v2709_v59, %v8750_v24  ;;  %v2903_v5 = vadd.f32 %v2902_v60, %v8752_v22  ;;  %v2711_v29 = vpop.f32.mrb[129].mxu0  ;;  %v2904_v18 = vpop.f32.mrb[129].mxu1 }
 0x35f   : > { %v2712_v2 = vadd.f32 %v2711_v29, %v8756_v26  ;;  %v2905_v63 = vadd.f32 %v2904_v18, %v8758_v61  ;;  %v2713_v9 = vpop.f32.mrb[130].mxu0  ;;  %v2906_v55 = vpop.f32.mrb[130].mxu1 }
 0x360   : > { %v2714_v57 = vadd.f32 %v2713_v9, %v8750_v24  ;;  %v2907_v16 = vadd.f32 %v2906_v55, %v8752_v22  ;;  %v2715_v37 = vpop.f32.mrb[131].mxu0  ;;  %v2908_v7 = vpop.f32.mrb[131].mxu1  ;;  %v7739_v9 = vld [vmem:[%s8014_s28 + $0xd0] ss:$8 sps:$4 sm:$0xff]  }
 0x361   : > { %v7158_v19 = vpack.c.bf16 %v2712_v2, %v2710_v35  ;;  %v7159_v28 = vpack.c.bf16 %v2905_v63, %v2903_v5  ;;  %v2716_v33 = vadd.f32 %v2715_v37, %v8756_v26  ;;  %v2909_v20 = vadd.f32 %v2908_v7, %v8758_v61 }
 0x362   : > { %3856 = vmatmul.mubr.bf16.gmra.mrb[236].mxu0 %v7735_v23 }
 0x363   : > { %3445 = vst [vmem:[%s8770_s18 + $0x10] sm:$0xff] %v7158_v19  ;;  %3446 = vst [vmem:[%s8770_s18 + $0x18] sm:$0xff] %v7159_v28  ;;  %v7160_v38 = vpack.c.bf16 %v2716_v33, %v2714_v57  ;;  %v7161_v43 = vpack.c.bf16 %v2909_v20, %v2907_v16  ;;  %3865 = vmatprep.mubr.bf16.mxu0 %v7736_v44  ;;  %v7740_v16 = vld [vmem:[%s8014_s28 + $0xe4] ss:$8 sps:$4 sm:$0xff]  }
 0x365   : > { %3447 = vst [vmem:[%s8770_s18 + $0x30] sm:$0x77] %v7160_v38  ;;  %3448 = vst [vmem:[%s8770_s18 + $0x38] sm:$0x77] %v7161_v43  ;;  %v2719_v21 = vpop.f32.mrb[132].mxu0  ;;  %v2912_v62 = vpop.f32.mrb[132].mxu1 }
 0x366   : > { %v2720_v34 = vadd.f32 %v2719_v21, %v8750_v24  ;;  %v2913_v41 = vadd.f32 %v2912_v62, %v8752_v22  ;;  %v2721_v46 = vpop.f32.mrb[133].mxu0  ;;  %v2914_v42 = vpop.f32.mrb[133].mxu1 }
 0x367   : > { %v2722_v13 = vadd.f32 %v2721_v46, %v8756_v26  ;;  %v2915_v25 = vadd.f32 %v2914_v42, %v8758_v61  ;;  %v2723_v14 = vpop.f32.mrb[134].mxu0  ;;  %v2916_v48 = vpop.f32.mrb[134].mxu1 }
 0x368   : > { %v2724_v6 = vadd.f32 %v2723_v14, %v8750_v24  ;;  %v2917_v49 = vadd.f32 %v2916_v48, %v8752_v22  ;;  %v2725_v27 = vpop.f32.mrb[135].mxu0  ;;  %v2918_v30 = vpop.f32.mrb[135].mxu1  ;;  %v7741_v14 = vld [vmem:[%s8014_s28 + $0xe0] ss:$8 sps:$4 sm:$0xff]  }
 0x369   : > { %v7162_v45 = vpack.c.bf16 %v2722_v13, %v2720_v34  ;;  %v7163_v58 = vpack.c.bf16 %v2915_v25, %v2913_v41  ;;  %v2726_v11 = vadd.f32 %v2725_v27, %v8756_v26  ;;  %v2919_v47 = vadd.f32 %v2918_v30, %v8758_v61 }
 0x36a   : > { %3866 = vmatmul.mubr.bf16.gmra.mrb[240].mxu0 %v7737_v56 }
 0x36b   : > { %3449 = vst [vmem:[%s8770_s18 + $0x90] sm:$0xff] %v7162_v45  ;;  %3450 = vst [vmem:[%s8770_s18 + $0x98] sm:$0xff] %v7163_v58  ;;  %v7164_v12 = vpack.c.bf16 %v2726_v11, %v2724_v6  ;;  %v7165_v36 = vpack.c.bf16 %v2919_v47, %v2917_v49  ;;  %3875 = vmatprep.mubr.bf16.mxu0 %v7738_v53  ;;  %v7742_v49 = vld [vmem:[%s8014_s28 + $0xf4] ss:$8 sps:$4 sm:$0xff]  }
 0x36d   : > { %3451 = vst [vmem:[%s8770_s18 + $0xb0] sm:$0x77] %v7164_v12  ;;  %3452 = vst [vmem:[%s8770_s18 + $0xb8] sm:$0x77] %v7165_v36  ;;  %v2729_v54 = vpop.f32.mrb[136].mxu0  ;;  %v2922_v1 = vpop.f32.mrb[136].mxu1 }
 0x36e   : > { %v2730_v0 = vadd.f32 %v2729_v54, %v8750_v24  ;;  %v2923_v3 = vadd.f32 %v2922_v1, %v8752_v22  ;;  %v2731_v31 = vpop.f32.mrb[137].mxu0  ;;  %v2924_v17 = vpop.f32.mrb[137].mxu1 }
 0x36f   : > { %v2732_v4 = vadd.f32 %v2731_v31, %v8756_v26  ;;  %v2925_v51 = vadd.f32 %v2924_v17, %v8758_v61  ;;  %v2733_v32 = vpop.f32.mrb[138].mxu0  ;;  %v2926_v52 = vpop.f32.mrb[138].mxu1 }
 0x370   : > { %v2734_v59 = vadd.f32 %v2733_v32, %v8750_v24  ;;  %v2927_v60 = vadd.f32 %v2926_v52, %v8752_v22  ;;  %v2735_v35 = vpop.f32.mrb[139].mxu0  ;;  %v2928_v5 = vpop.f32.mrb[139].mxu1 }
 0x371   : > { %v7166_v29 = vpack.c.bf16 %v2732_v4, %v2730_v0  ;;  %v7167_v18 = vpack.c.bf16 %v2925_v51, %v2923_v3  ;;  %v2736_v2 = vadd.f32 %v2735_v35, %v8756_v26  ;;  %v2929_v63 = vadd.f32 %v2928_v5, %v8758_v61  ;;  %v7743_v51 = vld [vmem:[%s8014_s28 + $0xf0] ss:$8 sps:$4 sm:$0xff]  }
 0x372   : > { %3876 = vmatmul.mubr.bf16.gmra.mrb[244].mxu0 %v7739_v9 }
 0x373   : > { %3453 = vst [vmem:[%s8770_s18 + $0x110] sm:$0xff] %v7166_v29  ;;  %3454 = vst [vmem:[%s8770_s18 + $0x118] sm:$0xff] %v7167_v18  ;;  %v7168_v55 = vpack.c.bf16 %v2736_v2, %v2734_v59  ;;  %v7169_v57 = vpack.c.bf16 %v2929_v63, %v2927_v60  ;;  %3885 = vmatprep.mubr.bf16.mxu0 %v7740_v16 }
 0x375   : > { %3455 = vst [vmem:[%s8770_s18 + $0x130] sm:$0x77] %v7168_v55  ;;  %3456 = vst [vmem:[%s8770_s18 + $0x138] sm:$0x77] %v7169_v57  ;;  %v2739_v37 = vpop.f32.mrb[140].mxu0  ;;  %v2932_v7 = vpop.f32.mrb[140].mxu1 }
 0x376   : > { %v2740_v19 = vadd.f32 %v2739_v37, %v8750_v24  ;;  %v2933_v28 = vadd.f32 %v2932_v7, %v8752_v22  ;;  %v2741_v33 = vpop.f32.mrb[141].mxu0  ;;  %v2934_v20 = vpop.f32.mrb[141].mxu1 }
 0x377   : > { %v2742_v23 = vadd.f32 %v2741_v33, %v8756_v26  ;;  %v2935_v38 = vadd.f32 %v2934_v20, %v8758_v61  ;;  %v2743_v43 = vpop.f32.mrb[142].mxu0  ;;  %v2936_v44 = vpop.f32.mrb[142].mxu1 }
 0x378   : > { %v2744_v21 = vadd.f32 %v2743_v43, %v8750_v24  ;;  %v2937_v62 = vadd.f32 %v2936_v44, %v8752_v22  ;;  %v2745_v34 = vpop.f32.mrb[143].mxu0  ;;  %v2938_v41 = vpop.f32.mrb[143].mxu1 }
 0x379   : > { %v7170_v46 = vpack.c.bf16 %v2742_v23, %v2740_v19  ;;  %v7171_v42 = vpack.c.bf16 %v2935_v38, %v2933_v28  ;;  %v2746_v13 = vadd.f32 %v2745_v34, %v8756_v26  ;;  %v2939_v25 = vadd.f32 %v2938_v41, %v8758_v61 }
 0x37a   : > { %3886 = vmatmul.mubr.bf16.gmra.mrb[248].mxu0 %v7741_v14 }
 0x37b   : > { %3457 = vst [vmem:[%s8770_s18 + $0x190] sm:$0xff] %v7170_v46  ;;  %3458 = vst [vmem:[%s8770_s18 + $0x198] sm:$0xff] %v7171_v42  ;;  %v7172_v48 = vpack.c.bf16 %v2746_v13, %v2744_v21  ;;  %v7173_v6 = vpack.c.bf16 %v2939_v25, %v2937_v62  ;;  %3895 = vmatprep.mubr.bf16.mxu0 %v7742_v49 }
 0x37d   : > { %3459 = vst [vmem:[%s8770_s18 + $0x1b0] sm:$0x77] %v7172_v48  ;;  %3460 = vst [vmem:[%s8770_s18 + $0x1b8] sm:$0x77] %v7173_v6  ;;  %v2749_v27 = vpop.f32.mrb[144].mxu0  ;;  %v2942_v30 = vpop.f32.mrb[144].mxu1 }
 0x37e   : > { %v2750_v45 = vadd.f32 %v2749_v27, %v8750_v24  ;;  %v2943_v58 = vadd.f32 %v2942_v30, %v8752_v22  ;;  %v2751_v11 = vpop.f32.mrb[145].mxu0  ;;  %v2944_v47 = vpop.f32.mrb[145].mxu1 }
 0x37f   : > { %v2752_v56 = vadd.f32 %v2751_v11, %v8756_v26  ;;  %v2945_v12 = vadd.f32 %v2944_v47, %v8758_v61  ;;  %v2753_v36 = vpop.f32.mrb[146].mxu0  ;;  %v2946_v53 = vpop.f32.mrb[146].mxu1 }
 0x380   : > { %v2754_v54 = vadd.f32 %v2753_v36, %v8750_v24  ;;  %v2947_v1 = vadd.f32 %v2946_v53, %v8752_v22  ;;  %v2755_v40 = vpop.f32.mrb[147].mxu0  ;;  %v2948_v0 = vpop.f32.mrb[147].mxu1 }
 0x381   : > { %v7174_v3 = vpack.c.bf16 %v2752_v56, %v2750_v45  ;;  %v7175_v31 = vpack.c.bf16 %v2945_v12, %v2943_v58  ;;  %v2756_v17 = vadd.f32 %v2755_v40, %v8756_v26  ;;  %v2949_v4 = vadd.f32 %v2948_v0, %v8758_v61 }
 0x382   : > { %3896 = vmatmul.mubr.bf16.gmra.mrb[252].mxu0 %v7743_v51 }
 0x383   : > { %3461 = vst [vmem:[%s8770_s18 + $0x210] sm:$0xff] %v7174_v3  ;;  %3462 = vst [vmem:[%s8770_s18 + $0x218] sm:$0xff] %v7175_v31  ;;  %v7176_v32 = vpack.c.bf16 %v2756_v17, %v2754_v54  ;;  %v7177_v52 = vpack.c.bf16 %v2949_v4, %v2947_v1 }
 0x385   : > { %3463 = vst [vmem:[%s8770_s18 + $0x230] sm:$0x77] %v7176_v32  ;;  %3464 = vst [vmem:[%s8770_s18 + $0x238] sm:$0x77] %v7177_v52  ;;  %v2759_v59 = vpop.f32.mrb[148].mxu0  ;;  %v2952_v60 = vpop.f32.mrb[148].mxu1 }
 0x386   : > { %v2760_v35 = vadd.f32 %v2759_v59, %v8750_v24  ;;  %v2953_v5 = vadd.f32 %v2952_v60, %v8752_v22  ;;  %v2761_v29 = vpop.f32.mrb[149].mxu0  ;;  %v2954_v18 = vpop.f32.mrb[149].mxu1 }
 0x387   : > { %v2762_v2 = vadd.f32 %v2761_v29, %v8756_v26  ;;  %v2955_v63 = vadd.f32 %v2954_v18, %v8758_v61  ;;  %v2763_v9 = vpop.f32.mrb[150].mxu0  ;;  %v2956_v55 = vpop.f32.mrb[150].mxu1 }
 0x388   : > { %v2764_v57 = vadd.f32 %v2763_v9, %v8750_v24  ;;  %v2957_v16 = vadd.f32 %v2956_v55, %v8752_v22  ;;  %v2765_v37 = vpop.f32.mrb[151].mxu0  ;;  %v2958_v7 = vpop.f32.mrb[151].mxu1 }
 0x389   : > { %v7178_v19 = vpack.c.bf16 %v2762_v2, %v2760_v35  ;;  %v7179_v28 = vpack.c.bf16 %v2955_v63, %v2953_v5  ;;  %v2766_v33 = vadd.f32 %v2765_v37, %v8756_v26  ;;  %v2959_v20 = vadd.f32 %v2958_v7, %v8758_v61 }
 0x38b   : > { %3465 = vst [vmem:[%s8770_s18 + $0x290] sm:$0xff] %v7178_v19  ;;  %3466 = vst [vmem:[%s8770_s18 + $0x298] sm:$0xff] %v7179_v28  ;;  %v7180_v23 = vpack.c.bf16 %v2766_v33, %v2764_v57  ;;  %v7181_v38 = vpack.c.bf16 %v2959_v20, %v2957_v16 }
 0x38d   : > { %3467 = vst [vmem:[%s8770_s18 + $0x2b0] sm:$0x77] %v7180_v23  ;;  %3468 = vst [vmem:[%s8770_s18 + $0x2b8] sm:$0x77] %v7181_v38  ;;  %v2769_v43 = vpop.f32.mrb[152].mxu0  ;;  %v2962_v44 = vpop.f32.mrb[152].mxu1 }
 0x38e   : > { %v2770_v21 = vadd.f32 %v2769_v43, %v8750_v24  ;;  %v2963_v62 = vadd.f32 %v2962_v44, %v8752_v22  ;;  %v2771_v34 = vpop.f32.mrb[153].mxu0  ;;  %v2964_v41 = vpop.f32.mrb[153].mxu1 }
 0x38f   : > { %v2772_v46 = vadd.f32 %v2771_v34, %v8756_v26  ;;  %v2965_v42 = vadd.f32 %v2964_v41, %v8758_v61  ;;  %v2773_v13 = vpop.f32.mrb[154].mxu0  ;;  %v2966_v25 = vpop.f32.mrb[154].mxu1 }
 0x390   : > { %v2774_v14 = vadd.f32 %v2773_v13, %v8750_v24  ;;  %v2967_v48 = vadd.f32 %v2966_v25, %v8752_v22  ;;  %v2775_v6 = vpop.f32.mrb[155].mxu0  ;;  %v2968_v49 = vpop.f32.mrb[155].mxu1 }
 0x391   : > { %v7182_v27 = vpack.c.bf16 %v2772_v46, %v2770_v21  ;;  %v7183_v30 = vpack.c.bf16 %v2965_v42, %v2963_v62  ;;  %v2776_v45 = vadd.f32 %v2775_v6, %v8756_v26  ;;  %v2969_v58 = vadd.f32 %v2968_v49, %v8758_v61 }
 0x393   : > { %3469 = vst [vmem:[%s8770_s18 + $0x310] sm:$0xff] %v7182_v27  ;;  %3470 = vst [vmem:[%s8770_s18 + $0x318] sm:$0xff] %v7183_v30  ;;  %v7184_v11 = vpack.c.bf16 %v2776_v45, %v2774_v14  ;;  %v7185_v47 = vpack.c.bf16 %v2969_v58, %v2967_v48 }
 0x395   : > { %3471 = vst [vmem:[%s8770_s18 + $0x330] sm:$0x77] %v7184_v11  ;;  %3472 = vst [vmem:[%s8770_s18 + $0x338] sm:$0x77] %v7185_v47  ;;  %v2779_v56 = vpop.f32.mrb[156].mxu0  ;;  %v2972_v12 = vpop.f32.mrb[156].mxu1 }
 0x396   : > { %v2780_v36 = vadd.f32 %v2779_v56, %v8750_v24  ;;  %v2973_v53 = vadd.f32 %v2972_v12, %v8752_v22  ;;  %v2781_v54 = vpop.f32.mrb[157].mxu0  ;;  %v2974_v1 = vpop.f32.mrb[157].mxu1 }
 0x397   : > { %v2782_v40 = vadd.f32 %v2781_v54, %v8756_v26  ;;  %v2975_v0 = vadd.f32 %v2974_v1, %v8758_v61  ;;  %v2783_v3 = vpop.f32.mrb[158].mxu0  ;;  %v2976_v31 = vpop.f32.mrb[158].mxu1 }
 0x398   : > { %v2784_v17 = vadd.f32 %v2783_v3, %v8750_v24  ;;  %v2977_v4 = vadd.f32 %v2976_v31, %v8752_v22  ;;  %v2785_v51 = vpop.f32.mrb[159].mxu0  ;;  %v2978_v32 = vpop.f32.mrb[159].mxu1 }
 0x399   : > { %v7186_v52 = vpack.c.bf16 %v2782_v40, %v2780_v36  ;;  %v7187_v59 = vpack.c.bf16 %v2975_v0, %v2973_v53  ;;  %v2786_v60 = vadd.f32 %v2785_v51, %v8756_v26  ;;  %v2979_v35 = vadd.f32 %v2978_v32, %v8758_v61 }
 0x39b   : > { %3473 = vst [vmem:[%s8770_s18 + $0x390] sm:$0xff] %v7186_v52  ;;  %3474 = vst [vmem:[%s8770_s18 + $0x398] sm:$0xff] %v7187_v59  ;;  %v7188_v5 = vpack.c.bf16 %v2786_v60, %v2784_v17  ;;  %v7189_v29 = vpack.c.bf16 %v2979_v35, %v2977_v4 }
 0x39d   : > { %3475 = vst [vmem:[%s8770_s18 + $0x3b0] sm:$0x77] %v7188_v5  ;;  %3476 = vst [vmem:[%s8770_s18 + $0x3b8] sm:$0x77] %v7189_v29  ;;  %v2789_v18 = vpop.f32.mrb[160].mxu0  ;;  %v2982_v2 = vpop.f32.mrb[160].mxu1 }
 0x39e   : > { %v2790_v63 = vadd.f32 %v2789_v18, %v8750_v24  ;;  %v2983_v9 = vadd.f32 %v2982_v2, %v8752_v22  ;;  %v2791_v55 = vpop.f32.mrb[161].mxu0  ;;  %v2984_v57 = vpop.f32.mrb[161].mxu1 }
 0x39f   : > { %v2792_v16 = vadd.f32 %v2791_v55, %v8756_v26  ;;  %v2985_v37 = vadd.f32 %v2984_v57, %v8758_v61  ;;  %v2793_v7 = vpop.f32.mrb[162].mxu0  ;;  %v2986_v19 = vpop.f32.mrb[162].mxu1 }
 0x3a0   : > { %v2794_v28 = vadd.f32 %v2793_v7, %v8750_v24  ;;  %v2987_v33 = vadd.f32 %v2986_v19, %v8752_v22  ;;  %v2795_v20 = vpop.f32.mrb[163].mxu0  ;;  %v2988_v23 = vpop.f32.mrb[163].mxu1 }
 0x3a1   : > { %v7190_v38 = vpack.c.bf16 %v2792_v16, %v2790_v63  ;;  %v7191_v43 = vpack.c.bf16 %v2985_v37, %v2983_v9  ;;  %v2796_v44 = vadd.f32 %v2795_v20, %v8756_v26  ;;  %v2989_v21 = vadd.f32 %v2988_v23, %v8758_v61 }
 0x3a3   : > { %3477 = vst [vmem:[%s8770_s18 + $0x410] sm:$0xff] %v7190_v38  ;;  %3478 = vst [vmem:[%s8770_s18 + $0x418] sm:$0xff] %v7191_v43  ;;  %v7192_v62 = vpack.c.bf16 %v2796_v44, %v2794_v28  ;;  %v7193_v34 = vpack.c.bf16 %v2989_v21, %v2987_v33 }
 0x3a5   : > { %3479 = vst [vmem:[%s8770_s18 + $0x430] sm:$0x77] %v7192_v62  ;;  %3480 = vst [vmem:[%s8770_s18 + $0x438] sm:$0x77] %v7193_v34  ;;  %v2799_v41 = vpop.f32.mrb[164].mxu0  ;;  %v2992_v46 = vpop.f32.mrb[164].mxu1 }
 0x3a6   : > { %v2800_v42 = vadd.f32 %v2799_v41, %v8750_v24  ;;  %v2993_v13 = vadd.f32 %v2992_v46, %v8752_v22  ;;  %v2801_v25 = vpop.f32.mrb[165].mxu0  ;;  %v2994_v14 = vpop.f32.mrb[165].mxu1 }
 0x3a7   : > { %v2802_v48 = vadd.f32 %v2801_v25, %v8756_v26  ;;  %v2995_v6 = vadd.f32 %v2994_v14, %v8758_v61  ;;  %v2803_v49 = vpop.f32.mrb[166].mxu0  ;;  %v2996_v27 = vpop.f32.mrb[166].mxu1 }
 0x3a8   : > { %v2804_v30 = vadd.f32 %v2803_v49, %v8750_v24  ;;  %v2997_v45 = vadd.f32 %v2996_v27, %v8752_v22  ;;  %v2805_v58 = vpop.f32.mrb[167].mxu0  ;;  %v2998_v11 = vpop.f32.mrb[167].mxu1 }
 0x3a9   : > { %v7194_v47 = vpack.c.bf16 %v2802_v48, %v2800_v42  ;;  %v7195_v56 = vpack.c.bf16 %v2995_v6, %v2993_v13  ;;  %v2806_v12 = vadd.f32 %v2805_v58, %v8756_v26  ;;  %v2999_v36 = vadd.f32 %v2998_v11, %v8758_v61 }
 0x3ab   : > { %3481 = vst [vmem:[%s8770_s18 + $0x490] sm:$0xff] %v7194_v47  ;;  %3482 = vst [vmem:[%s8770_s18 + $0x498] sm:$0xff] %v7195_v56  ;;  %v7196_v53 = vpack.c.bf16 %v2806_v12, %v2804_v30  ;;  %v7197_v54 = vpack.c.bf16 %v2999_v36, %v2997_v45 }
 0x3ad   : > { %3483 = vst [vmem:[%s8770_s18 + $0x4b0] sm:$0x77] %v7196_v53  ;;  %3484 = vst [vmem:[%s8770_s18 + $0x4b8] sm:$0x77] %v7197_v54  ;;  %v2809_v1 = vpop.f32.mrb[168].mxu0  ;;  %v3002_v40 = vpop.f32.mrb[168].mxu1 }
 0x3ae   : > { %v2810_v0 = vadd.f32 %v2809_v1, %v8750_v24  ;;  %v3003_v3 = vadd.f32 %v3002_v40, %v8752_v22  ;;  %v2811_v31 = vpop.f32.mrb[169].mxu0  ;;  %v3004_v17 = vpop.f32.mrb[169].mxu1 }
 0x3af   : > { %v2812_v4 = vadd.f32 %v2811_v31, %v8756_v26  ;;  %v3005_v51 = vadd.f32 %v3004_v17, %v8758_v61  ;;  %v2813_v32 = vpop.f32.mrb[170].mxu0  ;;  %v3006_v52 = vpop.f32.mrb[170].mxu1 }
 0x3b0   : > { %v2814_v59 = vadd.f32 %v2813_v32, %v8750_v24  ;;  %v3007_v60 = vadd.f32 %v3006_v52, %v8752_v22  ;;  %v2815_v35 = vpop.f32.mrb[171].mxu0  ;;  %v3008_v5 = vpop.f32.mrb[171].mxu1 }
 0x3b1   : > { %v7198_v29 = vpack.c.bf16 %v2812_v4, %v2810_v0  ;;  %v7199_v18 = vpack.c.bf16 %v3005_v51, %v3003_v3  ;;  %v2816_v2 = vadd.f32 %v2815_v35, %v8756_v26  ;;  %v3009_v63 = vadd.f32 %v3008_v5, %v8758_v61 }
 0x3b3   : > { %3485 = vst [vmem:[%s8770_s18 + $0x510] sm:$0xff] %v7198_v29  ;;  %3486 = vst [vmem:[%s8770_s18 + $0x518] sm:$0xff] %v7199_v18  ;;  %v7200_v9 = vpack.c.bf16 %v2816_v2, %v2814_v59  ;;  %v7201_v55 = vpack.c.bf16 %v3009_v63, %v3007_v60 }
 0x3b5   : > { %3487 = vst [vmem:[%s8770_s18 + $0x530] sm:$0x77] %v7200_v9  ;;  %3488 = vst [vmem:[%s8770_s18 + $0x538] sm:$0x77] %v7201_v55  ;;  %v2819_v57 = vpop.f32.mrb[172].mxu0  ;;  %v3012_v16 = vpop.f32.mrb[172].mxu1 }
 0x3b6   : > { %v2820_v37 = vadd.f32 %v2819_v57, %v8750_v24  ;;  %v3013_v7 = vadd.f32 %v3012_v16, %v8752_v22  ;;  %v2821_v19 = vpop.f32.mrb[173].mxu0  ;;  %v3014_v28 = vpop.f32.mrb[173].mxu1 }
 0x3b7   : > { %v2822_v33 = vadd.f32 %v2821_v19, %v8756_v26  ;;  %v3015_v20 = vadd.f32 %v3014_v28, %v8758_v61  ;;  %v2823_v23 = vpop.f32.mrb[174].mxu0  ;;  %v3016_v38 = vpop.f32.mrb[174].mxu1 }
 0x3b8   : > { %v2824_v43 = vadd.f32 %v2823_v23, %v8750_v24  ;;  %v3017_v44 = vadd.f32 %v3016_v38, %v8752_v22  ;;  %v2825_v21 = vpop.f32.mrb[175].mxu0  ;;  %v3018_v62 = vpop.f32.mrb[175].mxu1 }
 0x3b9   : > { %v7202_v34 = vpack.c.bf16 %v2822_v33, %v2820_v37  ;;  %v7203_v41 = vpack.c.bf16 %v3015_v20, %v3013_v7  ;;  %v2826_v46 = vadd.f32 %v2825_v21, %v8756_v26  ;;  %v3019_v42 = vadd.f32 %v3018_v62, %v8758_v61 }
 0x3bb   : > { %3489 = vst [vmem:[%s8770_s18 + $0x590] sm:$0xff] %v7202_v34  ;;  %3490 = vst [vmem:[%s8770_s18 + $0x598] sm:$0xff] %v7203_v41  ;;  %v7204_v13 = vpack.c.bf16 %v2826_v46, %v2824_v43  ;;  %v7205_v25 = vpack.c.bf16 %v3019_v42, %v3017_v44 }
 0x3bd   : > { %3491 = vst [vmem:[%s8770_s18 + $0x5b0] sm:$0x77] %v7204_v13  ;;  %3492 = vst [vmem:[%s8770_s18 + $0x5b8] sm:$0x77] %v7205_v25  ;;  %v2829_v14 = vpop.f32.mrb[176].mxu0  ;;  %v3022_v48 = vpop.f32.mrb[176].mxu1 }
 0x3be   : > { %v2830_v6 = vadd.f32 %v2829_v14, %v8750_v24  ;;  %v3023_v49 = vadd.f32 %v3022_v48, %v8752_v22  ;;  %v2831_v27 = vpop.f32.mrb[177].mxu0  ;;  %v3024_v30 = vpop.f32.mrb[177].mxu1 }
 0x3bf   : > { %v2832_v45 = vadd.f32 %v2831_v27, %v8756_v26  ;;  %v3025_v58 = vadd.f32 %v3024_v30, %v8758_v61  ;;  %v2833_v11 = vpop.f32.mrb[178].mxu0  ;;  %v3026_v47 = vpop.f32.mrb[178].mxu1 }
 0x3c0   : > { %v2834_v56 = vadd.f32 %v2833_v11, %v8750_v24  ;;  %v3027_v12 = vadd.f32 %v3026_v47, %v8752_v22  ;;  %v2835_v36 = vpop.f32.mrb[179].mxu0  ;;  %v3028_v53 = vpop.f32.mrb[179].mxu1 }
 0x3c1   : > { %v7206_v54 = vpack.c.bf16 %v2832_v45, %v2830_v6  ;;  %v7207_v1 = vpack.c.bf16 %v3025_v58, %v3023_v49  ;;  %v2836_v40 = vadd.f32 %v2835_v36, %v8756_v26  ;;  %v3029_v0 = vadd.f32 %v3028_v53, %v8758_v61 }
 0x3c3   : > { %3493 = vst [vmem:[%s8770_s18 + $0x610] sm:$0xff] %v7206_v54  ;;  %3494 = vst [vmem:[%s8770_s18 + $0x618] sm:$0xff] %v7207_v1  ;;  %v7208_v3 = vpack.c.bf16 %v2836_v40, %v2834_v56  ;;  %v7209_v31 = vpack.c.bf16 %v3029_v0, %v3027_v12  ;;  %v3541_v1 = vld [vmem:[%s10647_s2 + $0x4] sm:$0x3] }
 0x3c5   : > { %3495 = vst [vmem:[%s8770_s18 + $0x630] sm:$0x77] %v7208_v3  ;;  %3496 = vst [vmem:[%s8770_s18 + $0x638] sm:$0x77] %v7209_v31  ;;  %v2839_v17 = vpop.f32.mrb[180].mxu0  ;;  %v3032_v4 = vpop.f32.mrb[180].mxu1 }
 0x3c6   : > { %v2840_v51 = vadd.f32 %v2839_v17, %v8750_v24  ;;  %v3033_v32 = vadd.f32 %v3032_v4, %v8752_v22  ;;  %v2841_v52 = vpop.f32.mrb[181].mxu0  ;;  %v3034_v59 = vpop.f32.mrb[181].mxu1 }
 0x3c7   : > { %v2842_v60 = vadd.f32 %v2841_v52, %v8756_v26  ;;  %v3035_v35 = vadd.f32 %v3034_v59, %v8758_v61  ;;  %v2843_v5 = vpop.f32.mrb[182].mxu0  ;;  %v3036_v29 = vpop.f32.mrb[182].mxu1  ;;  %v9574_v52 = vrot.slane %v3541_v1, %v8436_v8 }
 0x3c8   : > { %v2844_v18 = vadd.f32 %v2843_v5, %v8750_v24  ;;  %v3037_v2 = vadd.f32 %v3036_v29, %v8752_v22  ;;  %v2845_v63 = vpop.f32.mrb[183].mxu0  ;;  %v3038_v9 = vpop.f32.mrb[183].mxu1 }
 0x3c9   : > { %v7210_v55 = vpack.c.bf16 %v2842_v60, %v2840_v51  ;;  %v7211_v57 = vpack.c.bf16 %v3035_v35, %v3033_v32  ;;  %v2846_v16 = vadd.f32 %v2845_v63, %v8756_v26  ;;  %v3039_v37 = vadd.f32 %v3038_v9, %v8758_v61 }
 0x3ca   : > { %v9579_v35 = vrot.slane %v3541_v1, %v8442_v10  ;;  %v7747_v1 = vld [vmem:[%s10648_s3 + $0x44] ss:$16 sps:$4 sm:$0xff]  }
 0x3cb   : > { %3497 = vst [vmem:[%s8770_s18 + $0x690] sm:$0xff] %v7210_v55  ;;  %3498 = vst [vmem:[%s8770_s18 + $0x698] sm:$0xff] %v7211_v57  ;;  %v7212_v7 = vpack.c.bf16 %v2846_v16, %v2844_v18  ;;  %v7213_v19 = vpack.c.bf16 %v3039_v37, %v3037_v2 }
 0x3cd   : > { %3499 = vst [vmem:[%s8770_s18 + $0x6b0] sm:$0x77] %v7212_v7  ;;  %3500 = vst [vmem:[%s8770_s18 + $0x6b8] sm:$0x77] %v7213_v19  ;;  %v2849_v28 = vpop.f32.mrb[184].mxu0  ;;  %v3042_v33 = vpop.f32.mrb[184].mxu1 }
 0x3ce   : > { %v2850_v20 = vadd.f32 %v2849_v28, %v8750_v24  ;;  %v3043_v23 = vadd.f32 %v3042_v33, %v8752_v22  ;;  %v2851_v38 = vpop.f32.mrb[185].mxu0  ;;  %v3044_v43 = vpop.f32.mrb[185].mxu1  ;;  %v4839_v28 = vld [vmem:[%s10646_s1 + $0x58] sm:$0xff] }
 0x3cf   : > { %v2852_v44 = vadd.f32 %v2851_v38, %v8756_v26  ;;  %v3045_v21 = vadd.f32 %v3044_v43, %v8758_v61  ;;  %v2853_v62 = vpop.f32.mrb[186].mxu0  ;;  %v3046_v34 = vpop.f32.mrb[186].mxu1  ;;  %v4840_v33 = vld [vmem:[%s10646_s1 + $0x78] sm:$0xff] }
 0x3d0   : > { %v2854_v41 = vadd.f32 %v2853_v62, %v8750_v24  ;;  %v3047_v46 = vadd.f32 %v3046_v34, %v8752_v22  ;;  %v2855_v42 = vpop.f32.mrb[187].mxu0  ;;  %v3048_v13 = vpop.f32.mrb[187].mxu1 }
 0x3d1   : > { %v7214_v25 = vpack.c.bf16 %v2852_v44, %v2850_v20  ;;  %v7215_v14 = vpack.c.bf16 %v3045_v21, %v3043_v23  ;;  %v2856_v48 = vadd.f32 %v2855_v42, %v8756_v26  ;;  %v3049_v6 = vadd.f32 %v3048_v13, %v8758_v61 }
 0x3d2   : > { %v6914_v21 = vcombine.high %v4839_v28, %v4840_v33 }
 0x3d3   : > { %3501 = vst [vmem:[%s8770_s18 + $0x710] sm:$0xff] %v7214_v25  ;;  %3502 = vst [vmem:[%s8770_s18 + $0x718] sm:$0xff] %v7215_v14  ;;  %v7216_v49 = vpack.c.bf16 %v2856_v48, %v2854_v41  ;;  %v7217_v27 = vpack.c.bf16 %v3049_v6, %v3047_v46  ;;  %v4841_v41 = vld [vmem:[%s10646_s1 + $0x98] sm:$0xff]  ;;  %v6913_v14 = vcombine.low %v4839_v28, %v4840_v33  ;;  %v7744_v48 = vld [vmem:[%s10648_s3] ss:$16 sps:$4 sm:$0xff]  }
 0x3d4   : > { %v4842_v46 = vld [vmem:[%s10646_s1 + $0xb8] sm:$0xff] }
 0x3d5   : > { %3503 = vst [vmem:[%s8770_s18 + $0x730] sm:$0x77] %v7216_v49  ;;  %3504 = vst [vmem:[%s8770_s18 + $0x738] sm:$0x77] %v7217_v27  ;;  %v2859_v30 = vpop.f32.mrb[188].mxu0  ;;  %v3052_v45 = vpop.f32.mrb[188].mxu1  ;;  %v6916_v27 = vcombine.high %v4841_v41, %v4842_v46 }
 0x3d6   : > { %v2860_v58 = vadd.f32 %v2859_v30, %v8750_v24  ;;  %v3053_v11 = vadd.f32 %v3052_v45, %v8752_v22  ;;  %v2861_v47 = vpop.f32.mrb[189].mxu0  ;;  %v3054_v56 = vpop.f32.mrb[189].mxu1  ;;  %v7745_v30 = vld [vmem:[%s10648_s3 + $0x24] ss:$16 sps:$4 sm:$0xff]  }
 0x3d7   : > { %v2862_v12 = vadd.f32 %v2861_v47, %v8756_v26  ;;  %v3055_v36 = vadd.f32 %v3054_v56, %v8758_v61  ;;  %v2863_v53 = vpop.f32.mrb[190].mxu0  ;;  %v3056_v54 = vpop.f32.mrb[190].mxu1  ;;  %v6915_v56 = vcombine.low %v4841_v41, %v4842_v46 }
 0x3d8   : > { %v2864_v40 = vadd.f32 %v2863_v53, %v8750_v24  ;;  %v3057_v0 = vadd.f32 %v3056_v54, %v8752_v22  ;;  %v2865_v3 = vpop.f32.mrb[191].mxu0  ;;  %v3058_v31 = vpop.f32.mrb[191].mxu1  ;;  %v6918_v54 = vcombine.high %v4843_v39, %v4844_v50 }
 0x3d9   : > { %v7218_v17 = vpack.c.bf16 %v2862_v12, %v2860_v58  ;;  %v7219_v4 = vpack.c.bf16 %v3055_v36, %v3053_v11  ;;  %v2866_v51 = vadd.f32 %v2865_v3, %v8756_v26  ;;  %v3059_v32 = vadd.f32 %v3058_v31, %v8758_v61  ;;  %v7746_v12 = vld [vmem:[%s10648_s3 + $0x20] ss:$16 sps:$4 sm:$0xff]   ;;  %v4845_v3 = vld [vmem:[%s10646_s1 + $0x118] sm:$0xff] }
 0x3da   : > { %v4846_v31 = vld [vmem:[%s10646_s1 + $0x138] sm:$0xff] }
 0x3db   : > { %3505 = vst [vmem:[%s8770_s18 + $0x790] sm:$0xff] %v7218_v17  ;;  %3506 = vst [vmem:[%s8770_s18 + $0x798] sm:$0xff] %v7219_v4  ;;  %v7220_v59 = vpack.c.bf16 %v2866_v51, %v2864_v40  ;;  %v7221_v60 = vpack.c.bf16 %v3059_v32, %v3057_v0  ;;  %v6917_v32 = vcombine.low %v4843_v39, %v4844_v50 }
 0x3dd   : > { %3507 = vst [vmem:[%s8770_s18 + $0x7b0] sm:$0x77] %v7220_v59  ;;  %3508 = vst [vmem:[%s8770_s18 + $0x7b8] sm:$0x77] %v7221_v60  ;;  %v3747_v5 = vpop.f32.mrb[192].mxu0 }
 0x3de   : > { %v3748_v29 = vadd.f32 %v3747_v5, %v9574_v52  ;;  %v3749_v18 = vpop.f32.mrb[193].mxu0  ;;  %v7748_v59 = vld [vmem:[%s10648_s3 + $0x40] ss:$16 sps:$4 sm:$0xff]  }
 0x3df   : > { %v3750_v2 = vadd.f32 %v3749_v18, %v9579_v35  ;;  %v3751_v63 = vpop.f32.mrb[194].mxu0  ;;  %v7749_v18 = vld [vmem:[%s10648_s3 + $0x64] ss:$16 sps:$4 sm:$0xff]  }
 0x3e0   : > { %v3752_v9 = vadd.f32 %v3751_v63, %v9574_v52  ;;  %v3753_v55 = vpop.f32.mrb[195].mxu0  ;;  %v3906_v16 = vmax.f32 %v3748_v29, 0.0  ;;  %v6920_v29 = vcombine.high %v4845_v3, %v4846_v31 }
 0x3e1   : > { %v3754_v57 = vadd.f32 %v3753_v55, %v9579_v35  ;;  %v3907_v7 = vmax.f32 %v3750_v2, 0.0  ;;  %v4848_v55 = vld [vmem:[%s10646_s1 + $0x178] sm:$0xff] }
 0x3e2   : > { %v3908_v37 = vmax.f32 %v3752_v9, 0.0  ;;  %v4847_v9 = vld [vmem:[%s10646_s1 + $0x158] sm:$0xff] }
 0x3e3   : > { %v3909_v19 = vmax.f32 %v3754_v57, 0.0  ;;  %v6921_v46 = vcombine.low %v4847_v9, %v4848_v55 }
 0x3e4   : > { %v3970_v20 = vpack.c.bf16 %v3908_v37, %v3906_v16 }
 0x3e5   : > { %v3971_v23 = vpack.c.bf16 %v3909_v19, %v3907_v7  ;;  %v3757_v38 = vpop.f32.mrb[196].mxu0  ;;  %v6919_v7 = vcombine.low %v4845_v3, %v4846_v31  ;;  %v7750_v19 = vld [vmem:[%s10648_s3 + $0x60] ss:$16 sps:$4 sm:$0xff]  }
 0x3e6   : > { %v3758_v43 = vadd.f32 %v3757_v38, %v9574_v52  ;;  %v3759_v44 = vpop.f32.mrb[197].mxu0 }
 0x3e7   : > { %v3760_v62 = vadd.f32 %v3759_v44, %v9579_v35  ;;  %v3761_v34 = vpop.f32.mrb[198].mxu0  ;;  %4034 = vmatprep.mubr.bf16.mxu1 %v3971_v23  ;;  %4227 = vmatprep.mubr.bf16.mxu0 %v3971_v23  ;;  %v7751_v23 = vld [vmem:[%s10648_s3 + $0x84] ss:$16 sps:$4 sm:$0xff]   ;;  %v4849_v44 = vld [vmem:[%s10646_s1 + $0x198] sm:$0xff] }
 0x3e8   : > { %v3762_v42 = vadd.f32 %v3761_v34, %v9574_v52  ;;  %v3763_v13 = vpop.f32.mrb[199].mxu0  ;;  %4035 = vmatmul.mubr.bf16.vlgmr.msra.gmra.mrb[192].mxu1 %v3970_v20  ;;  %4228 = vmatmul.mubr.bf16.vlgmr.msra.gmra.mrb[0].mxu0 %v3970_v20  ;;  %v3910_v6 = vmax.f32 %v3758_v43, 0.0  ;;  %v6922_v20 = vcombine.high %v4847_v9, %v4848_v55 }
 0x3e9   : > { %v3764_v25 = vadd.f32 %v3763_v13, %v9579_v35  ;;  %5042 = vmatpush1.bf16.msra.mxu1 %v6911_v15  ;;  %5331 = vmatpush1.bf16.msra.mxu0 %v7744_v48  ;;  %v3911_v45 = vmax.f32 %v3760_v62, 0.0  ;;  %v7753_v48 = vld [vmem:[%s10648_s3 + $0xa4] ss:$16 sps:$4 sm:$0xff]  }
 0x3ea   : > { %v3912_v49 = vmax.f32 %v3762_v42, 0.0  ;;  %5043 = vmatprep.subr.bf16.mxu1 %v6914_v21  ;;  %5332 = vmatprep.subr.bf16.mxu0 %v7745_v30  ;;  %v4850_v21 = vld [vmem:[%s10646_s1 + $0x1b8] sm:$0xff]  ;;  %v7752_v42 = vld [vmem:[%s10648_s3 + $0x80] ss:$16 sps:$4 sm:$0xff]  }
 0x3eb   : > { %v3913_v58 = vmax.f32 %v3764_v25, 0.0  ;;  %v4852_v30 = vld [vmem:[%s10646_s1 + $0x1f8] sm:$0xff]  ;;  %v6923_v50 = vcombine.low %v4849_v44, %v4850_v21 }
 0x3ec   : > { %v3972_v15 = vpack.c.bf16 %v3912_v49, %v3910_v6 }
 0x3ed   : > { %v3973_v11 = vpack.c.bf16 %v3913_v58, %v3911_v45  ;;  %v3767_v47 = vpop.f32.mrb[200].mxu0  ;;  %5044 = vmatpush1.bf16.msra.mxu1 %v6913_v14  ;;  %5333 = vmatpush1.bf16.msra.mxu0 %v7746_v12  ;;  %v6924_v14 = vcombine.high %v4849_v44, %v4850_v21  ;;  %v7755_v12 = vld [vmem:[%s10648_s3 + $0xc4] ss:$16 sps:$4 sm:$0xff]  }
 0x3ee   : > { %v3768_v36 = vadd.f32 %v3767_v47, %v9574_v52  ;;  %v3769_v53 = vpop.f32.mrb[201].mxu0  ;;  %5045 = vmatprep.subr.bf16.mxu1 %v6916_v27  ;;  %5334 = vmatprep.subr.bf16.mxu0 %v7747_v1  ;;  %v4851_v27 = vld [vmem:[%s10646_s1 + $0x1d8] sm:$0xff] }
 0x3ef   : > { %v3770_v40 = vadd.f32 %v3769_v53, %v9579_v35  ;;  %v3771_v0 = vpop.f32.mrb[202].mxu0  ;;  %4044 = vmatprep.mubr.bf16.mxu1 %v3973_v11  ;;  %4237 = vmatprep.mubr.bf16.mxu0 %v3973_v11  ;;  %v4854_v1 = vld [vmem:[%s10646_s1 + $0x238] sm:$0xff]  ;;  %v6925_v31 = vcombine.low %v4851_v27, %v4852_v30 }
 0x3f0   : > { %v3772_v17 = vadd.f32 %v3771_v0, %v9574_v52  ;;  %v3773_v4 = vpop.f32.mrb[203].mxu0  ;;  %4045 = vmatmul.mubr.bf16.gmra.mrb[196].mxu1 %v3972_v15  ;;  %4238 = vmatmul.mubr.bf16.gmra.mrb[4].mxu0 %v3972_v15  ;;  %v3914_v60 = vmax.f32 %v3768_v36, 0.0  ;;  %v7754_v15 = vld [vmem:[%s10648_s3 + $0xa0] ss:$16 sps:$4 sm:$0xff]  }
 0x3f1   : > { %v3774_v51 = vadd.f32 %v3773_v4, %v9579_v35  ;;  %5046 = vmatpush1.bf16.msra.mxu1 %v6915_v56  ;;  %5335 = vmatpush1.bf16.msra.mxu0 %v7748_v59  ;;  %v3915_v2 = vmax.f32 %v3770_v40, 0.0  ;;  %v6926_v56 = vcombine.high %v4851_v27, %v4852_v30  ;;  %v7757_v59 = vld [vmem:[%s10648_s3 + $0xe4] ss:$16 sps:$4 sm:$0xff]  }
 0x3f2   : > { %v3916_v5 = vmax.f32 %v3772_v17, 0.0  ;;  %5047 = vmatprep.subr.bf16.mxu1 %v6918_v54  ;;  %5336 = vmatprep.subr.bf16.mxu0 %v7749_v18  ;;  %v4853_v54 = vld [vmem:[%s10646_s1 + $0x218] sm:$0xff]  ;;  %v7756_v17 = vld [vmem:[%s10648_s3 + $0xc0] ss:$16 sps:$4 sm:$0xff]  }
 0x3f3   : > { %v3917_v63 = vmax.f32 %v3774_v51, 0.0  ;;  %v4856_v18 = vld [vmem:[%s10646_s1 + $0x278] sm:$0xff]  ;;  %v6927_v55 = vcombine.low %v4853_v54, %v4854_v1 }
 0x3f4   : > { %v3974_v57 = vpack.c.bf16 %v3916_v5, %v3914_v60 }
 0x3f5   : > { %v3975_v16 = vpack.c.bf16 %v3917_v63, %v3915_v2  ;;  %v3777_v37 = vpop.f32.mrb[204].mxu0  ;;  %5048 = vmatpush1.bf16.msra.mxu1 %v6917_v32  ;;  %5337 = vmatpush1.bf16.msra.mxu0 %v7750_v19  ;;  %v6928_v32 = vcombine.high %v4853_v54, %v4854_v1  ;;  %v7759_v19 = vld [vmem:[%s10648_s3 + $0x104] ss:$16 sps:$4 sm:$0xff]  }
 0x3f6   : > { %v3778_v28 = vadd.f32 %v3777_v37, %v9574_v52  ;;  %v3779_v33 = vpop.f32.mrb[205].mxu0  ;;  %5049 = vmatprep.subr.bf16.mxu1 %v6920_v29  ;;  %5338 = vmatprep.subr.bf16.mxu0 %v7751_v23  ;;  %v4855_v29 = vld [vmem:[%s10646_s1 + $0x258] sm:$0xff] }
 0x3f7   : > { %v3780_v38 = vadd.f32 %v3779_v33, %v9579_v35  ;;  %v3781_v43 = vpop.f32.mrb[206].mxu0  ;;  %4054 = vmatprep.mubr.bf16.mxu1 %v3975_v16  ;;  %4247 = vmatprep.mubr.bf16.mxu0 %v3975_v16  ;;  %v4858_v23 = vld [vmem:[%s10646_s1 + $0x2b8] sm:$0xff]  ;;  %v6929_v21 = vcombine.low %v4855_v29, %v4856_v18 }
 0x3f8   : > { %v3782_v62 = vadd.f32 %v3781_v43, %v9574_v52  ;;  %v3783_v34 = vpop.f32.mrb[207].mxu0  ;;  %4055 = vmatmul.mubr.bf16.gmra.mrb[200].mxu1 %v3974_v57  ;;  %4248 = vmatmul.mubr.bf16.gmra.mrb[8].mxu0 %v3974_v57  ;;  %v3918_v13 = vmax.f32 %v3778_v28, 0.0  ;;  %v7758_v57 = vld [vmem:[%s10648_s3 + $0xe0] ss:$16 sps:$4 sm:$0xff]  }
 0x3f9   : > { %v3784_v41 = vadd.f32 %v3783_v34, %v9579_v35  ;;  %5050 = vmatpush1.bf16.msra.mxu1 %v6919_v7  ;;  %5339 = vmatpush1.bf16.msra.mxu0 %v7752_v42  ;;  %v3919_v6 = vmax.f32 %v3780_v38, 0.0  ;;  %v6930_v7 = vcombine.high %v4855_v29, %v4856_v18  ;;  %v7761_v42 = vld [vmem:[%s10648_s3 + $0x124] ss:$16 sps:$4 sm:$0xff]  }
 0x3fa   : > { %v3920_v25 = vmax.f32 %v3782_v62, 0.0  ;;  %5051 = vmatprep.subr.bf16.mxu1 %v6922_v20  ;;  %5340 = vmatprep.subr.bf16.mxu0 %v7753_v48  ;;  %v4857_v20 = vld [vmem:[%s10646_s1 + $0x298] sm:$0xff]  ;;  %v7760_v62 = vld [vmem:[%s10648_s3 + $0x100] ss:$16 sps:$4 sm:$0xff]  }
 0x3fb   : > { %v3921_v49 = vmax.f32 %v3784_v41, 0.0  ;;  %v4860_v48 = vld [vmem:[%s10646_s1 + $0x2f8] sm:$0xff]  ;;  %v6931_v30 = vcombine.low %v4857_v20, %v4858_v23 }
 0x3fc   : > { %v3976_v45 = vpack.c.bf16 %v3920_v25, %v3918_v13 }
 0x3fd   : > { %v3977_v58 = vpack.c.bf16 %v3921_v49, %v3919_v6  ;;  %v3787_v39 = vpop.f32.mrb[208].mxu0  ;;  %5052 = vmatpush1.bf16.msra.mxu1 %v6921_v46  ;;  %5341 = vmatpush1.bf16.msra.mxu0 %v7754_v15  ;;  %v6932_v46 = vcombine.high %v4857_v20, %v4858_v23  ;;  %v7763_v15 = vld [vmem:[%s10648_s3 + $0x144] ss:$16 sps:$4 sm:$0xff]  }
 0x3fe   : > { %v3788_v11 = vadd.f32 %v3787_v39, %v9574_v52  ;;  %v3789_v47 = vpop.f32.mrb[209].mxu0  ;;  %5053 = vmatprep.subr.bf16.mxu1 %v6924_v14  ;;  %5342 = vmatprep.subr.bf16.mxu0 %v7755_v12  ;;  %v4859_v14 = vld [vmem:[%s10646_s1 + $0x2d8] sm:$0xff] }
 0x3ff   : > { %v3790_v36 = vadd.f32 %v3789_v47, %v9579_v35  ;;  %v3791_v53 = vpop.f32.mrb[210].mxu0  ;;  %4064 = vmatprep.mubr.bf16.mxu1 %v3977_v58  ;;  %4257 = vmatprep.mubr.bf16.mxu0 %v3977_v58  ;;  %v4862_v12 = vld [vmem:[%s10646_s1 + $0x338] sm:$0xff]  ;;  %v6933_v1 = vcombine.low %v4859_v14, %v4860_v48 }
 0x400   : > { %v3792_v40 = vadd.f32 %v3791_v53, %v9574_v52  ;;  %v3793_v0 = vpop.f32.mrb[211].mxu0  ;;  %4065 = vmatmul.mubr.bf16.gmra.mrb[204].mxu1 %v3976_v45  ;;  %4258 = vmatmul.mubr.bf16.gmra.mrb[12].mxu0 %v3976_v45  ;;  %v3922_v4 = vmax.f32 %v3788_v11, 0.0  ;;  %v7762_v45 = vld [vmem:[%s10648_s3 + $0x120] ss:$16 sps:$4 sm:$0xff]  }
 0x401   : > { %v3794_v3 = vadd.f32 %v3793_v0, %v9579_v35  ;;  %5054 = vmatpush1.bf16.msra.mxu1 %v6923_v50  ;;  %5343 = vmatpush1.bf16.msra.mxu0 %v7756_v17  ;;  %v3923_v60 = vmax.f32 %v3790_v36, 0.0  ;;  %v6934_v50 = vcombine.high %v4859_v14, %v4860_v48  ;;  %v7765_v17 = vld [vmem:[%s10648_s3 + $0x164] ss:$16 sps:$4 sm:$0xff]  }
 0x402   : > { %v3924_v51 = vmax.f32 %v3792_v40, 0.0  ;;  %5055 = vmatprep.subr.bf16.mxu1 %v6926_v56  ;;  %5344 = vmatprep.subr.bf16.mxu0 %v7757_v59  ;;  %v4861_v56 = vld [vmem:[%s10646_s1 + $0x318] sm:$0xff]  ;;  %v7764_v40 = vld [vmem:[%s10648_s3 + $0x140] ss:$16 sps:$4 sm:$0xff]  }
 0x403   : > { %v3925_v5 = vmax.f32 %v3794_v3, 0.0  ;;  %v4864_v59 = vld [vmem:[%s10646_s1 + $0x378] sm:$0xff]  ;;  %v6935_v18 = vcombine.low %v4861_v56, %v4862_v12 }
 0x404   : > { %v3978_v2 = vpack.c.bf16 %v3924_v51, %v3922_v4 }
 0x405   : > { %v3979_v63 = vpack.c.bf16 %v3925_v5, %v3923_v60  ;;  %v3797_v9 = vpop.f32.mrb[212].mxu0  ;;  %5056 = vmatpush1.bf16.msra.mxu1 %v6925_v31  ;;  %5345 = vmatpush1.bf16.msra.mxu0 %v7758_v57  ;;  %v6936_v31 = vcombine.high %v4861_v56, %v4862_v12  ;;  %v7767_v57 = vld [vmem:[%s10648_s3 + $0x184] ss:$16 sps:$4 sm:$0xff]   ;;  %v7772_v56 = vld [vmem:[%s10648_s3 + $0x1c0] ss:$16 sps:$4 sm:$0xff]  }
 0x406   : > { %v3798_v16 = vadd.f32 %v3797_v9, %v9574_v52  ;;  %v3799_v37 = vpop.f32.mrb[213].mxu0  ;;  %5057 = vmatprep.subr.bf16.mxu1 %v6928_v32  ;;  %5346 = vmatprep.subr.bf16.mxu0 %v7759_v19  ;;  %v4863_v32 = vld [vmem:[%s10646_s1 + $0x358] sm:$0xff] }
 0x407   : > { %v3800_v28 = vadd.f32 %v3799_v37, %v9579_v35  ;;  %v3801_v33 = vpop.f32.mrb[214].mxu0  ;;  %4074 = vmatprep.mubr.bf16.mxu1 %v3979_v63  ;;  %4267 = vmatprep.mubr.bf16.mxu0 %v3979_v63  ;;  %v4866_v19 = vld [vmem:[%s10646_s1 + $0x3b8] sm:$0xff]  ;;  %v6937_v23 = vcombine.low %v4863_v32, %v4864_v59 }
 0x408   : > { %v3802_v38 = vadd.f32 %v3801_v33, %v9574_v52  ;;  %v3803_v43 = vpop.f32.mrb[215].mxu0  ;;  %4075 = vmatmul.mubr.bf16.gmra.mrb[208].mxu1 %v3978_v2  ;;  %4268 = vmatmul.mubr.bf16.gmra.mrb[16].mxu0 %v3978_v2  ;;  %v3926_v34 = vmax.f32 %v3798_v16, 0.0  ;;  %v7766_v2 = vld [vmem:[%s10648_s3 + $0x160] ss:$16 sps:$4 sm:$0xff]  }
 0x409   : > { %v3804_v44 = vadd.f32 %v3803_v43, %v9579_v35  ;;  %5058 = vmatpush1.bf16.msra.mxu1 %v6927_v55  ;;  %5347 = vmatpush1.bf16.msra.mxu0 %v7760_v62  ;;  %v3927_v13 = vmax.f32 %v3800_v28, 0.0  ;;  %v6938_v55 = vcombine.high %v4863_v32, %v4864_v59  ;;  %v7769_v62 = vld [vmem:[%s10648_s3 + $0x1a4] ss:$16 sps:$4 sm:$0xff]  }
 0x40a   : > { %v3928_v41 = vmax.f32 %v3802_v38, 0.0  ;;  %5059 = vmatprep.subr.bf16.mxu1 %v6930_v7  ;;  %5348 = vmatprep.subr.bf16.mxu0 %v7761_v42  ;;  %v4865_v7 = vld [vmem:[%s10646_s1 + $0x398] sm:$0xff]  ;;  %v7768_v38 = vld [vmem:[%s10648_s3 + $0x180] ss:$16 sps:$4 sm:$0xff]  }
 0x40b   : > { %v3929_v25 = vmax.f32 %v3804_v44, 0.0  ;;  %v4868_v42 = vld [vmem:[%s10646_s1 + $0x3f8] sm:$0xff]  ;;  %v6939_v48 = vcombine.low %v4865_v7, %v4866_v19 }
 0x40c   : > { %v3980_v6 = vpack.c.bf16 %v3928_v41, %v3926_v34 }
 0x40d   : > { %v3981_v49 = vpack.c.bf16 %v3929_v25, %v3927_v13  ;;  %v3807_v27 = vpop.f32.mrb[216].mxu0  ;;  %5060 = vmatpush1.bf16.msra.mxu1 %v6929_v21  ;;  %5349 = vmatpush1.bf16.msra.mxu0 %v7762_v45  ;;  %v6940_v21 = vcombine.high %v4865_v7, %v4866_v19  ;;  %v7771_v45 = vld [vmem:[%s10648_s3 + $0x1c4] ss:$16 sps:$4 sm:$0xff]  }
 0x40e   : > { %v3808_v58 = vadd.f32 %v3807_v27, %v9574_v52  ;;  %v3809_v39 = vpop.f32.mrb[217].mxu0  ;;  %5061 = vmatprep.subr.bf16.mxu1 %v6932_v46  ;;  %5350 = vmatprep.subr.bf16.mxu0 %v7763_v15  ;;  %v4867_v46 = vld [vmem:[%s10646_s1 + $0x3d8] sm:$0xff] }
 0x40f   : > { %v3810_v11 = vadd.f32 %v3809_v39, %v9579_v35  ;;  %v3811_v47 = vpop.f32.mrb[218].mxu0  ;;  %4084 = vmatprep.mubr.bf16.mxu1 %v3981_v49  ;;  %4277 = vmatprep.mubr.bf16.mxu0 %v3981_v49 }
 0x410   : > { %v3812_v36 = vadd.f32 %v3811_v47, %v9574_v52  ;;  %v3813_v53 = vpop.f32.mrb[219].mxu0  ;;  %4085 = vmatmul.mubr.bf16.gmra.mrb[212].mxu1 %v3980_v6  ;;  %4278 = vmatmul.mubr.bf16.gmra.mrb[20].mxu0 %v3980_v6  ;;  %v3930_v0 = vmax.f32 %v3808_v58, 0.0  ;;  %v7770_v6 = vld [vmem:[%s10648_s3 + $0x1a0] ss:$16 sps:$4 sm:$0xff]   ;;  %v6941_v47 = vcombine.low %v4867_v46, %v4868_v42 }
 0x411   : > { %v3814_v54 = vadd.f32 %v3813_v53, %v9579_v35  ;;  %5062 = vmatpush1.bf16.msra.mxu1 %v6931_v30  ;;  %5351 = vmatpush1.bf16.msra.mxu0 %v7764_v40  ;;  %v3931_v4 = vmax.f32 %v3810_v11, 0.0  ;;  %v6942_v30 = vcombine.high %v4867_v46, %v4868_v42  ;;  %v7773_v53 = vld [vmem:[%s10648_s3 + $0x1e4] ss:$16 sps:$4 sm:$0xff]  }
 0x412   : > { %v3932_v3 = vmax.f32 %v3812_v36, 0.0  ;;  %5063 = vmatprep.subr.bf16.mxu1 %v6934_v50  ;;  %5352 = vmatprep.subr.bf16.mxu0 %v7765_v17 }
 0x413   : > { %v3933_v51 = vmax.f32 %v3814_v54, 0.0 }
 0x414   : > { %v3982_v60 = vpack.c.bf16 %v3932_v3, %v3930_v0 }
 0x415   : > { %v3983_v5 = vpack.c.bf16 %v3933_v51, %v3931_v4  ;;  %v3817_v29 = vpop.f32.mrb[220].mxu0  ;;  %5064 = vmatpush1.bf16.msra.mxu1 %v6933_v1  ;;  %5353 = vmatpush1.bf16.msra.mxu0 %v7766_v2  ;;  %v7775_v51 = vld [vmem:[%s10648_s3 + $0xc] ss:$16 sps:$4 sm:$0xff]  }
 0x416   : > { %v3818_v63 = vadd.f32 %v3817_v29, %v9574_v52  ;;  %v3819_v9 = vpop.f32.mrb[221].mxu0  ;;  %5065 = vmatprep.subr.bf16.mxu1 %v6936_v31  ;;  %5354 = vmatprep.subr.bf16.mxu0 %v7767_v57  ;;  %v7774_v31 = vld [vmem:[%s10648_s3 + $0x1e0] ss:$16 sps:$4 sm:$0xff]  }
 0x417   : > { %v3820_v16 = vadd.f32 %v3819_v9, %v9579_v35  ;;  %v3821_v37 = vpop.f32.mrb[222].mxu0  ;;  %4094 = vmatprep.mubr.bf16.mxu1 %v3983_v5  ;;  %4287 = vmatprep.mubr.bf16.mxu0 %v3983_v5 }
 0x418   : > { %v3822_v28 = vadd.f32 %v3821_v37, %v9574_v52  ;;  %v3823_v33 = vpop.f32.mrb[223].mxu0  ;;  %4095 = vmatmul.mubr.bf16.gmra.mrb[216].mxu1 %v3982_v60  ;;  %4288 = vmatmul.mubr.bf16.gmra.mrb[24].mxu0 %v3982_v60  ;;  %v3934_v43 = vmax.f32 %v3818_v63, 0.0 }
 0x419   : > { %v3824_v20 = vadd.f32 %v3823_v33, %v9579_v35  ;;  %5066 = vmatpush1.bf16.msra.mxu1 %v6935_v18  ;;  %5355 = vmatpush1.bf16.msra.mxu0 %v7768_v38  ;;  %v3935_v34 = vmax.f32 %v3820_v16, 0.0 }
 0x41a   : > { %v3936_v44 = vmax.f32 %v3822_v28, 0.0  ;;  %5067 = vmatprep.subr.bf16.mxu1 %v6938_v55  ;;  %5356 = vmatprep.subr.bf16.mxu0 %v7769_v62 }
 0x41b   : > { %v3937_v41 = vmax.f32 %v3824_v20, 0.0 }
 0x41c   : > { %v3984_v13 = vpack.c.bf16 %v3936_v44, %v3934_v43 }
 0x41d   : > { %v3985_v25 = vpack.c.bf16 %v3937_v41, %v3935_v34  ;;  %v3827_v14 = vpop.f32.mrb[224].mxu0  ;;  %5068 = vmatpush1.bf16.msra.mxu1 %v6937_v23  ;;  %5357 = vmatpush1.bf16.msra.mxu0 %v7770_v6 }
 0x41e   : > { %v3828_v49 = vadd.f32 %v3827_v14, %v9574_v52  ;;  %v3829_v27 = vpop.f32.mrb[225].mxu0  ;;  %5069 = vmatprep.subr.bf16.mxu1 %v6940_v21  ;;  %5358 = vmatprep.subr.bf16.mxu0 %v7771_v45 }
 0x41f   : > { %v3830_v58 = vadd.f32 %v3829_v27, %v9579_v35  ;;  %v3831_v39 = vpop.f32.mrb[226].mxu0  ;;  %4104 = vmatprep.mubr.bf16.mxu1 %v3985_v25  ;;  %4297 = vmatprep.mubr.bf16.mxu0 %v3985_v25 }
 0x420   : > { %v3832_v50 = vadd.f32 %v3831_v39, %v9574_v52  ;;  %v3833_v15 = vpop.f32.mrb[227].mxu0  ;;  %4105 = vmatmul.mubr.bf16.gmra.mrb[220].mxu1 %v3984_v13  ;;  %4298 = vmatmul.mubr.bf16.gmra.mrb[28].mxu0 %v3984_v13  ;;  %v3938_v12 = vmax.f32 %v3828_v49, 0.0 }
 0x421   : > { %v3834_v11 = vadd.f32 %v3833_v15, %v9579_v35  ;;  %5070 = vmatpush1.bf16.msra.mxu1 %v6939_v48  ;;  %5359 = vmatpush1.bf16.msra.mxu0 %v7772_v56  ;;  %v3939_v54 = vmax.f32 %v3830_v58, 0.0 }
 0x422   : > { %v3940_v36 = vmax.f32 %v3832_v50, 0.0  ;;  %5071 = vmatprep.subr.bf16.mxu1 %v6942_v30  ;;  %5360 = vmatprep.subr.bf16.mxu0 %v7773_v53 }
 0x423   : > { %v3941_v1 = vmax.f32 %v3834_v11, 0.0 }
 0x424   : > { %v3986_v40 = vpack.c.bf16 %v3940_v36, %v3938_v12 }
 0x425   : > { %v3987_v0 = vpack.c.bf16 %v3941_v1, %v3939_v54  ;;  %v3837_v3 = vpop.f32.mrb[228].mxu0  ;;  %5072 = vmatpush1.bf16.msra.mxu1 %v6941_v47  ;;  %5361 = vmatpush1.bf16.msra.mxu0 %v7774_v31 }
 0x426   : > { %v3838_v17 = vadd.f32 %v3837_v3, %v9574_v52  ;;  %v3839_v4 = vpop.f32.mrb[229].mxu0  ;;  %5523 = vmatprep.subr.bf16.mxu1 %v7775_v51 }
 0x427   : > { %v3840_v32 = vadd.f32 %v3839_v4, %v9579_v35  ;;  %v3841_v59 = vpop.f32.mrb[230].mxu0  ;;  %4114 = vmatprep.mubr.bf16.mxu1 %v3987_v0  ;;  %4307 = vmatprep.mubr.bf16.mxu0 %v3987_v0 }
 0x428   : > { %v3842_v60 = vadd.f32 %v3841_v59, %v9574_v52  ;;  %v3843_v5 = vpop.f32.mrb[231].mxu0  ;;  %4115 = vmatmul.mubr.bf16.gmra.mrb[224].mxu1 %v3986_v40  ;;  %4308 = vmatmul.mubr.bf16.gmra.mrb[32].mxu0 %v3986_v40  ;;  %v3942_v18 = vmax.f32 %v3838_v17, 0.0 }
 0x429   : > { %v3844_v29 = vadd.f32 %v3843_v5, %v9579_v35  ;;  %v3943_v63 = vmax.f32 %v3840_v32, 0.0 }
 0x42a   : > { %v3944_v2 = vmax.f32 %v3842_v60, 0.0 }
 0x42b   : > { %v3945_v9 = vmax.f32 %v3844_v29, 0.0 }
 0x42c   : > { %v3988_v55 = vpack.c.bf16 %v3944_v2, %v3942_v18 }
 0x42d   : > { %v3989_v57 = vpack.c.bf16 %v3945_v9, %v3943_v63  ;;  %v3847_v16 = vpop.f32.mrb[232].mxu0 }
 0x42e   : > { %v3848_v37 = vadd.f32 %v3847_v16, %v9574_v52  ;;  %v3849_v7 = vpop.f32.mrb[233].mxu0 }
 0x42f   : > { %v3850_v19 = vadd.f32 %v3849_v7, %v9579_v35  ;;  %v3851_v28 = vpop.f32.mrb[234].mxu0  ;;  %4124 = vmatprep.mubr.bf16.mxu1 %v3989_v57  ;;  %4317 = vmatprep.mubr.bf16.mxu0 %v3989_v57 }
 0x430   : > { %v3852_v33 = vadd.f32 %v3851_v28, %v9574_v52  ;;  %v3853_v20 = vpop.f32.mrb[235].mxu0  ;;  %4125 = vmatmul.mubr.bf16.gmra.mrb[228].mxu1 %v3988_v55  ;;  %4318 = vmatmul.mubr.bf16.gmra.mrb[36].mxu0 %v3988_v55  ;;  %v3946_v38 = vmax.f32 %v3848_v37, 0.0 }
 0x431   : > { %v3854_v23 = vadd.f32 %v3853_v20, %v9579_v35  ;;  %v3947_v44 = vmax.f32 %v3850_v19, 0.0 }
 0x432   : > { %v3948_v43 = vmax.f32 %v3852_v33, 0.0 }
 0x433   : > { %v3949_v21 = vmax.f32 %v3854_v23, 0.0 }
 0x434   : > { %v3990_v62 = vpack.c.bf16 %v3948_v43, %v3946_v38 }
 0x435   : > { %v3991_v34 = vpack.c.bf16 %v3949_v21, %v3947_v44  ;;  %v3857_v41 = vpop.f32.mrb[236].mxu0 }
 0x436   : > { %v3858_v46 = vadd.f32 %v3857_v41, %v9574_v52  ;;  %v3859_v42 = vpop.f32.mrb[237].mxu0 }
 0x437   : > { %v3860_v13 = vadd.f32 %v3859_v42, %v9579_v35  ;;  %v3861_v25 = vpop.f32.mrb[238].mxu0  ;;  %4134 = vmatprep.mubr.bf16.mxu1 %v3991_v34  ;;  %4327 = vmatprep.mubr.bf16.mxu0 %v3991_v34 }
 0x438   : > { %v3862_v14 = vadd.f32 %v3861_v25, %v9574_v52  ;;  %v3863_v48 = vpop.f32.mrb[239].mxu0  ;;  %4135 = vmatmul.mubr.bf16.gmra.mrb[232].mxu1 %v3990_v62  ;;  %4328 = vmatmul.mubr.bf16.gmra.mrb[40].mxu0 %v3990_v62  ;;  %v3950_v49 = vmax.f32 %v3858_v46, 0.0 }
 0x439   : > { %v3864_v6 = vadd.f32 %v3863_v48, %v9579_v35  ;;  %v3951_v30 = vmax.f32 %v3860_v13, 0.0 }
 0x43a   : > { %v3952_v27 = vmax.f32 %v3862_v14, 0.0 }
 0x43b   : > { %v3953_v45 = vmax.f32 %v3864_v6, 0.0 }
 0x43c   : > { %v3992_v58 = vpack.c.bf16 %v3952_v27, %v3950_v49 }
 0x43d   : > { %v3993_v39 = vpack.c.bf16 %v3953_v45, %v3951_v30  ;;  %v3867_v50 = vpop.f32.mrb[240].mxu0 }
 0x43e   : > { %v3868_v15 = vadd.f32 %v3867_v50, %v9574_v52  ;;  %v3869_v11 = vpop.f32.mrb[241].mxu0  ;;  %v7776_v50 = vld [vmem:[%s8014_s28 + $0x4] ss:$8 sps:$4 sm:$0xff]  }
 0x43f   : > { %v3870_v47 = vadd.f32 %v3869_v11, %v9579_v35  ;;  %v3871_v56 = vpop.f32.mrb[242].mxu0  ;;  %4144 = vmatprep.mubr.bf16.mxu1 %v3993_v39  ;;  %4337 = vmatprep.mubr.bf16.mxu0 %v3993_v39  ;;  %v7780_v11 = vld [vmem:[%s10648_s3 + $0x2c] ss:$16 sps:$4 sm:$0xff]  }
 0x440   : > { %v3872_v12 = vadd.f32 %v3871_v56, %v9574_v52  ;;  %v3873_v36 = vpop.f32.mrb[243].mxu0  ;;  %4145 = vmatmul.mubr.bf16.gmra.mrb[236].mxu1 %v3992_v58  ;;  %4338 = vmatmul.mubr.bf16.gmra.mrb[44].mxu0 %v3992_v58  ;;  %v3954_v54 = vmax.f32 %v3868_v15, 0.0  ;;  %v7778_v15 = vld [vmem:[%s8014_s28 + $0x14] ss:$8 sps:$4 sm:$0xff]  }
 0x441   : > { %v3874_v53 = vadd.f32 %v3873_v36, %v9579_v35  ;;  %v3955_v40 = vmax.f32 %v3870_v47, 0.0  ;;  %v7781_v47 = vld [vmem:[%s10648_s3 + $0x28] ss:$16 sps:$4 sm:$0xff]   ;;  %v7782_v56 = vld [vmem:[%s10648_s3 + $0x4c] ss:$16 sps:$4 sm:$0xff]  }
 0x442   : > { %v3956_v1 = vmax.f32 %v3872_v12, 0.0  ;;  %v7783_v12 = vld [vmem:[%s8014_s28 + $0x10] ss:$8 sps:$4 sm:$0xff]   ;;  %v7784_v36 = vld [vmem:[%s8014_s28 + $0x24] ss:$8 sps:$4 sm:$0xff]  }
 0x443   : > { %v3957_v0 = vmax.f32 %v3874_v53, 0.0  ;;  %v7785_v53 = vld [vmem:[%s10648_s3 + $0x48] ss:$16 sps:$4 sm:$0xff]  }
 0x444   : > { %v3994_v3 = vpack.c.bf16 %v3956_v1, %v3954_v54  ;;  %v7786_v54 = vld [vmem:[%s10648_s3 + $0x6c] ss:$16 sps:$4 sm:$0xff]   ;;  %v7787_v1 = vld [vmem:[%s10648_s3 + $0x68] ss:$16 sps:$4 sm:$0xff]  }
 0x445   : > { %v3995_v31 = vpack.c.bf16 %v3957_v0, %v3955_v40  ;;  %v3877_v17 = vpop.f32.mrb[244].mxu0  ;;  %v7788_v40 = vld [vmem:[%s10648_s3 + $0x8c] ss:$16 sps:$4 sm:$0xff]   ;;  %v7789_v0 = vld [vmem:[%s8014_s28 + $0x20] ss:$8 sps:$4 sm:$0xff]  }
 0x446   : > { %v3878_v4 = vadd.f32 %v3877_v17, %v9574_v52  ;;  %v3879_v51 = vpop.f32.mrb[245].mxu0  ;;  %v7792_v17 = vld [vmem:[%s10648_s3 + $0xac] ss:$16 sps:$4 sm:$0xff]  }
 0x447   : > { %v3880_v32 = vadd.f32 %v3879_v51, %v9579_v35  ;;  %v3881_v59 = vpop.f32.mrb[246].mxu0  ;;  %4154 = vmatprep.mubr.bf16.mxu1 %v3995_v31  ;;  %4347 = vmatprep.mubr.bf16.mxu0 %v3995_v31  ;;  %v7791_v31 = vld [vmem:[%s10648_s3 + $0x88] ss:$16 sps:$4 sm:$0xff]   ;;  %v7794_v51 = vld [vmem:[%s10648_s3 + $0xcc] ss:$16 sps:$4 sm:$0xff]  }
 0x448   : > { %v3882_v60 = vadd.f32 %v3881_v59, %v9574_v52  ;;  %v3883_v5 = vpop.f32.mrb[247].mxu0  ;;  %4155 = vmatmul.mubr.bf16.gmra.mrb[240].mxu1 %v3994_v3  ;;  %4348 = vmatmul.mubr.bf16.gmra.mrb[48].mxu0 %v3994_v3  ;;  %v3958_v18 = vmax.f32 %v3878_v4, 0.0  ;;  %v7790_v3 = vld [vmem:[%s8014_s28 + $0x34] ss:$8 sps:$4 sm:$0xff]   ;;  %v7793_v4 = vld [vmem:[%s10648_s3 + $0xa8] ss:$16 sps:$4 sm:$0xff]  }
 0x449   : > { %v3884_v29 = vadd.f32 %v3883_v5, %v9579_v35  ;;  %v3959_v63 = vmax.f32 %v3880_v32, 0.0  ;;  %v7795_v32 = vld [vmem:[%s8014_s28 + $0x30] ss:$8 sps:$4 sm:$0xff]   ;;  %v7796_v59 = vld [vmem:[%s8014_s28 + $0x44] ss:$8 sps:$4 sm:$0xff]  }
 0x44a   : > { %v3960_v2 = vmax.f32 %v3882_v60, 0.0  ;;  %v7797_v60 = vld [vmem:[%s10648_s3 + $0xc8] ss:$16 sps:$4 sm:$0xff]   ;;  %v7798_v5 = vld [vmem:[%s10648_s3 + $0xec] ss:$16 sps:$4 sm:$0xff]  }
 0x44b   : > { %v3961_v9 = vmax.f32 %v3884_v29, 0.0  ;;  %v7799_v29 = vld [vmem:[%s10648_s3 + $0xe8] ss:$16 sps:$4 sm:$0xff]  }
 0x44c   : > { %v3996_v55 = vpack.c.bf16 %v3960_v2, %v3958_v18  ;;  %v7800_v18 = vld [vmem:[%s10648_s3 + $0x10c] ss:$16 sps:$4 sm:$0xff]   ;;  %v7801_v2 = vld [vmem:[%s8014_s28 + $0x40] ss:$8 sps:$4 sm:$0xff]  }
 0x44d   : > { %v3997_v57 = vpack.c.bf16 %v3961_v9, %v3959_v63  ;;  %v3887_v16 = vpop.f32.mrb[248].mxu0  ;;  %v7802_v63 = vld [vmem:[%s8014_s28 + $0x54] ss:$8 sps:$4 sm:$0xff]   ;;  %v7803_v9 = vld [vmem:[%s10648_s3 + $0x108] ss:$16 sps:$4 sm:$0xff]  }
 0x44e   : > { %v3888_v37 = vadd.f32 %v3887_v16, %v9574_v52  ;;  %v3889_v7 = vpop.f32.mrb[249].mxu0  ;;  %v7806_v16 = vld [vmem:[%s10648_s3 + $0x14c] ss:$16 sps:$4 sm:$0xff]  }
 0x44f   : > { %v3890_v19 = vadd.f32 %v3889_v7, %v9579_v35  ;;  %v3891_v28 = vpop.f32.mrb[250].mxu0  ;;  %4164 = vmatprep.mubr.bf16.mxu1 %v3997_v57  ;;  %4357 = vmatprep.mubr.bf16.mxu0 %v3997_v57  ;;  %v7805_v57 = vld [vmem:[%s10648_s3 + $0x128] ss:$16 sps:$4 sm:$0xff]   ;;  %v7808_v7 = vld [vmem:[%s8014_s28 + $0x64] ss:$8 sps:$4 sm:$0xff]  }
 0x450   : > { %v3892_v33 = vadd.f32 %v3891_v28, %v9574_v52  ;;  %v3893_v20 = vpop.f32.mrb[251].mxu0  ;;  %4165 = vmatmul.mubr.bf16.gmra.mrb[244].mxu1 %v3996_v55  ;;  %4358 = vmatmul.mubr.bf16.gmra.mrb[52].mxu0 %v3996_v55  ;;  %v3962_v38 = vmax.f32 %v3888_v37, 0.0  ;;  %v7804_v55 = vld [vmem:[%s10648_s3 + $0x12c] ss:$16 sps:$4 sm:$0xff]   ;;  %v7807_v37 = vld [vmem:[%s8014_s28 + $0x50] ss:$8 sps:$4 sm:$0xff]  }
 0x451   : > { %v3894_v23 = vadd.f32 %v3893_v20, %v9579_v35  ;;  %v3963_v44 = vmax.f32 %v3890_v19, 0.0  ;;  %v7809_v19 = vld [vmem:[%s10648_s3 + $0x148] ss:$16 sps:$4 sm:$0xff]   ;;  %v7810_v28 = vld [vmem:[%s10648_s3 + $0x16c] ss:$16 sps:$4 sm:$0xff]  }
 0x452   : > { %v3964_v43 = vmax.f32 %v3892_v33, 0.0  ;;  %v7811_v33 = vld [vmem:[%s10648_s3 + $0x168] ss:$16 sps:$4 sm:$0xff]   ;;  %v7812_v20 = vld [vmem:[%s10648_s3 + $0x18c] ss:$16 sps:$4 sm:$0xff]  }
 0x453   : > { %v3965_v21 = vmax.f32 %v3894_v23, 0.0  ;;  %v7813_v23 = vld [vmem:[%s8014_s28 + $0x60] ss:$8 sps:$4 sm:$0xff]  }
 0x454   : > { %v3998_v62 = vpack.c.bf16 %v3964_v43, %v3962_v38  ;;  %v7814_v38 = vld [vmem:[%s8014_s28 + $0x74] ss:$8 sps:$4 sm:$0xff]   ;;  %v7815_v43 = vld [vmem:[%s10648_s3 + $0x188] ss:$16 sps:$4 sm:$0xff]  }
 0x455   : > { %v3999_v34 = vpack.c.bf16 %v3965_v21, %v3963_v44  ;;  %v3897_v41 = vpop.f32.mrb[252].mxu0  ;;  %v7816_v44 = vld [vmem:[%s10648_s3 + $0x1ac] ss:$16 sps:$4 sm:$0xff]   ;;  %v7817_v21 = vld [vmem:[%s10648_s3 + $0x1a8] ss:$16 sps:$4 sm:$0xff]  }
 0x456   : > { %v3898_v46 = vadd.f32 %v3897_v41, %v9574_v52  ;;  %v3899_v42 = vpop.f32.mrb[253].mxu0  ;;  %v7820_v41 = vld [vmem:[%s8014_s28 + $0x84] ss:$8 sps:$4 sm:$0xff]  }
 0x457   : > { %v3900_v13 = vadd.f32 %v3899_v42, %v9579_v35  ;;  %v3901_v25 = vpop.f32.mrb[254].mxu0  ;;  %4174 = vmatprep.mubr.bf16.mxu1 %v3999_v34  ;;  %4367 = vmatprep.mubr.bf16.mxu0 %v3999_v34  ;;  %v7819_v34 = vld [vmem:[%s8014_s28 + $0x70] ss:$8 sps:$4 sm:$0xff]   ;;  %v7822_v42 = vld [vmem:[%s10648_s3 + $0x1ec] ss:$16 sps:$4 sm:$0xff]  }
 0x458   : > { %v3902_v14 = vadd.f32 %v3901_v25, %v9574_v52  ;;  %v3903_v48 = vpop.f32.mrb[255].mxu0  ;;  %4175 = vmatmul.mubr.bf16.gmra.mrb[248].mxu1 %v3998_v62  ;;  %4368 = vmatmul.mubr.bf16.gmra.mrb[56].mxu0 %v3998_v62  ;;  %v3966_v49 = vmax.f32 %v3898_v46, 0.0  ;;  %v7777_v52 = vld [vmem:[%s8014_s28] ss:$8 sps:$4 sm:$0xff]   ;;  %v7818_v62 = vld [vmem:[%s10648_s3 + $0x1cc] ss:$16 sps:$4 sm:$0xff]  }
 0x459   : > { %v3904_v6 = vadd.f32 %v3903_v48, %v9579_v35  ;;  %v3967_v30 = vmax.f32 %v3900_v13, 0.0  ;;  %v7779_v35 = vld [vmem:[%s10648_s3 + $0x8] ss:$16 sps:$4 sm:$0xff]  }
 0x45a   : > { %v3968_v27 = vmax.f32 %v3902_v14, 0.0  ;;  %v7821_v46 = vld [vmem:[%s10648_s3 + $0x1c8] ss:$16 sps:$4 sm:$0xff]   ;;  %v7825_v14 = vld [vmem:[%s8014_s28 + $0x94] ss:$8 sps:$4 sm:$0xff]  }
 0x45b   : > { %v3969_v45 = vmax.f32 %v3904_v6, 0.0  ;;  %v7823_v13 = vld [vmem:[%s10648_s3 + $0x1e8] ss:$16 sps:$4 sm:$0xff]   ;;  %v7827_v6 = vld [vmem:[%s8014_s28 + $0xa4] ss:$8 sps:$4 sm:$0xff]  }
 0x45c   : > { %v4000_v58 = vpack.c.bf16 %v3968_v27, %v3966_v49  ;;  %v7824_v25 = vld [vmem:[%s8014_s28 + $0x80] ss:$8 sps:$4 sm:$0xff]   ;;  %v7826_v48 = vld [vmem:[%s8014_s28 + $0x90] ss:$8 sps:$4 sm:$0xff]   ;;  %v7829_v27 = vld [vmem:[%s8014_s28 + $0xb4] ss:$8 sps:$4 sm:$0xff]  }
 0x45d   : > { %v4001_v39 = vpack.c.bf16 %v3969_v45, %v3967_v30  ;;  %v7828_v49 = vld [vmem:[%s8014_s28 + $0xa0] ss:$8 sps:$4 sm:$0xff]  }
 0x45f   : > { %4184 = vmatprep.mubr.bf16.mxu1 %v4001_v39  ;;  %4377 = vmatprep.mubr.bf16.mxu0 %v4001_v39 }
 0x460   : > { %4185 = vmatmul.mubr.bf16.gmra.mrb[252].mxu1 %v4000_v58  ;;  %4378 = vmatmul.mubr.bf16.gmra.mrb[60].mxu0 %v4000_v58 }
 0x461   : > { %5073 = vmatprep.mubr.bf16.mxu1 %v7776_v50 }
 0x468   : > { %5074 = vmatmul.mubr.bf16.vlgmr.msra.gmra.mrb[0].mxu1 %v7777_v52 }
 0x469   : > { %5083 = vmatprep.mubr.bf16.mxu1 %v7778_v15  ;;  %5524 = vmatpush1.bf16.msra.mxu1 %v7779_v35 }
 0x46a   : > { %5525 = vmatprep.subr.bf16.mxu1 %v7780_v11 }
 0x46d   : > { %5526 = vmatpush1.bf16.msra.mxu1 %v7781_v47 }
 0x46e   : > { %5527 = vmatprep.subr.bf16.mxu1 %v7782_v56 }
 0x470   : > { %5084 = vmatmul.mubr.bf16.gmra.mrb[4].mxu1 %v7783_v12 }
 0x471   : > { %5093 = vmatprep.mubr.bf16.mxu1 %v7784_v36  ;;  %5528 = vmatpush1.bf16.msra.mxu1 %v7785_v53 }
 0x472   : > { %5529 = vmatprep.subr.bf16.mxu1 %v7786_v54 }
 0x475   : > { %5530 = vmatpush1.bf16.msra.mxu1 %v7787_v1 }
 0x476   : > { %5531 = vmatprep.subr.bf16.mxu1 %v7788_v40 }
 0x478   : > { %5094 = vmatmul.mubr.bf16.gmra.mrb[8].mxu1 %v7789_v0 }
 0x479   : > { %5103 = vmatprep.mubr.bf16.mxu1 %v7790_v3  ;;  %5532 = vmatpush1.bf16.msra.mxu1 %v7791_v31  ;;  %v7830_v3 = vld [vmem:[%s8014_s28 + $0xb0] ss:$8 sps:$4 sm:$0xff]  }
 0x47a   : > { %5533 = vmatprep.subr.bf16.mxu1 %v7792_v17 }
 0x47d   : > { %5534 = vmatpush1.bf16.msra.mxu1 %v7793_v4  ;;  %v7831_v4 = vld [vmem:[%s8014_s28 + $0xc4] ss:$8 sps:$4 sm:$0xff]  }
 0x47e   : > { %5535 = vmatprep.subr.bf16.mxu1 %v7794_v51 }
 0x480   : > { %5104 = vmatmul.mubr.bf16.gmra.mrb[12].mxu1 %v7795_v32 }
 0x481   : > { %5113 = vmatprep.mubr.bf16.mxu1 %v7796_v59  ;;  %5536 = vmatpush1.bf16.msra.mxu1 %v7797_v60 }
 0x482   : > { %5537 = vmatprep.subr.bf16.mxu1 %v7798_v5 }
 0x485   : > { %5538 = vmatpush1.bf16.msra.mxu1 %v7799_v29 }
 0x486   : > { %5539 = vmatprep.subr.bf16.mxu1 %v7800_v18 }
 0x488   : > { %5114 = vmatmul.mubr.bf16.gmra.mrb[16].mxu1 %v7801_v2 }
 0x489   : > { %5123 = vmatprep.mubr.bf16.mxu1 %v7802_v63  ;;  %5540 = vmatpush1.bf16.msra.mxu1 %v7803_v9 }
 0x48a   : > { %5541 = vmatprep.subr.bf16.mxu1 %v7804_v55 }
 0x48d   : > { %5542 = vmatpush1.bf16.msra.mxu1 %v7805_v57 }
 0x48e   : > { %5543 = vmatprep.subr.bf16.mxu1 %v7806_v16 }
 0x490   : > { %5124 = vmatmul.mubr.bf16.gmra.mrb[20].mxu1 %v7807_v37 }
 0x491   : > { %5133 = vmatprep.mubr.bf16.mxu1 %v7808_v7  ;;  %5544 = vmatpush1.bf16.msra.mxu1 %v7809_v19 }
 0x492   : > { %5545 = vmatprep.subr.bf16.mxu1 %v7810_v28 }
 0x495   : > { %5546 = vmatpush1.bf16.msra.mxu1 %v7811_v33 }
 0x496   : > { %5547 = vmatprep.subr.bf16.mxu1 %v7812_v20  ;;  %v7832_v20 = vld [vmem:[%s8014_s28 + $0xc0] ss:$8 sps:$4 sm:$0xff]  }
 0x498   : > { %5134 = vmatmul.mubr.bf16.gmra.mrb[24].mxu1 %v7813_v23 }
 0x499   : > { %5143 = vmatprep.mubr.bf16.mxu1 %v7814_v38  ;;  %5548 = vmatpush1.bf16.msra.mxu1 %v7815_v43  ;;  %v7833_v43 = vld [vmem:[%s8014_s28 + $0xd4] ss:$8 sps:$4 sm:$0xff]  }
 0x49a   : > { %5549 = vmatprep.subr.bf16.mxu1 %v7816_v44 }
 0x49d   : > { %5550 = vmatpush1.bf16.msra.mxu1 %v7817_v21 }
 0x49e   : > { %5551 = vmatprep.subr.bf16.mxu1 %v7818_v62 }
 0x4a0   : > { %5144 = vmatmul.mubr.bf16.gmra.mrb[28].mxu1 %v7819_v34 }
 0x4a1   : > { %5153 = vmatprep.mubr.bf16.mxu1 %v7820_v41  ;;  %5552 = vmatpush1.bf16.msra.mxu1 %v7821_v46 }
 0x4a2   : > { %5553 = vmatprep.subr.bf16.mxu1 %v7822_v42 }
 0x4a5   : > { %5554 = vmatpush1.bf16.msra.mxu1 %v7823_v13 }
 0x4a8   : > { %5154 = vmatmul.mubr.bf16.gmra.mrb[32].mxu1 %v7824_v25 }
 0x4a9   : > { %5163 = vmatprep.mubr.bf16.mxu1 %v7825_v14 }
 0x4b0   : > { %5164 = vmatmul.mubr.bf16.gmra.mrb[36].mxu1 %v7826_v48 }
 0x4b1   : > { %5173 = vmatprep.mubr.bf16.mxu1 %v7827_v6 }
 0x4b8   : > { %5174 = vmatmul.mubr.bf16.gmra.mrb[40].mxu1 %v7828_v49 }
 0x4b9   : > { %5183 = vmatprep.mubr.bf16.mxu1 %v7829_v27 }
 0x4bb   : > { %v4036_v30 = vpop.f32.mrb[192].mxu1  ;;  %v4229_v45 = vpop.f32.mrb[0].mxu0 }
 0x4bc   : > { %v4037_v58 = vadd.f32 %v4036_v30, %v8750_v24  ;;  %v4230_v39 = vadd.f32 %v4229_v45, %v8752_v22  ;;  %v4038_v50 = vpop.f32.mrb[193].mxu1  ;;  %v4231_v52 = vpop.f32.mrb[1].mxu0 }
 0x4bd   : > { %v4039_v15 = vadd.f32 %v4038_v50, %v8756_v26  ;;  %v4232_v35 = vadd.f32 %v4231_v52, %v8758_v61  ;;  %v4040_v11 = vpop.f32.mrb[194].mxu1  ;;  %v4233_v47 = vpop.f32.mrb[2].mxu0  ;;  %v7834_v50 = vld [vmem:[%s8014_s28 + $0xd0] ss:$8 sps:$4 sm:$0xff]  }
 0x4be   : > { %v4041_v56 = vadd.f32 %v4040_v11, %v8750_v24  ;;  %v4234_v12 = vadd.f32 %v4233_v47, %v8752_v22  ;;  %v4042_v36 = vpop.f32.mrb[195].mxu1  ;;  %v4235_v53 = vpop.f32.mrb[3].mxu0 }
 0x4bf   : > { %v7222_v54 = vpack.c.bf16 %v4039_v15, %v4037_v58  ;;  %v7223_v1 = vpack.c.bf16 %v4232_v35, %v4230_v39  ;;  %v4043_v40 = vadd.f32 %v4042_v36, %v8756_v26  ;;  %v4236_v0 = vadd.f32 %v4235_v53, %v8758_v61  ;;  %v7835_v35 = vld [vmem:[%s8014_s28 + $0xe4] ss:$8 sps:$4 sm:$0xff]  }
 0x4c0   : > { %5184 = vmatmul.mubr.bf16.gmra.mrb[44].mxu1 %v7830_v3 }
 0x4c1   : > { %6847 = vst [vmem:[%s8770_s18 + $0x40] sm:$0xff] %v7222_v54  ;;  %6848 = vst [vmem:[%s8770_s18 + $0x48] sm:$0xff] %v7223_v1  ;;  %v7224_v31 = vpack.c.bf16 %v4043_v40, %v4041_v56  ;;  %v7225_v17 = vpack.c.bf16 %v4236_v0, %v4234_v12  ;;  %5193 = vmatprep.mubr.bf16.mxu1 %v7831_v4 }
 0x4c3   : > { %6849 = vst [vmem:[%s8770_s18 + $0x60] sm:$0x77] %v7224_v31  ;;  %6850 = vst [vmem:[%s8770_s18 + $0x68] sm:$0x77] %v7225_v17  ;;  %v4046_v51 = vpop.f32.mrb[196].mxu1  ;;  %v4239_v32 = vpop.f32.mrb[4].mxu0 }
 0x4c4   : > { %v4047_v59 = vadd.f32 %v4046_v51, %v8750_v24  ;;  %v4240_v60 = vadd.f32 %v4239_v32, %v8752_v22  ;;  %v4048_v5 = vpop.f32.mrb[197].mxu1  ;;  %v4241_v29 = vpop.f32.mrb[5].mxu0 }
 0x4c5   : > { %v4049_v18 = vadd.f32 %v4048_v5, %v8756_v26  ;;  %v4242_v2 = vadd.f32 %v4241_v29, %v8758_v61  ;;  %v4050_v63 = vpop.f32.mrb[198].mxu1  ;;  %v4243_v9 = vpop.f32.mrb[6].mxu0  ;;  %v7836_v5 = vld [vmem:[%s8014_s28 + $0xe0] ss:$8 sps:$4 sm:$0xff]  }
 0x4c6   : > { %v4051_v55 = vadd.f32 %v4050_v63, %v8750_v24  ;;  %v4244_v57 = vadd.f32 %v4243_v9, %v8752_v22  ;;  %v4052_v16 = vpop.f32.mrb[199].mxu1  ;;  %v4245_v37 = vpop.f32.mrb[7].mxu0 }
 0x4c7   : > { %v7226_v7 = vpack.c.bf16 %v4049_v18, %v4047_v59  ;;  %v7227_v19 = vpack.c.bf16 %v4242_v2, %v4240_v60  ;;  %v4053_v28 = vadd.f32 %v4052_v16, %v8756_v26  ;;  %v4246_v33 = vadd.f32 %v4245_v37, %v8758_v61  ;;  %v7837_v2 = vld [vmem:[%s8014_s28 + $0xf4] ss:$8 sps:$4 sm:$0xff]  }
 0x4c8   : > { %5194 = vmatmul.mubr.bf16.gmra.mrb[48].mxu1 %v7832_v20 }
 0x4c9   : > { %6851 = vst [vmem:[%s8770_s18 + $0xc0] sm:$0xff] %v7226_v7  ;;  %6852 = vst [vmem:[%s8770_s18 + $0xc8] sm:$0xff] %v7227_v19  ;;  %v7228_v23 = vpack.c.bf16 %v4053_v28, %v4051_v55  ;;  %v7229_v38 = vpack.c.bf16 %v4246_v33, %v4244_v57  ;;  %5203 = vmatprep.mubr.bf16.mxu1 %v7833_v43 }
 0x4cb   : > { %6853 = vst [vmem:[%s8770_s18 + $0xe0] sm:$0x77] %v7228_v23  ;;  %6854 = vst [vmem:[%s8770_s18 + $0xe8] sm:$0x77] %v7229_v38  ;;  %v4056_v44 = vpop.f32.mrb[200].mxu1  ;;  %v4249_v21 = vpop.f32.mrb[8].mxu0 }
 0x4cc   : > { %v4057_v62 = vadd.f32 %v4056_v44, %v8750_v24  ;;  %v4250_v34 = vadd.f32 %v4249_v21, %v8752_v22  ;;  %v4058_v41 = vpop.f32.mrb[201].mxu1  ;;  %v4251_v46 = vpop.f32.mrb[9].mxu0 }
 0x4cd   : > { %v4059_v42 = vadd.f32 %v4058_v41, %v8756_v26  ;;  %v4252_v13 = vadd.f32 %v4251_v46, %v8758_v61  ;;  %v4060_v25 = vpop.f32.mrb[202].mxu1  ;;  %v4253_v14 = vpop.f32.mrb[10].mxu0  ;;  %v7838_v41 = vld [vmem:[%s8014_s28 + $0xf0] ss:$8 sps:$4 sm:$0xff]  }
 0x4ce   : > { %v4061_v48 = vadd.f32 %v4060_v25, %v8750_v24  ;;  %v4254_v6 = vadd.f32 %v4253_v14, %v8752_v22  ;;  %v4062_v49 = vpop.f32.mrb[203].mxu1  ;;  %v4255_v27 = vpop.f32.mrb[11].mxu0 }
 0x4cf   : > { %v7230_v30 = vpack.c.bf16 %v4059_v42, %v4057_v62  ;;  %v7231_v45 = vpack.c.bf16 %v4252_v13, %v4250_v34  ;;  %v4063_v58 = vadd.f32 %v4062_v49, %v8756_v26  ;;  %v4256_v39 = vadd.f32 %v4255_v27, %v8758_v61 }
 0x4d0   : > { %5204 = vmatmul.mubr.bf16.gmra.mrb[52].mxu1 %v7834_v50 }
 0x4d1   : > { %6855 = vst [vmem:[%s8770_s18 + $0x140] sm:$0xff] %v7230_v30  ;;  %6856 = vst [vmem:[%s8770_s18 + $0x148] sm:$0xff] %v7231_v45  ;;  %v7232_v52 = vpack.c.bf16 %v4063_v58, %v4061_v48  ;;  %v7233_v15 = vpack.c.bf16 %v4256_v39, %v4254_v6  ;;  %5213 = vmatprep.mubr.bf16.mxu1 %v7835_v35 }
 0x4d3   : > { %6857 = vst [vmem:[%s8770_s18 + $0x160] sm:$0x77] %v7232_v52  ;;  %6858 = vst [vmem:[%s8770_s18 + $0x168] sm:$0x77] %v7233_v15  ;;  %v4066_v11 = vpop.f32.mrb[204].mxu1  ;;  %v4259_v47 = vpop.f32.mrb[12].mxu0 }
 0x4d4   : > { %v4067_v56 = vadd.f32 %v4066_v11, %v8750_v24  ;;  %v4260_v12 = vadd.f32 %v4259_v47, %v8752_v22  ;;  %v4068_v36 = vpop.f32.mrb[205].mxu1  ;;  %v4261_v53 = vpop.f32.mrb[13].mxu0 }
 0x4d5   : > { %v4069_v54 = vadd.f32 %v4068_v36, %v8756_v26  ;;  %v4262_v1 = vadd.f32 %v4261_v53, %v8758_v61  ;;  %v4070_v40 = vpop.f32.mrb[206].mxu1  ;;  %v4263_v0 = vpop.f32.mrb[14].mxu0 }
 0x4d6   : > { %v4071_v3 = vadd.f32 %v4070_v40, %v8750_v24  ;;  %v4264_v31 = vadd.f32 %v4263_v0, %v8752_v22  ;;  %v4072_v17 = vpop.f32.mrb[207].mxu1  ;;  %v4265_v4 = vpop.f32.mrb[15].mxu0 }
 0x4d7   : > { %v7234_v51 = vpack.c.bf16 %v4069_v54, %v4067_v56  ;;  %v7235_v32 = vpack.c.bf16 %v4262_v1, %v4260_v12  ;;  %v4073_v59 = vadd.f32 %v4072_v17, %v8756_v26  ;;  %v4266_v60 = vadd.f32 %v4265_v4, %v8758_v61 }
 0x4d8   : > { %5214 = vmatmul.mubr.bf16.gmra.mrb[56].mxu1 %v7836_v5 }
 0x4d9   : > { %6859 = vst [vmem:[%s8770_s18 + $0x1c0] sm:$0xff] %v7234_v51  ;;  %6860 = vst [vmem:[%s8770_s18 + $0x1c8] sm:$0xff] %v7235_v32  ;;  %v7236_v29 = vpack.c.bf16 %v4073_v59, %v4071_v3  ;;  %v7237_v18 = vpack.c.bf16 %v4266_v60, %v4264_v31  ;;  %5223 = vmatprep.mubr.bf16.mxu1 %v7837_v2 }
 0x4db   : > { %6861 = vst [vmem:[%s8770_s18 + $0x1e0] sm:$0x77] %v7236_v29  ;;  %6862 = vst [vmem:[%s8770_s18 + $0x1e8] sm:$0x77] %v7237_v18  ;;  %v4076_v63 = vpop.f32.mrb[208].mxu1  ;;  %v4269_v9 = vpop.f32.mrb[16].mxu0 }
 0x4dc   : > { %v4077_v55 = vadd.f32 %v4076_v63, %v8750_v24  ;;  %v4270_v57 = vadd.f32 %v4269_v9, %v8752_v22  ;;  %v4078_v16 = vpop.f32.mrb[209].mxu1  ;;  %v4271_v37 = vpop.f32.mrb[17].mxu0 }
 0x4dd   : > { %v4079_v7 = vadd.f32 %v4078_v16, %v8756_v26  ;;  %v4272_v19 = vadd.f32 %v4271_v37, %v8758_v61  ;;  %v4080_v28 = vpop.f32.mrb[210].mxu1  ;;  %v4273_v33 = vpop.f32.mrb[18].mxu0 }
 0x4de   : > { %v4081_v20 = vadd.f32 %v4080_v28, %v8750_v24  ;;  %v4274_v23 = vadd.f32 %v4273_v33, %v8752_v22  ;;  %v4082_v38 = vpop.f32.mrb[211].mxu1  ;;  %v4275_v43 = vpop.f32.mrb[19].mxu0 }
 0x4df   : > { %v7238_v44 = vpack.c.bf16 %v4079_v7, %v4077_v55  ;;  %v7239_v21 = vpack.c.bf16 %v4272_v19, %v4270_v57  ;;  %v4083_v62 = vadd.f32 %v4082_v38, %v8756_v26  ;;  %v4276_v34 = vadd.f32 %v4275_v43, %v8758_v61 }
 0x4e0   : > { %5224 = vmatmul.mubr.bf16.gmra.mrb[60].mxu1 %v7838_v41 }
 0x4e1   : > { %6863 = vst [vmem:[%s8770_s18 + $0x240] sm:$0xff] %v7238_v44  ;;  %6864 = vst [vmem:[%s8770_s18 + $0x248] sm:$0xff] %v7239_v21  ;;  %v7240_v46 = vpack.c.bf16 %v4083_v62, %v4081_v20  ;;  %v7241_v42 = vpack.c.bf16 %v4276_v34, %v4274_v23 }
 0x4e3   : > { %6865 = vst [vmem:[%s8770_s18 + $0x260] sm:$0x77] %v7240_v46  ;;  %6866 = vst [vmem:[%s8770_s18 + $0x268] sm:$0x77] %v7241_v42  ;;  %v4086_v13 = vpop.f32.mrb[212].mxu1  ;;  %v4279_v25 = vpop.f32.mrb[20].mxu0 }
 0x4e4   : > { %v4087_v14 = vadd.f32 %v4086_v13, %v8750_v24  ;;  %v4280_v48 = vadd.f32 %v4279_v25, %v8752_v22  ;;  %v4088_v6 = vpop.f32.mrb[213].mxu1  ;;  %v4281_v49 = vpop.f32.mrb[21].mxu0 }
 0x4e5   : > { %v4089_v27 = vadd.f32 %v4088_v6, %v8756_v26  ;;  %v4282_v30 = vadd.f32 %v4281_v49, %v8758_v61  ;;  %v4090_v45 = vpop.f32.mrb[214].mxu1  ;;  %v4283_v58 = vpop.f32.mrb[22].mxu0 }
 0x4e6   : > { %v4091_v39 = vadd.f32 %v4090_v45, %v8750_v24  ;;  %v4284_v50 = vadd.f32 %v4283_v58, %v8752_v22  ;;  %v4092_v52 = vpop.f32.mrb[215].mxu1  ;;  %v4285_v15 = vpop.f32.mrb[23].mxu0 }
 0x4e7   : > { %v7242_v35 = vpack.c.bf16 %v4089_v27, %v4087_v14  ;;  %v7243_v11 = vpack.c.bf16 %v4282_v30, %v4280_v48  ;;  %v4093_v47 = vadd.f32 %v4092_v52, %v8756_v26  ;;  %v4286_v56 = vadd.f32 %v4285_v15, %v8758_v61 }
 0x4e9   : > { %6867 = vst [vmem:[%s8770_s18 + $0x2c0] sm:$0xff] %v7242_v35  ;;  %6868 = vst [vmem:[%s8770_s18 + $0x2c8] sm:$0xff] %v7243_v11  ;;  %v7244_v12 = vpack.c.bf16 %v4093_v47, %v4091_v39  ;;  %v7245_v36 = vpack.c.bf16 %v4286_v56, %v4284_v50 }
 0x4eb   : > { %6869 = vst [vmem:[%s8770_s18 + $0x2e0] sm:$0x77] %v7244_v12  ;;  %6870 = vst [vmem:[%s8770_s18 + $0x2e8] sm:$0x77] %v7245_v36  ;;  %v4096_v53 = vpop.f32.mrb[216].mxu1  ;;  %v4289_v54 = vpop.f32.mrb[24].mxu0 }
 0x4ec   : > { %v4097_v1 = vadd.f32 %v4096_v53, %v8750_v24  ;;  %v4290_v40 = vadd.f32 %v4289_v54, %v8752_v22  ;;  %v4098_v0 = vpop.f32.mrb[217].mxu1  ;;  %v4291_v3 = vpop.f32.mrb[25].mxu0 }
 0x4ed   : > { %v4099_v31 = vadd.f32 %v4098_v0, %v8756_v26  ;;  %v4292_v17 = vadd.f32 %v4291_v3, %v8758_v61  ;;  %v4100_v4 = vpop.f32.mrb[218].mxu1  ;;  %v4293_v51 = vpop.f32.mrb[26].mxu0 }
 0x4ee   : > { %v4101_v32 = vadd.f32 %v4100_v4, %v8750_v24  ;;  %v4294_v59 = vadd.f32 %v4293_v51, %v8752_v22  ;;  %v4102_v60 = vpop.f32.mrb[219].mxu1  ;;  %v4295_v5 = vpop.f32.mrb[27].mxu0 }
 0x4ef   : > { %v7246_v29 = vpack.c.bf16 %v4099_v31, %v4097_v1  ;;  %v7247_v18 = vpack.c.bf16 %v4292_v17, %v4290_v40  ;;  %v4103_v2 = vadd.f32 %v4102_v60, %v8756_v26  ;;  %v4296_v63 = vadd.f32 %v4295_v5, %v8758_v61 }
 0x4f1   : > { %6871 = vst [vmem:[%s8770_s18 + $0x340] sm:$0xff] %v7246_v29  ;;  %6872 = vst [vmem:[%s8770_s18 + $0x348] sm:$0xff] %v7247_v18  ;;  %v7248_v9 = vpack.c.bf16 %v4103_v2, %v4101_v32  ;;  %v7249_v55 = vpack.c.bf16 %v4296_v63, %v4294_v59 }
 0x4f3   : > { %6873 = vst [vmem:[%s8770_s18 + $0x360] sm:$0x77] %v7248_v9  ;;  %6874 = vst [vmem:[%s8770_s18 + $0x368] sm:$0x77] %v7249_v55  ;;  %v4106_v57 = vpop.f32.mrb[220].mxu1  ;;  %v4299_v16 = vpop.f32.mrb[28].mxu0 }
 0x4f4   : > { %v4107_v37 = vadd.f32 %v4106_v57, %v8750_v24  ;;  %v4300_v7 = vadd.f32 %v4299_v16, %v8752_v22  ;;  %v4108_v19 = vpop.f32.mrb[221].mxu1  ;;  %v4301_v28 = vpop.f32.mrb[29].mxu0 }
 0x4f5   : > { %v4109_v33 = vadd.f32 %v4108_v19, %v8756_v26  ;;  %v4302_v20 = vadd.f32 %v4301_v28, %v8758_v61  ;;  %v4110_v23 = vpop.f32.mrb[222].mxu1  ;;  %v4303_v38 = vpop.f32.mrb[30].mxu0 }
 0x4f6   : > { %v4111_v43 = vadd.f32 %v4110_v23, %v8750_v24  ;;  %v4304_v44 = vadd.f32 %v4303_v38, %v8752_v22  ;;  %v4112_v21 = vpop.f32.mrb[223].mxu1  ;;  %v4305_v62 = vpop.f32.mrb[31].mxu0 }
 0x4f7   : > { %v7250_v34 = vpack.c.bf16 %v4109_v33, %v4107_v37  ;;  %v7251_v41 = vpack.c.bf16 %v4302_v20, %v4300_v7  ;;  %v4113_v46 = vadd.f32 %v4112_v21, %v8756_v26  ;;  %v4306_v42 = vadd.f32 %v4305_v62, %v8758_v61 }
 0x4f9   : > { %6875 = vst [vmem:[%s8770_s18 + $0x3c0] sm:$0xff] %v7250_v34  ;;  %6876 = vst [vmem:[%s8770_s18 + $0x3c8] sm:$0xff] %v7251_v41  ;;  %v7252_v13 = vpack.c.bf16 %v4113_v46, %v4111_v43  ;;  %v7253_v25 = vpack.c.bf16 %v4306_v42, %v4304_v44 }
 0x4fb   : > { %6877 = vst [vmem:[%s8770_s18 + $0x3e0] sm:$0x77] %v7252_v13  ;;  %6878 = vst [vmem:[%s8770_s18 + $0x3e8] sm:$0x77] %v7253_v25  ;;  %v4116_v14 = vpop.f32.mrb[224].mxu1  ;;  %v4309_v48 = vpop.f32.mrb[32].mxu0 }
 0x4fc   : > { %v4117_v6 = vadd.f32 %v4116_v14, %v8750_v24  ;;  %v4310_v49 = vadd.f32 %v4309_v48, %v8752_v22  ;;  %v4118_v27 = vpop.f32.mrb[225].mxu1  ;;  %v4311_v30 = vpop.f32.mrb[33].mxu0 }
 0x4fd   : > { %v4119_v45 = vadd.f32 %v4118_v27, %v8756_v26  ;;  %v4312_v58 = vadd.f32 %v4311_v30, %v8758_v61  ;;  %v4120_v39 = vpop.f32.mrb[226].mxu1  ;;  %v4313_v50 = vpop.f32.mrb[34].mxu0 }
 0x4fe   : > { %v4121_v52 = vadd.f32 %v4120_v39, %v8750_v24  ;;  %v4314_v15 = vadd.f32 %v4313_v50, %v8752_v22  ;;  %v4122_v35 = vpop.f32.mrb[227].mxu1  ;;  %v4315_v11 = vpop.f32.mrb[35].mxu0 }
 0x4ff   : > { %v7254_v47 = vpack.c.bf16 %v4119_v45, %v4117_v6  ;;  %v7255_v56 = vpack.c.bf16 %v4312_v58, %v4310_v49  ;;  %v4123_v12 = vadd.f32 %v4122_v35, %v8756_v26  ;;  %v4316_v36 = vadd.f32 %v4315_v11, %v8758_v61 }
 0x501   : > { %6879 = vst [vmem:[%s8770_s18 + $0x440] sm:$0xff] %v7254_v47  ;;  %6880 = vst [vmem:[%s8770_s18 + $0x448] sm:$0xff] %v7255_v56  ;;  %v7256_v53 = vpack.c.bf16 %v4123_v12, %v4121_v52  ;;  %v7257_v54 = vpack.c.bf16 %v4316_v36, %v4314_v15 }
 0x503   : > { %6881 = vst [vmem:[%s8770_s18 + $0x460] sm:$0x77] %v7256_v53  ;;  %6882 = vst [vmem:[%s8770_s18 + $0x468] sm:$0x77] %v7257_v54  ;;  %v4126_v1 = vpop.f32.mrb[228].mxu1  ;;  %v4319_v40 = vpop.f32.mrb[36].mxu0 }
 0x504   : > { %v4127_v0 = vadd.f32 %v4126_v1, %v8750_v24  ;;  %v4320_v3 = vadd.f32 %v4319_v40, %v8752_v22  ;;  %v4128_v31 = vpop.f32.mrb[229].mxu1  ;;  %v4321_v17 = vpop.f32.mrb[37].mxu0 }
 0x505   : > { %v4129_v4 = vadd.f32 %v4128_v31, %v8756_v26  ;;  %v4322_v51 = vadd.f32 %v4321_v17, %v8758_v61  ;;  %v4130_v32 = vpop.f32.mrb[230].mxu1  ;;  %v4323_v59 = vpop.f32.mrb[38].mxu0 }
 0x506   : > { %v4131_v60 = vadd.f32 %v4130_v32, %v8750_v24  ;;  %v4324_v5 = vadd.f32 %v4323_v59, %v8752_v22  ;;  %v4132_v29 = vpop.f32.mrb[231].mxu1  ;;  %v4325_v18 = vpop.f32.mrb[39].mxu0 }
 0x507   : > { %v7258_v2 = vpack.c.bf16 %v4129_v4, %v4127_v0  ;;  %v7259_v63 = vpack.c.bf16 %v4322_v51, %v4320_v3  ;;  %v4133_v9 = vadd.f32 %v4132_v29, %v8756_v26  ;;  %v4326_v55 = vadd.f32 %v4325_v18, %v8758_v61 }
 0x509   : > { %6883 = vst [vmem:[%s8770_s18 + $0x4c0] sm:$0xff] %v7258_v2  ;;  %6884 = vst [vmem:[%s8770_s18 + $0x4c8] sm:$0xff] %v7259_v63  ;;  %v7260_v57 = vpack.c.bf16 %v4133_v9, %v4131_v60  ;;  %v7261_v16 = vpack.c.bf16 %v4326_v55, %v4324_v5 }
 0x50b   : > { %6885 = vst [vmem:[%s8770_s18 + $0x4e0] sm:$0x77] %v7260_v57  ;;  %6886 = vst [vmem:[%s8770_s18 + $0x4e8] sm:$0x77] %v7261_v16  ;;  %v4136_v37 = vpop.f32.mrb[232].mxu1  ;;  %v4329_v7 = vpop.f32.mrb[40].mxu0 }
 0x50c   : > { %v4137_v19 = vadd.f32 %v4136_v37, %v8750_v24  ;;  %v4330_v28 = vadd.f32 %v4329_v7, %v8752_v22  ;;  %v4138_v33 = vpop.f32.mrb[233].mxu1  ;;  %v4331_v20 = vpop.f32.mrb[41].mxu0 }
 0x50d   : > { %v4139_v23 = vadd.f32 %v4138_v33, %v8756_v26  ;;  %v4332_v38 = vadd.f32 %v4331_v20, %v8758_v61  ;;  %v4140_v43 = vpop.f32.mrb[234].mxu1  ;;  %v4333_v44 = vpop.f32.mrb[42].mxu0 }
 0x50e   : > { %v4141_v21 = vadd.f32 %v4140_v43, %v8750_v24  ;;  %v4334_v62 = vadd.f32 %v4333_v44, %v8752_v22  ;;  %v4142_v34 = vpop.f32.mrb[235].mxu1  ;;  %v4335_v41 = vpop.f32.mrb[43].mxu0 }
 0x50f   : > { %v7262_v46 = vpack.c.bf16 %v4139_v23, %v4137_v19  ;;  %v7263_v42 = vpack.c.bf16 %v4332_v38, %v4330_v28  ;;  %v4143_v13 = vadd.f32 %v4142_v34, %v8756_v26  ;;  %v4336_v25 = vadd.f32 %v4335_v41, %v8758_v61 }
 0x511   : > { %6887 = vst [vmem:[%s8770_s18 + $0x540] sm:$0xff] %v7262_v46  ;;  %6888 = vst [vmem:[%s8770_s18 + $0x548] sm:$0xff] %v7263_v42  ;;  %v7264_v14 = vpack.c.bf16 %v4143_v13, %v4141_v21  ;;  %v7265_v48 = vpack.c.bf16 %v4336_v25, %v4334_v62 }
 0x513   : > { %6889 = vst [vmem:[%s8770_s18 + $0x560] sm:$0x77] %v7264_v14  ;;  %6890 = vst [vmem:[%s8770_s18 + $0x568] sm:$0x77] %v7265_v48  ;;  %v4146_v6 = vpop.f32.mrb[236].mxu1  ;;  %v4339_v49 = vpop.f32.mrb[44].mxu0 }
 0x514   : > { %v4147_v27 = vadd.f32 %v4146_v6, %v8750_v24  ;;  %v4340_v30 = vadd.f32 %v4339_v49, %v8752_v22  ;;  %v4148_v45 = vpop.f32.mrb[237].mxu1  ;;  %v4341_v58 = vpop.f32.mrb[45].mxu0 }
 0x515   : > { %v4149_v39 = vadd.f32 %v4148_v45, %v8756_v26  ;;  %v4342_v50 = vadd.f32 %v4341_v58, %v8758_v61  ;;  %v4150_v52 = vpop.f32.mrb[238].mxu1  ;;  %v4343_v15 = vpop.f32.mrb[46].mxu0 }
 0x516   : > { %v4151_v35 = vadd.f32 %v4150_v52, %v8750_v24  ;;  %v4344_v11 = vadd.f32 %v4343_v15, %v8752_v22  ;;  %v4152_v47 = vpop.f32.mrb[239].mxu1  ;;  %v4345_v56 = vpop.f32.mrb[47].mxu0 }
 0x517   : > { %v7266_v12 = vpack.c.bf16 %v4149_v39, %v4147_v27  ;;  %v7267_v36 = vpack.c.bf16 %v4342_v50, %v4340_v30  ;;  %v4153_v53 = vadd.f32 %v4152_v47, %v8756_v26  ;;  %v4346_v54 = vadd.f32 %v4345_v56, %v8758_v61 }
 0x519   : > { %6891 = vst [vmem:[%s8770_s18 + $0x5c0] sm:$0xff] %v7266_v12  ;;  %6892 = vst [vmem:[%s8770_s18 + $0x5c8] sm:$0xff] %v7267_v36  ;;  %v7268_v1 = vpack.c.bf16 %v4153_v53, %v4151_v35  ;;  %v7269_v40 = vpack.c.bf16 %v4346_v54, %v4344_v11 }
 0x51b   : > { %6893 = vst [vmem:[%s8770_s18 + $0x5e0] sm:$0x77] %v7268_v1  ;;  %6894 = vst [vmem:[%s8770_s18 + $0x5e8] sm:$0x77] %v7269_v40  ;;  %v4156_v0 = vpop.f32.mrb[240].mxu1  ;;  %v4349_v3 = vpop.f32.mrb[48].mxu0 }
 0x51c   : > { %v4157_v31 = vadd.f32 %v4156_v0, %v8750_v24  ;;  %v4350_v17 = vadd.f32 %v4349_v3, %v8752_v22  ;;  %v4158_v4 = vpop.f32.mrb[241].mxu1  ;;  %v4351_v51 = vpop.f32.mrb[49].mxu0 }
 0x51d   : > { %v4159_v32 = vadd.f32 %v4158_v4, %v8756_v26  ;;  %v4352_v59 = vadd.f32 %v4351_v51, %v8758_v61  ;;  %v4160_v60 = vpop.f32.mrb[242].mxu1  ;;  %v4353_v5 = vpop.f32.mrb[50].mxu0 }
 0x51e   : > { %v4161_v29 = vadd.f32 %v4160_v60, %v8750_v24  ;;  %v4354_v18 = vadd.f32 %v4353_v5, %v8752_v22  ;;  %v4162_v2 = vpop.f32.mrb[243].mxu1  ;;  %v4355_v63 = vpop.f32.mrb[51].mxu0 }
 0x51f   : > { %v7270_v9 = vpack.c.bf16 %v4159_v32, %v4157_v31  ;;  %v7271_v55 = vpack.c.bf16 %v4352_v59, %v4350_v17  ;;  %v4163_v57 = vadd.f32 %v4162_v2, %v8756_v26  ;;  %v4356_v16 = vadd.f32 %v4355_v63, %v8758_v61  ;;  %v4869_v2 = vld [vmem:[%s10647_s2 + $0x6] sm:$0x3] }
 0x521   : > { %6895 = vst [vmem:[%s8770_s18 + $0x640] sm:$0xff] %v7270_v9  ;;  %6896 = vst [vmem:[%s8770_s18 + $0x648] sm:$0xff] %v7271_v55  ;;  %v7272_v37 = vpack.c.bf16 %v4163_v57, %v4161_v29  ;;  %v7273_v7 = vpack.c.bf16 %v4356_v16, %v4354_v18 }
 0x523   : > { %6897 = vst [vmem:[%s8770_s18 + $0x660] sm:$0x77] %v7272_v37  ;;  %6898 = vst [vmem:[%s8770_s18 + $0x668] sm:$0x77] %v7273_v7  ;;  %v4166_v19 = vpop.f32.mrb[244].mxu1  ;;  %v4359_v28 = vpop.f32.mrb[52].mxu0 }
 0x524   : > { %v4167_v33 = vadd.f32 %v4166_v19, %v8750_v24  ;;  %v4360_v20 = vadd.f32 %v4359_v28, %v8752_v22  ;;  %v4168_v23 = vpop.f32.mrb[245].mxu1  ;;  %v4361_v38 = vpop.f32.mrb[53].mxu0  ;;  %v10153_v28 = vrot.slane %v4869_v2, %v8436_v8 }
 0x525   : > { %v4169_v43 = vadd.f32 %v4168_v23, %v8756_v26  ;;  %v4362_v44 = vadd.f32 %v4361_v38, %v8758_v61  ;;  %v4170_v21 = vpop.f32.mrb[246].mxu1  ;;  %v4363_v62 = vpop.f32.mrb[54].mxu0  ;;  %v10158_v23 = vrot.slane %v4869_v2, %v8442_v10 }
 0x526   : > { %v4171_v34 = vadd.f32 %v4170_v21, %v8750_v24  ;;  %v4364_v41 = vadd.f32 %v4363_v62, %v8752_v22  ;;  %v4172_v46 = vpop.f32.mrb[247].mxu1  ;;  %v4365_v42 = vpop.f32.mrb[55].mxu0 }
 0x527   : > { %v7274_v13 = vpack.c.bf16 %v4169_v43, %v4167_v33  ;;  %v7275_v25 = vpack.c.bf16 %v4362_v44, %v4360_v20  ;;  %v4173_v14 = vadd.f32 %v4172_v46, %v8756_v26  ;;  %v4366_v48 = vadd.f32 %v4365_v42, %v8758_v61 }
 0x529   : > { %6899 = vst [vmem:[%s8770_s18 + $0x6c0] sm:$0xff] %v7274_v13  ;;  %6900 = vst [vmem:[%s8770_s18 + $0x6c8] sm:$0xff] %v7275_v25  ;;  %v7276_v6 = vpack.c.bf16 %v4173_v14, %v4171_v34  ;;  %v7277_v49 = vpack.c.bf16 %v4366_v48, %v4364_v41 }
 0x52b   : > { %6901 = vst [vmem:[%s8770_s18 + $0x6e0] sm:$0x77] %v7276_v6  ;;  %6902 = vst [vmem:[%s8770_s18 + $0x6e8] sm:$0x77] %v7277_v49  ;;  %v4176_v27 = vpop.f32.mrb[248].mxu1  ;;  %v4369_v30 = vpop.f32.mrb[56].mxu0 }
 0x52c   : > { %v4177_v45 = vadd.f32 %v4176_v27, %v8750_v24  ;;  %v4370_v58 = vadd.f32 %v4369_v30, %v8752_v22  ;;  %v4178_v39 = vpop.f32.mrb[249].mxu1  ;;  %v4371_v50 = vpop.f32.mrb[57].mxu0 }
 0x52d   : > { %v4179_v52 = vadd.f32 %v4178_v39, %v8756_v26  ;;  %v4372_v15 = vadd.f32 %v4371_v50, %v8758_v61  ;;  %v4180_v35 = vpop.f32.mrb[250].mxu1  ;;  %v4373_v11 = vpop.f32.mrb[58].mxu0 }
 0x52e   : > { %v4181_v47 = vadd.f32 %v4180_v35, %v8750_v24  ;;  %v4374_v56 = vadd.f32 %v4373_v11, %v8752_v22  ;;  %v4182_v12 = vpop.f32.mrb[251].mxu1  ;;  %v4375_v36 = vpop.f32.mrb[59].mxu0 }
 0x52f   : > { %v7278_v53 = vpack.c.bf16 %v4179_v52, %v4177_v45  ;;  %v7279_v54 = vpack.c.bf16 %v4372_v15, %v4370_v58  ;;  %v4183_v1 = vadd.f32 %v4182_v12, %v8756_v26  ;;  %v4376_v40 = vadd.f32 %v4375_v36, %v8758_v61 }
 0x531   : > { %6903 = vst [vmem:[%s8770_s18 + $0x740] sm:$0xff] %v7278_v53  ;;  %6904 = vst [vmem:[%s8770_s18 + $0x748] sm:$0xff] %v7279_v54  ;;  %v7280_v0 = vpack.c.bf16 %v4183_v1, %v4181_v47  ;;  %v7281_v3 = vpack.c.bf16 %v4376_v40, %v4374_v56 }
 0x533   : > { %6905 = vst [vmem:[%s8770_s18 + $0x760] sm:$0x77] %v7280_v0  ;;  %6906 = vst [vmem:[%s8770_s18 + $0x768] sm:$0x77] %v7281_v3  ;;  %v4186_v31 = vpop.f32.mrb[252].mxu1  ;;  %v4379_v17 = vpop.f32.mrb[60].mxu0 }
 0x534   : > { %v4187_v4 = vadd.f32 %v4186_v31, %v8750_v24  ;;  %v4380_v51 = vadd.f32 %v4379_v17, %v8752_v22  ;;  %v4188_v32 = vpop.f32.mrb[253].mxu1  ;;  %v4381_v59 = vpop.f32.mrb[61].mxu0 }
 0x535   : > { %v4189_v60 = vadd.f32 %v4188_v32, %v8756_v26  ;;  %v4382_v5 = vadd.f32 %v4381_v59, %v8758_v61  ;;  %v4190_v29 = vpop.f32.mrb[254].mxu1  ;;  %v4383_v18 = vpop.f32.mrb[62].mxu0 }
 0x536   : > { %v4191_v63 = vadd.f32 %v4190_v29, %v8750_v24  ;;  %v4384_v9 = vadd.f32 %v4383_v18, %v8752_v22  ;;  %v4192_v55 = vpop.f32.mrb[255].mxu1  ;;  %v4385_v57 = vpop.f32.mrb[63].mxu0 }
 0x537   : > { %v7282_v16 = vpack.c.bf16 %v4189_v60, %v4187_v4  ;;  %v7283_v37 = vpack.c.bf16 %v4382_v5, %v4380_v51  ;;  %v4193_v7 = vadd.f32 %v4192_v55, %v8756_v26  ;;  %v4386_v19 = vadd.f32 %v4385_v57, %v8758_v61 }
 0x539   : > { %6907 = vst [vmem:[%s8770_s18 + $0x7c0] sm:$0xff] %v7282_v16  ;;  %6908 = vst [vmem:[%s8770_s18 + $0x7c8] sm:$0xff] %v7283_v37  ;;  %v7284_v33 = vpack.c.bf16 %v4193_v7, %v4191_v63  ;;  %v7285_v20 = vpack.c.bf16 %v4386_v19, %v4384_v9 }
 0x53b   : > { %6909 = vst [vmem:[%s8770_s18 + $0x7e0] sm:$0x77] %v7284_v33  ;;  %6910 = vst [vmem:[%s8770_s18 + $0x7e8] sm:$0x77] %v7285_v20  ;;  %v5075_v38 = vpop.f32.mrb[0].mxu1 }
 0x53c   : > { %v5076_v43 = vadd.f32 %v5075_v38, %v10153_v28  ;;  %v5077_v44 = vpop.f32.mrb[1].mxu1 }
 0x53d   : > { %v5078_v21 = vadd.f32 %v5077_v44, %v10158_v23  ;;  %v5079_v62 = vpop.f32.mrb[2].mxu1 }
 0x53e   : > { %v5080_v34 = vadd.f32 %v5079_v62, %v10153_v28  ;;  %v5081_v8 = vpop.f32.mrb[3].mxu1  ;;  %v5234_v46 = vmax.f32 %v5076_v43, 0.0 }
 0x53f   : > { %v5082_v41 = vadd.f32 %v5081_v8, %v10158_v23  ;;  %v5235_v13 = vmax.f32 %v5078_v21, 0.0 }
 0x540   : > { %v5236_v42 = vmax.f32 %v5080_v34, 0.0 }
 0x541   : > { %v5237_v25 = vmax.f32 %v5082_v41, 0.0 }
 0x542   : > { %v5298_v10 = vpack.c.bf16 %v5236_v42, %v5234_v46 }
 0x543   : > { %v5299_v14 = vpack.c.bf16 %v5237_v25, %v5235_v13  ;;  %v5085_v48 = vpop.f32.mrb[4].mxu1 }
 0x544   : > { %v5086_v6 = vadd.f32 %v5085_v48, %v10153_v28  ;;  %v5087_v49 = vpop.f32.mrb[5].mxu1 }
 0x545   : > { %v5088_v27 = vadd.f32 %v5087_v49, %v10158_v23  ;;  %v5089_v30 = vpop.f32.mrb[6].mxu1  ;;  %5362 = vmatprep.mubr.bf16.mxu0 %v5299_v14  ;;  %5555 = vmatprep.mubr.bf16.mxu1 %v5299_v14 }
 0x546   : > { %v5090_v45 = vadd.f32 %v5089_v30, %v10153_v28  ;;  %v5091_v58 = vpop.f32.mrb[7].mxu1  ;;  %5363 = vmatmul.mubr.bf16.vlgmr.msra.gmra.mrb[64].mxu0 %v5298_v10  ;;  %5556 = vmatmul.mubr.bf16.vlgmr.msra.gmra.mrb[64].mxu1 %v5298_v10  ;;  %v5238_v50 = vmax.f32 %v5086_v6, 0.0 }
 0x547   : > { %v5092_v39 = vadd.f32 %v5091_v58, %v10158_v23  ;;  %v5239_v15 = vmax.f32 %v5088_v27, 0.0 }
 0x548   : > { %v5240_v52 = vmax.f32 %v5090_v45, 0.0 }
 0x549   : > { %v5241_v35 = vmax.f32 %v5092_v39, 0.0 }
 0x54a   : > { %v5300_v11 = vpack.c.bf16 %v5240_v52, %v5238_v50 }
 0x54b   : > { %v5301_v47 = vpack.c.bf16 %v5241_v35, %v5239_v15  ;;  %v5095_v56 = vpop.f32.mrb[8].mxu1 }
 0x54c   : > { %v5096_v12 = vadd.f32 %v5095_v56, %v10153_v28  ;;  %v5097_v36 = vpop.f32.mrb[9].mxu1 }
 0x54d   : > { %v5098_v53 = vadd.f32 %v5097_v36, %v10158_v23  ;;  %v5099_v54 = vpop.f32.mrb[10].mxu1  ;;  %5372 = vmatprep.mubr.bf16.mxu0 %v5301_v47  ;;  %5565 = vmatprep.mubr.bf16.mxu1 %v5301_v47 }
 0x54e   : > { %v5100_v1 = vadd.f32 %v5099_v54, %v10153_v28  ;;  %v5101_v40 = vpop.f32.mrb[11].mxu1  ;;  %5373 = vmatmul.mubr.bf16.gmra.mrb[68].mxu0 %v5300_v11  ;;  %5566 = vmatmul.mubr.bf16.gmra.mrb[68].mxu1 %v5300_v11  ;;  %v5242_v3 = vmax.f32 %v5096_v12, 0.0 }
 0x54f   : > { %v5102_v0 = vadd.f32 %v5101_v40, %v10158_v23  ;;  %v5243_v17 = vmax.f32 %v5098_v53, 0.0 }
 0x550   : > { %v5244_v31 = vmax.f32 %v5100_v1, 0.0 }
 0x551   : > { %v5245_v4 = vmax.f32 %v5102_v0, 0.0 }
 0x552   : > { %v5302_v51 = vpack.c.bf16 %v5244_v31, %v5242_v3 }
 0x553   : > { %v5303_v32 = vpack.c.bf16 %v5245_v4, %v5243_v17  ;;  %v5105_v59 = vpop.f32.mrb[12].mxu1 }
 0x554   : > { %v5106_v60 = vadd.f32 %v5105_v59, %v10153_v28  ;;  %v5107_v5 = vpop.f32.mrb[13].mxu1 }
 0x555   : > { %v5108_v29 = vadd.f32 %v5107_v5, %v10158_v23  ;;  %v5109_v18 = vpop.f32.mrb[14].mxu1  ;;  %5382 = vmatprep.mubr.bf16.mxu0 %v5303_v32  ;;  %5575 = vmatprep.mubr.bf16.mxu1 %v5303_v32 }
 0x556   : > { %v5110_v2 = vadd.f32 %v5109_v18, %v10153_v28  ;;  %v5111_v63 = vpop.f32.mrb[15].mxu1  ;;  %5383 = vmatmul.mubr.bf16.gmra.mrb[72].mxu0 %v5302_v51  ;;  %5576 = vmatmul.mubr.bf16.gmra.mrb[72].mxu1 %v5302_v51  ;;  %v5246_v55 = vmax.f32 %v5106_v60, 0.0 }
 0x557   : > { %v5112_v9 = vadd.f32 %v5111_v63, %v10158_v23  ;;  %v5247_v16 = vmax.f32 %v5108_v29, 0.0 }
 0x558   : > { %v5248_v57 = vmax.f32 %v5110_v2, 0.0 }
 0x559   : > { %v5249_v37 = vmax.f32 %v5112_v9, 0.0 }
 0x55a   : > { %v5304_v7 = vpack.c.bf16 %v5248_v57, %v5246_v55 }
 0x55b   : > { %v5305_v19 = vpack.c.bf16 %v5249_v37, %v5247_v16  ;;  %v5115_v33 = vpop.f32.mrb[16].mxu1 }
 0x55c   : > { %v5116_v20 = vadd.f32 %v5115_v33, %v10153_v28  ;;  %v5117_v38 = vpop.f32.mrb[17].mxu1 }
 0x55d   : > { %v5118_v43 = vadd.f32 %v5117_v38, %v10158_v23  ;;  %v5119_v44 = vpop.f32.mrb[18].mxu1  ;;  %5392 = vmatprep.mubr.bf16.mxu0 %v5305_v19  ;;  %5585 = vmatprep.mubr.bf16.mxu1 %v5305_v19 }
 0x55e   : > { %v5120_v21 = vadd.f32 %v5119_v44, %v10153_v28  ;;  %v5121_v62 = vpop.f32.mrb[19].mxu1  ;;  %5393 = vmatmul.mubr.bf16.gmra.mrb[76].mxu0 %v5304_v7  ;;  %5586 = vmatmul.mubr.bf16.gmra.mrb[76].mxu1 %v5304_v7  ;;  %v5250_v8 = vmax.f32 %v5116_v20, 0.0 }
 0x55f   : > { %v5122_v34 = vadd.f32 %v5121_v62, %v10158_v23  ;;  %v5251_v46 = vmax.f32 %v5118_v43, 0.0 }
 0x560   : > { %v5252_v41 = vmax.f32 %v5120_v21, 0.0 }
 0x561   : > { %v5253_v42 = vmax.f32 %v5122_v34, 0.0 }
 0x562   : > { %v5306_v13 = vpack.c.bf16 %v5252_v41, %v5250_v8 }
 0x563   : > { %v5307_v25 = vpack.c.bf16 %v5253_v42, %v5251_v46  ;;  %v5125_v10 = vpop.f32.mrb[20].mxu1 }
 0x564   : > { %v5126_v14 = vadd.f32 %v5125_v10, %v10153_v28  ;;  %v5127_v48 = vpop.f32.mrb[21].mxu1 }
 0x565   : > { %v5128_v6 = vadd.f32 %v5127_v48, %v10158_v23  ;;  %v5129_v49 = vpop.f32.mrb[22].mxu1  ;;  %5402 = vmatprep.mubr.bf16.mxu0 %v5307_v25  ;;  %5595 = vmatprep.mubr.bf16.mxu1 %v5307_v25 }
 0x566   : > { %v5130_v27 = vadd.f32 %v5129_v49, %v10153_v28  ;;  %v5131_v30 = vpop.f32.mrb[23].mxu1  ;;  %5403 = vmatmul.mubr.bf16.gmra.mrb[80].mxu0 %v5306_v13  ;;  %5596 = vmatmul.mubr.bf16.gmra.mrb[80].mxu1 %v5306_v13  ;;  %v5254_v58 = vmax.f32 %v5126_v14, 0.0 }
 0x567   : > { %v5132_v45 = vadd.f32 %v5131_v30, %v10158_v23  ;;  %v5255_v50 = vmax.f32 %v5128_v6, 0.0 }
 0x568   : > { %v5256_v39 = vmax.f32 %v5130_v27, 0.0 }
 0x569   : > { %v5257_v52 = vmax.f32 %v5132_v45, 0.0 }
 0x56a   : > { %v5308_v15 = vpack.c.bf16 %v5256_v39, %v5254_v58 }
 0x56b   : > { %v5309_v35 = vpack.c.bf16 %v5257_v52, %v5255_v50  ;;  %v5135_v11 = vpop.f32.mrb[24].mxu1 }
 0x56c   : > { %v5136_v47 = vadd.f32 %v5135_v11, %v10153_v28  ;;  %v5137_v56 = vpop.f32.mrb[25].mxu1 }
 0x56d   : > { %v5138_v12 = vadd.f32 %v5137_v56, %v10158_v23  ;;  %v5139_v36 = vpop.f32.mrb[26].mxu1  ;;  %5412 = vmatprep.mubr.bf16.mxu0 %v5309_v35  ;;  %5605 = vmatprep.mubr.bf16.mxu1 %v5309_v35 }
 0x56e   : > { %v5140_v53 = vadd.f32 %v5139_v36, %v10153_v28  ;;  %v5141_v54 = vpop.f32.mrb[27].mxu1  ;;  %5413 = vmatmul.mubr.bf16.gmra.mrb[84].mxu0 %v5308_v15  ;;  %5606 = vmatmul.mubr.bf16.gmra.mrb[84].mxu1 %v5308_v15  ;;  %v5258_v40 = vmax.f32 %v5136_v47, 0.0 }
 0x56f   : > { %v5142_v1 = vadd.f32 %v5141_v54, %v10158_v23  ;;  %v5259_v3 = vmax.f32 %v5138_v12, 0.0 }
 0x570   : > { %v5260_v0 = vmax.f32 %v5140_v53, 0.0 }
 0x571   : > { %v5261_v31 = vmax.f32 %v5142_v1, 0.0 }
 0x572   : > { %v5310_v17 = vpack.c.bf16 %v5260_v0, %v5258_v40 }
 0x573   : > { %v5311_v4 = vpack.c.bf16 %v5261_v31, %v5259_v3  ;;  %v5145_v51 = vpop.f32.mrb[28].mxu1 }
 0x574   : > { %v5146_v32 = vadd.f32 %v5145_v51, %v10153_v28  ;;  %v5147_v59 = vpop.f32.mrb[29].mxu1 }
 0x575   : > { %v5148_v60 = vadd.f32 %v5147_v59, %v10158_v23  ;;  %v5149_v5 = vpop.f32.mrb[30].mxu1  ;;  %5422 = vmatprep.mubr.bf16.mxu0 %v5311_v4  ;;  %5615 = vmatprep.mubr.bf16.mxu1 %v5311_v4 }
 0x576   : > { %v5150_v29 = vadd.f32 %v5149_v5, %v10153_v28  ;;  %v5151_v18 = vpop.f32.mrb[31].mxu1  ;;  %5423 = vmatmul.mubr.bf16.gmra.mrb[88].mxu0 %v5310_v17  ;;  %5616 = vmatmul.mubr.bf16.gmra.mrb[88].mxu1 %v5310_v17  ;;  %v5262_v63 = vmax.f32 %v5146_v32, 0.0 }
 0x577   : > { %v5152_v2 = vadd.f32 %v5151_v18, %v10158_v23  ;;  %v5263_v55 = vmax.f32 %v5148_v60, 0.0 }
 0x578   : > { %v5264_v9 = vmax.f32 %v5150_v29, 0.0 }
 0x579   : > { %v5265_v57 = vmax.f32 %v5152_v2, 0.0 }
 0x57a   : > { %v5312_v16 = vpack.c.bf16 %v5264_v9, %v5262_v63 }
 0x57b   : > { %v5313_v37 = vpack.c.bf16 %v5265_v57, %v5263_v55  ;;  %v5155_v7 = vpop.f32.mrb[32].mxu1 }
 0x57c   : > { %v5156_v19 = vadd.f32 %v5155_v7, %v10153_v28  ;;  %v5157_v33 = vpop.f32.mrb[33].mxu1 }
 0x57d   : > { %v5158_v20 = vadd.f32 %v5157_v33, %v10158_v23  ;;  %v5159_v38 = vpop.f32.mrb[34].mxu1  ;;  %5432 = vmatprep.mubr.bf16.mxu0 %v5313_v37  ;;  %5625 = vmatprep.mubr.bf16.mxu1 %v5313_v37 }
 0x57e   : > { %v5160_v43 = vadd.f32 %v5159_v38, %v10153_v28  ;;  %v5161_v44 = vpop.f32.mrb[35].mxu1  ;;  %5433 = vmatmul.mubr.bf16.gmra.mrb[92].mxu0 %v5312_v16  ;;  %5626 = vmatmul.mubr.bf16.gmra.mrb[92].mxu1 %v5312_v16  ;;  %v5266_v62 = vmax.f32 %v5156_v19, 0.0 }
 0x57f   : > { %v5162_v21 = vadd.f32 %v5161_v44, %v10158_v23  ;;  %v5267_v8 = vmax.f32 %v5158_v20, 0.0 }
 0x580   : > { %v5268_v34 = vmax.f32 %v5160_v43, 0.0 }
 0x581   : > { %v5269_v41 = vmax.f32 %v5162_v21, 0.0 }
 0x582   : > { %v5314_v46 = vpack.c.bf16 %v5268_v34, %v5266_v62 }
 0x583   : > { %v5315_v42 = vpack.c.bf16 %v5269_v41, %v5267_v8  ;;  %v5165_v13 = vpop.f32.mrb[36].mxu1 }
 0x584   : > { %v5166_v25 = vadd.f32 %v5165_v13, %v10153_v28  ;;  %v5167_v10 = vpop.f32.mrb[37].mxu1 }
 0x585   : > { %v5168_v14 = vadd.f32 %v5167_v10, %v10158_v23  ;;  %v5169_v48 = vpop.f32.mrb[38].mxu1  ;;  %5442 = vmatprep.mubr.bf16.mxu0 %v5315_v42  ;;  %5635 = vmatprep.mubr.bf16.mxu1 %v5315_v42 }
 0x586   : > { %v5170_v6 = vadd.f32 %v5169_v48, %v10153_v28  ;;  %v5171_v49 = vpop.f32.mrb[39].mxu1  ;;  %5443 = vmatmul.mubr.bf16.gmra.mrb[96].mxu0 %v5314_v46  ;;  %5636 = vmatmul.mubr.bf16.gmra.mrb[96].mxu1 %v5314_v46  ;;  %v5270_v30 = vmax.f32 %v5166_v25, 0.0 }
 0x587   : > { %v5172_v27 = vadd.f32 %v5171_v49, %v10158_v23  ;;  %v5271_v58 = vmax.f32 %v5168_v14, 0.0 }
 0x588   : > { %v5272_v45 = vmax.f32 %v5170_v6, 0.0 }
 0x589   : > { %v5273_v39 = vmax.f32 %v5172_v27, 0.0 }
 0x58a   : > { %v5316_v50 = vpack.c.bf16 %v5272_v45, %v5270_v30 }
 0x58b   : > { %v5317_v52 = vpack.c.bf16 %v5273_v39, %v5271_v58  ;;  %v5175_v15 = vpop.f32.mrb[40].mxu1 }
 0x58c   : > { %v5176_v35 = vadd.f32 %v5175_v15, %v10153_v28  ;;  %v5177_v11 = vpop.f32.mrb[41].mxu1 }
 0x58d   : > { %v5178_v47 = vadd.f32 %v5177_v11, %v10158_v23  ;;  %v5179_v56 = vpop.f32.mrb[42].mxu1  ;;  %5452 = vmatprep.mubr.bf16.mxu0 %v5317_v52  ;;  %5645 = vmatprep.mubr.bf16.mxu1 %v5317_v52 }
 0x58e   : > { %v5180_v12 = vadd.f32 %v5179_v56, %v10153_v28  ;;  %v5181_v36 = vpop.f32.mrb[43].mxu1  ;;  %5453 = vmatmul.mubr.bf16.gmra.mrb[100].mxu0 %v5316_v50  ;;  %5646 = vmatmul.mubr.bf16.gmra.mrb[100].mxu1 %v5316_v50  ;;  %v5274_v54 = vmax.f32 %v5176_v35, 0.0 }
 0x58f   : > { %v5182_v53 = vadd.f32 %v5181_v36, %v10158_v23  ;;  %v5275_v40 = vmax.f32 %v5178_v47, 0.0 }
 0x590   : > { %v5276_v1 = vmax.f32 %v5180_v12, 0.0 }
 0x591   : > { %v5277_v0 = vmax.f32 %v5182_v53, 0.0 }
 0x592   : > { %v5318_v3 = vpack.c.bf16 %v5276_v1, %v5274_v54 }
 0x593   : > { %v5319_v31 = vpack.c.bf16 %v5277_v0, %v5275_v40  ;;  %v5185_v17 = vpop.f32.mrb[44].mxu1 }
 0x594   : > { %v5186_v4 = vadd.f32 %v5185_v17, %v10153_v28  ;;  %v5187_v51 = vpop.f32.mrb[45].mxu1 }
 0x595   : > { %v5188_v32 = vadd.f32 %v5187_v51, %v10158_v23  ;;  %v5189_v59 = vpop.f32.mrb[46].mxu1  ;;  %5462 = vmatprep.mubr.bf16.mxu0 %v5319_v31  ;;  %5655 = vmatprep.mubr.bf16.mxu1 %v5319_v31 }
 0x596   : > { %v5190_v60 = vadd.f32 %v5189_v59, %v10153_v28  ;;  %v5191_v5 = vpop.f32.mrb[47].mxu1  ;;  %5463 = vmatmul.mubr.bf16.gmra.mrb[104].mxu0 %v5318_v3  ;;  %5656 = vmatmul.mubr.bf16.gmra.mrb[104].mxu1 %v5318_v3  ;;  %v5278_v18 = vmax.f32 %v5186_v4, 0.0 }
 0x597   : > { %v5192_v29 = vadd.f32 %v5191_v5, %v10158_v23  ;;  %v5279_v63 = vmax.f32 %v5188_v32, 0.0 }
 0x598   : > { %v5280_v2 = vmax.f32 %v5190_v60, 0.0 }
 0x599   : > { %v5281_v9 = vmax.f32 %v5192_v29, 0.0 }
 0x59a   : > { %v5320_v55 = vpack.c.bf16 %v5280_v2, %v5278_v18 }
 0x59b   : > { %v5321_v57 = vpack.c.bf16 %v5281_v9, %v5279_v63  ;;  %v5195_v16 = vpop.f32.mrb[48].mxu1 }
 0x59c   : > { %v5196_v37 = vadd.f32 %v5195_v16, %v10153_v28  ;;  %v5197_v7 = vpop.f32.mrb[49].mxu1 }
 0x59d   : > { %v5198_v19 = vadd.f32 %v5197_v7, %v10158_v23  ;;  %v5199_v33 = vpop.f32.mrb[50].mxu1  ;;  %5472 = vmatprep.mubr.bf16.mxu0 %v5321_v57  ;;  %5665 = vmatprep.mubr.bf16.mxu1 %v5321_v57 }
 0x59e   : > { %v5200_v20 = vadd.f32 %v5199_v33, %v10153_v28  ;;  %v5201_v38 = vpop.f32.mrb[51].mxu1  ;;  %5473 = vmatmul.mubr.bf16.gmra.mrb[108].mxu0 %v5320_v55  ;;  %5666 = vmatmul.mubr.bf16.gmra.mrb[108].mxu1 %v5320_v55  ;;  %v5282_v44 = vmax.f32 %v5196_v37, 0.0 }
 0x59f   : > { %v5202_v43 = vadd.f32 %v5201_v38, %v10158_v23  ;;  %v5283_v62 = vmax.f32 %v5198_v19, 0.0 }
 0x5a0   : > { %v5284_v21 = vmax.f32 %v5200_v20, 0.0 }
 0x5a1   : > { %v5285_v34 = vmax.f32 %v5202_v43, 0.0 }
 0x5a2   : > { %v5322_v8 = vpack.c.bf16 %v5284_v21, %v5282_v44 }
 0x5a3   : > { %v5323_v41 = vpack.c.bf16 %v5285_v34, %v5283_v62  ;;  %v5205_v46 = vpop.f32.mrb[52].mxu1 }
 0x5a4   : > { %v5206_v42 = vadd.f32 %v5205_v46, %v10153_v28  ;;  %v5207_v13 = vpop.f32.mrb[53].mxu1 }
 0x5a5   : > { %v5208_v25 = vadd.f32 %v5207_v13, %v10158_v23  ;;  %v5209_v10 = vpop.f32.mrb[54].mxu1  ;;  %5482 = vmatprep.mubr.bf16.mxu0 %v5323_v41  ;;  %5675 = vmatprep.mubr.bf16.mxu1 %v5323_v41 }
 0x5a6   : > { %v5210_v14 = vadd.f32 %v5209_v10, %v10153_v28  ;;  %v5211_v48 = vpop.f32.mrb[55].mxu1  ;;  %5483 = vmatmul.mubr.bf16.gmra.mrb[112].mxu0 %v5322_v8  ;;  %5676 = vmatmul.mubr.bf16.gmra.mrb[112].mxu1 %v5322_v8  ;;  %v5286_v49 = vmax.f32 %v5206_v42, 0.0 }
 0x5a7   : > { %v5212_v6 = vadd.f32 %v5211_v48, %v10158_v23  ;;  %v5287_v30 = vmax.f32 %v5208_v25, 0.0 }
 0x5a8   : > { %v5288_v27 = vmax.f32 %v5210_v14, 0.0 }
 0x5a9   : > { %v5289_v45 = vmax.f32 %v5212_v6, 0.0 }
 0x5aa   : > { %v5324_v58 = vpack.c.bf16 %v5288_v27, %v5286_v49 }
 0x5ab   : > { %v5325_v39 = vpack.c.bf16 %v5289_v45, %v5287_v30  ;;  %v5215_v50 = vpop.f32.mrb[56].mxu1 }
 0x5ac   : > { %v5216_v52 = vadd.f32 %v5215_v50, %v10153_v28  ;;  %v5217_v15 = vpop.f32.mrb[57].mxu1 }
 0x5ad   : > { %v5218_v35 = vadd.f32 %v5217_v15, %v10158_v23  ;;  %v5219_v11 = vpop.f32.mrb[58].mxu1  ;;  %5492 = vmatprep.mubr.bf16.mxu0 %v5325_v39  ;;  %5685 = vmatprep.mubr.bf16.mxu1 %v5325_v39 }
 0x5ae   : > { %v5220_v47 = vadd.f32 %v5219_v11, %v10153_v28  ;;  %v5221_v56 = vpop.f32.mrb[59].mxu1  ;;  %5493 = vmatmul.mubr.bf16.gmra.mrb[116].mxu0 %v5324_v58  ;;  %5686 = vmatmul.mubr.bf16.gmra.mrb[116].mxu1 %v5324_v58  ;;  %v5290_v36 = vmax.f32 %v5216_v52, 0.0 }
 0x5af   : > { %v5222_v12 = vadd.f32 %v5221_v56, %v10158_v23  ;;  %v5291_v54 = vmax.f32 %v5218_v35, 0.0 }
 0x5b0   : > { %v5292_v53 = vmax.f32 %v5220_v47, 0.0 }
 0x5b1   : > { %v5293_v1 = vmax.f32 %v5222_v12, 0.0 }
 0x5b2   : > { %v5326_v40 = vpack.c.bf16 %v5292_v53, %v5290_v36 }
 0x5b3   : > { %v5327_v0 = vpack.c.bf16 %v5293_v1, %v5291_v54  ;;  %v5225_v3 = vpop.f32.mrb[60].mxu1 }
 0x5b4   : > { %v5226_v31 = vadd.f32 %v5225_v3, %v10153_v28  ;;  %v5227_v17 = vpop.f32.mrb[61].mxu1 }
 0x5b5   : > { %v5228_v4 = vadd.f32 %v5227_v17, %v10158_v23  ;;  %v5229_v51 = vpop.f32.mrb[62].mxu1  ;;  %5502 = vmatprep.mubr.bf16.mxu0 %v5327_v0  ;;  %5695 = vmatprep.mubr.bf16.mxu1 %v5327_v0 }
 0x5b6   : > { %v5230_v32 = vadd.f32 %v5229_v51, %v10153_v28  ;;  %v5231_v59 = vpop.f32.mrb[63].mxu1  ;;  %5503 = vmatmul.mubr.bf16.gmra.mrb[120].mxu0 %v5326_v40  ;;  %5696 = vmatmul.mubr.bf16.gmra.mrb[120].mxu1 %v5326_v40  ;;  %v5294_v5 = vmax.f32 %v5226_v31, 0.0 }
 0x5b7   : > { %v5232_v60 = vadd.f32 %v5231_v59, %v10158_v23  ;;  %v5295_v18 = vmax.f32 %v5228_v4, 0.0 }
 0x5b8   : > { %v5296_v29 = vmax.f32 %v5230_v32, 0.0 }
 0x5b9   : > { %v5297_v2 = vmax.f32 %v5232_v60, 0.0 }
 0x5ba   : > { %v5328_v63 = vpack.c.bf16 %v5296_v29, %v5294_v5 }
 0x5bb   : > { %v5329_v9 = vpack.c.bf16 %v5297_v2, %v5295_v18 }
 0x5bd   : > { %5512 = vmatprep.mubr.bf16.mxu0 %v5329_v9  ;;  %5705 = vmatprep.mubr.bf16.mxu1 %v5329_v9 }
 0x5be   : > { %5513 = vmatmul.mubr.bf16.gmra.mrb[124].mxu0 %v5328_v63  ;;  %5706 = vmatmul.mubr.bf16.gmra.mrb[124].mxu1 %v5328_v63 }
 0x619   : > { %v5364_v55 = vpop.f32.mrb[64].mxu0  ;;  %v5557_v57 = vpop.f32.mrb[64].mxu1 }
 0x61a   : > { %v5365_v16 = vadd.f32 %v5364_v55, %v8750_v24  ;;  %v5558_v28 = vadd.f32 %v5557_v57, %v8752_v22  ;;  %v5366_v37 = vpop.f32.mrb[65].mxu0  ;;  %v5559_v23 = vpop.f32.mrb[65].mxu1 }
 0x61b   : > { %v5367_v7 = vadd.f32 %v5366_v37, %v8756_v26  ;;  %v5560_v19 = vadd.f32 %v5559_v23, %v8758_v61  ;;  %v5368_v33 = vpop.f32.mrb[66].mxu0  ;;  %v5561_v20 = vpop.f32.mrb[66].mxu1 }
 0x61c   : > { %v5369_v38 = vadd.f32 %v5368_v33, %v8750_v24  ;;  %v5562_v43 = vadd.f32 %v5561_v20, %v8752_v22  ;;  %v5370_v44 = vpop.f32.mrb[67].mxu0  ;;  %v5563_v21 = vpop.f32.mrb[67].mxu1 }
 0x61d   : > { %v7286_v62 = vpack.c.bf16 %v5367_v7, %v5365_v16  ;;  %v7287_v34 = vpack.c.bf16 %v5560_v19, %v5558_v28  ;;  %v5371_v8 = vadd.f32 %v5370_v44, %v8756_v26  ;;  %v5564_v41 = vadd.f32 %v5563_v21, %v8758_v61 }
 0x61f   : > { %7007 = vst [vmem:[%s8770_s18 + $0x50] sm:$0xff] %v7286_v62  ;;  %7008 = vst [vmem:[%s8770_s18 + $0x58] sm:$0xff] %v7287_v34  ;;  %v7288_v46 = vpack.c.bf16 %v5371_v8, %v5369_v38  ;;  %v7289_v42 = vpack.c.bf16 %v5564_v41, %v5562_v43 }
 0x621   : > { %7009 = vst [vmem:[%s8770_s18 + $0x70] sm:$0x77] %v7288_v46  ;;  %7010 = vst [vmem:[%s8770_s18 + $0x78] sm:$0x77] %v7289_v42  ;;  %v5374_v13 = vpop.f32.mrb[68].mxu0  ;;  %v5567_v25 = vpop.f32.mrb[68].mxu1 }
 0x622   : > { %v5375_v10 = vadd.f32 %v5374_v13, %v8750_v24  ;;  %v5568_v14 = vadd.f32 %v5567_v25, %v8752_v22  ;;  %v5376_v48 = vpop.f32.mrb[69].mxu0  ;;  %v5569_v6 = vpop.f32.mrb[69].mxu1 }
 0x623   : > { %v5377_v49 = vadd.f32 %v5376_v48, %v8756_v26  ;;  %v5570_v27 = vadd.f32 %v5569_v6, %v8758_v61  ;;  %v5378_v30 = vpop.f32.mrb[70].mxu0  ;;  %v5571_v45 = vpop.f32.mrb[70].mxu1 }
 0x624   : > { %v5379_v58 = vadd.f32 %v5378_v30, %v8750_v24  ;;  %v5572_v39 = vadd.f32 %v5571_v45, %v8752_v22  ;;  %v5380_v50 = vpop.f32.mrb[71].mxu0  ;;  %v5573_v52 = vpop.f32.mrb[71].mxu1 }
 0x625   : > { %v7290_v15 = vpack.c.bf16 %v5377_v49, %v5375_v10  ;;  %v7291_v35 = vpack.c.bf16 %v5570_v27, %v5568_v14  ;;  %v5381_v11 = vadd.f32 %v5380_v50, %v8756_v26  ;;  %v5574_v47 = vadd.f32 %v5573_v52, %v8758_v61 }
 0x627   : > { %7011 = vst [vmem:[%s8770_s18 + $0xd0] sm:$0xff] %v7290_v15  ;;  %7012 = vst [vmem:[%s8770_s18 + $0xd8] sm:$0xff] %v7291_v35  ;;  %v7292_v56 = vpack.c.bf16 %v5381_v11, %v5379_v58  ;;  %v7293_v12 = vpack.c.bf16 %v5574_v47, %v5572_v39 }
 0x629   : > { %7013 = vst [vmem:[%s8770_s18 + $0xf0] sm:$0x77] %v7292_v56  ;;  %7014 = vst [vmem:[%s8770_s18 + $0xf8] sm:$0x77] %v7293_v12  ;;  %v5384_v36 = vpop.f32.mrb[72].mxu0  ;;  %v5577_v53 = vpop.f32.mrb[72].mxu1 }
 0x62a   : > { %v5385_v54 = vadd.f32 %v5384_v36, %v8750_v24  ;;  %v5578_v1 = vadd.f32 %v5577_v53, %v8752_v22  ;;  %v5386_v40 = vpop.f32.mrb[73].mxu0  ;;  %v5579_v0 = vpop.f32.mrb[73].mxu1 }
 0x62b   : > { %v5387_v3 = vadd.f32 %v5386_v40, %v8756_v26  ;;  %v5580_v31 = vadd.f32 %v5579_v0, %v8758_v61  ;;  %v5388_v17 = vpop.f32.mrb[74].mxu0  ;;  %v5581_v4 = vpop.f32.mrb[74].mxu1 }
 0x62c   : > { %v5389_v51 = vadd.f32 %v5388_v17, %v8750_v24  ;;  %v5582_v32 = vadd.f32 %v5581_v4, %v8752_v22  ;;  %v5390_v59 = vpop.f32.mrb[75].mxu0  ;;  %v5583_v60 = vpop.f32.mrb[75].mxu1 }
 0x62d   : > { %v7294_v5 = vpack.c.bf16 %v5387_v3, %v5385_v54  ;;  %v7295_v29 = vpack.c.bf16 %v5580_v31, %v5578_v1  ;;  %v5391_v18 = vadd.f32 %v5390_v59, %v8756_v26  ;;  %v5584_v2 = vadd.f32 %v5583_v60, %v8758_v61 }
 0x62f   : > { %7015 = vst [vmem:[%s8770_s18 + $0x150] sm:$0xff] %v7294_v5  ;;  %7016 = vst [vmem:[%s8770_s18 + $0x158] sm:$0xff] %v7295_v29  ;;  %v7296_v63 = vpack.c.bf16 %v5391_v18, %v5389_v51  ;;  %v7297_v9 = vpack.c.bf16 %v5584_v2, %v5582_v32 }
 0x631   : > { %7017 = vst [vmem:[%s8770_s18 + $0x170] sm:$0x77] %v7296_v63  ;;  %7018 = vst [vmem:[%s8770_s18 + $0x178] sm:$0x77] %v7297_v9  ;;  %v5394_v55 = vpop.f32.mrb[76].mxu0  ;;  %v5587_v57 = vpop.f32.mrb[76].mxu1 }
 0x632   : > { %v5395_v16 = vadd.f32 %v5394_v55, %v8750_v24  ;;  %v5588_v28 = vadd.f32 %v5587_v57, %v8752_v22  ;;  %v5396_v37 = vpop.f32.mrb[77].mxu0  ;;  %v5589_v23 = vpop.f32.mrb[77].mxu1 }
 0x633   : > { %v5397_v7 = vadd.f32 %v5396_v37, %v8756_v26  ;;  %v5590_v19 = vadd.f32 %v5589_v23, %v8758_v61  ;;  %v5398_v33 = vpop.f32.mrb[78].mxu0  ;;  %v5591_v20 = vpop.f32.mrb[78].mxu1 }
 0x634   : > { %v5399_v38 = vadd.f32 %v5398_v33, %v8750_v24  ;;  %v5592_v43 = vadd.f32 %v5591_v20, %v8752_v22  ;;  %v5400_v44 = vpop.f32.mrb[79].mxu0  ;;  %v5593_v21 = vpop.f32.mrb[79].mxu1 }
 0x635   : > { %v7298_v62 = vpack.c.bf16 %v5397_v7, %v5395_v16  ;;  %v7299_v34 = vpack.c.bf16 %v5590_v19, %v5588_v28  ;;  %v5401_v8 = vadd.f32 %v5400_v44, %v8756_v26  ;;  %v5594_v41 = vadd.f32 %v5593_v21, %v8758_v61 }
 0x637   : > { %7019 = vst [vmem:[%s8770_s18 + $0x1d0] sm:$0xff] %v7298_v62  ;;  %7020 = vst [vmem:[%s8770_s18 + $0x1d8] sm:$0xff] %v7299_v34  ;;  %v7300_v46 = vpack.c.bf16 %v5401_v8, %v5399_v38  ;;  %v7301_v42 = vpack.c.bf16 %v5594_v41, %v5592_v43 }
 0x639   : > { %7021 = vst [vmem:[%s8770_s18 + $0x1f0] sm:$0x77] %v7300_v46  ;;  %7022 = vst [vmem:[%s8770_s18 + $0x1f8] sm:$0x77] %v7301_v42  ;;  %v5404_v13 = vpop.f32.mrb[80].mxu0  ;;  %v5597_v25 = vpop.f32.mrb[80].mxu1 }
 0x63a   : > { %v5405_v10 = vadd.f32 %v5404_v13, %v8750_v24  ;;  %v5598_v14 = vadd.f32 %v5597_v25, %v8752_v22  ;;  %v5406_v48 = vpop.f32.mrb[81].mxu0  ;;  %v5599_v6 = vpop.f32.mrb[81].mxu1 }
 0x63b   : > { %v5407_v49 = vadd.f32 %v5406_v48, %v8756_v26  ;;  %v5600_v27 = vadd.f32 %v5599_v6, %v8758_v61  ;;  %v5408_v30 = vpop.f32.mrb[82].mxu0  ;;  %v5601_v45 = vpop.f32.mrb[82].mxu1 }
 0x63c   : > { %v5409_v58 = vadd.f32 %v5408_v30, %v8750_v24  ;;  %v5602_v39 = vadd.f32 %v5601_v45, %v8752_v22  ;;  %v5410_v50 = vpop.f32.mrb[83].mxu0  ;;  %v5603_v52 = vpop.f32.mrb[83].mxu1 }
 0x63d   : > { %v7302_v15 = vpack.c.bf16 %v5407_v49, %v5405_v10  ;;  %v7303_v35 = vpack.c.bf16 %v5600_v27, %v5598_v14  ;;  %v5411_v11 = vadd.f32 %v5410_v50, %v8756_v26  ;;  %v5604_v47 = vadd.f32 %v5603_v52, %v8758_v61 }
 0x63f   : > { %7023 = vst [vmem:[%s8770_s18 + $0x250] sm:$0xff] %v7302_v15  ;;  %7024 = vst [vmem:[%s8770_s18 + $0x258] sm:$0xff] %v7303_v35  ;;  %v7304_v56 = vpack.c.bf16 %v5411_v11, %v5409_v58  ;;  %v7305_v12 = vpack.c.bf16 %v5604_v47, %v5602_v39 }
 0x641   : > { %7025 = vst [vmem:[%s8770_s18 + $0x270] sm:$0x77] %v7304_v56  ;;  %7026 = vst [vmem:[%s8770_s18 + $0x278] sm:$0x77] %v7305_v12  ;;  %v5414_v36 = vpop.f32.mrb[84].mxu0  ;;  %v5607_v53 = vpop.f32.mrb[84].mxu1 }
 0x642   : > { %v5415_v54 = vadd.f32 %v5414_v36, %v8750_v24  ;;  %v5608_v1 = vadd.f32 %v5607_v53, %v8752_v22  ;;  %v5416_v40 = vpop.f32.mrb[85].mxu0  ;;  %v5609_v0 = vpop.f32.mrb[85].mxu1 }
 0x643   : > { %v5417_v3 = vadd.f32 %v5416_v40, %v8756_v26  ;;  %v5610_v31 = vadd.f32 %v5609_v0, %v8758_v61  ;;  %v5418_v17 = vpop.f32.mrb[86].mxu0  ;;  %v5611_v4 = vpop.f32.mrb[86].mxu1 }
 0x644   : > { %v5419_v51 = vadd.f32 %v5418_v17, %v8750_v24  ;;  %v5612_v32 = vadd.f32 %v5611_v4, %v8752_v22  ;;  %v5420_v59 = vpop.f32.mrb[87].mxu0  ;;  %v5613_v60 = vpop.f32.mrb[87].mxu1 }
 0x645   : > { %v7306_v5 = vpack.c.bf16 %v5417_v3, %v5415_v54  ;;  %v7307_v29 = vpack.c.bf16 %v5610_v31, %v5608_v1  ;;  %v5421_v18 = vadd.f32 %v5420_v59, %v8756_v26  ;;  %v5614_v2 = vadd.f32 %v5613_v60, %v8758_v61 }
 0x647   : > { %7027 = vst [vmem:[%s8770_s18 + $0x2d0] sm:$0xff] %v7306_v5  ;;  %7028 = vst [vmem:[%s8770_s18 + $0x2d8] sm:$0xff] %v7307_v29  ;;  %v7308_v63 = vpack.c.bf16 %v5421_v18, %v5419_v51  ;;  %v7309_v9 = vpack.c.bf16 %v5614_v2, %v5612_v32 }
 0x649   : > { %7029 = vst [vmem:[%s8770_s18 + $0x2f0] sm:$0x77] %v7308_v63  ;;  %7030 = vst [vmem:[%s8770_s18 + $0x2f8] sm:$0x77] %v7309_v9  ;;  %v5424_v55 = vpop.f32.mrb[88].mxu0  ;;  %v5617_v57 = vpop.f32.mrb[88].mxu1 }
 0x64a   : > { %v5425_v16 = vadd.f32 %v5424_v55, %v8750_v24  ;;  %v5618_v28 = vadd.f32 %v5617_v57, %v8752_v22  ;;  %v5426_v37 = vpop.f32.mrb[89].mxu0  ;;  %v5619_v23 = vpop.f32.mrb[89].mxu1 }
 0x64b   : > { %v5427_v7 = vadd.f32 %v5426_v37, %v8756_v26  ;;  %v5620_v19 = vadd.f32 %v5619_v23, %v8758_v61  ;;  %v5428_v33 = vpop.f32.mrb[90].mxu0  ;;  %v5621_v20 = vpop.f32.mrb[90].mxu1 }
 0x64c   : > { %v5429_v38 = vadd.f32 %v5428_v33, %v8750_v24  ;;  %v5622_v43 = vadd.f32 %v5621_v20, %v8752_v22  ;;  %v5430_v44 = vpop.f32.mrb[91].mxu0  ;;  %v5623_v21 = vpop.f32.mrb[91].mxu1 }
 0x64d   : > { %v7310_v62 = vpack.c.bf16 %v5427_v7, %v5425_v16  ;;  %v7311_v34 = vpack.c.bf16 %v5620_v19, %v5618_v28  ;;  %v5431_v8 = vadd.f32 %v5430_v44, %v8756_v26  ;;  %v5624_v41 = vadd.f32 %v5623_v21, %v8758_v61 }
 0x64f   : > { %7031 = vst [vmem:[%s8770_s18 + $0x350] sm:$0xff] %v7310_v62  ;;  %7032 = vst [vmem:[%s8770_s18 + $0x358] sm:$0xff] %v7311_v34  ;;  %v7312_v46 = vpack.c.bf16 %v5431_v8, %v5429_v38  ;;  %v7313_v42 = vpack.c.bf16 %v5624_v41, %v5622_v43 }
 0x651   : > { %7033 = vst [vmem:[%s8770_s18 + $0x370] sm:$0x77] %v7312_v46  ;;  %7034 = vst [vmem:[%s8770_s18 + $0x378] sm:$0x77] %v7313_v42  ;;  %v5434_v13 = vpop.f32.mrb[92].mxu0  ;;  %v5627_v25 = vpop.f32.mrb[92].mxu1 }
 0x652   : > { %v5435_v10 = vadd.f32 %v5434_v13, %v8750_v24  ;;  %v5628_v14 = vadd.f32 %v5627_v25, %v8752_v22  ;;  %v5436_v48 = vpop.f32.mrb[93].mxu0  ;;  %v5629_v6 = vpop.f32.mrb[93].mxu1 }
 0x653   : > { %v5437_v49 = vadd.f32 %v5436_v48, %v8756_v26  ;;  %v5630_v27 = vadd.f32 %v5629_v6, %v8758_v61  ;;  %v5438_v30 = vpop.f32.mrb[94].mxu0  ;;  %v5631_v45 = vpop.f32.mrb[94].mxu1 }
 0x654   : > { %v5439_v58 = vadd.f32 %v5438_v30, %v8750_v24  ;;  %v5632_v39 = vadd.f32 %v5631_v45, %v8752_v22  ;;  %v5440_v50 = vpop.f32.mrb[95].mxu0  ;;  %v5633_v52 = vpop.f32.mrb[95].mxu1 }
 0x655   : > { %v7314_v15 = vpack.c.bf16 %v5437_v49, %v5435_v10  ;;  %v7315_v35 = vpack.c.bf16 %v5630_v27, %v5628_v14  ;;  %v5441_v11 = vadd.f32 %v5440_v50, %v8756_v26  ;;  %v5634_v47 = vadd.f32 %v5633_v52, %v8758_v61 }
 0x657   : > { %7035 = vst [vmem:[%s8770_s18 + $0x3d0] sm:$0xff] %v7314_v15  ;;  %7036 = vst [vmem:[%s8770_s18 + $0x3d8] sm:$0xff] %v7315_v35  ;;  %v7316_v56 = vpack.c.bf16 %v5441_v11, %v5439_v58  ;;  %v7317_v12 = vpack.c.bf16 %v5634_v47, %v5632_v39 }
 0x659   : > { %7037 = vst [vmem:[%s8770_s18 + $0x3f0] sm:$0x77] %v7316_v56  ;;  %7038 = vst [vmem:[%s8770_s18 + $0x3f8] sm:$0x77] %v7317_v12  ;;  %v5444_v36 = vpop.f32.mrb[96].mxu0  ;;  %v5637_v53 = vpop.f32.mrb[96].mxu1 }
 0x65a   : > { %v5445_v54 = vadd.f32 %v5444_v36, %v8750_v24  ;;  %v5638_v1 = vadd.f32 %v5637_v53, %v8752_v22  ;;  %v5446_v40 = vpop.f32.mrb[97].mxu0  ;;  %v5639_v0 = vpop.f32.mrb[97].mxu1 }
 0x65b   : > { %v5447_v3 = vadd.f32 %v5446_v40, %v8756_v26  ;;  %v5640_v31 = vadd.f32 %v5639_v0, %v8758_v61  ;;  %v5448_v17 = vpop.f32.mrb[98].mxu0  ;;  %v5641_v4 = vpop.f32.mrb[98].mxu1 }
 0x65c   : > { %v5449_v51 = vadd.f32 %v5448_v17, %v8750_v24  ;;  %v5642_v32 = vadd.f32 %v5641_v4, %v8752_v22  ;;  %v5450_v59 = vpop.f32.mrb[99].mxu0  ;;  %v5643_v60 = vpop.f32.mrb[99].mxu1 }
 0x65d   : > { %v7318_v5 = vpack.c.bf16 %v5447_v3, %v5445_v54  ;;  %v7319_v29 = vpack.c.bf16 %v5640_v31, %v5638_v1  ;;  %v5451_v18 = vadd.f32 %v5450_v59, %v8756_v26  ;;  %v5644_v2 = vadd.f32 %v5643_v60, %v8758_v61 }
 0x65f   : > { %7039 = vst [vmem:[%s8770_s18 + $0x450] sm:$0xff] %v7318_v5  ;;  %7040 = vst [vmem:[%s8770_s18 + $0x458] sm:$0xff] %v7319_v29  ;;  %v7320_v63 = vpack.c.bf16 %v5451_v18, %v5449_v51  ;;  %v7321_v9 = vpack.c.bf16 %v5644_v2, %v5642_v32 }
 0x661   : > { %7041 = vst [vmem:[%s8770_s18 + $0x470] sm:$0x77] %v7320_v63  ;;  %7042 = vst [vmem:[%s8770_s18 + $0x478] sm:$0x77] %v7321_v9  ;;  %v5454_v55 = vpop.f32.mrb[100].mxu0  ;;  %v5647_v57 = vpop.f32.mrb[100].mxu1 }
 0x662   : > { %v5455_v16 = vadd.f32 %v5454_v55, %v8750_v24  ;;  %v5648_v28 = vadd.f32 %v5647_v57, %v8752_v22  ;;  %v5456_v37 = vpop.f32.mrb[101].mxu0  ;;  %v5649_v23 = vpop.f32.mrb[101].mxu1 }
 0x663   : > { %v5457_v7 = vadd.f32 %v5456_v37, %v8756_v26  ;;  %v5650_v19 = vadd.f32 %v5649_v23, %v8758_v61  ;;  %v5458_v33 = vpop.f32.mrb[102].mxu0  ;;  %v5651_v20 = vpop.f32.mrb[102].mxu1 }
 0x664   : > { %v5459_v38 = vadd.f32 %v5458_v33, %v8750_v24  ;;  %v5652_v43 = vadd.f32 %v5651_v20, %v8752_v22  ;;  %v5460_v44 = vpop.f32.mrb[103].mxu0  ;;  %v5653_v21 = vpop.f32.mrb[103].mxu1 }
 0x665   : > { %v7322_v62 = vpack.c.bf16 %v5457_v7, %v5455_v16  ;;  %v7323_v34 = vpack.c.bf16 %v5650_v19, %v5648_v28  ;;  %v5461_v8 = vadd.f32 %v5460_v44, %v8756_v26  ;;  %v5654_v41 = vadd.f32 %v5653_v21, %v8758_v61 }
 0x667   : > { %7043 = vst [vmem:[%s8770_s18 + $0x4d0] sm:$0xff] %v7322_v62  ;;  %7044 = vst [vmem:[%s8770_s18 + $0x4d8] sm:$0xff] %v7323_v34  ;;  %v7324_v46 = vpack.c.bf16 %v5461_v8, %v5459_v38  ;;  %v7325_v42 = vpack.c.bf16 %v5654_v41, %v5652_v43 }
 0x669   : > { %7045 = vst [vmem:[%s8770_s18 + $0x4f0] sm:$0x77] %v7324_v46  ;;  %7046 = vst [vmem:[%s8770_s18 + $0x4f8] sm:$0x77] %v7325_v42  ;;  %v5464_v13 = vpop.f32.mrb[104].mxu0  ;;  %v5657_v25 = vpop.f32.mrb[104].mxu1 }
 0x66a   : > { %v5465_v10 = vadd.f32 %v5464_v13, %v8750_v24  ;;  %v5658_v14 = vadd.f32 %v5657_v25, %v8752_v22  ;;  %v5466_v48 = vpop.f32.mrb[105].mxu0  ;;  %v5659_v6 = vpop.f32.mrb[105].mxu1 }
 0x66b   : > { %v5467_v49 = vadd.f32 %v5466_v48, %v8756_v26  ;;  %v5660_v27 = vadd.f32 %v5659_v6, %v8758_v61  ;;  %v5468_v30 = vpop.f32.mrb[106].mxu0  ;;  %v5661_v45 = vpop.f32.mrb[106].mxu1 }
 0x66c   : > { %v5469_v58 = vadd.f32 %v5468_v30, %v8750_v24  ;;  %v5662_v39 = vadd.f32 %v5661_v45, %v8752_v22  ;;  %v5470_v50 = vpop.f32.mrb[107].mxu0  ;;  %v5663_v52 = vpop.f32.mrb[107].mxu1 }
 0x66d   : > { %v7326_v15 = vpack.c.bf16 %v5467_v49, %v5465_v10  ;;  %v7327_v35 = vpack.c.bf16 %v5660_v27, %v5658_v14  ;;  %v5471_v11 = vadd.f32 %v5470_v50, %v8756_v26  ;;  %v5664_v47 = vadd.f32 %v5663_v52, %v8758_v61 }
 0x66f   : > { %7047 = vst [vmem:[%s8770_s18 + $0x550] sm:$0xff] %v7326_v15  ;;  %7048 = vst [vmem:[%s8770_s18 + $0x558] sm:$0xff] %v7327_v35  ;;  %v7328_v56 = vpack.c.bf16 %v5471_v11, %v5469_v58  ;;  %v7329_v12 = vpack.c.bf16 %v5664_v47, %v5662_v39 }
 0x671   : > { %7049 = vst [vmem:[%s8770_s18 + $0x570] sm:$0x77] %v7328_v56  ;;  %7050 = vst [vmem:[%s8770_s18 + $0x578] sm:$0x77] %v7329_v12  ;;  %v5474_v36 = vpop.f32.mrb[108].mxu0  ;;  %v5667_v53 = vpop.f32.mrb[108].mxu1 }
 0x672   : > { %v5475_v54 = vadd.f32 %v5474_v36, %v8750_v24  ;;  %v5668_v1 = vadd.f32 %v5667_v53, %v8752_v22  ;;  %v5476_v40 = vpop.f32.mrb[109].mxu0  ;;  %v5669_v0 = vpop.f32.mrb[109].mxu1 }
 0x673   : > { %v5477_v3 = vadd.f32 %v5476_v40, %v8756_v26  ;;  %v5670_v31 = vadd.f32 %v5669_v0, %v8758_v61  ;;  %v5478_v17 = vpop.f32.mrb[110].mxu0  ;;  %v5671_v4 = vpop.f32.mrb[110].mxu1 }
 0x674   : > { %v5479_v51 = vadd.f32 %v5478_v17, %v8750_v24  ;;  %v5672_v32 = vadd.f32 %v5671_v4, %v8752_v22  ;;  %v5480_v59 = vpop.f32.mrb[111].mxu0  ;;  %v5673_v60 = vpop.f32.mrb[111].mxu1 }
 0x675   : > { %v7330_v5 = vpack.c.bf16 %v5477_v3, %v5475_v54  ;;  %v7331_v29 = vpack.c.bf16 %v5670_v31, %v5668_v1  ;;  %v5481_v18 = vadd.f32 %v5480_v59, %v8756_v26  ;;  %v5674_v2 = vadd.f32 %v5673_v60, %v8758_v61 }
 0x677   : > { %7051 = vst [vmem:[%s8770_s18 + $0x5d0] sm:$0xff] %v7330_v5  ;;  %7052 = vst [vmem:[%s8770_s18 + $0x5d8] sm:$0xff] %v7331_v29  ;;  %v7332_v63 = vpack.c.bf16 %v5481_v18, %v5479_v51  ;;  %v7333_v9 = vpack.c.bf16 %v5674_v2, %v5672_v32 }
 0x679   : > { %7053 = vst [vmem:[%s8770_s18 + $0x5f0] sm:$0x77] %v7332_v63  ;;  %7054 = vst [vmem:[%s8770_s18 + $0x5f8] sm:$0x77] %v7333_v9  ;;  %v5484_v55 = vpop.f32.mrb[112].mxu0  ;;  %v5677_v57 = vpop.f32.mrb[112].mxu1 }
 0x67a   : > { %v5485_v16 = vadd.f32 %v5484_v55, %v8750_v24  ;;  %v5678_v28 = vadd.f32 %v5677_v57, %v8752_v22  ;;  %v5486_v37 = vpop.f32.mrb[113].mxu0  ;;  %v5679_v23 = vpop.f32.mrb[113].mxu1 }
 0x67b   : > { %v5487_v7 = vadd.f32 %v5486_v37, %v8756_v26  ;;  %v5680_v19 = vadd.f32 %v5679_v23, %v8758_v61  ;;  %v5488_v33 = vpop.f32.mrb[114].mxu0  ;;  %v5681_v20 = vpop.f32.mrb[114].mxu1 }
 0x67c   : > { %v5489_v38 = vadd.f32 %v5488_v33, %v8750_v24  ;;  %v5682_v43 = vadd.f32 %v5681_v20, %v8752_v22  ;;  %v5490_v44 = vpop.f32.mrb[115].mxu0  ;;  %v5683_v21 = vpop.f32.mrb[115].mxu1 }
 0x67d   : > { %v7334_v62 = vpack.c.bf16 %v5487_v7, %v5485_v16  ;;  %v7335_v34 = vpack.c.bf16 %v5680_v19, %v5678_v28  ;;  %v5491_v8 = vadd.f32 %v5490_v44, %v8756_v26  ;;  %v5684_v41 = vadd.f32 %v5683_v21, %v8758_v61 }
 0x67f   : > { %7055 = vst [vmem:[%s8770_s18 + $0x650] sm:$0xff] %v7334_v62  ;;  %7056 = vst [vmem:[%s8770_s18 + $0x658] sm:$0xff] %v7335_v34  ;;  %v7336_v46 = vpack.c.bf16 %v5491_v8, %v5489_v38  ;;  %v7337_v42 = vpack.c.bf16 %v5684_v41, %v5682_v43 }
 0x681   : > { %7057 = vst [vmem:[%s8770_s18 + $0x670] sm:$0x77] %v7336_v46  ;;  %7058 = vst [vmem:[%s8770_s18 + $0x678] sm:$0x77] %v7337_v42  ;;  %v5494_v13 = vpop.f32.mrb[116].mxu0  ;;  %v5687_v25 = vpop.f32.mrb[116].mxu1 }
 0x682   : > { %v5495_v10 = vadd.f32 %v5494_v13, %v8750_v24  ;;  %v5688_v14 = vadd.f32 %v5687_v25, %v8752_v22  ;;  %v5496_v48 = vpop.f32.mrb[117].mxu0  ;;  %v5689_v6 = vpop.f32.mrb[117].mxu1 }
 0x683   : > { %v5497_v49 = vadd.f32 %v5496_v48, %v8756_v26  ;;  %v5690_v27 = vadd.f32 %v5689_v6, %v8758_v61  ;;  %v5498_v30 = vpop.f32.mrb[118].mxu0  ;;  %v5691_v45 = vpop.f32.mrb[118].mxu1 }
 0x684   : > { %v5499_v58 = vadd.f32 %v5498_v30, %v8750_v24  ;;  %v5692_v39 = vadd.f32 %v5691_v45, %v8752_v22  ;;  %v5500_v50 = vpop.f32.mrb[119].mxu0  ;;  %v5693_v52 = vpop.f32.mrb[119].mxu1 }
 0x685   : > { %v7338_v15 = vpack.c.bf16 %v5497_v49, %v5495_v10  ;;  %v7339_v35 = vpack.c.bf16 %v5690_v27, %v5688_v14  ;;  %v5501_v11 = vadd.f32 %v5500_v50, %v8756_v26  ;;  %v5694_v47 = vadd.f32 %v5693_v52, %v8758_v61 }
 0x687   : > { %7059 = vst [vmem:[%s8770_s18 + $0x6d0] sm:$0xff] %v7338_v15  ;;  %7060 = vst [vmem:[%s8770_s18 + $0x6d8] sm:$0xff] %v7339_v35  ;;  %v7340_v56 = vpack.c.bf16 %v5501_v11, %v5499_v58  ;;  %v7341_v12 = vpack.c.bf16 %v5694_v47, %v5692_v39 }
 0x689   : > { %7061 = vst [vmem:[%s8770_s18 + $0x6f0] sm:$0x77] %v7340_v56  ;;  %7062 = vst [vmem:[%s8770_s18 + $0x6f8] sm:$0x77] %v7341_v12  ;;  %v5504_v36 = vpop.f32.mrb[120].mxu0  ;;  %v5697_v53 = vpop.f32.mrb[120].mxu1 }
 0x68a   : > { %v5505_v54 = vadd.f32 %v5504_v36, %v8750_v24  ;;  %v5698_v1 = vadd.f32 %v5697_v53, %v8752_v22  ;;  %v5506_v40 = vpop.f32.mrb[121].mxu0  ;;  %v5699_v0 = vpop.f32.mrb[121].mxu1 }
 0x68b   : > { %v5507_v3 = vadd.f32 %v5506_v40, %v8756_v26  ;;  %v5700_v31 = vadd.f32 %v5699_v0, %v8758_v61  ;;  %v5508_v17 = vpop.f32.mrb[122].mxu0  ;;  %v5701_v4 = vpop.f32.mrb[122].mxu1 }
 0x68c   : > { %v5509_v51 = vadd.f32 %v5508_v17, %v8750_v24  ;;  %v5702_v32 = vadd.f32 %v5701_v4, %v8752_v22  ;;  %v5510_v59 = vpop.f32.mrb[123].mxu0  ;;  %v5703_v60 = vpop.f32.mrb[123].mxu1 }
 0x68d   : > { %v7342_v5 = vpack.c.bf16 %v5507_v3, %v5505_v54  ;;  %v7343_v29 = vpack.c.bf16 %v5700_v31, %v5698_v1  ;;  %v5511_v18 = vadd.f32 %v5510_v59, %v8756_v26  ;;  %v5704_v2 = vadd.f32 %v5703_v60, %v8758_v61 }
 0x68f   : > { %7063 = vst [vmem:[%s8770_s18 + $0x750] sm:$0xff] %v7342_v5  ;;  %7064 = vst [vmem:[%s8770_s18 + $0x758] sm:$0xff] %v7343_v29  ;;  %v7344_v63 = vpack.c.bf16 %v5511_v18, %v5509_v51  ;;  %v7345_v9 = vpack.c.bf16 %v5704_v2, %v5702_v32 }
 0x691   : > { %7065 = vst [vmem:[%s8770_s18 + $0x770] sm:$0x77] %v7344_v63  ;;  %7066 = vst [vmem:[%s8770_s18 + $0x778] sm:$0x77] %v7345_v9  ;;  %v5514_v55 = vpop.f32.mrb[124].mxu0  ;;  %v5707_v57 = vpop.f32.mrb[124].mxu1 }
 0x692   : > { %v5515_v16 = vadd.f32 %v5514_v55, %v8750_v24  ;;  %v5708_v28 = vadd.f32 %v5707_v57, %v8752_v22  ;;  %v5516_v37 = vpop.f32.mrb[125].mxu0  ;;  %v5709_v23 = vpop.f32.mrb[125].mxu1 }
 0x693   : > { %v5517_v7 = vadd.f32 %v5516_v37, %v8756_v26  ;;  %v5710_v19 = vadd.f32 %v5709_v23, %v8758_v61  ;;  %v5518_v33 = vpop.f32.mrb[126].mxu0  ;;  %v5711_v20 = vpop.f32.mrb[126].mxu1  ;;  %6170 = sbr.rel (!%p7982_p4) target bundleno = 1762 (0x6e2), region = 44 }
 0x694   : > { %v5519_v38 = vadd.f32 %v5518_v33, %v8750_v24  ;;  %v5712_v43 = vadd.f32 %v5711_v20, %v8752_v22  ;;  %v5520_v44 = vpop.f32.mrb[127].mxu0  ;;  %v5713_v21 = vpop.f32.mrb[127].mxu1 }
 0x695   : > { %v7346_v62 = vpack.c.bf16 %v5517_v7, %v5515_v16  ;;  %v7347_v34 = vpack.c.bf16 %v5710_v19, %v5708_v28  ;;  %v5521_v8 = vadd.f32 %v5520_v44, %v8756_v26  ;;  %v5714_v41 = vadd.f32 %v5713_v21, %v8758_v61 }
 0x697   : > { %7067 = vst [vmem:[%s8770_s18 + $0x7d0] sm:$0xff] %v7346_v62  ;;  %7068 = vst [vmem:[%s8770_s18 + $0x7d8] sm:$0xff] %v7347_v34  ;;  %v7348_v46 = vpack.c.bf16 %v5521_v8, %v5519_v38  ;;  %v7349_v42 = vpack.c.bf16 %v5714_v41, %v5712_v43 }
 0x699   : > { %7069 = vst [vmem:[%s8770_s18 + $0x7f0] sm:$0x77] %v7348_v46  ;;  %7070 = vst [vmem:[%s8770_s18 + $0x7f8] sm:$0x77] %v7349_v42 }
 0x69a   : > { %s10665_s9 = smov (!%p6173_p8, %s6172_s9), 16 }
 0x69b   : > { %s7352_s13 = sshll.u32 %s10665_s9, 11  ;;  %s7080_s14 = sshll.u32 %s10665_s9, 2 }
 0x69c   : > { %p7081_p9 = scmp.eq.s32.totalorder %s7352_s13, 0 }
 0x69d   : > { %s10433_s26 = sshrl.u32 (!%p7081_p9), %s7080_s14, 4 }
 0x69e   : > { %6186 = sbr.rel (%p7081_p9) target bundleno = 1762 (0x6e2), region = 48  ;;  %p7082_p10 = scmp.le.s32.totalorder (!%p7081_p9), %s10433_s26, 0 }
 0x6a5   : > { %6411 = sbr.rel (%p7082_p10) target bundleno = 1741 (0x6cd), region = 97  ;;  %s10652_s21 = smov (!%p7082_p10), %s10425_s12 }
 0x6a6   : > { %s10653_s15 = smov (!%p7082_p10), %s8770_s18  ;;  %s10442_s16 = smov (!%p7082_p10), 0  }
 0x6a7   : > { %s10444_s17 = smov (!%p7082_p10), 0  }
 0x6ac LB: >> { %v6199_v24 = vld [vmem:[%s7901_s15] sm:$0xff]  ;;  %s6327_s20 = sadd.s32 1, %s7905_s16  ;;  %v6231_v50 = vld [vmem:[%s7901_s15 + $0x8] sm:$0xff]  ;;  %v6263_v17 = vld [vmem:[%s7901_s15 + $0x10] sm:$0xff]  ;;  %s6193_s17 = sadd.s32 1, %s7909_s17   ;;  %s7909_s17 = sphi %s10444_s17, %s6193_s17   ;;  %s7905_s16 = sphi %s10442_s16, %s10656_s16   ;;  %s7901_s15 = sphi %s10653_s15, %s10655_s15   ;;  %s7897_s21 = sphi %s10652_s21, %s10654_s21  }
 0x6ad   : >> { %v6201_v22 = vld [vmem:[%s7901_s15 + $0x20] sm:$0xff]  ;;  %6200 = vst [vmem:[%s7897_s21] sm:$0xff] %v6199_v24  ;;  %p6328_p11 = scmp.ge.s32.totalorder %s6327_s20, %s10433_s26  ;;  %v6233_v52 = vld [vmem:[%s7901_s15 + $0x28] sm:$0xff]  ;;  %6232 = vst [vmem:[%s7897_s21 + $0x8] sm:$0xff] %v6231_v50  ;;  %p6192_p12 = scmp.ge.s32.totalorder %s6193_s17, %s10433_s26 }
 0x6ae   : >> { %v6203_v26 = vld [vmem:[%s7901_s15 + $0x40] sm:$0xff]  ;;  %6202 = vst [vmem:[%s7897_s21 + $0x20] sm:$0xff] %v6201_v22  ;;  %6234 = vst [vmem:[%s7897_s21 + $0x28] sm:$0xff] %v6233_v52  ;;  %v6235_v15 = vld [vmem:[%s7901_s15 + $0x48] sm:$0xff] }
 0x6af   : >> { %6204 = vst [vmem:[%s7897_s21 + $0x40] sm:$0xff] %v6203_v26  ;;  %v6205_v61 = vld [vmem:[%s7901_s15 + $0x60] sm:$0xff]  ;;  %s10667_s20 = smov (%p6328_p11, %s6327_s20), 0  ;;  %v6237_v35 = vld [vmem:[%s7901_s15 + $0x68] sm:$0xff]  ;;  %6236 = vst [vmem:[%s7897_s21 + $0x48] sm:$0xff] %v6235_v15 }
 0x6b0   : >> { %v6207_v13 = vld [vmem:[%s7901_s15 + $0x80] sm:$0xff]  ;;  %6206 = vst [vmem:[%s7897_s21 + $0x60] sm:$0xff] %v6205_v61  ;;  %s7083_s23 = sshll.u32 %s10667_s20, 9  ;;  %v6239_v11 = vld [vmem:[%s7901_s15 + $0x88] sm:$0xff]  ;;  %6238 = vst [vmem:[%s7897_s21 + $0x68] sm:$0xff] %v6237_v35  ;;  %s10656_s16 = smov %s10667_s20 }
 0x6b1   : >> { %v6209_v25 = vld [vmem:[%s7901_s15 + $0xa0] sm:$0xff]  ;;  %6208 = vst [vmem:[%s7897_s21 + $0x80] sm:$0xff] %v6207_v13  ;;  %s10500_s24 = scalar_lea.vmem %s8770_s18, %s7083_s23 [#allocation2]   ;;  %s10503_s27 = scalar_lea.vmem %s10425_s12, %s7083_s23   ;;  %6240 = vst [vmem:[%s7897_s21 + $0x88] sm:$0xff] %v6239_v11  ;;  %v6241_v47 = vld [vmem:[%s7901_s15 + $0xa8] sm:$0xff] }
 0x6b2   : >> { %6210 = vst [vmem:[%s7897_s21 + $0xa0] sm:$0xff] %v6209_v25  ;;  %v6211_v10 = vld [vmem:[%s7901_s15 + $0xc0] sm:$0xff]  ;;  %v6243_v56 = vld [vmem:[%s7901_s15 + $0xc8] sm:$0xff]  ;;  %6242 = vst [vmem:[%s7897_s21 + $0xa8] sm:$0xff] %v6241_v47 }
 0x6b3   : >> { %v6213_v14 = vld [vmem:[%s7901_s15 + $0xe0] sm:$0xff]  ;;  %6212 = vst [vmem:[%s7897_s21 + $0xc0] sm:$0xff] %v6211_v10  ;;  %v6245_v12 = vld [vmem:[%s7901_s15 + $0xe8] sm:$0xff]  ;;  %6244 = vst [vmem:[%s7897_s21 + $0xc8] sm:$0xff] %v6243_v56 }
 0x6b4   : >> { %v6215_v48 = vld [vmem:[%s7901_s15 + $0x100] sm:$0xff]  ;;  %6214 = vst [vmem:[%s7897_s21 + $0xe0] sm:$0xff] %v6213_v14  ;;  %6246 = vst [vmem:[%s7897_s21 + $0xe8] sm:$0xff] %v6245_v12  ;;  %v6247_v36 = vld [vmem:[%s7901_s15 + $0x108] sm:$0xff] }
 0x6b5   : >> { %6216 = vst [vmem:[%s7897_s21 + $0x100] sm:$0xff] %v6215_v48  ;;  %v6217_v6 = vld [vmem:[%s7901_s15 + $0x120] sm:$0xff]  ;;  %v6249_v53 = vld [vmem:[%s7901_s15 + $0x128] sm:$0xff]  ;;  %6248 = vst [vmem:[%s7897_s21 + $0x108] sm:$0xff] %v6247_v36 }
 0x6b6   : >> { %v6219_v49 = vld [vmem:[%s7901_s15 + $0x140] sm:$0xff]  ;;  %6218 = vst [vmem:[%s7897_s21 + $0x120] sm:$0xff] %v6217_v6  ;;  %v6251_v54 = vld [vmem:[%s7901_s15 + $0x148] sm:$0xff]  ;;  %6250 = vst [vmem:[%s7897_s21 + $0x128] sm:$0xff] %v6249_v53 }
 0x6b7   : >> { %v6221_v27 = vld [vmem:[%s7901_s15 + $0x160] sm:$0xff]  ;;  %6220 = vst [vmem:[%s7897_s21 + $0x140] sm:$0xff] %v6219_v49  ;;  %6252 = vst [vmem:[%s7897_s21 + $0x148] sm:$0xff] %v6251_v54  ;;  %v6253_v1 = vld [vmem:[%s7901_s15 + $0x168] sm:$0xff] }
 0x6b8   : >> { %6222 = vst [vmem:[%s7897_s21 + $0x160] sm:$0xff] %v6221_v27  ;;  %v6223_v30 = vld [vmem:[%s7901_s15 + $0x180] sm:$0xff]  ;;  %v6255_v40 = vld [vmem:[%s7901_s15 + $0x188] sm:$0xff]  ;;  %6254 = vst [vmem:[%s7897_s21 + $0x168] sm:$0xff] %v6253_v1 }
 0x6b9   : >> { %v6225_v45 = vld [vmem:[%s7901_s15 + $0x1a0] sm:$0xff]  ;;  %6224 = vst [vmem:[%s7897_s21 + $0x180] sm:$0xff] %v6223_v30  ;;  %v6257_v0 = vld [vmem:[%s7901_s15 + $0x1a8] sm:$0xff]  ;;  %6256 = vst [vmem:[%s7897_s21 + $0x188] sm:$0xff] %v6255_v40 }
 0x6ba   : >> { %v6227_v58 = vld [vmem:[%s7901_s15 + $0x1c0] sm:$0xff]  ;;  %6226 = vst [vmem:[%s7897_s21 + $0x1a0] sm:$0xff] %v6225_v45  ;;  %6258 = vst [vmem:[%s7897_s21 + $0x1a8] sm:$0xff] %v6257_v0  ;;  %v6259_v3 = vld [vmem:[%s7901_s15 + $0x1c8] sm:$0xff] }
 0x6bb   : >> { %6228 = vst [vmem:[%s7897_s21 + $0x1c0] sm:$0xff] %v6227_v58  ;;  %v6229_v39 = vld [vmem:[%s7901_s15 + $0x1e0] sm:$0xff]  ;;  %v6261_v31 = vld [vmem:[%s7901_s15 + $0x1e8] sm:$0xff]  ;;  %6260 = vst [vmem:[%s7897_s21 + $0x1c8] sm:$0xff] %v6259_v3 }
 0x6bc   : >> { %6230 = vst [vmem:[%s7897_s21 + $0x1e0] sm:$0xff] %v6229_v39  ;;  %6262 = vst [vmem:[%s7897_s21 + $0x1e8] sm:$0xff] %v6261_v31  ;;  %v6265_v4 = vld [vmem:[%s7901_s15 + $0x30] sm:$0xff]  ;;  %v6295_v37 = vld [vmem:[%s7901_s15 + $0x18] sm:$0xff] }
 0x6bd   : >> { %6264 = vst [vmem:[%s7897_s21 + $0x10] sm:$0xff] %v6263_v17  ;;  %v6267_v51 = vld [vmem:[%s7901_s15 + $0x50] sm:$0xff]  ;;  %6266 = vst [vmem:[%s7897_s21 + $0x30] sm:$0xff] %v6265_v4  ;;  %v6297_v23 = vld [vmem:[%s7901_s15 + $0x38] sm:$0xff] }
 0x6be   : >> { %v6269_v32 = vld [vmem:[%s7901_s15 + $0x70] sm:$0xff]  ;;  %6268 = vst [vmem:[%s7897_s21 + $0x50] sm:$0xff] %v6267_v51  ;;  %v6299_v7 = vld [vmem:[%s7901_s15 + $0x58] sm:$0xff]  ;;  %6296 = vst [vmem:[%s7897_s21 + $0x18] sm:$0xff] %v6295_v37 }
 0x6bf   : >> { %6270 = vst [vmem:[%s7897_s21 + $0x70] sm:$0xff] %v6269_v32  ;;  %v6271_v59 = vld [vmem:[%s7901_s15 + $0x90] sm:$0xff]  ;;  %6298 = vst [vmem:[%s7897_s21 + $0x38] sm:$0xff] %v6297_v23  ;;  %v6301_v19 = vld [vmem:[%s7901_s15 + $0x78] sm:$0xff] }
 0x6c0   : >> { %v6273_v60 = vld [vmem:[%s7901_s15 + $0xb0] sm:$0xff]  ;;  %6272 = vst [vmem:[%s7897_s21 + $0x90] sm:$0xff] %v6271_v59  ;;  %6300 = vst [vmem:[%s7897_s21 + $0x58] sm:$0xff] %v6299_v7  ;;  %v6303_v33 = vld [vmem:[%s7901_s15 + $0x98] sm:$0xff] }
 0x6c1   : >> { %v6275_v5 = vld [vmem:[%s7901_s15 + $0xd0] sm:$0xff]  ;;  %6274 = vst [vmem:[%s7897_s21 + $0xb0] sm:$0xff] %v6273_v60  ;;  %v6305_v20 = vld [vmem:[%s7901_s15 + $0xb8] sm:$0xff]  ;;  %6302 = vst [vmem:[%s7897_s21 + $0x78] sm:$0xff] %v6301_v19 }
 0x6c2   : >> { %6276 = vst [vmem:[%s7897_s21 + $0xd0] sm:$0xff] %v6275_v5  ;;  %v6277_v29 = vld [vmem:[%s7901_s15 + $0xf0] sm:$0xff]  ;;  %6304 = vst [vmem:[%s7897_s21 + $0x98] sm:$0xff] %v6303_v33  ;;  %v6307_v38 = vld [vmem:[%s7901_s15 + $0xd8] sm:$0xff] }
 0x6c3   : >> { %v6279_v18 = vld [vmem:[%s7901_s15 + $0x110] sm:$0xff]  ;;  %6278 = vst [vmem:[%s7897_s21 + $0xf0] sm:$0xff] %v6277_v29  ;;  %6306 = vst [vmem:[%s7897_s21 + $0xb8] sm:$0xff] %v6305_v20  ;;  %v6309_v43 = vld [vmem:[%s7901_s15 + $0xf8] sm:$0xff] }
 0x6c4   : >> { %v6281_v2 = vld [vmem:[%s7901_s15 + $0x130] sm:$0xff]  ;;  %6280 = vst [vmem:[%s7897_s21 + $0x110] sm:$0xff] %v6279_v18  ;;  %v6311_v44 = vld [vmem:[%s7901_s15 + $0x118] sm:$0xff]  ;;  %6308 = vst [vmem:[%s7897_s21 + $0xd8] sm:$0xff] %v6307_v38 }
 0x6c5   : >> { %6282 = vst [vmem:[%s7897_s21 + $0x130] sm:$0xff] %v6281_v2  ;;  %v6283_v63 = vld [vmem:[%s7901_s15 + $0x150] sm:$0xff]  ;;  %6310 = vst [vmem:[%s7897_s21 + $0xf8] sm:$0xff] %v6309_v43  ;;  %v6313_v21 = vld [vmem:[%s7901_s15 + $0x138] sm:$0xff] }
 0x6c6   : >> { %v6285_v9 = vld [vmem:[%s7901_s15 + $0x170] sm:$0xff]  ;;  %6284 = vst [vmem:[%s7897_s21 + $0x150] sm:$0xff] %v6283_v63  ;;  %6312 = vst [vmem:[%s7897_s21 + $0x118] sm:$0xff] %v6311_v44  ;;  %v6315_v62 = vld [vmem:[%s7901_s15 + $0x158] sm:$0xff]  ;;  %6195 = sbr.rel (!%p6192_p12) target bundleno = 1708 (0x6ac), region = 103 }
 0x6c7   : >> { %v6287_v55 = vld [vmem:[%s7901_s15 + $0x190] sm:$0xff]  ;;  %6286 = vst [vmem:[%s7897_s21 + $0x170] sm:$0xff] %v6285_v9  ;;  %v6317_v34 = vld [vmem:[%s7901_s15 + $0x178] sm:$0xff]  ;;  %6314 = vst [vmem:[%s7897_s21 + $0x138] sm:$0xff] %v6313_v21 }
 0x6c8   : >> { %6288 = vst [vmem:[%s7897_s21 + $0x190] sm:$0xff] %v6287_v55  ;;  %v6289_v57 = vld [vmem:[%s7901_s15 + $0x1b0] sm:$0xff]  ;;  %6316 = vst [vmem:[%s7897_s21 + $0x158] sm:$0xff] %v6315_v62  ;;  %v6319_v8 = vld [vmem:[%s7901_s15 + $0x198] sm:$0xff] }
 0x6c9   : >> { %v6291_v16 = vld [vmem:[%s7901_s15 + $0x1d0] sm:$0xff]  ;;  %6290 = vst [vmem:[%s7897_s21 + $0x1b0] sm:$0xff] %v6289_v57  ;;  %6318 = vst [vmem:[%s7897_s21 + $0x178] sm:$0xff] %v6317_v34  ;;  %v6321_v41 = vld [vmem:[%s7901_s15 + $0x1b8] sm:$0xff] }
 0x6ca   : >> { %v6293_v28 = vld [vmem:[%s7901_s15 + $0x1f0] sm:$0xff]  ;;  %6292 = vst [vmem:[%s7897_s21 + $0x1d0] sm:$0xff] %v6291_v16  ;;  %v6323_v46 = vld [vmem:[%s7901_s15 + $0x1d8] sm:$0xff]  ;;  %6320 = vst [vmem:[%s7897_s21 + $0x198] sm:$0xff] %v6319_v8 }
 0x6cb   : >> { %6294 = vst [vmem:[%s7897_s21 + $0x1f0] sm:$0xff] %v6293_v28  ;;  %6322 = vst [vmem:[%s7897_s21 + $0x1b8] sm:$0xff] %v6321_v41  ;;  %v6325_v42 = vld [vmem:[%s7901_s15 + $0x1f8] sm:$0xff]  ;;  %s10655_s15 = smov %s10500_s24 }
 0x6cc   : >> { %6324 = vst [vmem:[%s7897_s21 + $0x1d8] sm:$0xff] %v6323_v46  ;;  %6326 = vst [vmem:[%s7897_s21 + $0x1f8] sm:$0xff] %v6325_v42  ;;  %s10654_s21 = smov %s10503_s27 }
 0x6cd PF: > { %s10609_s29 = sand.u32 15, %s7080_s14   ;;  %s7355_s30 = sshll.u32 %s10433_s26, 9 }
 0x6ce   : > { %s10613_s28 = scalar_lea.vmem %s8770_s18, %s7355_s30 [#allocation2]   ;;  %s10616_s6 = scalar_lea.vmem %s10425_s12, %s7355_s30  }
 0x6cf   : > { %p7088_p13 = scmp.le.s32.totalorder %s10609_s29, 0 }
 0x6d0   : > { %s10657_s7 = smov (!%p7088_p13), %s10616_s6  ;;  %s10658_s8 = smov (!%p7088_p13), %s10613_s28 }
 0x6d1   : > { %6425 = sbr.rel (%p7088_p13) target bundleno = 1762 (0x6e2), region = 108  ;;  %s7919_s9 = smov (!%p7088_p13), 0  }
 0x6d2   : > { %s7923_s10 = smov (!%p7088_p13), 0  }
 0x6d8 LB: >> { %v6350_v24 = vld [vmem:[%s7917_s8] sm:$0xff]  ;;  %v6352_v22 = vld [vmem:[%s7917_s8 + $0x8] sm:$0xff]  ;;  %v6354_v26 = vld [vmem:[%s7917_s8 + $0x10] sm:$0xff]  ;;  %s6358_s18 = sadd.s32 1, %s7921_s9  ;;  %s6344_s10 = sadd.s32 1, %s7925_s10   ;;  %s7925_s10 = sphi %s7923_s10, %s6344_s10   ;;  %s7921_s9 = sphi %s7919_s9, %s7920_s9   ;;  %s7917_s8 = sphi %s10658_s8, %s6363_s8   ;;  %s7913_s7 = sphi %s10657_s7, %s6364_s7  }
 0x6d9   : >> { %6351 = vst [vmem:[%s7913_s7] sm:$0xff] %v6350_v24  ;;  %6353 = vst [vmem:[%s7913_s7 + $0x8] sm:$0xff] %v6352_v22  ;;  %v6356_v61 = vld [vmem:[%s7917_s8 + $0x18] sm:$0xff]  ;;  %p6359_p0 = scmp.ge.s32.totalorder %s6358_s18, %s10609_s29  ;;  %p6343_p1 = scmp.ge.s32.totalorder %s6344_s10, %s10609_s29 }
 0x6da   : >> { %6355 = vst [vmem:[%s7913_s7 + $0x10] sm:$0xff] %v6354_v26  ;;  %6357 = vst [vmem:[%s7913_s7 + $0x18] sm:$0xff] %v6356_v61 }
 0x6db   : >> { %s10669_s18 = smov (%p6359_p0, %s6358_s18), 0  ;;  %6346 = sbr.rel (!%p6343_p1) target bundleno = 1752 (0x6d8), region = 114 }
 0x6dc   : >> { %s7089_s11 = sshll.u32 %s10669_s18, 5  ;;  %s7920_s9 = smov %s10669_s18  }
 0x6dd   : >> { %s6363_s8 = scalar_lea.vmem %s10613_s28, %s7089_s11 [#allocation2]   ;;  %s6364_s7 = scalar_lea.vmem %s10616_s6, %s7089_s11  }
 0x6e2 PF: > { %p12_p2 = scmp.ge.s32.totalorder %s7972_s22, 4   ;;  %s10659_s18 = smov %s7889_s19 }
 0x6e3   : > { %s10660_s19 = smov %s7980_s25  ;;  %s10661_s20 = smov %s7972_s22 }
 0x6e4   :  { %14 = sbr.rel (!%p12_p2) target bundleno = 2 (0x2), region = 125 }

</bundles_post_ra>
